<compile_context>
chip_gen: v7x
topology: tpu7x:2x2x1
jax: 0.10.0
libtpu: 0.0.40
codegen_flags: <defaults>
</compile_context>

<pallas_src>
import functools

import jax
import jax.numpy as jnp
from jax import lax
from jax.experimental import pallas as pl
from jax.experimental.pallas import tpu as pltpu


BN_EPS = 1e-5


# -----------------------------------------------------------------------------
# Helpers
# -----------------------------------------------------------------------------
def _round_up(x, m):
    return ((x + m - 1) // m) * m


def _pick_tiles(M, Kp, Np, P):
    """Tile sizes for the batched matmul (P, M, Kp) x (P, Kp, Np)."""
    assert Kp % 128 == 0 and Np % 128 == 0
    Mp = _round_up(max(M, 8), 8)
    if Mp <= 512:
        tm = Mp
    else:
        Mp = _round_up(M, 512)
        tm = 512
    tn = 256 if Np % 256 == 0 else 128
    # largest K tile <= 2048 that divides the (128-padded) K exactly
    nk = Kp // 128
    tk_blocks = 1
    for d in range(1, nk + 1):
        if nk % d == 0 and d * 128 <= 2048:
            tk_blocks = d
    tk = tk_blocks * 128
    # keep >= 2 parallel grid blocks so both v7x TensorCores get work
    if P * (Mp // tm) * (Np // tn) < 2:
        if tn == 256:
            tn = 128
        elif Mp >= 16 and Mp % 16 == 0:
            tm = Mp // 2
    return Mp, tm, tn, tk


# -----------------------------------------------------------------------------
# Pallas kernels
# -----------------------------------------------------------------------------
def _bmm_bn_act_kernel(a_ref, b_ref, shift_ref, o_ref, acc_ref, *, act,
                       neg_slope):
    """Phase-batched, K-tiled matmul; epilogue = + per-channel shift, act.

    BN per-channel scale is pre-folded into B by prepare_params().
    """
    @pl.when(pl.program_id(3) == 0)
    def _init():
        acc_ref[...] = jnp.zeros_like(acc_ref)

    acc_ref[...] += jnp.dot(a_ref[...], b_ref[...],
                            preferred_element_type=jnp.float32)

    @pl.when(pl.program_id(3) == pl.num_programs(3) - 1)
    def _finalize():
        y = acc_ref[...] + shift_ref[...]
        if act == "relu":
            y = jnp.maximum(y, 0.0)
        elif act == "leaky_relu":
            y = jnp.where(y >= 0.0, y, jnp.float32(neg_slope) * y)
        o_ref[...] = y.astype(o_ref.dtype)


def fused_matmul(a, b_pad, shift_pad, *, act="none", neg_slope=0.2,
                 out_dtype=jnp.bfloat16):
    """a: (P, M, K) bf16 ; b_pad: (P, Kp, Np) bf16 ; shift_pad: (1, Np) f32."""
    P, M, K = a.shape
    _, Kp, Np = b_pad.shape
    Mp, tm, tn, tk = _pick_tiles(M, Kp, Np, P)
    a_pad = jnp.pad(a.astype(jnp.bfloat16), ((0, 0), (0, Mp - M), (0, Kp - K)))

    kernel = functools.partial(_bmm_bn_act_kernel, act=act,
                               neg_slope=neg_slope)
    out = pl.pallas_call(
        kernel,
        out_shape=jax.ShapeDtypeStruct((P, Mp, Np), out_dtype),
        grid_spec=pltpu.PrefetchScalarGridSpec(
            num_scalar_prefetch=0,
            grid=(P, Mp // tm, Np // tn, Kp // tk),
            in_specs=[
                pl.BlockSpec((None, tm, tk), lambda p, i, j, k: (p, i, k)),
                pl.BlockSpec((None, tk, tn), lambda p, i, j, k: (p, k, j)),
                pl.BlockSpec((1, tn), lambda p, i, j, k: (0, j)),
            ],
            out_specs=pl.BlockSpec((None, tm, tn), lambda p, i, j, k: (p, i, j)),
            scratch_shapes=[pltpu.VMEM((tm, tn), jnp.float32)],
        ),
        compiler_params=pltpu.CompilerParams(
            dimension_semantics=("parallel", "parallel", "parallel",
                                 "arbitrary"),
            vmem_limit_bytes=32 * 1024 * 1024),
    )(a_pad, b_pad, shift_pad)
    return out   # (P, Mp, Np)


def _memory_kernel(x_ref, w_ref, out_ref, att_ref, *, shrink_thres):
    """MemoryUnit.forward fused: softmax(x W^T) -> shrink -> L1 norm -> att W."""
    x = x_ref[...]                               # (Mp, fea) bf16
    w = w_ref[...]                               # (mem, fea) bf16
    # logits = x @ w.T without materializing the transpose; f32 accumulate.
    logits = lax.dot_general(x, w, dimension_numbers=(((1,), (1,)), ((), ())),
                             preferred_element_type=jnp.float32)   # (Mp, mem)
    m = jnp.max(logits, axis=1, keepdims=True)
    e = jnp.exp(logits - m)
    att = e / jnp.sum(e, axis=1, keepdims=True)                    # softmax dim=1
    if shrink_thres > 0:
        lam = jnp.float32(shrink_thres)
        diff = att - lam
        # hard_shrink_relu: relu(att - lam) * att / (|att - lam| + 1e-12)
        att = jnp.maximum(diff, 0.0) * att / (jnp.abs(diff) + 1e-12)
        # F.normalize(p=1, dim=1)
        norm = jnp.sum(jnp.abs(att), axis=1, keepdims=True)
        att = att / jnp.maximum(norm, 1e-12)
    out_ref[...] = jnp.dot(att.astype(jnp.bfloat16), w,
                           preferred_element_type=jnp.float32)
    att_ref[...] = att


def memory_module(x, w, shrink_thres):
    """x: (M, fea_dim) bf16, w: (mem_dim, fea_dim) bf16 -> (out (M,fea) f32, att)."""
    m, fea = x.shape
    mem = w.shape[0]
    mp = _round_up(max(m, 8), 8)
    x_p = jnp.pad(x.astype(jnp.bfloat16), ((0, mp - m), (0, 0)))
    out, att = pl.pallas_call(
        functools.partial(_memory_kernel, shrink_thres=float(shrink_thres)),
        out_shape=(jax.ShapeDtypeStruct((mp, fea), jnp.float32),
                   jax.ShapeDtypeStruct((mp, mem), jnp.float32)),
        grid=(1,),
        in_specs=[pl.BlockSpec((mp, fea), lambda i: (0, 0)),
                  pl.BlockSpec((mem, fea), lambda i: (0, 0))],
        out_specs=(pl.BlockSpec((mp, fea), lambda i: (0, 0)),
                   pl.BlockSpec((mp, mem), lambda i: (0, 0))),
    )(x_p, w.astype(jnp.bfloat16))
    return out[:m], att[:m]


# -----------------------------------------------------------------------------
# Conv / ConvTranspose glue (plain-JAX slicing only; activations stay bf16)
# -----------------------------------------------------------------------------
def conv3d_s2(x, b_pad, shift_pad, cout, *, act):
    """Conv3d k=3 s=2 p=1 via im2col + Pallas matmul.  x: (N,D,H,W,Cin) bf16."""
    n, d, h, w, cin = x.shape
    od, oh, ow = d // 2, h // 2, w // 2
    xp = jnp.pad(x, ((0, 0), (1, 1), (1, 1), (1, 1), (0, 0)))
    cols = []
    for kd in range(3):
        for kh in range(3):
            for kw in range(3):
                cols.append(xp[:, kd:kd + 2 * od - 1:2,
                               kh:kh + 2 * oh - 1:2,
                               kw:kw + 2 * ow - 1:2, :])
    a = jnp.stack(cols, axis=4).reshape(n * od * oh * ow, 27 * cin)
    out = fused_matmul(a[None], b_pad, shift_pad, act=act)
    return out[0, :a.shape[0], :cout].reshape(n, od, oh, ow, cout)


def convtranspose3d_s2(x, b_pad, shift_pad, cout, *, act):
    """ConvTranspose3d k=3 s=2 p=1 op=1 via sub-pixel (output-parity)
    decomposition: 8 phases, each a <=8-tap stride-1 conv, batched into one
    Pallas matmul call.  x: (N,D,H,W,Cin) bf16 -> (N,2D,2H,2W,Cout) bf16."""
    n, d, h, w, cin = x.shape
    xp = jnp.pad(x, ((0, 0), (0, 1), (0, 1), (0, 1), (0, 0)))
    m = n * d * h * w
    phases = []
    for pd in (0, 1):
        for ph in (0, 1):
            for pw in (0, 1):
                slots = []
                for sd in (0, 1):
                    for sh in (0, 1):
                        for sw in (0, 1):
                            od_, oh_, ow_ = sd * pd, sh * ph, sw * pw
                            slots.append(xp[:, od_:od_ + d, oh_:oh_ + h,
                                            ow_:ow_ + w, :])
                phases.append(jnp.stack(slots, axis=4).reshape(m, 8 * cin))
    a = jnp.stack(phases, axis=0)                       # (8, M, 8*Cin)
    out = fused_matmul(a, b_pad, shift_pad, act=act)
    y = out[:, :m, :cout]                               # (8, M, Cout)
    # interleave phases back into the 2x upsampled output
    y = y.reshape(2, 2, 2, n, d, h, w, cout)
    y = jnp.transpose(y, (3, 4, 0, 5, 1, 6, 2, 7))
    return y.reshape(n, 2 * d, 2 * h, 2 * w, cout)


# -----------------------------------------------------------------------------
# Parameters (deterministic, PyTorch-style default init) and weight prep
# -----------------------------------------------------------------------------
ENC_SPECS = lambda cin: [(cin, 96), (96, 128), (128, 256), (256, 256)]
DEC_SPECS = lambda cin: [(256, 256), (256, 256), (256, 128), (128, cin)]


def init_params(key, chnum_in, mem_dim, fea_dim=256):
    enc_specs = ENC_SPECS(chnum_in)
    dec_specs = DEC_SPECS(chnum_in)
    n_keys = 2 * (len(enc_specs) + len(dec_specs)) + 1
    keys = jax.random.split(key, n_keys)
    ki = 0
    enc = []
    for cin, cout in enc_specs:
        bound = 1.0 / float((cin * 27) ** 0.5)
        w = jax.random.uniform(keys[ki], (cout, cin, 3, 3, 3), jnp.float32,
                               -bound, bound); ki += 1
        b = jax.random.uniform(keys[ki], (cout,), jnp.float32,
                               -bound, bound); ki += 1
        enc.append((w, b))
    dec = []
    for cin, cout in dec_specs:
        bound = 1.0 / float((cout * 27) ** 0.5)   # PyTorch fan_in for transposed conv
        w = jax.random.uniform(keys[ki], (cin, cout, 3, 3, 3), jnp.float32,
                               -bound, bound); ki += 1
        b = jax.random.uniform(keys[ki], (cout,), jnp.float32,
                               -bound, bound); ki += 1
        dec.append((w, b))
    stdv = 1.0 / float(fea_dim ** 0.5)
    mem_w = jax.random.uniform(keys[ki], (mem_dim, fea_dim), jnp.float32,
                               -stdv, stdv)
    return {"enc": enc, "dec": dec, "mem_w": mem_w}


# (output parity, slot bit) -> ConvTranspose kernel tap; (0, 1) has no tap.
_K_OF = {(0, 0): 1, (1, 0): 2, (1, 1): 0}


def _deconv_weight_phases(w):
    """w: (Cin, Cout, 3, 3, 3) -> (8, 8*Cin, Cout) sub-pixel phase weights."""
    cin, cout = int(w.shape[0]), int(w.shape[1])
    zeros = jnp.zeros((cin, cout), w.dtype)
    phases = []
    for pd in (0, 1):
        for ph in (0, 1):
            for pw in (0, 1):
                slots = []
                for sd in (0, 1):
                    for sh in (0, 1):
                        for sw in (0, 1):
                            kd = _K_OF.get((pd, sd))
                            kh = _K_OF.get((ph, sh))
                            kw = _K_OF.get((pw, sw))
                            if kd is None or kh is None or kw is None:
                                slots.append(zeros)
                            else:
                                slots.append(w[:, :, kd, kh, kw])
                phases.append(jnp.stack(slots, axis=0).reshape(8 * cin, cout))
    return jnp.stack(phases, axis=0)


def prepare_params(params):
    """Hoisted, once-per-param-set weight prep: im2col/phase layout, BN fold,
    bf16 cast, K/N padding.  Returns (array pytree, static config)."""
    bn_scale = 1.0 / float((1.0 + BN_EPS) ** 0.5)   # gamma=1, var=1, mean=0
    enc_prep, enc_cout = [], []
    for (w, b) in params["enc"]:
        cout, cin = int(w.shape[0]), int(w.shape[1])
        k = 27 * cin
        bm = jnp.transpose(w, (2, 3, 4, 1, 0)).reshape(k, cout) * bn_scale
        shift = (b * bn_scale).astype(jnp.float32)
        kp, np_ = _round_up(k, 128), _round_up(cout, 128)
        enc_prep.append({
            "B": jnp.pad(bm, ((0, kp - k), (0, np_ - cout)))
                    .astype(jnp.bfloat16)[None],                  # (1, Kp, Np)
            "shift": jnp.pad(shift.reshape(1, cout), ((0, 0), (0, np_ - cout))),
        })
        enc_cout.append(cout)

    dec_prep, dec_cout = [], []
    n_dec = len(params["dec"])
    for idx, (w, b) in enumerate(params["dec"]):
        cin, cout = int(w.shape[0]), int(w.shape[1])
        has_bn = idx < n_dec - 1
        scale = bn_scale if has_bn else 1.0
        bm = _deconv_weight_phases(w) * scale                     # (8, 8*Cin, Cout)
        shift = (b * scale).astype(jnp.float32)
        k = 8 * cin
        kp, np_ = _round_up(k, 128), _round_up(cout, 128)
        dec_prep.append({
            "B": jnp.pad(bm, ((0, 0), (0, kp - k), (0, np_ - cout)))
                    .astype(jnp.bfloat16),                        # (8, Kp, Np)
            "shift": jnp.pad(shift.reshape(1, cout), ((0, 0), (0, np_ - cout))),
        })
        dec_cout.append(cout)

    prep = {"enc": enc_prep, "dec": dec_prep,
            "mem_w": params["mem_w"].astype(jnp.bfloat16)}
    cfg = {"enc_cout": tuple(enc_cout), "dec_cout": tuple(dec_cout),
           "mem_dim": int(params["mem_w"].shape[0])}
    return prep, cfg


# -----------------------------------------------------------------------------
# Forward pass
# -----------------------------------------------------------------------------
def autoencoder_cov3d_mem_forward(x_ncdhw, prep, *, cfg, shrink_thres):
    """Returns (output NCDHW f32, att (N, mem_dim, d, h, w)) matching PyTorch."""
    x = jnp.transpose(x_ncdhw, (0, 2, 3, 4, 1)).astype(jnp.bfloat16)  # NDHWC

    # ---- encoder: 4 x (Conv3d s2 + BN + ReLU) ----
    for layer, cout in zip(prep["enc"], cfg["enc_cout"]):
        x = conv3d_s2(x, layer["B"], layer["shift"], cout, act="relu")

    # ---- memory module ----
    n, od, oh, ow, c = x.shape
    f = x.reshape(-1, c)                    # channels-last flatten == torch permute+view
    mem_out, att = memory_module(f, prep["mem_w"], shrink_thres)
    x = mem_out.astype(jnp.bfloat16).reshape(n, od, oh, ow, c)
    mem_dim = cfg["mem_dim"]
    att_ncdhw = jnp.transpose(att.reshape(n, od, oh, ow, mem_dim),
                              (0, 4, 1, 2, 3))

    # ---- decoder: 3 x (ConvTranspose3d s2 + BN + LeakyReLU(0.2)) + ConvTranspose3d ----
    n_dec = len(prep["dec"])
    for idx, (layer, cout) in enumerate(zip(prep["dec"], cfg["dec_cout"])):
        act = "leaky_relu" if idx < n_dec - 1 else "none"
        x = convtranspose3d_s2(x, layer["B"], layer["shift"], cout, act=act)

    out = jnp.transpose(x, (0, 4, 1, 2, 3)).astype(jnp.float32)       # NCDHW
    return out, att_ncdhw


# -----------------------------------------------------------------------------
# main
# -----------------------------------------------------------------------------
if __name__ == "__main__":
    chnum_in = 1
    mem_dim = 32
    shrink_thres = 0.0025
    N, D, H, W = 2, 16, 16, 16

    params = init_params(jax.random.PRNGKey(0), chnum_in, mem_dim)
    prep, cfg = prepare_params(params)          # hoisted weight prep (once)
    x = jax.random.normal(jax.random.PRNGKey(0), (N, chnum_in, D, H, W),
                          jnp.float32)

    fwd = jax.jit(functools.partial(autoencoder_cov3d_mem_forward,
                                    cfg=cfg, shrink_thres=shrink_thres))
    out, att = fwd(x, prep)
    jax.block_until_ready((out, att))

    assert out.shape == (N, chnum_in, D, H, W), out.shape
    assert att.shape == (N, mem_dim, D // 16, H // 16, W // 16), att.shape
    assert bool(jnp.all(jnp.isfinite(out))) and bool(jnp.all(jnp.isfinite(att)))
    print("KERNEL_OK")
</pallas_src>

<mosaic_0001>
module attributes {stable_mosaic.version = 11 : i64} {
  func.func @_bmm_bn_act_kernel(%arg0: i32, %arg1: i32, %arg2: i32, %arg3: i32, %arg4: memref<1x512x128xbf16, #tpu.memory_space<vmem>>, %arg5: memref<1x128x128xbf16, #tpu.memory_space<vmem>>, %arg6: memref<1x128xf32, #tpu.memory_space<vmem>>, %arg7: memref<1x512x128xbf16, #tpu.memory_space<vmem>>, %arg8: memref<512x128xf32, #tpu.memory_space<vmem>>) attributes {dimension_semantics = [#tpu.dimension_semantics<parallel>, #tpu.dimension_semantics<parallel>, #tpu.dimension_semantics<parallel>, #tpu.dimension_semantics<arbitrary>], iteration_bounds = array<i64: 1, 2, 1, 1>, scalar_prefetch = 0 : i64, scratch_operands = 1 : i64, tpu.core_type = #tpu.core_type<tc>, window_params = [{transform_indices = @transform_0, window_bounds = array<i64: 1, 512, 128>}, {transform_indices = @transform_1, window_bounds = array<i64: 1, 128, 128>}, {transform_indices = @transform_2, window_bounds = array<i64: 1, 128>}, {transform_indices = @transform_3, window_bounds = array<i64: 1, 512, 128>}]} {
    %c0_i32 = arith.constant 0 : i32
    %0 = arith.cmpi eq, %arg3, %c0_i32 : i32
    %1 = arith.extui %0 : i1 to i32
    %c0_i32_0 = arith.constant 0 : i32
    %2 = arith.cmpi ne, %1, %c0_i32_0 : i32
    scf.if %2 {
      %cst_12 = arith.constant 0.000000e+00 : f32
      %14 = vector.broadcast %cst_12 : f32 to vector<512x128xf32>
      %c0_13 = arith.constant 0 : index
      %c0_14 = arith.constant 0 : index
      %15 = vector.load %arg8[%c0_13, %c0_14] : memref<512x128xf32, #tpu.memory_space<vmem>>, vector<512x128xf32>
      tpu.vector_store %arg8[%c0_13, %c0_14], %14 {strides = array<i32>} : memref<512x128xf32, #tpu.memory_space<vmem>>, vector<512x128xf32>,
    } else {
    }
    %c0 = arith.constant 0 : index
    %c0_1 = arith.constant 0 : index
    %3 = vector.load %arg8[%c0, %c0_1] : memref<512x128xf32, #tpu.memory_space<vmem>>, vector<512x128xf32>
    %c0_2 = arith.constant 0 : index
    %c0_3 = arith.constant 0 : index
    %c0_4 = arith.constant 0 : index
    %4 = vector.load %arg4[%c0_2, %c0_3, %c0_4] : memref<1x512x128xbf16, #tpu.memory_space<vmem>>, vector<1x512x128xbf16>
    %5 = vector.shape_cast %4 : vector<1x512x128xbf16> to vector<512x128xbf16>
    %c0_5 = arith.constant 0 : index
    %c0_6 = arith.constant 0 : index
    %c0_7 = arith.constant 0 : index
    %6 = vector.load %arg5[%c0_5, %c0_6, %c0_7] : memref<1x128x128xbf16, #tpu.memory_space<vmem>>, vector<1x128x128xbf16>
    %7 = vector.shape_cast %6 : vector<1x128x128xbf16> to vector<128x128xbf16>
    %cst = arith.constant dense<0.000000e+00> : vector<512x128xf32>
    %8 = tpu.matmul %5, %7, %cst {dimension_numbers = #tpu.dot_dimension_numbers<[1], [0], [0], [1], [0, 0, 1, 1], [], []>} : vector<512x128xbf16>, vector<128x128xbf16>, vector<512x128xf32> -> vector<512x128xf32>
    %9 = arith.addf %3, %8 : vector<512x128xf32>
    %c0_8 = arith.constant 0 : index
    %c0_9 = arith.constant 0 : index
    %10 = vector.load %arg8[%c0_8, %c0_9] : memref<512x128xf32, #tpu.memory_space<vmem>>, vector<512x128xf32>
    tpu.vector_store %arg8[%c0_8, %c0_9], %9 {strides = array<i32>} : memref<512x128xf32, #tpu.memory_space<vmem>>, vector<512x128xf32>,
    %c0_i32_10 = arith.constant 0 : i32
    %11 = arith.cmpi eq, %arg3, %c0_i32_10 : i32
    %12 = arith.extui %11 : i1 to i32
    %c0_i32_11 = arith.constant 0 : i32
    %13 = arith.cmpi ne, %12, %c0_i32_11 : i32
    scf.if %13 {
      %c0_12 = arith.constant 0 : index
      %c0_13 = arith.constant 0 : index
      %14 = vector.load %arg8[%c0_12, %c0_13] : memref<512x128xf32, #tpu.memory_space<vmem>>, vector<512x128xf32>
      %c0_14 = arith.constant 0 : index
      %c0_15 = arith.constant 0 : index
      %15 = vector.load %arg6[%c0_14, %c0_15] : memref<1x128xf32, #tpu.memory_space<vmem>>, vector<1x128xf32>
      %16 = vector.broadcast %15 : vector<1x128xf32> to vector<512x128xf32>
      %17 = arith.addf %14, %16 : vector<512x128xf32>
      %cst_16 = arith.constant 0.000000e+00 : f32
      %18 = vector.broadcast %cst_16 : f32 to vector<512x128xf32>
      %19 = arith.maximumf %17, %18 : vector<512x128xf32>
      %20 = arith.truncf %19 : vector<512x128xf32> to vector<512x128xbf16>
      %c0_17 = arith.constant 0 : index
      %c0_18 = arith.constant 0 : index
      %c0_19 = arith.constant 0 : index
      %21 = vector.load %arg7[%c0_17, %c0_18, %c0_19] : memref<1x512x128xbf16, #tpu.memory_space<vmem>>, vector<1x512x128xbf16>
      %22 = vector.shape_cast %21 : vector<1x512x128xbf16> to vector<512x128xbf16>
      %23 = vector.shape_cast %20 : vector<512x128xbf16> to vector<1x512x128xbf16>
      tpu.vector_store %arg7[%c0_17, %c0_18, %c0_19], %23 {strides = array<i32>} : memref<1x512x128xbf16, #tpu.memory_space<vmem>>, vector<1x512x128xbf16>,
    } else {
    }
    return
  }
  func.func @transform_0(%arg0: i32, %arg1: i32, %arg2: i32, %arg3: i32) -> (i32, i32, i32) {
    %c0_i32 = arith.constant 0 : i32
    return %arg0, %arg1, %arg3 : i32, i32, i32
  }
  func.func @transform_1(%arg0: i32, %arg1: i32, %arg2: i32, %arg3: i32) -> (i32, i32, i32) {
    %c0_i32 = arith.constant 0 : i32
    return %arg0, %arg3, %arg2 : i32, i32, i32
  }
  func.func @transform_2(%arg0: i32, %arg1: i32, %arg2: i32, %arg3: i32) -> (i32, i32) {
    %c0_i32 = arith.constant 0 : i32
    %c0_i32_0 = arith.constant 0 : i32
    return %c0_i32, %arg2 : i32, i32
  }
  func.func @transform_3(%arg0: i32, %arg1: i32, %arg2: i32, %arg3: i32) -> (i32, i32, i32) {
    %c0_i32 = arith.constant 0 : i32
    return %arg0, %arg1, %arg2 : i32, i32, i32
  }
}

module attributes {stable_mosaic.version = 11 : i64} {
  func.func @_bmm_bn_act_kernel(%arg0: i32, %arg1: i32, %arg2: i32, %arg3: i32, %arg4: memref<1x64x896xbf16, #tpu.memory_space<vmem>>, %arg5: memref<1x896x128xbf16, #tpu.memory_space<vmem>>, %arg6: memref<1x128xf32, #tpu.memory_space<vmem>>, %arg7: memref<1x64x128xbf16, #tpu.memory_space<vmem>>, %arg8: memref<64x128xf32, #tpu.memory_space<vmem>>) attributes {dimension_semantics = [#tpu.dimension_semantics<parallel>, #tpu.dimension_semantics<parallel>, #tpu.dimension_semantics<parallel>, #tpu.dimension_semantics<arbitrary>], iteration_bounds = array<i64: 1, 2, 1, 3>, scalar_prefetch = 0 : i64, scratch_operands = 1 : i64, tpu.core_type = #tpu.core_type<tc>, window_params = [{transform_indices = @transform_0, window_bounds = array<i64: 1, 64, 896>}, {transform_indices = @transform_1, window_bounds = array<i64: 1, 896, 128>}, {transform_indices = @transform_2, window_bounds = array<i64: 1, 128>}, {transform_indices = @transform_3, window_bounds = array<i64: 1, 64, 128>}]} {
    %c0_i32 = arith.constant 0 : i32
    %0 = arith.cmpi eq, %arg3, %c0_i32 : i32
    %1 = arith.extui %0 : i1 to i32
    %c0_i32_0 = arith.constant 0 : i32
    %2 = arith.cmpi ne, %1, %c0_i32_0 : i32
    scf.if %2 {
      %cst_11 = arith.constant 0.000000e+00 : f32
      %14 = vector.broadcast %cst_11 : f32 to vector<64x128xf32>
      %c0_12 = arith.constant 0 : index
      %c0_13 = arith.constant 0 : index
      %15 = vector.load %arg8[%c0_12, %c0_13] : memref<64x128xf32, #tpu.memory_space<vmem>>, vector<64x128xf32>
      tpu.vector_store %arg8[%c0_12, %c0_13], %14 {strides = array<i32>} : memref<64x128xf32, #tpu.memory_space<vmem>>, vector<64x128xf32>,
    } else {
    }
    %c0 = arith.constant 0 : index
    %c0_1 = arith.constant 0 : index
    %3 = vector.load %arg8[%c0, %c0_1] : memref<64x128xf32, #tpu.memory_space<vmem>>, vector<64x128xf32>
    %c0_2 = arith.constant 0 : index
    %c0_3 = arith.constant 0 : index
    %c0_4 = arith.constant 0 : index
    %4 = vector.load %arg4[%c0_2, %c0_3, %c0_4] : memref<1x64x896xbf16, #tpu.memory_space<vmem>>, vector<1x64x896xbf16>
    %5 = vector.shape_cast %4 : vector<1x64x896xbf16> to vector<64x896xbf16>
    %c0_5 = arith.constant 0 : index
    %c0_6 = arith.constant 0 : index
    %c0_7 = arith.constant 0 : index
    %6 = vector.load %arg5[%c0_5, %c0_6, %c0_7] : memref<1x896x128xbf16, #tpu.memory_space<vmem>>, vector<1x896x128xbf16>
    %7 = vector.shape_cast %6 : vector<1x896x128xbf16> to vector<896x128xbf16>
    %cst = arith.constant dense<0.000000e+00> : vector<64x128xf32>
    %8 = tpu.matmul %5, %7, %cst {dimension_numbers = #tpu.dot_dimension_numbers<[1], [0], [0], [1], [0, 0, 1, 1], [], []>} : vector<64x896xbf16>, vector<896x128xbf16>, vector<64x128xf32> -> vector<64x128xf32>
    %9 = arith.addf %3, %8 : vector<64x128xf32>
    %c0_8 = arith.constant 0 : index
    %c0_9 = arith.constant 0 : index
    %10 = vector.load %arg8[%c0_8, %c0_9] : memref<64x128xf32, #tpu.memory_space<vmem>>, vector<64x128xf32>
    tpu.vector_store %arg8[%c0_8, %c0_9], %9 {strides = array<i32>} : memref<64x128xf32, #tpu.memory_space<vmem>>, vector<64x128xf32>,
    %c2_i32 = arith.constant 2 : i32
    %11 = arith.cmpi eq, %arg3, %c2_i32 : i32
    %12 = arith.extui %11 : i1 to i32
    %c0_i32_10 = arith.constant 0 : i32
    %13 = arith.cmpi ne, %12, %c0_i32_10 : i32
    scf.if %13 {
      %c0_11 = arith.constant 0 : index
      %c0_12 = arith.constant 0 : index
      %14 = vector.load %arg8[%c0_11, %c0_12] : memref<64x128xf32, #tpu.memory_space<vmem>>, vector<64x128xf32>
      %c0_13 = arith.constant 0 : index
      %c0_14 = arith.constant 0 : index
      %15 = vector.load %arg6[%c0_13, %c0_14] : memref<1x128xf32, #tpu.memory_space<vmem>>, vector<1x128xf32>
      %16 = vector.broadcast %15 : vector<1x128xf32> to vector<64x128xf32>
      %17 = arith.addf %14, %16 : vector<64x128xf32>
      %cst_15 = arith.constant 0.000000e+00 : f32
      %18 = vector.broadcast %cst_15 : f32 to vector<64x128xf32>
      %19 = arith.maximumf %17, %18 : vector<64x128xf32>
      %20 = arith.truncf %19 : vector<64x128xf32> to vector<64x128xbf16>
      %c0_16 = arith.constant 0 : index
      %c0_17 = arith.constant 0 : index
      %c0_18 = arith.constant 0 : index
      %21 = vector.load %arg7[%c0_16, %c0_17, %c0_18] : memref<1x64x128xbf16, #tpu.memory_space<vmem>>, vector<1x64x128xbf16>
      %22 = vector.shape_cast %21 : vector<1x64x128xbf16> to vector<64x128xbf16>
      %23 = vector.shape_cast %20 : vector<64x128xbf16> to vector<1x64x128xbf16>
      tpu.vector_store %arg7[%c0_16, %c0_17, %c0_18], %23 {strides = array<i32>} : memref<1x64x128xbf16, #tpu.memory_space<vmem>>, vector<1x64x128xbf16>,
    } else {
    }
    return
  }
  func.func @transform_0(%arg0: i32, %arg1: i32, %arg2: i32, %arg3: i32) -> (i32, i32, i32) {
    %c0_i32 = arith.constant 0 : i32
    return %arg0, %arg1, %arg3 : i32, i32, i32
  }
  func.func @transform_1(%arg0: i32, %arg1: i32, %arg2: i32, %arg3: i32) -> (i32, i32, i32) {
    %c0_i32 = arith.constant 0 : i32
    return %arg0, %arg3, %arg2 : i32, i32, i32
  }
  func.func @transform_2(%arg0: i32, %arg1: i32, %arg2: i32, %arg3: i32) -> (i32, i32) {
    %c0_i32 = arith.constant 0 : i32
    %c0_i32_0 = arith.constant 0 : i32
    return %c0_i32, %arg2 : i32, i32
  }
  func.func @transform_3(%arg0: i32, %arg1: i32, %arg2: i32, %arg3: i32) -> (i32, i32, i32) {
    %c0_i32 = arith.constant 0 : i32
    return %arg0, %arg1, %arg2 : i32, i32, i32
  }
}

module attributes {stable_mosaic.version = 11 : i64} {
  func.func @_bmm_bn_act_kernel(%arg0: i32, %arg1: i32, %arg2: i32, %arg3: i32, %arg4: memref<1x16x1152xbf16, #tpu.memory_space<vmem>>, %arg5: memref<1x1152x128xbf16, #tpu.memory_space<vmem>>, %arg6: memref<1x128xf32, #tpu.memory_space<vmem>>, %arg7: memref<1x16x128xbf16, #tpu.memory_space<vmem>>, %arg8: memref<16x128xf32, #tpu.memory_space<vmem>>) attributes {dimension_semantics = [#tpu.dimension_semantics<parallel>, #tpu.dimension_semantics<parallel>, #tpu.dimension_semantics<parallel>, #tpu.dimension_semantics<arbitrary>], iteration_bounds = array<i64: 1, 1, 2, 3>, scalar_prefetch = 0 : i64, scratch_operands = 1 : i64, tpu.core_type = #tpu.core_type<tc>, window_params = [{transform_indices = @transform_0, window_bounds = array<i64: 1, 16, 1152>}, {transform_indices = @transform_1, window_bounds = array<i64: 1, 1152, 128>}, {transform_indices = @transform_2, window_bounds = array<i64: 1, 128>}, {transform_indices = @transform_3, window_bounds = array<i64: 1, 16, 128>}]} {
    %c0_i32 = arith.constant 0 : i32
    %0 = arith.cmpi eq, %arg3, %c0_i32 : i32
    %1 = arith.extui %0 : i1 to i32
    %c0_i32_0 = arith.constant 0 : i32
    %2 = arith.cmpi ne, %1, %c0_i32_0 : i32
    scf.if %2 {
      %cst_11 = arith.constant 0.000000e+00 : f32
      %14 = vector.broadcast %cst_11 : f32 to vector<16x128xf32>
      %c0_12 = arith.constant 0 : index
      %c0_13 = arith.constant 0 : index
      %15 = vector.load %arg8[%c0_12, %c0_13] : memref<16x128xf32, #tpu.memory_space<vmem>>, vector<16x128xf32>
      tpu.vector_store %arg8[%c0_12, %c0_13], %14 {strides = array<i32>} : memref<16x128xf32, #tpu.memory_space<vmem>>, vector<16x128xf32>,
    } else {
    }
    %c0 = arith.constant 0 : index
    %c0_1 = arith.constant 0 : index
    %3 = vector.load %arg8[%c0, %c0_1] : memref<16x128xf32, #tpu.memory_space<vmem>>, vector<16x128xf32>
    %c0_2 = arith.constant 0 : index
    %c0_3 = arith.constant 0 : index
    %c0_4 = arith.constant 0 : index
    %4 = vector.load %arg4[%c0_2, %c0_3, %c0_4] : memref<1x16x1152xbf16, #tpu.memory_space<vmem>>, vector<1x16x1152xbf16>
    %5 = vector.shape_cast %4 : vector<1x16x1152xbf16> to vector<16x1152xbf16>
    %c0_5 = arith.constant 0 : index
    %c0_6 = arith.constant 0 : index
    %c0_7 = arith.constant 0 : index
    %6 = vector.load %arg5[%c0_5, %c0_6, %c0_7] : memref<1x1152x128xbf16, #tpu.memory_space<vmem>>, vector<1x1152x128xbf16>
    %7 = vector.shape_cast %6 : vector<1x1152x128xbf16> to vector<1152x128xbf16>
    %cst = arith.constant dense<0.000000e+00> : vector<16x128xf32>
    %8 = tpu.matmul %5, %7, %cst {dimension_numbers = #tpu.dot_dimension_numbers<[1], [0], [0], [1], [0, 0, 1, 1], [], []>} : vector<16x1152xbf16>, vector<1152x128xbf16>, vector<16x128xf32> -> vector<16x128xf32>
    %9 = arith.addf %3, %8 : vector<16x128xf32>
    %c0_8 = arith.constant 0 : index
    %c0_9 = arith.constant 0 : index
    %10 = vector.load %arg8[%c0_8, %c0_9] : memref<16x128xf32, #tpu.memory_space<vmem>>, vector<16x128xf32>
    tpu.vector_store %arg8[%c0_8, %c0_9], %9 {strides = array<i32>} : memref<16x128xf32, #tpu.memory_space<vmem>>, vector<16x128xf32>,
    %c2_i32 = arith.constant 2 : i32
    %11 = arith.cmpi eq, %arg3, %c2_i32 : i32
    %12 = arith.extui %11 : i1 to i32
    %c0_i32_10 = arith.constant 0 : i32
    %13 = arith.cmpi ne, %12, %c0_i32_10 : i32
    scf.if %13 {
      %c0_11 = arith.constant 0 : index
      %c0_12 = arith.constant 0 : index
      %14 = vector.load %arg8[%c0_11, %c0_12] : memref<16x128xf32, #tpu.memory_space<vmem>>, vector<16x128xf32>
      %c0_13 = arith.constant 0 : index
      %c0_14 = arith.constant 0 : index
      %15 = vector.load %arg6[%c0_13, %c0_14] : memref<1x128xf32, #tpu.memory_space<vmem>>, vector<1x128xf32>
      %16 = vector.broadcast %15 : vector<1x128xf32> to vector<16x128xf32>
      %17 = arith.addf %14, %16 : vector<16x128xf32>
      %cst_15 = arith.constant 0.000000e+00 : f32
      %18 = vector.broadcast %cst_15 : f32 to vector<16x128xf32>
      %19 = arith.maximumf %17, %18 : vector<16x128xf32>
      %20 = arith.truncf %19 : vector<16x128xf32> to vector<16x128xbf16>
      %c0_16 = arith.constant 0 : index
      %c0_17 = arith.constant 0 : index
      %c0_18 = arith.constant 0 : index
      %21 = vector.load %arg7[%c0_16, %c0_17, %c0_18] : memref<1x16x128xbf16, #tpu.memory_space<vmem>>, vector<1x16x128xbf16>
      %22 = vector.shape_cast %21 : vector<1x16x128xbf16> to vector<16x128xbf16>
      %23 = vector.shape_cast %20 : vector<16x128xbf16> to vector<1x16x128xbf16>
      tpu.vector_store %arg7[%c0_16, %c0_17, %c0_18], %23 {strides = array<i32>} : memref<1x16x128xbf16, #tpu.memory_space<vmem>>, vector<1x16x128xbf16>,
    } else {
    }
    return
  }
  func.func @transform_0(%arg0: i32, %arg1: i32, %arg2: i32, %arg3: i32) -> (i32, i32, i32) {
    %c0_i32 = arith.constant 0 : i32
    return %arg0, %arg1, %arg3 : i32, i32, i32
  }
  func.func @transform_1(%arg0: i32, %arg1: i32, %arg2: i32, %arg3: i32) -> (i32, i32, i32) {
    %c0_i32 = arith.constant 0 : i32
    return %arg0, %arg3, %arg2 : i32, i32, i32
  }
  func.func @transform_2(%arg0: i32, %arg1: i32, %arg2: i32, %arg3: i32) -> (i32, i32) {
    %c0_i32 = arith.constant 0 : i32
    %c0_i32_0 = arith.constant 0 : i32
    return %c0_i32, %arg2 : i32, i32
  }
  func.func @transform_3(%arg0: i32, %arg1: i32, %arg2: i32, %arg3: i32) -> (i32, i32, i32) {
    %c0_i32 = arith.constant 0 : i32
    return %arg0, %arg1, %arg2 : i32, i32, i32
  }
}

module attributes {stable_mosaic.version = 11 : i64} {
  func.func @_bmm_bn_act_kernel(%arg0: i32, %arg1: i32, %arg2: i32, %arg3: i32, %arg4: memref<1x8x1152xbf16, #tpu.memory_space<vmem>>, %arg5: memref<1x1152x128xbf16, #tpu.memory_space<vmem>>, %arg6: memref<1x128xf32, #tpu.memory_space<vmem>>, %arg7: memref<1x8x128xbf16, #tpu.memory_space<vmem>>, %arg8: memref<8x128xf32, #tpu.memory_space<vmem>>) attributes {dimension_semantics = [#tpu.dimension_semantics<parallel>, #tpu.dimension_semantics<parallel>, #tpu.dimension_semantics<parallel>, #tpu.dimension_semantics<arbitrary>], iteration_bounds = array<i64: 1, 1, 2, 6>, scalar_prefetch = 0 : i64, scratch_operands = 1 : i64, tpu.core_type = #tpu.core_type<tc>, window_params = [{transform_indices = @transform_0, window_bounds = array<i64: 1, 8, 1152>}, {transform_indices = @transform_1, window_bounds = array<i64: 1, 1152, 128>}, {transform_indices = @transform_2, window_bounds = array<i64: 1, 128>}, {transform_indices = @transform_3, window_bounds = array<i64: 1, 8, 128>}]} {
    %c0_i32 = arith.constant 0 : i32
    %0 = arith.cmpi eq, %arg3, %c0_i32 : i32
    %1 = arith.extui %0 : i1 to i32
    %c0_i32_0 = arith.constant 0 : i32
    %2 = arith.cmpi ne, %1, %c0_i32_0 : i32
    scf.if %2 {
      %cst_11 = arith.constant 0.000000e+00 : f32
      %14 = vector.broadcast %cst_11 : f32 to vector<8x128xf32>
      %c0_12 = arith.constant 0 : index
      %c0_13 = arith.constant 0 : index
      %15 = vector.load %arg8[%c0_12, %c0_13] : memref<8x128xf32, #tpu.memory_space<vmem>>, vector<8x128xf32>
      tpu.vector_store %arg8[%c0_12, %c0_13], %14 {strides = array<i32>} : memref<8x128xf32, #tpu.memory_space<vmem>>, vector<8x128xf32>,
    } else {
    }
    %c0 = arith.constant 0 : index
    %c0_1 = arith.constant 0 : index
    %3 = vector.load %arg8[%c0, %c0_1] : memref<8x128xf32, #tpu.memory_space<vmem>>, vector<8x128xf32>
    %c0_2 = arith.constant 0 : index
    %c0_3 = arith.constant 0 : index
    %c0_4 = arith.constant 0 : index
    %4 = vector.load %arg4[%c0_2, %c0_3, %c0_4] : memref<1x8x1152xbf16, #tpu.memory_space<vmem>>, vector<1x8x1152xbf16>
    %5 = vector.shape_cast %4 : vector<1x8x1152xbf16> to vector<8x1152xbf16>
    %c0_5 = arith.constant 0 : index
    %c0_6 = arith.constant 0 : index
    %c0_7 = arith.constant 0 : index
    %6 = vector.load %arg5[%c0_5, %c0_6, %c0_7] : memref<1x1152x128xbf16, #tpu.memory_space<vmem>>, vector<1x1152x128xbf16>
    %7 = vector.shape_cast %6 : vector<1x1152x128xbf16> to vector<1152x128xbf16>
    %cst = arith.constant dense<0.000000e+00> : vector<8x128xf32>
    %8 = tpu.matmul %5, %7, %cst {dimension_numbers = #tpu.dot_dimension_numbers<[1], [0], [0], [1], [0, 0, 1, 1], [], []>} : vector<8x1152xbf16>, vector<1152x128xbf16>, vector<8x128xf32> -> vector<8x128xf32>
    %9 = arith.addf %3, %8 : vector<8x128xf32>
    %c0_8 = arith.constant 0 : index
    %c0_9 = arith.constant 0 : index
    %10 = vector.load %arg8[%c0_8, %c0_9] : memref<8x128xf32, #tpu.memory_space<vmem>>, vector<8x128xf32>
    tpu.vector_store %arg8[%c0_8, %c0_9], %9 {strides = array<i32>} : memref<8x128xf32, #tpu.memory_space<vmem>>, vector<8x128xf32>,
    %c5_i32 = arith.constant 5 : i32
    %11 = arith.cmpi eq, %arg3, %c5_i32 : i32
    %12 = arith.extui %11 : i1 to i32
    %c0_i32_10 = arith.constant 0 : i32
    %13 = arith.cmpi ne, %12, %c0_i32_10 : i32
    scf.if %13 {
      %c0_11 = arith.constant 0 : index
      %c0_12 = arith.constant 0 : index
      %14 = vector.load %arg8[%c0_11, %c0_12] : memref<8x128xf32, #tpu.memory_space<vmem>>, vector<8x128xf32>
      %c0_13 = arith.constant 0 : index
      %c0_14 = arith.constant 0 : index
      %15 = vector.load %arg6[%c0_13, %c0_14] : memref<1x128xf32, #tpu.memory_space<vmem>>, vector<1x128xf32>
      %16 = vector.broadcast %15 : vector<1x128xf32> to vector<8x128xf32>
      %17 = arith.addf %14, %16 : vector<8x128xf32>
      %cst_15 = arith.constant 0.000000e+00 : f32
      %18 = vector.broadcast %cst_15 : f32 to vector<8x128xf32>
      %19 = arith.maximumf %17, %18 : vector<8x128xf32>
      %20 = arith.truncf %19 : vector<8x128xf32> to vector<8x128xbf16>
      %c0_16 = arith.constant 0 : index
      %c0_17 = arith.constant 0 : index
      %c0_18 = arith.constant 0 : index
      %21 = vector.load %arg7[%c0_16, %c0_17, %c0_18] : memref<1x8x128xbf16, #tpu.memory_space<vmem>>, vector<1x8x128xbf16>
      %22 = vector.shape_cast %21 : vector<1x8x128xbf16> to vector<8x128xbf16>
      %23 = vector.shape_cast %20 : vector<8x128xbf16> to vector<1x8x128xbf16>
      tpu.vector_store %arg7[%c0_16, %c0_17, %c0_18], %23 {strides = array<i32>} : memref<1x8x128xbf16, #tpu.memory_space<vmem>>, vector<1x8x128xbf16>,
    } else {
    }
    return
  }
  func.func @transform_0(%arg0: i32, %arg1: i32, %arg2: i32, %arg3: i32) -> (i32, i32, i32) {
    %c0_i32 = arith.constant 0 : i32
    return %arg0, %arg1, %arg3 : i32, i32, i32
  }
  func.func @transform_1(%arg0: i32, %arg1: i32, %arg2: i32, %arg3: i32) -> (i32, i32, i32) {
    %c0_i32 = arith.constant 0 : i32
    return %arg0, %arg3, %arg2 : i32, i32, i32
  }
  func.func @transform_2(%arg0: i32, %arg1: i32, %arg2: i32, %arg3: i32) -> (i32, i32) {
    %c0_i32 = arith.constant 0 : i32
    %c0_i32_0 = arith.constant 0 : i32
    return %c0_i32, %arg2 : i32, i32
  }
  func.func @transform_3(%arg0: i32, %arg1: i32, %arg2: i32, %arg3: i32) -> (i32, i32, i32) {
    %c0_i32 = arith.constant 0 : i32
    return %arg0, %arg1, %arg2 : i32, i32, i32
  }
}

module attributes {stable_mosaic.version = 11 : i64} {
  func.func @_memory_kernel(%arg0: i32, %arg1: memref<8x256xbf16, #tpu.memory_space<vmem>>, %arg2: memref<32x256xbf16, #tpu.memory_space<vmem>>, %arg3: memref<8x256xf32, #tpu.memory_space<vmem>>, %arg4: memref<8x32xf32, #tpu.memory_space<vmem>>) attributes {dimension_semantics = [#tpu.dimension_semantics<arbitrary>], iteration_bounds = array<i64: 1>, scalar_prefetch = 0 : i64, scratch_operands = 0 : i64, tpu.core_type = #tpu.core_type<tc>, window_params = [{pipeline_mode = #tpu.pipeline_mode<synchronous>, transform_indices = @transform_0, window_bounds = array<i64: 8, 256>}, {pipeline_mode = #tpu.pipeline_mode<synchronous>, transform_indices = @transform_1, window_bounds = array<i64: 32, 256>}, {pipeline_mode = #tpu.pipeline_mode<synchronous>, transform_indices = @transform_2, window_bounds = array<i64: 8, 256>}, {pipeline_mode = #tpu.pipeline_mode<synchronous>, transform_indices = @transform_3, window_bounds = array<i64: 8, 32>}]} {
    %c0 = arith.constant 0 : index
    %c0_0 = arith.constant 0 : index
    %0 = vector.load %arg1[%c0, %c0_0] : memref<8x256xbf16, #tpu.memory_space<vmem>>, vector<8x256xbf16>
    %c0_1 = arith.constant 0 : index
    %c0_2 = arith.constant 0 : index
    %1 = vector.load %arg2[%c0_1, %c0_2] : memref<32x256xbf16, #tpu.memory_space<vmem>>, vector<32x256xbf16>
    %cst = arith.constant dense<0.000000e+00> : vector<8x32xf32>
    %2 = tpu.matmul %0, %1, %cst {dimension_numbers = #tpu.dot_dimension_numbers<[1], [1], [0], [0], [0, 0, 1, 0], [], []>} : vector<8x256xbf16>, vector<32x256xbf16>, vector<8x32xf32> -> vector<8x32xf32>
    %cst_3 = arith.constant dense<0xFF800000> : vector<8xf32>
    %3 = vector.multi_reduction <maximumf>, %2, %cst_3 [1] : vector<8x32xf32> to vector<8xf32>
    %4 = vector.shape_cast %3 : vector<8xf32> to vector<8x1xf32>
    %5 = vector.broadcast %4 : vector<8x1xf32> to vector<8x32xf32>
    %6 = arith.subf %2, %5 : vector<8x32xf32>
    %7 = math.exp %6 : vector<8x32xf32>
    %cst_4 = arith.constant dense<0.000000e+00> : vector<8xf32>
    %8 = vector.multi_reduction <add>, %7, %cst_4 [1] : vector<8x32xf32> to vector<8xf32>
    %9 = vector.shape_cast %8 : vector<8xf32> to vector<8x1xf32>
    %10 = vector.broadcast %9 : vector<8x1xf32> to vector<8x32xf32>
    %11 = arith.divf %7, %10 : vector<8x32xf32>
    %cst_5 = arith.constant 2.500000e-03 : f32
    %12 = vector.broadcast %cst_5 : f32 to vector<8x32xf32>
    %13 = arith.subf %11, %12 : vector<8x32xf32>
    %cst_6 = arith.constant 0.000000e+00 : f32
    %14 = vector.broadcast %cst_6 : f32 to vector<8x32xf32>
    %15 = arith.maximumf %13, %14 : vector<8x32xf32>
    %16 = arith.mulf %15, %11 : vector<8x32xf32>
    %17 = math.absf %13 : vector<8x32xf32>
    %cst_7 = arith.constant 9.99999996E-13 : f32
    %18 = vector.broadcast %cst_7 : f32 to vector<8x32xf32>
    %19 = arith.addf %17, %18 : vector<8x32xf32>
    %20 = arith.divf %16, %19 : vector<8x32xf32>
    %21 = math.absf %20 : vector<8x32xf32>
    %cst_8 = arith.constant dense<0.000000e+00> : vector<8xf32>
    %22 = vector.multi_reduction <add>, %21, %cst_8 [1] : vector<8x32xf32> to vector<8xf32>
    %23 = vector.shape_cast %22 : vector<8xf32> to vector<8x1xf32>
    %cst_9 = arith.constant 9.99999996E-13 : f32
    %24 = vector.broadcast %cst_9 : f32 to vector<8x1xf32>
    %25 = arith.maximumf %23, %24 : vector<8x1xf32>
    %26 = vector.broadcast %25 : vector<8x1xf32> to vector<8x32xf32>
    %27 = arith.divf %20, %26 : vector<8x32xf32>
    %28 = arith.truncf %27 : vector<8x32xf32> to vector<8x32xbf16>
    %cst_10 = arith.constant dense<0.000000e+00> : vector<8x256xf32>
    %29 = tpu.matmul %28, %1, %cst_10 {dimension_numbers = #tpu.dot_dimension_numbers<[1], [0], [0], [1], [0, 0, 1, 1], [], []>} : vector<8x32xbf16>, vector<32x256xbf16>, vector<8x256xf32> -> vector<8x256xf32>
    %c0_11 = arith.constant 0 : index
    %c0_12 = arith.constant 0 : index
    %30 = vector.load %arg3[%c0_11, %c0_12] : memref<8x256xf32, #tpu.memory_space<vmem>>, vector<8x256xf32>
    tpu.vector_store %arg3[%c0_11, %c0_12], %29 {strides = array<i32>} : memref<8x256xf32, #tpu.memory_space<vmem>>, vector<8x256xf32>,
    %c0_13 = arith.constant 0 : index
    %c0_14 = arith.constant 0 : index
    %31 = vector.load %arg4[%c0_13, %c0_14] : memref<8x32xf32, #tpu.memory_space<vmem>>, vector<8x32xf32>
    tpu.vector_store %arg4[%c0_13, %c0_14], %27 {strides = array<i32>} : memref<8x32xf32, #tpu.memory_space<vmem>>, vector<8x32xf32>,
    return
  }
  func.func @transform_0(%arg0: i32) -> (i32, i32) {
    %c0_i32 = arith.constant 0 : i32
    %c0_i32_0 = arith.constant 0 : i32
    %c0_i32_1 = arith.constant 0 : i32
    return %c0_i32, %c0_i32_0 : i32, i32
  }
  func.func @transform_1(%arg0: i32) -> (i32, i32) {
    %c0_i32 = arith.constant 0 : i32
    %c0_i32_0 = arith.constant 0 : i32
    %c0_i32_1 = arith.constant 0 : i32
    return %c0_i32, %c0_i32_0 : i32, i32
  }
  func.func @transform_2(%arg0: i32) -> (i32, i32) {
    %c0_i32 = arith.constant 0 : i32
    %c0_i32_0 = arith.constant 0 : i32
    %c0_i32_1 = arith.constant 0 : i32
    return %c0_i32, %c0_i32_0 : i32, i32
  }
  func.func @transform_3(%arg0: i32) -> (i32, i32) {
    %c0_i32 = arith.constant 0 : i32
    %c0_i32_0 = arith.constant 0 : i32
    %c0_i32_1 = arith.constant 0 : i32
    return %c0_i32, %c0_i32_0 : i32, i32
  }
}

module attributes {stable_mosaic.version = 11 : i64} {
  func.func @_bmm_bn_act_kernel(%arg0: i32, %arg1: i32, %arg2: i32, %arg3: i32, %arg4: memref<1x8x2048xbf16, #tpu.memory_space<vmem>>, %arg5: memref<1x2048x256xbf16, #tpu.memory_space<vmem>>, %arg6: memref<1x256xf32, #tpu.memory_space<vmem>>, %arg7: memref<1x8x256xbf16, #tpu.memory_space<vmem>>, %arg8: memref<8x256xf32, #tpu.memory_space<vmem>>) attributes {dimension_semantics = [#tpu.dimension_semantics<parallel>, #tpu.dimension_semantics<parallel>, #tpu.dimension_semantics<parallel>, #tpu.dimension_semantics<arbitrary>], iteration_bounds = array<i64: 8, 1, 1, 1>, scalar_prefetch = 0 : i64, scratch_operands = 1 : i64, tpu.core_type = #tpu.core_type<tc>, window_params = [{transform_indices = @transform_0, window_bounds = array<i64: 1, 8, 2048>}, {transform_indices = @transform_1, window_bounds = array<i64: 1, 2048, 256>}, {transform_indices = @transform_2, window_bounds = array<i64: 1, 256>}, {transform_indices = @transform_3, window_bounds = array<i64: 1, 8, 256>}]} {
    %c0_i32 = arith.constant 0 : i32
    %0 = arith.cmpi eq, %arg3, %c0_i32 : i32
    %1 = arith.extui %0 : i1 to i32
    %c0_i32_0 = arith.constant 0 : i32
    %2 = arith.cmpi ne, %1, %c0_i32_0 : i32
    scf.if %2 {
      %cst_12 = arith.constant 0.000000e+00 : f32
      %14 = vector.broadcast %cst_12 : f32 to vector<8x256xf32>
      %c0_13 = arith.constant 0 : index
      %c0_14 = arith.constant 0 : index
      %15 = vector.load %arg8[%c0_13, %c0_14] : memref<8x256xf32, #tpu.memory_space<vmem>>, vector<8x256xf32>
      tpu.vector_store %arg8[%c0_13, %c0_14], %14 {strides = array<i32>} : memref<8x256xf32, #tpu.memory_space<vmem>>, vector<8x256xf32>,
    } else {
    }
    %c0 = arith.constant 0 : index
    %c0_1 = arith.constant 0 : index
    %3 = vector.load %arg8[%c0, %c0_1] : memref<8x256xf32, #tpu.memory_space<vmem>>, vector<8x256xf32>
    %c0_2 = arith.constant 0 : index
    %c0_3 = arith.constant 0 : index
    %c0_4 = arith.constant 0 : index
    %4 = vector.load %arg4[%c0_2, %c0_3, %c0_4] : memref<1x8x2048xbf16, #tpu.memory_space<vmem>>, vector<1x8x2048xbf16>
    %5 = vector.shape_cast %4 : vector<1x8x2048xbf16> to vector<8x2048xbf16>
    %c0_5 = arith.constant 0 : index
    %c0_6 = arith.constant 0 : index
    %c0_7 = arith.constant 0 : index
    %6 = vector.load %arg5[%c0_5, %c0_6, %c0_7] : memref<1x2048x256xbf16, #tpu.memory_space<vmem>>, vector<1x2048x256xbf16>
    %7 = vector.shape_cast %6 : vector<1x2048x256xbf16> to vector<2048x256xbf16>
    %cst = arith.constant dense<0.000000e+00> : vector<8x256xf32>
    %8 = tpu.matmul %5, %7, %cst {dimension_numbers = #tpu.dot_dimension_numbers<[1], [0], [0], [1], [0, 0, 1, 1], [], []>} : vector<8x2048xbf16>, vector<2048x256xbf16>, vector<8x256xf32> -> vector<8x256xf32>
    %9 = arith.addf %3, %8 : vector<8x256xf32>
    %c0_8 = arith.constant 0 : index
    %c0_9 = arith.constant 0 : index
    %10 = vector.load %arg8[%c0_8, %c0_9] : memref<8x256xf32, #tpu.memory_space<vmem>>, vector<8x256xf32>
    tpu.vector_store %arg8[%c0_8, %c0_9], %9 {strides = array<i32>} : memref<8x256xf32, #tpu.memory_space<vmem>>, vector<8x256xf32>,
    %c0_i32_10 = arith.constant 0 : i32
    %11 = arith.cmpi eq, %arg3, %c0_i32_10 : i32
    %12 = arith.extui %11 : i1 to i32
    %c0_i32_11 = arith.constant 0 : i32
    %13 = arith.cmpi ne, %12, %c0_i32_11 : i32
    scf.if %13 {
      %c0_12 = arith.constant 0 : index
      %c0_13 = arith.constant 0 : index
      %14 = vector.load %arg8[%c0_12, %c0_13] : memref<8x256xf32, #tpu.memory_space<vmem>>, vector<8x256xf32>
      %c0_14 = arith.constant 0 : index
      %c0_15 = arith.constant 0 : index
      %15 = vector.load %arg6[%c0_14, %c0_15] : memref<1x256xf32, #tpu.memory_space<vmem>>, vector<1x256xf32>
      %16 = vector.broadcast %15 : vector<1x256xf32> to vector<8x256xf32>
      %17 = arith.addf %14, %16 : vector<8x256xf32>
      %cst_16 = arith.constant 0.000000e+00 : f32
      %18 = vector.broadcast %cst_16 : f32 to vector<8x256xf32>
      %19 = arith.cmpf oge, %17, %18 : vector<8x256xf32>
      %cst_17 = arith.constant 2.000000e-01 : f32
      %20 = vector.broadcast %cst_17 : f32 to vector<8x256xf32>
      %21 = arith.mulf %20, %17 : vector<8x256xf32>
      %22 = arith.select %19, %17, %21 : vector<8x256xi1>, vector<8x256xf32>
      %23 = arith.truncf %22 : vector<8x256xf32> to vector<8x256xbf16>
      %c0_18 = arith.constant 0 : index
      %c0_19 = arith.constant 0 : index
      %c0_20 = arith.constant 0 : index
      %24 = vector.load %arg7[%c0_18, %c0_19, %c0_20] : memref<1x8x256xbf16, #tpu.memory_space<vmem>>, vector<1x8x256xbf16>
      %25 = vector.shape_cast %24 : vector<1x8x256xbf16> to vector<8x256xbf16>
      %26 = vector.shape_cast %23 : vector<8x256xbf16> to vector<1x8x256xbf16>
      tpu.vector_store %arg7[%c0_18, %c0_19, %c0_20], %26 {strides = array<i32>} : memref<1x8x256xbf16, #tpu.memory_space<vmem>>, vector<1x8x256xbf16>,
    } else {
    }
    return
  }
  func.func @transform_0(%arg0: i32, %arg1: i32, %arg2: i32, %arg3: i32) -> (i32, i32, i32) {
    %c0_i32 = arith.constant 0 : i32
    return %arg0, %arg1, %arg3 : i32, i32, i32
  }
  func.func @transform_1(%arg0: i32, %arg1: i32, %arg2: i32, %arg3: i32) -> (i32, i32, i32) {
    %c0_i32 = arith.constant 0 : i32
    return %arg0, %arg3, %arg2 : i32, i32, i32
  }
  func.func @transform_2(%arg0: i32, %arg1: i32, %arg2: i32, %arg3: i32) -> (i32, i32) {
    %c0_i32 = arith.constant 0 : i32
    %c0_i32_0 = arith.constant 0 : i32
    return %c0_i32, %arg2 : i32, i32
  }
  func.func @transform_3(%arg0: i32, %arg1: i32, %arg2: i32, %arg3: i32) -> (i32, i32, i32) {
    %c0_i32 = arith.constant 0 : i32
    return %arg0, %arg1, %arg2 : i32, i32, i32
  }
}

module attributes {stable_mosaic.version = 11 : i64} {
  func.func @_bmm_bn_act_kernel(%arg0: i32, %arg1: i32, %arg2: i32, %arg3: i32, %arg4: memref<1x16x2048xbf16, #tpu.memory_space<vmem>>, %arg5: memref<1x2048x256xbf16, #tpu.memory_space<vmem>>, %arg6: memref<1x256xf32, #tpu.memory_space<vmem>>, %arg7: memref<1x16x256xbf16, #tpu.memory_space<vmem>>, %arg8: memref<16x256xf32, #tpu.memory_space<vmem>>) attributes {dimension_semantics = [#tpu.dimension_semantics<parallel>, #tpu.dimension_semantics<parallel>, #tpu.dimension_semantics<parallel>, #tpu.dimension_semantics<arbitrary>], iteration_bounds = array<i64: 8, 1, 1, 1>, scalar_prefetch = 0 : i64, scratch_operands = 1 : i64, tpu.core_type = #tpu.core_type<tc>, window_params = [{transform_indices = @transform_0, window_bounds = array<i64: 1, 16, 2048>}, {transform_indices = @transform_1, window_bounds = array<i64: 1, 2048, 256>}, {transform_indices = @transform_2, window_bounds = array<i64: 1, 256>}, {transform_indices = @transform_3, window_bounds = array<i64: 1, 16, 256>}]} {
    %c0_i32 = arith.constant 0 : i32
    %0 = arith.cmpi eq, %arg3, %c0_i32 : i32
    %1 = arith.extui %0 : i1 to i32
    %c0_i32_0 = arith.constant 0 : i32
    %2 = arith.cmpi ne, %1, %c0_i32_0 : i32
    scf.if %2 {
      %cst_12 = arith.constant 0.000000e+00 : f32
      %14 = vector.broadcast %cst_12 : f32 to vector<16x256xf32>
      %c0_13 = arith.constant 0 : index
      %c0_14 = arith.constant 0 : index
      %15 = vector.load %arg8[%c0_13, %c0_14] : memref<16x256xf32, #tpu.memory_space<vmem>>, vector<16x256xf32>
      tpu.vector_store %arg8[%c0_13, %c0_14], %14 {strides = array<i32>} : memref<16x256xf32, #tpu.memory_space<vmem>>, vector<16x256xf32>,
    } else {
    }
    %c0 = arith.constant 0 : index
    %c0_1 = arith.constant 0 : index
    %3 = vector.load %arg8[%c0, %c0_1] : memref<16x256xf32, #tpu.memory_space<vmem>>, vector<16x256xf32>
    %c0_2 = arith.constant 0 : index
    %c0_3 = arith.constant 0 : index
    %c0_4 = arith.constant 0 : index
    %4 = vector.load %arg4[%c0_2, %c0_3, %c0_4] : memref<1x16x2048xbf16, #tpu.memory_space<vmem>>, vector<1x16x2048xbf16>
    %5 = vector.shape_cast %4 : vector<1x16x2048xbf16> to vector<16x2048xbf16>
    %c0_5 = arith.constant 0 : index
    %c0_6 = arith.constant 0 : index
    %c0_7 = arith.constant 0 : index
    %6 = vector.load %arg5[%c0_5, %c0_6, %c0_7] : memref<1x2048x256xbf16, #tpu.memory_space<vmem>>, vector<1x2048x256xbf16>
    %7 = vector.shape_cast %6 : vector<1x2048x256xbf16> to vector<2048x256xbf16>
    %cst = arith.constant dense<0.000000e+00> : vector<16x256xf32>
    %8 = tpu.matmul %5, %7, %cst {dimension_numbers = #tpu.dot_dimension_numbers<[1], [0], [0], [1], [0, 0, 1, 1], [], []>} : vector<16x2048xbf16>, vector<2048x256xbf16>, vector<16x256xf32> -> vector<16x256xf32>
    %9 = arith.addf %3, %8 : vector<16x256xf32>
    %c0_8 = arith.constant 0 : index
    %c0_9 = arith.constant 0 : index
    %10 = vector.load %arg8[%c0_8, %c0_9] : memref<16x256xf32, #tpu.memory_space<vmem>>, vector<16x256xf32>
    tpu.vector_store %arg8[%c0_8, %c0_9], %9 {strides = array<i32>} : memref<16x256xf32, #tpu.memory_space<vmem>>, vector<16x256xf32>,
    %c0_i32_10 = arith.constant 0 : i32
    %11 = arith.cmpi eq, %arg3, %c0_i32_10 : i32
    %12 = arith.extui %11 : i1 to i32
    %c0_i32_11 = arith.constant 0 : i32
    %13 = arith.cmpi ne, %12, %c0_i32_11 : i32
    scf.if %13 {
      %c0_12 = arith.constant 0 : index
      %c0_13 = arith.constant 0 : index
      %14 = vector.load %arg8[%c0_12, %c0_13] : memref<16x256xf32, #tpu.memory_space<vmem>>, vector<16x256xf32>
      %c0_14 = arith.constant 0 : index
      %c0_15 = arith.constant 0 : index
      %15 = vector.load %arg6[%c0_14, %c0_15] : memref<1x256xf32, #tpu.memory_space<vmem>>, vector<1x256xf32>
      %16 = vector.broadcast %15 : vector<1x256xf32> to vector<16x256xf32>
      %17 = arith.addf %14, %16 : vector<16x256xf32>
      %cst_16 = arith.constant 0.000000e+00 : f32
      %18 = vector.broadcast %cst_16 : f32 to vector<16x256xf32>
      %19 = arith.cmpf oge, %17, %18 : vector<16x256xf32>
      %cst_17 = arith.constant 2.000000e-01 : f32
      %20 = vector.broadcast %cst_17 : f32 to vector<16x256xf32>
      %21 = arith.mulf %20, %17 : vector<16x256xf32>
      %22 = arith.select %19, %17, %21 : vector<16x256xi1>, vector<16x256xf32>
      %23 = arith.truncf %22 : vector<16x256xf32> to vector<16x256xbf16>
      %c0_18 = arith.constant 0 : index
      %c0_19 = arith.constant 0 : index
      %c0_20 = arith.constant 0 : index
      %24 = vector.load %arg7[%c0_18, %c0_19, %c0_20] : memref<1x16x256xbf16, #tpu.memory_space<vmem>>, vector<1x16x256xbf16>
      %25 = vector.shape_cast %24 : vector<1x16x256xbf16> to vector<16x256xbf16>
      %26 = vector.shape_cast %23 : vector<16x256xbf16> to vector<1x16x256xbf16>
      tpu.vector_store %arg7[%c0_18, %c0_19, %c0_20], %26 {strides = array<i32>} : memref<1x16x256xbf16, #tpu.memory_space<vmem>>, vector<1x16x256xbf16>,
    } else {
    }
    return
  }
  func.func @transform_0(%arg0: i32, %arg1: i32, %arg2: i32, %arg3: i32) -> (i32, i32, i32) {
    %c0_i32 = arith.constant 0 : i32
    return %arg0, %arg1, %arg3 : i32, i32, i32
  }
  func.func @transform_1(%arg0: i32, %arg1: i32, %arg2: i32, %arg3: i32) -> (i32, i32, i32) {
    %c0_i32 = arith.constant 0 : i32
    return %arg0, %arg3, %arg2 : i32, i32, i32
  }
  func.func @transform_2(%arg0: i32, %arg1: i32, %arg2: i32, %arg3: i32) -> (i32, i32) {
    %c0_i32 = arith.constant 0 : i32
    %c0_i32_0 = arith.constant 0 : i32
    return %c0_i32, %arg2 : i32, i32
  }
  func.func @transform_3(%arg0: i32, %arg1: i32, %arg2: i32, %arg3: i32) -> (i32, i32, i32) {
    %c0_i32 = arith.constant 0 : i32
    return %arg0, %arg1, %arg2 : i32, i32, i32
  }
}

module attributes {stable_mosaic.version = 11 : i64} {
  func.func @_bmm_bn_act_kernel(%arg0: i32, %arg1: i32, %arg2: i32, %arg3: i32, %arg4: memref<1x128x2048xbf16, #tpu.memory_space<vmem>>, %arg5: memref<1x2048x128xbf16, #tpu.memory_space<vmem>>, %arg6: memref<1x128xf32, #tpu.memory_space<vmem>>, %arg7: memref<1x128x128xbf16, #tpu.memory_space<vmem>>, %arg8: memref<128x128xf32, #tpu.memory_space<vmem>>) attributes {dimension_semantics = [#tpu.dimension_semantics<parallel>, #tpu.dimension_semantics<parallel>, #tpu.dimension_semantics<parallel>, #tpu.dimension_semantics<arbitrary>], iteration_bounds = array<i64: 8, 1, 1, 1>, scalar_prefetch = 0 : i64, scratch_operands = 1 : i64, tpu.core_type = #tpu.core_type<tc>, window_params = [{transform_indices = @transform_0, window_bounds = array<i64: 1, 128, 2048>}, {transform_indices = @transform_1, window_bounds = array<i64: 1, 2048, 128>}, {transform_indices = @transform_2, window_bounds = array<i64: 1, 128>}, {transform_indices = @transform_3, window_bounds = array<i64: 1, 128, 128>}]} {
    %c0_i32 = arith.constant 0 : i32
    %0 = arith.cmpi eq, %arg3, %c0_i32 : i32
    %1 = arith.extui %0 : i1 to i32
    %c0_i32_0 = arith.constant 0 : i32
    %2 = arith.cmpi ne, %1, %c0_i32_0 : i32
    scf.if %2 {
      %cst_12 = arith.constant 0.000000e+00 : f32
      %14 = vector.broadcast %cst_12 : f32 to vector<128x128xf32>
      %c0_13 = arith.constant 0 : index
      %c0_14 = arith.constant 0 : index
      %15 = vector.load %arg8[%c0_13, %c0_14] : memref<128x128xf32, #tpu.memory_space<vmem>>, vector<128x128xf32>
      tpu.vector_store %arg8[%c0_13, %c0_14], %14 {strides = array<i32>} : memref<128x128xf32, #tpu.memory_space<vmem>>, vector<128x128xf32>,
    } else {
    }
    %c0 = arith.constant 0 : index
    %c0_1 = arith.constant 0 : index
    %3 = vector.load %arg8[%c0, %c0_1] : memref<128x128xf32, #tpu.memory_space<vmem>>, vector<128x128xf32>
    %c0_2 = arith.constant 0 : index
    %c0_3 = arith.constant 0 : index
    %c0_4 = arith.constant 0 : index
    %4 = vector.load %arg4[%c0_2, %c0_3, %c0_4] : memref<1x128x2048xbf16, #tpu.memory_space<vmem>>, vector<1x128x2048xbf16>
    %5 = vector.shape_cast %4 : vector<1x128x2048xbf16> to vector<128x2048xbf16>
    %c0_5 = arith.constant 0 : index
    %c0_6 = arith.constant 0 : index
    %c0_7 = arith.constant 0 : index
    %6 = vector.load %arg5[%c0_5, %c0_6, %c0_7] : memref<1x2048x128xbf16, #tpu.memory_space<vmem>>, vector<1x2048x128xbf16>
    %7 = vector.shape_cast %6 : vector<1x2048x128xbf16> to vector<2048x128xbf16>
    %cst = arith.constant dense<0.000000e+00> : vector<128x128xf32>
    %8 = tpu.matmul %5, %7, %cst {dimension_numbers = #tpu.dot_dimension_numbers<[1], [0], [0], [1], [0, 0, 1, 1], [], []>} : vector<128x2048xbf16>, vector<2048x128xbf16>, vector<128x128xf32> -> vector<128x128xf32>
    %9 = arith.addf %3, %8 : vector<128x128xf32>
    %c0_8 = arith.constant 0 : index
    %c0_9 = arith.constant 0 : index
    %10 = vector.load %arg8[%c0_8, %c0_9] : memref<128x128xf32, #tpu.memory_space<vmem>>, vector<128x128xf32>
    tpu.vector_store %arg8[%c0_8, %c0_9], %9 {strides = array<i32>} : memref<128x128xf32, #tpu.memory_space<vmem>>, vector<128x128xf32>,
    %c0_i32_10 = arith.constant 0 : i32
    %11 = arith.cmpi eq, %arg3, %c0_i32_10 : i32
    %12 = arith.extui %11 : i1 to i32
    %c0_i32_11 = arith.constant 0 : i32
    %13 = arith.cmpi ne, %12, %c0_i32_11 : i32
    scf.if %13 {
      %c0_12 = arith.constant 0 : index
      %c0_13 = arith.constant 0 : index
      %14 = vector.load %arg8[%c0_12, %c0_13] : memref<128x128xf32, #tpu.memory_space<vmem>>, vector<128x128xf32>
      %c0_14 = arith.constant 0 : index
      %c0_15 = arith.constant 0 : index
      %15 = vector.load %arg6[%c0_14, %c0_15] : memref<1x128xf32, #tpu.memory_space<vmem>>, vector<1x128xf32>
      %16 = vector.broadcast %15 : vector<1x128xf32> to vector<128x128xf32>
      %17 = arith.addf %14, %16 : vector<128x128xf32>
      %cst_16 = arith.constant 0.000000e+00 : f32
      %18 = vector.broadcast %cst_16 : f32 to vector<128x128xf32>
      %19 = arith.cmpf oge, %17, %18 : vector<128x128xf32>
      %cst_17 = arith.constant 2.000000e-01 : f32
      %20 = vector.broadcast %cst_17 : f32 to vector<128x128xf32>
      %21 = arith.mulf %20, %17 : vector<128x128xf32>
      %22 = arith.select %19, %17, %21 : vector<128x128xi1>, vector<128x128xf32>
      %23 = arith.truncf %22 : vector<128x128xf32> to vector<128x128xbf16>
      %c0_18 = arith.constant 0 : index
      %c0_19 = arith.constant 0 : index
      %c0_20 = arith.constant 0 : index
      %24 = vector.load %arg7[%c0_18, %c0_19, %c0_20] : memref<1x128x128xbf16, #tpu.memory_space<vmem>>, vector<1x128x128xbf16>
      %25 = vector.shape_cast %24 : vector<1x128x128xbf16> to vector<128x128xbf16>
      %26 = vector.shape_cast %23 : vector<128x128xbf16> to vector<1x128x128xbf16>
      tpu.vector_store %arg7[%c0_18, %c0_19, %c0_20], %26 {strides = array<i32>} : memref<1x128x128xbf16, #tpu.memory_space<vmem>>, vector<1x128x128xbf16>,
    } else {
    }
    return
  }
  func.func @transform_0(%arg0: i32, %arg1: i32, %arg2: i32, %arg3: i32) -> (i32, i32, i32) {
    %c0_i32 = arith.constant 0 : i32
    return %arg0, %arg1, %arg3 : i32, i32, i32
  }
  func.func @transform_1(%arg0: i32, %arg1: i32, %arg2: i32, %arg3: i32) -> (i32, i32, i32) {
    %c0_i32 = arith.constant 0 : i32
    return %arg0, %arg3, %arg2 : i32, i32, i32
  }
  func.func @transform_2(%arg0: i32, %arg1: i32, %arg2: i32, %arg3: i32) -> (i32, i32) {
    %c0_i32 = arith.constant 0 : i32
    %c0_i32_0 = arith.constant 0 : i32
    return %c0_i32, %arg2 : i32, i32
  }
  func.func @transform_3(%arg0: i32, %arg1: i32, %arg2: i32, %arg3: i32) -> (i32, i32, i32) {
    %c0_i32 = arith.constant 0 : i32
    return %arg0, %arg1, %arg2 : i32, i32, i32
  }
}

module attributes {stable_mosaic.version = 11 : i64} {
  func.func @_bmm_bn_act_kernel(%arg0: i32, %arg1: i32, %arg2: i32, %arg3: i32, %arg4: memref<1x512x1024xbf16, #tpu.memory_space<vmem>>, %arg5: memref<1x1024x128xbf16, #tpu.memory_space<vmem>>, %arg6: memref<1x128xf32, #tpu.memory_space<vmem>>, %arg7: memref<1x512x128xbf16, #tpu.memory_space<vmem>>, %arg8: memref<512x128xf32, #tpu.memory_space<vmem>>) attributes {dimension_semantics = [#tpu.dimension_semantics<parallel>, #tpu.dimension_semantics<parallel>, #tpu.dimension_semantics<parallel>, #tpu.dimension_semantics<arbitrary>], iteration_bounds = array<i64: 8, 2, 1, 1>, scalar_prefetch = 0 : i64, scratch_operands = 1 : i64, tpu.core_type = #tpu.core_type<tc>, window_params = [{transform_indices = @transform_0, window_bounds = array<i64: 1, 512, 1024>}, {transform_indices = @transform_1, window_bounds = array<i64: 1, 1024, 128>}, {transform_indices = @transform_2, window_bounds = array<i64: 1, 128>}, {transform_indices = @transform_3, window_bounds = array<i64: 1, 512, 128>}]} {
    %c0_i32 = arith.constant 0 : i32
    %0 = arith.cmpi eq, %arg3, %c0_i32 : i32
    %1 = arith.extui %0 : i1 to i32
    %c0_i32_0 = arith.constant 0 : i32
    %2 = arith.cmpi ne, %1, %c0_i32_0 : i32
    scf.if %2 {
      %cst_12 = arith.constant 0.000000e+00 : f32
      %14 = vector.broadcast %cst_12 : f32 to vector<512x128xf32>
      %c0_13 = arith.constant 0 : index
      %c0_14 = arith.constant 0 : index
      %15 = vector.load %arg8[%c0_13, %c0_14] : memref<512x128xf32, #tpu.memory_space<vmem>>, vector<512x128xf32>
      tpu.vector_store %arg8[%c0_13, %c0_14], %14 {strides = array<i32>} : memref<512x128xf32, #tpu.memory_space<vmem>>, vector<512x128xf32>,
    } else {
    }
    %c0 = arith.constant 0 : index
    %c0_1 = arith.constant 0 : index
    %3 = vector.load %arg8[%c0, %c0_1] : memref<512x128xf32, #tpu.memory_space<vmem>>, vector<512x128xf32>
    %c0_2 = arith.constant 0 : index
    %c0_3 = arith.constant 0 : index
    %c0_4 = arith.constant 0 : index
    %4 = vector.load %arg4[%c0_2, %c0_3, %c0_4] : memref<1x512x1024xbf16, #tpu.memory_space<vmem>>, vector<1x512x1024xbf16>
    %5 = vector.shape_cast %4 : vector<1x512x1024xbf16> to vector<512x1024xbf16>
    %c0_5 = arith.constant 0 : index
    %c0_6 = arith.constant 0 : index
    %c0_7 = arith.constant 0 : index
    %6 = vector.load %arg5[%c0_5, %c0_6, %c0_7] : memref<1x1024x128xbf16, #tpu.memory_space<vmem>>, vector<1x1024x128xbf16>
    %7 = vector.shape_cast %6 : vector<1x1024x128xbf16> to vector<1024x128xbf16>
    %cst = arith.constant dense<0.000000e+00> : vector<512x128xf32>
    %8 = tpu.matmul %5, %7, %cst {dimension_numbers = #tpu.dot_dimension_numbers<[1], [0], [0], [1], [0, 0, 1, 1], [], []>} : vector<512x1024xbf16>, vector<1024x128xbf16>, vector<512x128xf32> -> vector<512x128xf32>
    %9 = arith.addf %3, %8 : vector<512x128xf32>
    %c0_8 = arith.constant 0 : index
    %c0_9 = arith.constant 0 : index
    %10 = vector.load %arg8[%c0_8, %c0_9] : memref<512x128xf32, #tpu.memory_space<vmem>>, vector<512x128xf32>
    tpu.vector_store %arg8[%c0_8, %c0_9], %9 {strides = array<i32>} : memref<512x128xf32, #tpu.memory_space<vmem>>, vector<512x128xf32>,
    %c0_i32_10 = arith.constant 0 : i32
    %11 = arith.cmpi eq, %arg3, %c0_i32_10 : i32
    %12 = arith.extui %11 : i1 to i32
    %c0_i32_11 = arith.constant 0 : i32
    %13 = arith.cmpi ne, %12, %c0_i32_11 : i32
    scf.if %13 {
      %c0_12 = arith.constant 0 : index
      %c0_13 = arith.constant 0 : index
      %14 = vector.load %arg8[%c0_12, %c0_13] : memref<512x128xf32, #tpu.memory_space<vmem>>, vector<512x128xf32>
      %c0_14 = arith.constant 0 : index
      %c0_15 = arith.constant 0 : index
      %15 = vector.load %arg6[%c0_14, %c0_15] : memref<1x128xf32, #tpu.memory_space<vmem>>, vector<1x128xf32>
      %16 = vector.broadcast %15 : vector<1x128xf32> to vector<512x128xf32>
      %17 = arith.addf %14, %16 : vector<512x128xf32>
      %18 = arith.truncf %17 : vector<512x128xf32> to vector<512x128xbf16>
      %c0_16 = arith.constant 0 : index
      %c0_17 = arith.constant 0 : index
      %c0_18 = arith.constant 0 : index
      %19 = vector.load %arg7[%c0_16, %c0_17, %c0_18] : memref<1x512x128xbf16, #tpu.memory_space<vmem>>, vector<1x512x128xbf16>
      %20 = vector.shape_cast %19 : vector<1x512x128xbf16> to vector<512x128xbf16>
      %21 = vector.shape_cast %18 : vector<512x128xbf16> to vector<1x512x128xbf16>
      tpu.vector_store %arg7[%c0_16, %c0_17, %c0_18], %21 {strides = array<i32>} : memref<1x512x128xbf16, #tpu.memory_space<vmem>>, vector<1x512x128xbf16>,
    } else {
    }
    return
  }
  func.func @transform_0(%arg0: i32, %arg1: i32, %arg2: i32, %arg3: i32) -> (i32, i32, i32) {
    %c0_i32 = arith.constant 0 : i32
    return %arg0, %arg1, %arg3 : i32, i32, i32
  }
  func.func @transform_1(%arg0: i32, %arg1: i32, %arg2: i32, %arg3: i32) -> (i32, i32, i32) {
    %c0_i32 = arith.constant 0 : i32
    return %arg0, %arg3, %arg2 : i32, i32, i32
  }
  func.func @transform_2(%arg0: i32, %arg1: i32, %arg2: i32, %arg3: i32) -> (i32, i32) {
    %c0_i32 = arith.constant 0 : i32
    %c0_i32_0 = arith.constant 0 : i32
    return %c0_i32, %arg2 : i32, i32
  }
  func.func @transform_3(%arg0: i32, %arg1: i32, %arg2: i32, %arg3: i32) -> (i32, i32, i32) {
    %c0_i32 = arith.constant 0 : i32
    return %arg0, %arg1, %arg2 : i32, i32, i32
  }
}

</mosaic_0001>

<bundles_post_ra>
// kernel: autoencoder_cov3d_mem_forward.9
= control target key start
LH: loop header
LB: loop body
LE: loop exit
PB: predicated region body
PF: predicated region fallthrough
CT: control target
= control target key end

     0   :  { %s2455_s12 = smov 0   ;;  %s2457_s13 = smov 0   ;;  %s2656_s0 = inlined_call_operand.vmem [shape: bf16[1,1024,128], index: 0, kind: input, shape index: {}]   ;;  %s2657_s1 = inlined_call_operand.vmem [shape: bf16[1,128,128], index: 1, kind: input, shape index: {}]   ;;  %s2658_s2 = inlined_call_operand.vmem [shape: f32[1,128], index: 2, kind: input, shape index: {}]   ;;  %s2659_s3 = inlined_call_operand.vmem [shape: bf16[1,1024,128], index: 3, kind: output, shape index: {}]  }
   0x1   :  { %s2459_s14 = smov 0  }
   0x2 LB: > { %s35_s15 = sadd.s32 1, %s2429_s13  ;;  %p1844_p0 = scmp.ge.s32.totalorder %s2433_s14, 1  ;;  %s2433_s14 = sphi %s2459_s14, %s13_s14   ;;  %s2429_s13 = sphi %s2457_s13, %s2661_s13   ;;  %s2425_s12 = sphi %s2455_s12, %s2660_s12  }
   0x3   : > { %p37_p1 = scmp.ge.s32.totalorder %s35_s15, 2  ;;  %p209_p2 = scmp.lt.s32.totalorder %s2433_s14, 3 }
   0x5   : > { %s2663_s15 = smov (%p37_p1, %s35_s15), 0  ;;  %p210_p3 = pnand %p1844_p0, %p209_p2 }
   0x6   : > { %v2371_v0 = vld [vmem:[%s2657_s1] sm:$0xff] (!%p210_p3)   ;;  %s1845_s18 = sshll.u32 (!%p210_p3), %s2425_s12, 6  ;;  %v2372_v1 = vld [vmem:[%s2657_s1 + $0x8] sm:$0xff] (!%p210_p3)   ;;  %v2373_v2 = vld [vmem:[%s2657_s1 + $0x10] sm:$0xff] (!%p210_p3)  }
   0x7   : > { %213 = sbr.rel (%p210_p3) target bundleno = 317 (0x13d), region = 32  ;;  %p265_p4 = scmp.lt.s32.totalorder (!%p210_p3), %s1845_s18, 127  ;;  %2251 = vmatprep.subr.bf16.mxu0 (!%p210_p3), %v2371_v0  ;;  %2331 = vmatprep.subr.bf16.mxu1 (!%p210_p3), %v2371_v0  ;;  %v2374_v3 = vld [vmem:[%s2657_s1 + $0x18] sm:$0xff] (!%p210_p3)   ;;  %v2375_v6 = vld [vmem:[%s2657_s1 + $0x20] sm:$0xff] (!%p210_p3)   ;;  %v2376_v7 = vld [vmem:[%s2657_s1 + $0x28] sm:$0xff] (!%p210_p3)  }
   0x8   : > { %2252 = vmatpush3.bf16.msra.mxu0 (!%p210_p3), %v2371_v0  ;;  %2339 = vmatpush3.bf16.msra.mxu1 (!%p210_p3), %v2371_v0  ;;  %v2377_v8 = vld [vmem:[%s2657_s1 + $0x30] sm:$0xff] (!%p210_p3)   ;;  %v2378_v9 = vld [vmem:[%s2657_s1 + $0x38] sm:$0xff] (!%p210_p3)   ;;  %v2542_v40 = vld [vmem:[%s2658_s2] ss:$0 sm:$0xff] (!%p210_p3) }
   0x9   : > { %2253 = vmatprep.subr.bf16.mxu0 (!%p210_p3), %v2372_v1  ;;  %2332 = vmatprep.subr.bf16.mxu1 (!%p210_p3), %v2372_v1 }
   0xc   : > { %2254 = vmatpush3.bf16.msra.mxu0 (!%p210_p3), %v2372_v1  ;;  %2340 = vmatpush3.bf16.msra.mxu1 (!%p210_p3), %v2372_v1 }
   0xd   : > { %2255 = vmatprep.subr.bf16.mxu0 (!%p210_p3), %v2373_v2  ;;  %2333 = vmatprep.subr.bf16.mxu1 (!%p210_p3), %v2373_v2 }
   0xe   : > { %s2665_s18 = smov (!%p265_p4, %s1845_s18), 127 }
   0xf   : > { %s1846_s23 = sshll.u32 %s2665_s18, 2 }
  0x10   : > { %s2490_s26 = scalar_lea.vmem %s2656_s0, %s1846_s23  ;;  %2256 = vmatpush3.bf16.msra.mxu0 %v2373_v2  ;;  %2341 = vmatpush3.bf16.msra.mxu1 %v2373_v2  ;;  %s2557_s17 = scalar_lea.vmem %s2659_s3, %s1846_s23 }
  0x11   : > { %v2379_v4 = vld [vmem:[%s2490_s26] sm:$0xff]   ;;  %2257 = vmatprep.subr.bf16.mxu0 %v2374_v3  ;;  %2334 = vmatprep.subr.bf16.mxu1 %v2374_v3  ;;  %v2381_v10 = vld [vmem:[%s2490_s26 + $0x8] sm:$0xff]   ;;  %v2383_v12 = vld [vmem:[%s2490_s26 + $0x10] sm:$0xff]  }
  0x12   : > { %v2380_v5 = vld [vmem:[%s2490_s26 + $0x80] sm:$0xff]   ;;  %2267 = vmatprep.mubr.bf16.mxu0 %v2379_v4  ;;  %v2382_v11 = vld [vmem:[%s2490_s26 + $0x88] sm:$0xff]   ;;  %v2384_v13 = vld [vmem:[%s2490_s26 + $0x90] sm:$0xff]  }
  0x13   : > { %2299 = vmatprep.mubr.bf16.mxu1 %v2380_v5  ;;  %v2385_v14 = vld [vmem:[%s2490_s26 + $0x18] sm:$0xff]   ;;  %v2387_v16 = vld [vmem:[%s2490_s26 + $0x20] sm:$0xff]   ;;  %v2389_v18 = vld [vmem:[%s2490_s26 + $0x28] sm:$0xff]  }
  0x14   : > { %2258 = vmatpush3.bf16.msra.mxu0 %v2374_v3  ;;  %2342 = vmatpush3.bf16.msra.mxu1 %v2374_v3  ;;  %v2386_v15 = vld [vmem:[%s2490_s26 + $0x98] sm:$0xff]   ;;  %v2388_v17 = vld [vmem:[%s2490_s26 + $0xa0] sm:$0xff]   ;;  %v2390_v19 = vld [vmem:[%s2490_s26 + $0xa8] sm:$0xff]  }
  0x15   : > { %2259 = vmatprep.subr.bf16.mxu0 %v2375_v6  ;;  %2335 = vmatprep.subr.bf16.mxu1 %v2375_v6  ;;  %v2391_v20 = vld [vmem:[%s2490_s26 + $0x30] sm:$0xff]   ;;  %v2393_v22 = vld [vmem:[%s2490_s26 + $0x38] sm:$0xff]   ;;  %v2395_v24 = vld [vmem:[%s2490_s26 + $0x40] sm:$0xff]  }
  0x16   : > { %v2392_v21 = vld [vmem:[%s2490_s26 + $0xb0] sm:$0xff]   ;;  %v2394_v23 = vld [vmem:[%s2490_s26 + $0xb8] sm:$0xff]   ;;  %v2396_v25 = vld [vmem:[%s2490_s26 + $0xc0] sm:$0xff]  }
  0x17   : > { %v2397_v26 = vld [vmem:[%s2490_s26 + $0x48] sm:$0xff]   ;;  %v2399_v28 = vld [vmem:[%s2490_s26 + $0x50] sm:$0xff]   ;;  %v2401_v30 = vld [vmem:[%s2490_s26 + $0x58] sm:$0xff]  }
  0x18   : > { %2260 = vmatpush3.bf16.msra.mxu0 %v2375_v6  ;;  %2343 = vmatpush3.bf16.msra.mxu1 %v2375_v6  ;;  %v2398_v27 = vld [vmem:[%s2490_s26 + $0xc8] sm:$0xff]   ;;  %v2400_v29 = vld [vmem:[%s2490_s26 + $0xd0] sm:$0xff]   ;;  %v2402_v31 = vld [vmem:[%s2490_s26 + $0xd8] sm:$0xff]  }
  0x19   : > { %2261 = vmatprep.subr.bf16.mxu0 %v2376_v7  ;;  %2336 = vmatprep.subr.bf16.mxu1 %v2376_v7  ;;  %v2403_v32 = vld [vmem:[%s2490_s26 + $0x60] sm:$0xff]   ;;  %v2405_v34 = vld [vmem:[%s2490_s26 + $0x68] sm:$0xff]   ;;  %v2407_v36 = vld [vmem:[%s2490_s26 + $0x70] sm:$0xff]  }
  0x1a   : > { %v2404_v33 = vld [vmem:[%s2490_s26 + $0xe0] sm:$0xff]   ;;  %v2406_v35 = vld [vmem:[%s2490_s26 + $0xe8] sm:$0xff]   ;;  %v2408_v37 = vld [vmem:[%s2490_s26 + $0xf0] sm:$0xff]  }
  0x1b   : > { %v2409_v38 = vld [vmem:[%s2490_s26 + $0x78] sm:$0xff]  }
  0x1c   : > { %2262 = vmatpush3.bf16.msra.mxu0 %v2376_v7  ;;  %2344 = vmatpush3.bf16.msra.mxu1 %v2376_v7  ;;  %v2410_v39 = vld [vmem:[%s2490_s26 + $0xf8] sm:$0xff]  }
  0x1d   : > { %2263 = vmatprep.subr.bf16.mxu0 %v2377_v8  ;;  %2337 = vmatprep.subr.bf16.mxu1 %v2377_v8 }
  0x20   : > { %2264 = vmatpush3.bf16.msra.mxu0 %v2377_v8  ;;  %2345 = vmatpush3.bf16.msra.mxu1 %v2377_v8 }
  0x21   : > { %2265 = vmatprep.subr.bf16.mxu0 %v2378_v9  ;;  %2338 = vmatprep.subr.bf16.mxu1 %v2378_v9 }
  0x24   : > { %2266 = vmatpush3.bf16.msra.mxu0 %v2378_v9  ;;  %2346 = vmatpush3.bf16.msra.mxu1 %v2378_v9 }
  0x27   : > { %2268 = vmatmul.mubr.bf16.vlgmr.msra.gmra.mrb[0].mxu0 %v2381_v10  ;;  %2300 = vmatmul.mubr.bf16.vlgmr.msra.gmra.mrb[0].mxu1 %v2382_v11 }
  0x28   : > { %2271 = vmatprep.mubr.bf16.mxu0 %v2383_v12  ;;  %2303 = vmatprep.mubr.bf16.mxu1 %v2384_v13 }
  0x2f   : > { %2272 = vmatmul.mubr.bf16.gmra.mrb[4].mxu0 %v2385_v14  ;;  %2304 = vmatmul.mubr.bf16.gmra.mrb[4].mxu1 %v2386_v15 }
  0x30   : > { %2275 = vmatprep.mubr.bf16.mxu0 %v2387_v16  ;;  %2307 = vmatprep.mubr.bf16.mxu1 %v2388_v17 }
  0x37   : > { %2276 = vmatmul.mubr.bf16.gmra.mrb[8].mxu0 %v2389_v18  ;;  %2308 = vmatmul.mubr.bf16.gmra.mrb[8].mxu1 %v2390_v19 }
  0x38   : > { %2279 = vmatprep.mubr.bf16.mxu0 %v2391_v20  ;;  %2311 = vmatprep.mubr.bf16.mxu1 %v2392_v21 }
  0x3f   : > { %2280 = vmatmul.mubr.bf16.gmra.mrb[12].mxu0 %v2393_v22  ;;  %2312 = vmatmul.mubr.bf16.gmra.mrb[12].mxu1 %v2394_v23 }
  0x40   : > { %2283 = vmatprep.mubr.bf16.mxu0 %v2395_v24  ;;  %2315 = vmatprep.mubr.bf16.mxu1 %v2396_v25 }
  0x47   : > { %2284 = vmatmul.mubr.bf16.gmra.mrb[16].mxu0 %v2397_v26  ;;  %2316 = vmatmul.mubr.bf16.gmra.mrb[16].mxu1 %v2398_v27 }
  0x48   : > { %2287 = vmatprep.mubr.bf16.mxu0 %v2399_v28  ;;  %2319 = vmatprep.mubr.bf16.mxu1 %v2400_v29 }
  0x4f   : > { %2288 = vmatmul.mubr.bf16.gmra.mrb[20].mxu0 %v2401_v30  ;;  %2320 = vmatmul.mubr.bf16.gmra.mrb[20].mxu1 %v2402_v31 }
  0x50   : > { %2291 = vmatprep.mubr.bf16.mxu0 %v2403_v32  ;;  %2323 = vmatprep.mubr.bf16.mxu1 %v2404_v33 }
  0x57   : > { %2292 = vmatmul.mubr.bf16.gmra.mrb[24].mxu0 %v2405_v34  ;;  %2324 = vmatmul.mubr.bf16.gmra.mrb[24].mxu1 %v2406_v35 }
  0x58   : > { %2295 = vmatprep.mubr.bf16.mxu0 %v2407_v36  ;;  %2327 = vmatprep.mubr.bf16.mxu1 %v2408_v37 }
  0x5f   : > { %2296 = vmatmul.mubr.bf16.gmra.mrb[28].mxu0 %v2409_v38  ;;  %2328 = vmatmul.mubr.bf16.gmra.mrb[28].mxu1 %v2410_v39 }
  0xfa   : > { %v2269_v41 = vpop.f32.mrb[0].mxu0  ;;  %v2301_v42 = vpop.f32.mrb[0].mxu1 }
  0xfb   : > { %v1250_v43 = vadd.f32 %v2269_v41, %v2542_v40  ;;  %v1282_v44 = vadd.f32 %v2301_v42, %v2542_v40  ;;  %v791_v45 = vpop.f32.mrb[1].mxu0  ;;  %v919_v46 = vpop.f32.mrb[1].mxu1 }
  0xfc   : > { %v1248_v47 = vadd.f32 %v2542_v40, %v791_v45  ;;  %v1280_v48 = vadd.f32 %v2542_v40, %v919_v46  ;;  %v2270_v49 = vpop.f32.mrb[2].mxu0  ;;  %v2302_v50 = vpop.f32.mrb[2].mxu1 }
  0xfd   : > { %v1251_v51 = vadd.f32 %v2270_v49, %v2542_v40  ;;  %v1283_v52 = vadd.f32 %v2302_v50, %v2542_v40  ;;  %v794_v53 = vpop.f32.mrb[3].mxu0  ;;  %v922_v54 = vpop.f32.mrb[3].mxu1  ;;  %v1314_v57 = vmax.f32 %v1250_v43, 0.0  ;;  %v1346_v58 = vmax.f32 %v1282_v44, 0.0 }
  0xfe   : > { %v1249_v55 = vadd.f32 %v2542_v40, %v794_v53  ;;  %v1281_v56 = vadd.f32 %v2542_v40, %v922_v54  ;;  %v1312_v61 = vmax.f32 %v1248_v47, 0.0  ;;  %v1344_v62 = vmax.f32 %v1280_v48, 0.0 }
  0xff   : > { %v1315_v59 = vmax.f32 %v1251_v51, 0.0  ;;  %v1347_v60 = vmax.f32 %v1283_v52, 0.0 }
 0x100   : > { %v1313_v63 = vmax.f32 %v1249_v55, 0.0  ;;  %v1345_v0 = vmax.f32 %v1281_v56, 0.0 }
 0x101   : > { %v2028_v1 = vpack.c.bf16 %v1315_v59, %v1314_v57  ;;  %v2108_v2 = vpack.c.bf16 %v1347_v60, %v1346_v58 }
 0x102   : > { %v2023_v3 = vpack.c.bf16 %v1313_v63, %v1312_v61  ;;  %v2103_v4 = vpack.c.bf16 %v1345_v0, %v1344_v62  ;;  %v2273_v5 = vpop.f32.mrb[4].mxu0  ;;  %v2305_v6 = vpop.f32.mrb[4].mxu1 }
 0x103   : > { %2180 = vst [vmem:[%s2557_s17 + $0x8] sm:$0xff] %v2028_v1   ;;  %2196 = vst [vmem:[%s2557_s17 + $0x88] sm:$0xff] %v2108_v2   ;;  %v1254_v7 = vadd.f32 %v2273_v5, %v2542_v40  ;;  %v1286_v8 = vadd.f32 %v2305_v6, %v2542_v40  ;;  %v807_v9 = vpop.f32.mrb[5].mxu0  ;;  %v935_v10 = vpop.f32.mrb[5].mxu1 }
 0x104   : > { %2024 = vst [vmem:[%s2557_s17] sm:$0xff] %v2023_v3   ;;  %2195 = vst [vmem:[%s2557_s17 + $0x80] sm:$0xff] %v2103_v4   ;;  %v1252_v11 = vadd.f32 %v2542_v40, %v807_v9  ;;  %v1284_v12 = vadd.f32 %v2542_v40, %v935_v10  ;;  %v2274_v13 = vpop.f32.mrb[6].mxu0  ;;  %v2306_v14 = vpop.f32.mrb[6].mxu1 }
 0x105   : > { %v1255_v15 = vadd.f32 %v2274_v13, %v2542_v40  ;;  %v1287_v16 = vadd.f32 %v2306_v14, %v2542_v40  ;;  %v810_v17 = vpop.f32.mrb[7].mxu0  ;;  %v938_v18 = vpop.f32.mrb[7].mxu1  ;;  %v1318_v21 = vmax.f32 %v1254_v7, 0.0  ;;  %v1350_v22 = vmax.f32 %v1286_v8, 0.0 }
 0x106   : > { %v1253_v19 = vadd.f32 %v2542_v40, %v810_v17  ;;  %v1285_v20 = vadd.f32 %v2542_v40, %v938_v18  ;;  %v1316_v25 = vmax.f32 %v1252_v11, 0.0  ;;  %v1348_v26 = vmax.f32 %v1284_v12, 0.0 }
 0x107   : > { %v1319_v23 = vmax.f32 %v1255_v15, 0.0  ;;  %v1351_v24 = vmax.f32 %v1287_v16, 0.0 }
 0x108   : > { %v1317_v27 = vmax.f32 %v1253_v19, 0.0  ;;  %v1349_v28 = vmax.f32 %v1285_v20, 0.0 }
 0x109   : > { %v2038_v29 = vpack.c.bf16 %v1319_v23, %v1318_v21  ;;  %v2118_v30 = vpack.c.bf16 %v1351_v24, %v1350_v22 }
 0x10a   : > { %v2033_v31 = vpack.c.bf16 %v1317_v27, %v1316_v25  ;;  %v2113_v32 = vpack.c.bf16 %v1349_v28, %v1348_v26  ;;  %v2277_v33 = vpop.f32.mrb[8].mxu0  ;;  %v2309_v34 = vpop.f32.mrb[8].mxu1 }
 0x10b   : > { %2182 = vst [vmem:[%s2557_s17 + $0x18] sm:$0xff] %v2038_v29   ;;  %2198 = vst [vmem:[%s2557_s17 + $0x98] sm:$0xff] %v2118_v30   ;;  %v1258_v35 = vadd.f32 %v2277_v33, %v2542_v40  ;;  %v1290_v36 = vadd.f32 %v2309_v34, %v2542_v40  ;;  %v823_v37 = vpop.f32.mrb[9].mxu0  ;;  %v951_v38 = vpop.f32.mrb[9].mxu1 }
 0x10c   : > { %2181 = vst [vmem:[%s2557_s17 + $0x10] sm:$0xff] %v2033_v31   ;;  %2197 = vst [vmem:[%s2557_s17 + $0x90] sm:$0xff] %v2113_v32   ;;  %v1256_v39 = vadd.f32 %v2542_v40, %v823_v37  ;;  %v1288_v41 = vadd.f32 %v2542_v40, %v951_v38  ;;  %v2278_v42 = vpop.f32.mrb[10].mxu0  ;;  %v2310_v43 = vpop.f32.mrb[10].mxu1 }
 0x10d   : > { %v1259_v44 = vadd.f32 %v2278_v42, %v2542_v40  ;;  %v1291_v45 = vadd.f32 %v2310_v43, %v2542_v40  ;;  %v826_v46 = vpop.f32.mrb[11].mxu0  ;;  %v954_v47 = vpop.f32.mrb[11].mxu1  ;;  %v1322_v50 = vmax.f32 %v1258_v35, 0.0  ;;  %v1354_v51 = vmax.f32 %v1290_v36, 0.0 }
 0x10e   : > { %v1257_v48 = vadd.f32 %v2542_v40, %v826_v46  ;;  %v1289_v49 = vadd.f32 %v2542_v40, %v954_v47  ;;  %v1320_v54 = vmax.f32 %v1256_v39, 0.0  ;;  %v1352_v55 = vmax.f32 %v1288_v41, 0.0 }
 0x10f   : > { %v1323_v52 = vmax.f32 %v1259_v44, 0.0  ;;  %v1355_v53 = vmax.f32 %v1291_v45, 0.0 }
 0x110   : > { %v1321_v56 = vmax.f32 %v1257_v48, 0.0  ;;  %v1353_v57 = vmax.f32 %v1289_v49, 0.0 }
 0x111   : > { %v2048_v58 = vpack.c.bf16 %v1323_v52, %v1322_v50  ;;  %v2128_v59 = vpack.c.bf16 %v1355_v53, %v1354_v51 }
 0x112   : > { %v2043_v60 = vpack.c.bf16 %v1321_v56, %v1320_v54  ;;  %v2123_v61 = vpack.c.bf16 %v1353_v57, %v1352_v55  ;;  %v2281_v62 = vpop.f32.mrb[12].mxu0  ;;  %v2313_v63 = vpop.f32.mrb[12].mxu1 }
 0x113   : > { %2184 = vst [vmem:[%s2557_s17 + $0x28] sm:$0xff] %v2048_v58   ;;  %2200 = vst [vmem:[%s2557_s17 + $0xa8] sm:$0xff] %v2128_v59   ;;  %v1262_v0 = vadd.f32 %v2281_v62, %v2542_v40  ;;  %v1294_v1 = vadd.f32 %v2313_v63, %v2542_v40  ;;  %v839_v2 = vpop.f32.mrb[13].mxu0  ;;  %v967_v3 = vpop.f32.mrb[13].mxu1 }
 0x114   : > { %2183 = vst [vmem:[%s2557_s17 + $0x20] sm:$0xff] %v2043_v60   ;;  %2199 = vst [vmem:[%s2557_s17 + $0xa0] sm:$0xff] %v2123_v61   ;;  %v1260_v4 = vadd.f32 %v2542_v40, %v839_v2  ;;  %v1292_v5 = vadd.f32 %v2542_v40, %v967_v3  ;;  %v2282_v6 = vpop.f32.mrb[14].mxu0  ;;  %v2314_v7 = vpop.f32.mrb[14].mxu1 }
 0x115   : > { %v1263_v8 = vadd.f32 %v2282_v6, %v2542_v40  ;;  %v1295_v9 = vadd.f32 %v2314_v7, %v2542_v40  ;;  %v842_v10 = vpop.f32.mrb[15].mxu0  ;;  %v970_v11 = vpop.f32.mrb[15].mxu1  ;;  %v1326_v14 = vmax.f32 %v1262_v0, 0.0  ;;  %v1358_v15 = vmax.f32 %v1294_v1, 0.0 }
 0x116   : > { %v1261_v12 = vadd.f32 %v2542_v40, %v842_v10  ;;  %v1293_v13 = vadd.f32 %v2542_v40, %v970_v11  ;;  %v1324_v18 = vmax.f32 %v1260_v4, 0.0  ;;  %v1356_v19 = vmax.f32 %v1292_v5, 0.0 }
 0x117   : > { %v1327_v16 = vmax.f32 %v1263_v8, 0.0  ;;  %v1359_v17 = vmax.f32 %v1295_v9, 0.0 }
 0x118   : > { %v1325_v20 = vmax.f32 %v1261_v12, 0.0  ;;  %v1357_v21 = vmax.f32 %v1293_v13, 0.0 }
 0x119   : > { %v2058_v22 = vpack.c.bf16 %v1327_v16, %v1326_v14  ;;  %v2138_v23 = vpack.c.bf16 %v1359_v17, %v1358_v15 }
 0x11a   : > { %v2053_v24 = vpack.c.bf16 %v1325_v20, %v1324_v18  ;;  %v2133_v25 = vpack.c.bf16 %v1357_v21, %v1356_v19  ;;  %v2285_v26 = vpop.f32.mrb[16].mxu0  ;;  %v2317_v27 = vpop.f32.mrb[16].mxu1 }
 0x11b   : > { %2186 = vst [vmem:[%s2557_s17 + $0x38] sm:$0xff] %v2058_v22   ;;  %2202 = vst [vmem:[%s2557_s17 + $0xb8] sm:$0xff] %v2138_v23   ;;  %v1266_v28 = vadd.f32 %v2285_v26, %v2542_v40  ;;  %v1298_v29 = vadd.f32 %v2317_v27, %v2542_v40  ;;  %v855_v30 = vpop.f32.mrb[17].mxu0  ;;  %v983_v31 = vpop.f32.mrb[17].mxu1 }
 0x11c   : > { %2185 = vst [vmem:[%s2557_s17 + $0x30] sm:$0xff] %v2053_v24   ;;  %2201 = vst [vmem:[%s2557_s17 + $0xb0] sm:$0xff] %v2133_v25   ;;  %v1264_v32 = vadd.f32 %v2542_v40, %v855_v30  ;;  %v1296_v33 = vadd.f32 %v2542_v40, %v983_v31  ;;  %v2286_v34 = vpop.f32.mrb[18].mxu0  ;;  %v2318_v35 = vpop.f32.mrb[18].mxu1 }
 0x11d   : > { %v1267_v36 = vadd.f32 %v2286_v34, %v2542_v40  ;;  %v1299_v37 = vadd.f32 %v2318_v35, %v2542_v40  ;;  %v858_v38 = vpop.f32.mrb[19].mxu0  ;;  %v986_v39 = vpop.f32.mrb[19].mxu1  ;;  %v1330_v43 = vmax.f32 %v1266_v28, 0.0  ;;  %v1362_v44 = vmax.f32 %v1298_v29, 0.0 }
 0x11e   : > { %v1265_v41 = vadd.f32 %v2542_v40, %v858_v38  ;;  %v1297_v42 = vadd.f32 %v2542_v40, %v986_v39  ;;  %v1328_v47 = vmax.f32 %v1264_v32, 0.0  ;;  %v1360_v48 = vmax.f32 %v1296_v33, 0.0 }
 0x11f   : > { %v1331_v45 = vmax.f32 %v1267_v36, 0.0  ;;  %v1363_v46 = vmax.f32 %v1299_v37, 0.0 }
 0x120   : > { %v1329_v49 = vmax.f32 %v1265_v41, 0.0  ;;  %v1361_v50 = vmax.f32 %v1297_v42, 0.0 }
 0x121   : > { %v2068_v51 = vpack.c.bf16 %v1331_v45, %v1330_v43  ;;  %v2148_v52 = vpack.c.bf16 %v1363_v46, %v1362_v44 }
 0x122   : > { %v2063_v53 = vpack.c.bf16 %v1329_v49, %v1328_v47  ;;  %v2143_v54 = vpack.c.bf16 %v1361_v50, %v1360_v48  ;;  %v2289_v55 = vpop.f32.mrb[20].mxu0  ;;  %v2321_v56 = vpop.f32.mrb[20].mxu1 }
 0x123   : > { %2188 = vst [vmem:[%s2557_s17 + $0x48] sm:$0xff] %v2068_v51   ;;  %2204 = vst [vmem:[%s2557_s17 + $0xc8] sm:$0xff] %v2148_v52   ;;  %v1270_v57 = vadd.f32 %v2289_v55, %v2542_v40  ;;  %v1302_v58 = vadd.f32 %v2321_v56, %v2542_v40  ;;  %v871_v59 = vpop.f32.mrb[21].mxu0  ;;  %v999_v60 = vpop.f32.mrb[21].mxu1 }
 0x124   : > { %2187 = vst [vmem:[%s2557_s17 + $0x40] sm:$0xff] %v2063_v53   ;;  %2203 = vst [vmem:[%s2557_s17 + $0xc0] sm:$0xff] %v2143_v54   ;;  %v1268_v61 = vadd.f32 %v2542_v40, %v871_v59  ;;  %v1300_v62 = vadd.f32 %v2542_v40, %v999_v60  ;;  %v2290_v63 = vpop.f32.mrb[22].mxu0  ;;  %v2322_v0 = vpop.f32.mrb[22].mxu1 }
 0x125   : > { %v1271_v1 = vadd.f32 %v2290_v63, %v2542_v40  ;;  %v1303_v2 = vadd.f32 %v2322_v0, %v2542_v40  ;;  %v874_v3 = vpop.f32.mrb[23].mxu0  ;;  %v1002_v4 = vpop.f32.mrb[23].mxu1  ;;  %v1334_v7 = vmax.f32 %v1270_v57, 0.0  ;;  %v1366_v8 = vmax.f32 %v1302_v58, 0.0 }
 0x126   : > { %v1269_v5 = vadd.f32 %v2542_v40, %v874_v3  ;;  %v1301_v6 = vadd.f32 %v2542_v40, %v1002_v4  ;;  %v1332_v11 = vmax.f32 %v1268_v61, 0.0  ;;  %v1364_v12 = vmax.f32 %v1300_v62, 0.0 }
 0x127   : > { %v1335_v9 = vmax.f32 %v1271_v1, 0.0  ;;  %v1367_v10 = vmax.f32 %v1303_v2, 0.0 }
 0x128   : > { %v1333_v13 = vmax.f32 %v1269_v5, 0.0  ;;  %v1365_v14 = vmax.f32 %v1301_v6, 0.0 }
 0x129   : > { %v2078_v15 = vpack.c.bf16 %v1335_v9, %v1334_v7  ;;  %v2158_v16 = vpack.c.bf16 %v1367_v10, %v1366_v8 }
 0x12a   : > { %v2073_v17 = vpack.c.bf16 %v1333_v13, %v1332_v11  ;;  %v2153_v18 = vpack.c.bf16 %v1365_v14, %v1364_v12  ;;  %v2293_v19 = vpop.f32.mrb[24].mxu0  ;;  %v2325_v20 = vpop.f32.mrb[24].mxu1 }
 0x12b   : > { %2190 = vst [vmem:[%s2557_s17 + $0x58] sm:$0xff] %v2078_v15   ;;  %2206 = vst [vmem:[%s2557_s17 + $0xd8] sm:$0xff] %v2158_v16   ;;  %v1274_v21 = vadd.f32 %v2293_v19, %v2542_v40  ;;  %v1306_v22 = vadd.f32 %v2325_v20, %v2542_v40  ;;  %v887_v23 = vpop.f32.mrb[25].mxu0  ;;  %v1015_v24 = vpop.f32.mrb[25].mxu1 }
 0x12c   : > { %2189 = vst [vmem:[%s2557_s17 + $0x50] sm:$0xff] %v2073_v17   ;;  %2205 = vst [vmem:[%s2557_s17 + $0xd0] sm:$0xff] %v2153_v18   ;;  %v1272_v25 = vadd.f32 %v2542_v40, %v887_v23  ;;  %v1304_v26 = vadd.f32 %v2542_v40, %v1015_v24  ;;  %v2294_v27 = vpop.f32.mrb[26].mxu0  ;;  %v2326_v28 = vpop.f32.mrb[26].mxu1 }
 0x12d   : > { %v1275_v29 = vadd.f32 %v2294_v27, %v2542_v40  ;;  %v1307_v30 = vadd.f32 %v2326_v28, %v2542_v40  ;;  %v890_v31 = vpop.f32.mrb[27].mxu0  ;;  %v1018_v32 = vpop.f32.mrb[27].mxu1  ;;  %v1338_v35 = vmax.f32 %v1274_v21, 0.0  ;;  %v1370_v36 = vmax.f32 %v1306_v22, 0.0 }
 0x12e   : > { %v1273_v33 = vadd.f32 %v2542_v40, %v890_v31  ;;  %v1305_v34 = vadd.f32 %v2542_v40, %v1018_v32  ;;  %v1336_v39 = vmax.f32 %v1272_v25, 0.0  ;;  %v1368_v41 = vmax.f32 %v1304_v26, 0.0 }
 0x12f   : > { %v1339_v37 = vmax.f32 %v1275_v29, 0.0  ;;  %v1371_v38 = vmax.f32 %v1307_v30, 0.0 }
 0x130   : > { %v1337_v42 = vmax.f32 %v1273_v33, 0.0  ;;  %v1369_v43 = vmax.f32 %v1305_v34, 0.0 }
 0x131   : > { %v2088_v44 = vpack.c.bf16 %v1339_v37, %v1338_v35  ;;  %v2168_v45 = vpack.c.bf16 %v1371_v38, %v1370_v36 }
 0x132   : > { %v2083_v46 = vpack.c.bf16 %v1337_v42, %v1336_v39  ;;  %v2163_v47 = vpack.c.bf16 %v1369_v43, %v1368_v41  ;;  %v2297_v48 = vpop.f32.mrb[28].mxu0  ;;  %v2329_v49 = vpop.f32.mrb[28].mxu1 }
 0x133   : > { %2192 = vst [vmem:[%s2557_s17 + $0x68] sm:$0xff] %v2088_v44   ;;  %2208 = vst [vmem:[%s2557_s17 + $0xe8] sm:$0xff] %v2168_v45   ;;  %v1278_v50 = vadd.f32 %v2297_v48, %v2542_v40  ;;  %v1310_v51 = vadd.f32 %v2329_v49, %v2542_v40  ;;  %v903_v52 = vpop.f32.mrb[29].mxu0  ;;  %v1031_v53 = vpop.f32.mrb[29].mxu1 }
 0x134   : > { %2191 = vst [vmem:[%s2557_s17 + $0x60] sm:$0xff] %v2083_v46   ;;  %2207 = vst [vmem:[%s2557_s17 + $0xe0] sm:$0xff] %v2163_v47   ;;  %v1276_v54 = vadd.f32 %v2542_v40, %v903_v52  ;;  %v1308_v55 = vadd.f32 %v2542_v40, %v1031_v53  ;;  %v2298_v56 = vpop.f32.mrb[30].mxu0  ;;  %v2330_v57 = vpop.f32.mrb[30].mxu1 }
 0x135   : > { %v1279_v58 = vadd.f32 %v2298_v56, %v2542_v40  ;;  %v1311_v59 = vadd.f32 %v2330_v57, %v2542_v40  ;;  %v906_v60 = vpop.f32.mrb[31].mxu0  ;;  %v1034_v61 = vpop.f32.mrb[31].mxu1  ;;  %v1342_v0 = vmax.f32 %v1278_v50, 0.0  ;;  %v1374_v1 = vmax.f32 %v1310_v51, 0.0 }
 0x136   : > { %v1277_v62 = vadd.f32 %v2542_v40, %v906_v60  ;;  %v1309_v63 = vadd.f32 %v2542_v40, %v1034_v61  ;;  %v1340_v4 = vmax.f32 %v1276_v54, 0.0  ;;  %v1372_v5 = vmax.f32 %v1308_v55, 0.0 }
 0x137   : > { %v1343_v2 = vmax.f32 %v1279_v58, 0.0  ;;  %v1375_v3 = vmax.f32 %v1311_v59, 0.0 }
 0x138   : > { %v1341_v6 = vmax.f32 %v1277_v62, 0.0  ;;  %v1373_v7 = vmax.f32 %v1309_v63, 0.0 }
 0x139   : > { %v2098_v8 = vpack.c.bf16 %v1343_v2, %v1342_v0  ;;  %v2178_v9 = vpack.c.bf16 %v1375_v3, %v1374_v1 }
 0x13a   : > { %v2093_v10 = vpack.c.bf16 %v1341_v6, %v1340_v4  ;;  %v2173_v11 = vpack.c.bf16 %v1373_v7, %v1372_v5 }
 0x13b   : > { %2194 = vst [vmem:[%s2557_s17 + $0x78] sm:$0xff] %v2098_v8   ;;  %2210 = vst [vmem:[%s2557_s17 + $0xf8] sm:$0xff] %v2178_v9  }
 0x13c   : > { %2193 = vst [vmem:[%s2557_s17 + $0x70] sm:$0xff] %v2093_v10   ;;  %2209 = vst [vmem:[%s2557_s17 + $0xf0] sm:$0xff] %v2173_v11  }
 0x13d PF: > { %s13_s14 = sadd.s32 1, %s2433_s14   ;;  %s2660_s12 = smov %s2429_s13 }
 0x13e   : > { %p10_p5 = scmp.ge.s32.totalorder %s13_s14, 4   ;;  %s2661_s13 = smov %s2663_s15 }
 0x140   :  { %12 = sbr.rel (!%p10_p5) target bundleno = 2 (0x2), region = 76 }

// kernel: autoencoder_cov3d_mem_forward.10
= control target key start
LH: loop header
LB: loop body
LE: loop exit
PB: predicated region body
PF: predicated region fallthrough
CT: control target
= control target key end

     0   :  { %s2068_s12 = smov 0   ;;  %s2070_s13 = smov 0   ;;  %s2339_s0 = inlined_call_operand.vmem [shape: bf16[1,128,2688], index: 0, kind: input, shape index: {}]   ;;  %s2340_s1 = inlined_call_operand.vmem [shape: bf16[1,2688,128], index: 1, kind: input, shape index: {}]   ;;  %s2341_s2 = inlined_call_operand.vmem [shape: f32[1,128], index: 2, kind: input, shape index: {}]   ;;  %s2342_s3 = inlined_call_operand.vmem [shape: bf16[1,128,128], index: 3, kind: output, shape index: {}]  }
   0x1   :  { %s2072_s14 = smov 0   ;;  %s2074_s15 = smov 0  }
   0x2   :  { %s2076_s16 = smov 0   ;;  %s2078_s17 = smov 0  }
   0x3   :  { %s2080_s18 = smov 0  }
   0x4 LB: > { %s28_s19 = sadd.s32 1, %s2037_s16  ;;  %s35_s20 = sadd.s32 1, %s2041_s17  ;;  %s2045_s18 = sphi %s2080_s18, %s13_s18   ;;  %s2041_s17 = sphi %s2078_s17, %s2348_s17   ;;  %s2037_s16 = sphi %s2076_s16, %s2347_s16   ;;  %s2033_s15 = sphi %s2074_s15, %s2346_s15   ;;  %s2029_s14 = sphi %s2072_s14, %s2345_s14   ;;  %s2025_s13 = sphi %s2070_s13, %s2344_s13   ;;  %s2021_s12 = sphi %s2068_s12, %s2343_s12  }
   0x5   : > { %p29_p0 = scmp.ge.s32.totalorder %s28_s19, 3  ;;  %p57_p1 = scmp.ne.s32.totalorder %s2025_s13, %s2021_s12 }
   0x6   : > { %p58_p2 = scmp.eq.s32.totalorder %s2045_s18, 0  ;;  %s50_s24 = sadd.s32 1, %s2025_s13 }
   0x7   : > { %s2350_s19 = smov (%p29_p0, %s28_s19), 0  ;;  %s2352_s20 = smov (!%p29_p0, %s35_s20), %s2041_s17 }
   0x8   : > { %p59_p3 = por %p58_p2, %p57_p1  ;;  %p37_p4 = scmp.ge.s32.totalorder %s2352_s20, 2 }
   0x9   : > { %s46_s21 = ssub.s32 %s2037_s16, %s2350_s19  ;;  %p1527_p6 = scmp.ge.s32.totalorder %s2045_s18, 6 }
   0xa   : > { %s2354_s20 = smov (%p37_p4, %s2352_s20), 0 }
   0xb   : > { %s44_s22 = ssub.s32 %s2041_s17, %s2354_s20  ;;  %175 = sbr.rel (%p1527_p6) target bundleno = 44 (0x2c), region = 20 }
   0xc   : > { %s47_s23 = sor.u32 %s46_s21, %s44_s22 }
   0xd   : > { %p48_p5 = scmp.eq.s32.totalorder %s47_s23, 0 }
   0xf   : > { %s2119_s25 = scalar_select %p48_p5, %s2025_s13, %s50_s24  }
  0x12   : > { %178 = sbr.rel (!%p59_p3) target bundleno = 44 (0x2c), region = 24  ;;  %s180_s26 = sand.u32 (%p59_p3), 1, %s2025_s13  }
  0x13   : > { %s184_s27 = smul.u32 (%p59_p3), 7, %s2037_s16 }
  0x14   : > { %s1835_s28 = smul.u32 (%p59_p3), 224, %s180_s26 }
  0x15   : > { %s1836_s29 = smul.u32 (%p59_p3), 168, %s2041_s17 }
  0x16   : > { %s2133_s8 = scalar_lea.vmem (%p59_p3), [#allocation3], %s1835_s28 }
  0x17   : > { %s186_s30 = sadd.s32 (%p59_p3), %s1836_s29, %s184_s27 }
  0x18   : > { %s1530_s4 = sshll.u32 (%p59_p3), %s186_s30, 2 }
  0x19   : > { %s2128_s7 = scalar_lea.vmem %s2339_s0, %s1530_s4 }
  0x1a   : > { %v205_v0 = vld [vmem:[%s2128_s7] sm:$0xff]  ;;  %v207_v1 = vld [vmem:[%s2128_s7 + $0x8] sm:$0xff]  ;;  %v209_v2 = vld [vmem:[%s2128_s7 + $0x10] sm:$0xff] }
  0x1b   : > { %206 = vst [vmem:[%s2133_s8] sm:$0xff] %v205_v0  ;;  %208 = vst [vmem:[%s2133_s8 + $0x8] sm:$0xff] %v207_v1  ;;  %v211_v3 = vld [vmem:[%s2128_s7 + $0x54] sm:$0xff]  ;;  %v213_v4 = vld [vmem:[%s2128_s7 + $0x5c] sm:$0xff] }
  0x1c   : > { %210 = vst [vmem:[%s2133_s8 + $0x10] sm:$0xff] %v209_v2  ;;  %v215_v5 = vld [vmem:[%s2128_s7 + $0x64] sm:$0xff]  ;;  %212 = vst [vmem:[%s2133_s8 + $0x1c] sm:$0xff] %v211_v3  ;;  %v219_v7 = vld [vmem:[%s2128_s7 + $0xb0] sm:$0xff] }
  0x1d   : > { %214 = vst [vmem:[%s2133_s8 + $0x24] sm:$0xff] %v213_v4  ;;  %216 = vst [vmem:[%s2133_s8 + $0x2c] sm:$0xff] %v215_v5  ;;  %v217_v6 = vld [vmem:[%s2128_s7 + $0xa8] sm:$0xff]  ;;  %v221_v8 = vld [vmem:[%s2128_s7 + $0xb8] sm:$0xff] }
  0x1e   : > { %218 = vst [vmem:[%s2133_s8 + $0x38] sm:$0xff] %v217_v6  ;;  %220 = vst [vmem:[%s2133_s8 + $0x40] sm:$0xff] %v219_v7  ;;  %v223_v9 = vld [vmem:[%s2128_s7 + $0xfc] sm:$0xff]  ;;  %v225_v10 = vld [vmem:[%s2128_s7 + $0x104] sm:$0xff] }
  0x1f   : > { %222 = vst [vmem:[%s2133_s8 + $0x48] sm:$0xff] %v221_v8  ;;  %v227_v11 = vld [vmem:[%s2128_s7 + $0x10c] sm:$0xff]  ;;  %224 = vst [vmem:[%s2133_s8 + $0x54] sm:$0xff] %v223_v9  ;;  %v231_v13 = vld [vmem:[%s2128_s7 + $0x158] sm:$0xff] }
  0x20   : > { %226 = vst [vmem:[%s2133_s8 + $0x5c] sm:$0xff] %v225_v10  ;;  %228 = vst [vmem:[%s2133_s8 + $0x64] sm:$0xff] %v227_v11  ;;  %v229_v12 = vld [vmem:[%s2128_s7 + $0x150] sm:$0xff]  ;;  %v233_v14 = vld [vmem:[%s2128_s7 + $0x160] sm:$0xff] }
  0x21   : > { %230 = vst [vmem:[%s2133_s8 + $0x70] sm:$0xff] %v229_v12  ;;  %232 = vst [vmem:[%s2133_s8 + $0x78] sm:$0xff] %v231_v13  ;;  %v235_v15 = vld [vmem:[%s2128_s7 + $0x1a4] sm:$0xff]  ;;  %v237_v16 = vld [vmem:[%s2128_s7 + $0x1ac] sm:$0xff] }
  0x22   : > { %234 = vst [vmem:[%s2133_s8 + $0x80] sm:$0xff] %v233_v14  ;;  %v239_v17 = vld [vmem:[%s2128_s7 + $0x1b4] sm:$0xff]  ;;  %236 = vst [vmem:[%s2133_s8 + $0x8c] sm:$0xff] %v235_v15  ;;  %v243_v19 = vld [vmem:[%s2128_s7 + $0x200] sm:$0xff] }
  0x23   : > { %238 = vst [vmem:[%s2133_s8 + $0x94] sm:$0xff] %v237_v16  ;;  %240 = vst [vmem:[%s2133_s8 + $0x9c] sm:$0xff] %v239_v17  ;;  %v241_v18 = vld [vmem:[%s2128_s7 + $0x1f8] sm:$0xff]  ;;  %v245_v20 = vld [vmem:[%s2128_s7 + $0x208] sm:$0xff] }
  0x24   : > { %242 = vst [vmem:[%s2133_s8 + $0xa8] sm:$0xff] %v241_v18  ;;  %244 = vst [vmem:[%s2133_s8 + $0xb0] sm:$0xff] %v243_v19  ;;  %v247_v21 = vld [vmem:[%s2128_s7 + $0x24c] sm:$0xff]  ;;  %v249_v22 = vld [vmem:[%s2128_s7 + $0x254] sm:$0xff] }
  0x25   : > { %246 = vst [vmem:[%s2133_s8 + $0xb8] sm:$0xff] %v245_v20  ;;  %v251_v23 = vld [vmem:[%s2128_s7 + $0x25c] sm:$0xff]  ;;  %248 = vst [vmem:[%s2133_s8 + $0xc4] sm:$0xff] %v247_v21  ;;  %v1531_v24 = vld [vmem:[%s2128_s7 + $0x18] sm:$0xf] }
  0x26   : > { %250 = vst [vmem:[%s2133_s8 + $0xcc] sm:$0xff] %v249_v22  ;;  %252 = vst [vmem:[%s2133_s8 + $0xd4] sm:$0xff] %v251_v23  ;;  %v1533_v25 = vld [vmem:[%s2128_s7 + $0x6c] sm:$0xf]  ;;  %v1535_v26 = vld [vmem:[%s2128_s7 + $0xc0] sm:$0xf] }
  0x27   : > { %1532 = vst [vmem:[%s2133_s8 + $0x18] sm:$0xf] %v1531_v24  ;;  %1534 = vst [vmem:[%s2133_s8 + $0x34] sm:$0xf] %v1533_v25  ;;  %v1537_v27 = vld [vmem:[%s2128_s7 + $0x114] sm:$0xf] }
  0x28   : > { %1536 = vst [vmem:[%s2133_s8 + $0x50] sm:$0xf] %v1535_v26  ;;  %v1539_v28 = vld [vmem:[%s2128_s7 + $0x168] sm:$0xf]  ;;  %v1541_v29 = vld [vmem:[%s2128_s7 + $0x1bc] sm:$0xf] }
  0x29   : > { %1538 = vst [vmem:[%s2133_s8 + $0x6c] sm:$0xf] %v1537_v27  ;;  %1540 = vst [vmem:[%s2133_s8 + $0x88] sm:$0xf] %v1539_v28  ;;  %v1543_v30 = vld [vmem:[%s2128_s7 + $0x210] sm:$0xf] }
  0x2a   : > { %1542 = vst [vmem:[%s2133_s8 + $0xa4] sm:$0xf] %v1541_v29  ;;  %v1545_v31 = vld [vmem:[%s2128_s7 + $0x264] sm:$0xf]  ;;  %1544 = vst [vmem:[%s2133_s8 + $0xc0] sm:$0xf] %v1543_v30 }
  0x2b   : > { %1546 = vst [vmem:[%s2133_s8 + $0xdc] sm:$0xf] %v1545_v31 }
  0x2c PF: > { %p1547_p7 = scmp.ge.s32.totalorder %s2045_s18, 1  ;;  %p296_p8 = scmp.lt.s32.totalorder %s2045_s18, 7 }
  0x2e   : > { %p297_p9 = pnand %p1547_p7, %p296_p8 }
  0x2f   : > { %s303_s9 = sand.u32 (!%p297_p9), 1, %s2021_s12   ;;  %s350_s10 = smul.u32 (!%p297_p9), 112, %s2029_s14 }
  0x30   : > { %300 = sbr.rel (%p297_p9) target bundleno = 393 (0x189), region = 54  ;;  %s1549_s21 = sshll.u32 (!%p297_p9), %s2033_s15, 3 }
  0x31   : > { %s1837_s11 = smul.u32 (!%p297_p9), 224, %s303_s9  ;;  %p353_p10 = scmp.lt.s32.totalorder (!%p297_p9), %s350_s10, 335 }
  0x32   : > { %p369_p11 = scmp.lt.s32.totalorder (!%p297_p9), %s1549_s21, 15  ;;  %p1551_p12 = scmp.ne.s32.totalorder (!%p297_p9), %s2029_s14, 0 }
  0x33   : > { %s2211_s12 = scalar_lea.vmem (!%p297_p9), [#allocation3], %s1837_s11 }
  0x37   : > { %s2356_s10 = smov (!%p353_p10, %s350_s10), 335  ;;  %s2358_s21 = smov (!%p369_p11, %s1549_s21), 15 }
  0x38   : > { %s1548_s22 = sshll.u32 %s2356_s10, 2  ;;  %s1550_s27 = sshll.u32 %s2358_s21, 2  ;;  %v2047_v32 = vmov (!%p1551_p12), 0.0  }
  0x39   : > { %s2204_s26 = scalar_lea.vmem %s2340_s1, %s1548_s22  ;;  %s2209_s30 = scalar_lea.vmem %s2342_s3, %s1550_s27  ;;  %384 = vst [vmem:[#allocation2] sm:$0xff] (!%p1551_p12), %v2047_v32  ;;  %385 = vst [vmem:[#allocation2 + $0x8] sm:$0xff] (!%p1551_p12), %v2047_v32 }
  0x3a   : > { %383 = sbr.rel (%p1551_p12) target bundleno = 65 (0x41), region = 62  ;;  %386 = vst [vmem:[#allocation2 + $0x10] sm:$0xff] (!%p1551_p12), %v2047_v32  ;;  %387 = vst [vmem:[#allocation2 + $0x18] sm:$0xff] (!%p1551_p12), %v2047_v32 }
  0x3b   : > { %388 = vst [vmem:[#allocation2 + $0x20] sm:$0xff] (!%p1551_p12), %v2047_v32  ;;  %389 = vst [vmem:[#allocation2 + $0x28] sm:$0xff] (!%p1551_p12), %v2047_v32 }
  0x3c   : > { %390 = vst [vmem:[#allocation2 + $0x30] sm:$0xff] (!%p1551_p12), %v2047_v32  ;;  %391 = vst [vmem:[#allocation2 + $0x38] sm:$0xff] (!%p1551_p12), %v2047_v32 }
  0x41 PF: > { %v1895_v33 = vld [vmem:[%s2204_s26 + $0x40] sm:$0xff]   ;;  %v1899_v37 = vld [vmem:[%s2204_s26 + $0x48] sm:$0xff]   ;;  %v1903_v41 = vld [vmem:[%s2204_s26 + $0x50] sm:$0xff]   ;;  %p1636_p13 = scmp.ne.s32.totalorder %s2029_s14, 2 }
  0x42   : > { %v1896_v34 = vld [vmem:[%s2204_s26 + $0xc0] sm:$0xff]   ;;  %1679 = vmatprep.subr.bf16.mxu0 %v1895_v33  ;;  %v1900_v38 = vld [vmem:[%s2204_s26 + $0xc8] sm:$0xff]   ;;  %v1904_v42 = vld [vmem:[%s2204_s26 + $0xd0] sm:$0xff]  }
  0x43   : > { %v1897_v35 = vld [vmem:[%s2204_s26] sm:$0xff]   ;;  %1719 = vmatprep.subr.bf16.mxu1 %v1896_v34  ;;  %v1901_v39 = vld [vmem:[%s2204_s26 + $0x8] sm:$0xff]   ;;  %v1905_v43 = vld [vmem:[%s2204_s26 + $0x10] sm:$0xff]  }
  0x44   : > { %v1898_v36 = vld [vmem:[%s2204_s26 + $0x80] sm:$0xff]   ;;  %1680 = vmatpush3.bf16.msra.mxu0 %v1897_v35  ;;  %v1902_v40 = vld [vmem:[%s2204_s26 + $0x88] sm:$0xff]   ;;  %v1906_v44 = vld [vmem:[%s2204_s26 + $0x90] sm:$0xff]  }
  0x45   : > { %1720 = vmatpush3.bf16.msra.mxu1 %v1898_v36  ;;  %1681 = vmatprep.subr.bf16.mxu0 %v1899_v37  ;;  %v1907_v45 = vld [vmem:[%s2204_s26 + $0x58] sm:$0xff]   ;;  %v1911_v49 = vld [vmem:[%s2204_s26 + $0x60] sm:$0xff]   ;;  %v1915_v53 = vld [vmem:[%s2204_s26 + $0x68] sm:$0xff]  }
  0x46   : > { %1721 = vmatprep.subr.bf16.mxu1 %v1900_v38  ;;  %v1908_v46 = vld [vmem:[%s2204_s26 + $0xd8] sm:$0xff]   ;;  %v1912_v50 = vld [vmem:[%s2204_s26 + $0xe0] sm:$0xff]   ;;  %v1916_v54 = vld [vmem:[%s2204_s26 + $0xe8] sm:$0xff]  }
  0x47   : > { %v1909_v47 = vld [vmem:[%s2204_s26 + $0x18] sm:$0xff]   ;;  %v1913_v51 = vld [vmem:[%s2204_s26 + $0x20] sm:$0xff]   ;;  %v1917_v55 = vld [vmem:[%s2204_s26 + $0x28] sm:$0xff]  }
  0x48   : > { %1682 = vmatpush3.bf16.msra.mxu0 %v1901_v39  ;;  %v1910_v48 = vld [vmem:[%s2204_s26 + $0x98] sm:$0xff]   ;;  %v1914_v52 = vld [vmem:[%s2204_s26 + $0xa0] sm:$0xff]   ;;  %v1918_v56 = vld [vmem:[%s2204_s26 + $0xa8] sm:$0xff]  }
  0x49   : > { %1722 = vmatpush3.bf16.msra.mxu1 %v1902_v40  ;;  %1683 = vmatprep.subr.bf16.mxu0 %v1903_v41  ;;  %v1919_v57 = vld [vmem:[%s2204_s26 + $0x70] sm:$0xff]   ;;  %v1923_v61 = vld [vmem:[%s2204_s26 + $0x78] sm:$0xff]   ;;  %v1929_v2 = vld [vmem:[%s2211_s12 + $0x4] ss:$28 sps:$4 sm:$0xff]  }
  0x4a   : > { %1723 = vmatprep.subr.bf16.mxu1 %v1904_v42  ;;  %v1920_v58 = vld [vmem:[%s2204_s26 + $0xf0] sm:$0xff]   ;;  %v1924_v62 = vld [vmem:[%s2204_s26 + $0xf8] sm:$0xff]   ;;  %v1930_v3 = vld [vmem:[%s2211_s12 + $0x8] ss:$28 sps:$4 sm:$0xff]   ;;  %1056 = vmatprep.mubr.bf16.mxu0 %v1929_v2 }
  0x4b   : > { %v1921_v59 = vld [vmem:[%s2204_s26 + $0x30] sm:$0xff]   ;;  %v1925_v63 = vld [vmem:[%s2204_s26 + $0x38] sm:$0xff]   ;;  %v1932_v4 = vld [vmem:[%s2211_s12 + $0xc] ss:$28 sps:$4 sm:$0xff]  }
  0x4c   : > { %1684 = vmatpush3.bf16.msra.mxu0 %v1905_v43  ;;  %v1922_v60 = vld [vmem:[%s2204_s26 + $0xb0] sm:$0xff]   ;;  %v1926_v0 = vld [vmem:[%s2204_s26 + $0xb8] sm:$0xff]   ;;  %v1933_v5 = vld [vmem:[%s2204_s26 + $0x140] sm:$0xff]   ;;  %1121 = vmatprep.mubr.bf16.mxu1 %v1932_v4 }
  0x4d   : > { %1724 = vmatpush3.bf16.msra.mxu1 %v1906_v44  ;;  %1685 = vmatprep.subr.bf16.mxu0 %v1907_v45  ;;  %v1927_v1 = vld [vmem:[%s2211_s12] ss:$28 sps:$4 sm:$0xff]   ;;  %v1935_v7 = vld [vmem:[%s2204_s26 + $0x148] sm:$0xff]   ;;  %v1942_v12 = vld [vmem:[%s2211_s12 + $0x38] ss:$28 sps:$4 sm:$0xff]  }
  0x4e   : > { %1725 = vmatprep.subr.bf16.mxu1 %v1908_v46  ;;  %v1934_v6 = vld [vmem:[%s2204_s26 + $0x100] sm:$0xff]   ;;  %v1937_v9 = vld [vmem:[%s2204_s26 + $0x108] sm:$0xff]   ;;  %v1938_v10 = vld [vmem:[%s2211_s12 + $0x3c] ss:$28 sps:$4 sm:$0xff]  }
  0x4f   : > { %v1936_v8 = vld [vmem:[%s2204_s26 + $0x180] sm:$0xff]   ;;  %v1944_v14 = vld [vmem:[%s2204_s26 + $0x150] sm:$0xff]   ;;  %v1945_v15 = vld [vmem:[%s2204_s26 + $0x188] sm:$0xff]  }
  0x50   : > { %1686 = vmatpush3.bf16.msra.mxu0 %v1909_v47  ;;  %v1940_v11 = vld [vmem:[%s2211_s12 + $0x44] ss:$28 sps:$4 sm:$0xff]   ;;  %v1946_v16 = vld [vmem:[%s2204_s26 + $0x110] sm:$0xff]   ;;  %v1947_v17 = vld [vmem:[%s2204_s26 + $0x158] sm:$0xff]  }
  0x51   : > { %1726 = vmatpush3.bf16.msra.mxu1 %v1910_v48  ;;  %1687 = vmatprep.subr.bf16.mxu0 %v1911_v49  ;;  %v1943_v13 = vld [vmem:[%s2211_s12 + $0x40] ss:$28 sps:$4 sm:$0xff]   ;;  %v1948_v18 = vld [vmem:[%s2204_s26 + $0x190] sm:$0xff]   ;;  %v1959_v27 = vld [vmem:[%s2204_s26 + $0x168] sm:$0xff]  }
  0x52   : > { %1727 = vmatprep.subr.bf16.mxu1 %v1912_v50  ;;  %v1949_v19 = vld [vmem:[%s2204_s26 + $0x118] sm:$0xff]   ;;  %v1950_v20 = vld [vmem:[%s2211_s12 + $0x74] ss:$28 sps:$4 sm:$0xff]   ;;  %v1956_v24 = vld [vmem:[%s2204_s26 + $0x160] sm:$0xff]  }
  0x53   : > { %v1952_v21 = vld [vmem:[%s2211_s12 + $0x7c] ss:$28 sps:$4 sm:$0xff]   ;;  %v1954_v22 = vld [vmem:[%s2211_s12 + $0x70] ss:$28 sps:$4 sm:$0xff]   ;;  %v1958_v26 = vld [vmem:[%s2204_s26 + $0x120] sm:$0xff]  }
  0x54   : > { %1688 = vmatpush3.bf16.msra.mxu0 %v1913_v51  ;;  %v1955_v23 = vld [vmem:[%s2211_s12 + $0x78] ss:$28 sps:$4 sm:$0xff]   ;;  %v1960_v28 = vld [vmem:[%s2204_s26 + $0x1a0] sm:$0xff]   ;;  %v1961_v29 = vld [vmem:[%s2204_s26 + $0x128] sm:$0xff]  }
  0x55   : > { %1728 = vmatpush3.bf16.msra.mxu1 %v1914_v52  ;;  %1689 = vmatprep.subr.bf16.mxu0 %v1915_v53  ;;  %v1957_v25 = vld [vmem:[%s2204_s26 + $0x198] sm:$0xff]   ;;  %v1962_v30 = vld [vmem:[%s2211_s12 + $0xac] ss:$28 sps:$4 sm:$0xff]   ;;  %v1964_v31 = vld [vmem:[%s2211_s12 + $0xb4] ss:$28 sps:$4 sm:$0xff]  }
  0x56   : > { %1729 = vmatprep.subr.bf16.mxu1 %v1916_v54  ;;  %v1966_v32 = vld [vmem:[%s2211_s12 + $0xa8] ss:$28 sps:$4 sm:$0xff]   ;;  %v1967_v33 = vld [vmem:[%s2211_s12 + $0xb0] ss:$28 sps:$4 sm:$0xff]   ;;  %v1971_v37 = vld [vmem:[%s2204_s26 + $0x178] sm:$0xff]  }
  0x57   : > { %v1968_v34 = vld [vmem:[%s2204_s26 + $0x170] sm:$0xff]   ;;  %v1969_v35 = vld [vmem:[%s2204_s26 + $0x1a8] sm:$0xff]   ;;  %v1973_v39 = vld [vmem:[%s2204_s26 + $0x138] sm:$0xff]  }
  0x58   : > { %1690 = vmatpush3.bf16.msra.mxu0 %v1917_v55  ;;  %v1970_v36 = vld [vmem:[%s2204_s26 + $0x130] sm:$0xff]   ;;  %v1977_v42 = vld [vmem:[%s2204_s26 + $0x1b8] sm:$0xff]   ;;  %v1980_v44 = vld [vmem:[%s2211_s12 + $0x4c] ss:$28 sps:$4 sm:$0xff]  }
  0x59   : > { %1730 = vmatpush3.bf16.msra.mxu1 %v1918_v56  ;;  %1691 = vmatprep.subr.bf16.mxu0 %v1919_v57  ;;  %v1972_v38 = vld [vmem:[%s2204_s26 + $0x1b0] sm:$0xff]   ;;  %v1986_v46 = vld [vmem:[%s2211_s12 + $0x88] ss:$28 sps:$4 sm:$0xff]   ;;  %v1987_v49 = vld [vmem:[%s2211_s12 + $0xc0] ss:$28 sps:$4 sm:$0xff]  }
  0x5a   : > { %1731 = vmatprep.subr.bf16.mxu1 %v1920_v58  ;;  %v1974_v40 = vld [vmem:[%s2211_s12 + $0x10] ss:$28 sps:$4 sm:$0xff]   ;;  %v1978_v43 = vld [vmem:[%s2211_s12 + $0x18] ss:$28 sps:$4 sm:$0xff]   ;;  %v1982_v47 = vld [vmem:[%s2211_s12 + $0x48] ss:$28 sps:$4 sm:$0xff]  }
  0x5b   : > { %v1976_v41 = vld [vmem:[%s2211_s12 + $0x14] ss:$28 sps:$4 sm:$0xff]   ;;  %v1983_v48 = vld [vmem:[%s2211_s12 + $0x84] ss:$28 sps:$4 sm:$0xff]   ;;  %v1988_v51 = vld [vmem:[%s2211_s12 + $0xbc] ss:$28 sps:$4 sm:$0xff]  }
  0x5c   : > { %1692 = vmatpush3.bf16.msra.mxu0 %v1921_v59  ;;  %v1979_v45 = vld [vmem:[%s2211_s12 + $0x50] ss:$28 sps:$4 sm:$0xff]   ;;  %v1985_v50 = vld [vmem:[%s2211_s12 + $0x80] ss:$28 sps:$4 sm:$0xff]   ;;  %v1990_v52 = vld [vmem:[%s2211_s12 + $0xb8] ss:$28 sps:$4 sm:$0xff]  }
  0x5d   : > { %1732 = vmatpush3.bf16.msra.mxu1 %v1922_v60  ;;  %1693 = vmatprep.subr.bf16.mxu0 %v1923_v61 }
  0x5e   : > { %1733 = vmatprep.subr.bf16.mxu1 %v1924_v62 }
  0x60   : > { %1694 = vmatpush3.bf16.msra.mxu0 %v1925_v63 }
  0x61   : > { %1734 = vmatpush3.bf16.msra.mxu1 %v1926_v0  ;;  %1759 = vmatprep.subr.bf16.mxu0 %v1933_v5 }
  0x62   : > { %1811 = vmatprep.subr.bf16.mxu1 %v1936_v8 }
  0x63   : > { %1057 = vmatmul.mubr.bf16.vlgmr.msra.gmra.mrb[0].mxu0 %v1927_v1 }
  0x64   : > { %1122 = vmatmul.mubr.bf16.vlgmr.msra.gmra.mrb[0].mxu1 %v1930_v3  ;;  %1760 = vmatpush3.bf16.msra.mxu0 %v1934_v6 }
  0x65   : > { %1761 = vmatprep.subr.bf16.mxu0 %v1935_v7  ;;  %1812 = vmatpush3.bf16.msra.mxu1 %v1936_v8 }
  0x66   : > { %1064 = vmatprep.mubr.bf16.mxu0 %v1938_v10  ;;  %1129 = vmatprep.mubr.bf16.mxu1 %v1940_v11 }
  0x67   : > { %1813 = vmatprep.subr.bf16.mxu1 %v1945_v15 }
  0x68   : > { %1762 = vmatpush3.bf16.msra.mxu0 %v1937_v9 }
  0x69   : > { %1763 = vmatprep.subr.bf16.mxu0 %v1944_v14  ;;  %1814 = vmatpush3.bf16.msra.mxu1 %v1945_v15 }
  0x6a   : > { %1815 = vmatprep.subr.bf16.mxu1 %v1948_v18 }
  0x6b   : > { %1065 = vmatmul.mubr.bf16.gmra.mrb[4].mxu0 %v1942_v12 }
  0x6c   : > { %1130 = vmatmul.mubr.bf16.gmra.mrb[4].mxu1 %v1943_v13  ;;  %1764 = vmatpush3.bf16.msra.mxu0 %v1946_v16 }
  0x6d   : > { %1765 = vmatprep.subr.bf16.mxu0 %v1947_v17  ;;  %1816 = vmatpush3.bf16.msra.mxu1 %v1948_v18 }
  0x6e   : > { %1072 = vmatprep.mubr.bf16.mxu0 %v1950_v20  ;;  %1137 = vmatprep.mubr.bf16.mxu1 %v1952_v21 }
  0x6f   : > { %1817 = vmatprep.subr.bf16.mxu1 %v1957_v25 }
  0x70   : > { %1766 = vmatpush3.bf16.msra.mxu0 %v1949_v19 }
  0x71   : > { %1767 = vmatprep.subr.bf16.mxu0 %v1956_v24  ;;  %1818 = vmatpush3.bf16.msra.mxu1 %v1957_v25 }
  0x72   : > { %1819 = vmatprep.subr.bf16.mxu1 %v1960_v28 }
  0x73   : > { %1073 = vmatmul.mubr.bf16.gmra.mrb[8].mxu0 %v1954_v22 }
  0x74   : > { %1138 = vmatmul.mubr.bf16.gmra.mrb[8].mxu1 %v1955_v23  ;;  %1768 = vmatpush3.bf16.msra.mxu0 %v1958_v26 }
  0x75   : > { %1769 = vmatprep.subr.bf16.mxu0 %v1959_v27  ;;  %1820 = vmatpush3.bf16.msra.mxu1 %v1960_v28 }
  0x76   : > { %1080 = vmatprep.mubr.bf16.mxu0 %v1962_v30  ;;  %1145 = vmatprep.mubr.bf16.mxu1 %v1964_v31 }
  0x77   : > { %1821 = vmatprep.subr.bf16.mxu1 %v1969_v35 }
  0x78   : > { %1770 = vmatpush3.bf16.msra.mxu0 %v1961_v29 }
  0x79   : > { %1771 = vmatprep.subr.bf16.mxu0 %v1968_v34  ;;  %1822 = vmatpush3.bf16.msra.mxu1 %v1969_v35 }
  0x7a   : > { %1823 = vmatprep.subr.bf16.mxu1 %v1972_v38 }
  0x7b   : > { %1081 = vmatmul.mubr.bf16.gmra.mrb[12].mxu0 %v1966_v32 }
  0x7c   : > { %1146 = vmatmul.mubr.bf16.gmra.mrb[12].mxu1 %v1967_v33  ;;  %1772 = vmatpush3.bf16.msra.mxu0 %v1970_v36 }
  0x7d   : > { %1773 = vmatprep.subr.bf16.mxu0 %v1971_v37  ;;  %1824 = vmatpush3.bf16.msra.mxu1 %v1972_v38 }
  0x7e   : > { %1186 = vmatprep.mubr.bf16.mxu0 %v1976_v41  ;;  %1825 = vmatprep.subr.bf16.mxu1 %v1977_v42 }
  0x7f   : > { %1827 = vmatprep.mubr.bf16.mxu1 %v1978_v43 }
  0x80   : > { %1774 = vmatpush3.bf16.msra.mxu0 %v1973_v39 }
  0x81   : > { %1826 = vmatpush3.bf16.msra.mxu1 %v1977_v42 }
  0x83   : > { %1187 = vmatmul.mubr.bf16.vlgmr.msra.gmra.mrb[16].mxu0 %v1974_v40 }
  0x84   : > { %1194 = vmatprep.mubr.bf16.mxu0 %v1980_v44  ;;  %1828 = vmatmul.mubr.bf16.vlgmr.msra.gmra.mrb[16].mxu1 %v1979_v45 }
  0x85   : > { %1831 = vmatprep.mubr.bf16.mxu1 %v1986_v46 }
  0x8b   : > { %1195 = vmatmul.mubr.bf16.gmra.mrb[20].mxu0 %v1982_v47 }
  0x8c   : > { %1202 = vmatprep.mubr.bf16.mxu0 %v1983_v48  ;;  %1832 = vmatmul.mubr.bf16.gmra.mrb[20].mxu1 %v1987_v49 }
  0x93   : > { %1203 = vmatmul.mubr.bf16.gmra.mrb[24].mxu0 %v1985_v50 }
  0x94   : > { %1210 = vmatprep.mubr.bf16.mxu0 %v1988_v51 }
  0x9b   : > { %1211 = vmatmul.mubr.bf16.gmra.mrb[28].mxu0 %v1990_v52 }
 0x136   : > { %v1695_v53 = vpop.f32.mrb[0].mxu0 }
 0x137   : > { %v1735_v54 = vpop.f32.mrb[0].mxu1  ;;  %v1696_v55 = vpop.f32.mrb[1].mxu0 }
 0x138   : > { %v1697_v56 = vadd.f32 %v1696_v55, %v1695_v53  ;;  %v1736_v57 = vpop.f32.mrb[1].mxu1  ;;  %v1698_v58 = vpop.f32.mrb[2].mxu0  ;;  %v392_v53 = vld [vmem:[#allocation2] sm:$0xff] }
 0x139   : > { %v1737_v59 = vadd.f32 %v1736_v57, %v1735_v54  ;;  %v1738_v60 = vpop.f32.mrb[2].mxu1  ;;  %v1699_v61 = vpop.f32.mrb[3].mxu0 }
 0x13a   : > { %v1700_v62 = vadd.f32 %v1699_v61, %v1698_v58  ;;  %v1739_v63 = vpop.f32.mrb[3].mxu1  ;;  %v393_v58 = vld [vmem:[#allocation2 + $0x8] sm:$0xff] }
 0x13b   : > { %v1124_v0 = vadd.f32 %v1737_v59, %v1697_v56  ;;  %v1740_v1 = vadd.f32 %v1739_v63, %v1738_v60 }
 0x13d   : > { %v1127_v2 = vadd.f32 %v1740_v1, %v1700_v62 }
 0x13e   : > { %v1701_v3 = vpop.f32.mrb[4].mxu0 }
 0x13f   : > { %v1741_v4 = vpop.f32.mrb[4].mxu1  ;;  %v1702_v5 = vpop.f32.mrb[5].mxu0 }
 0x140   : > { %v1703_v6 = vadd.f32 %v1702_v5, %v1701_v3  ;;  %v1742_v7 = vpop.f32.mrb[5].mxu1  ;;  %v1704_v8 = vpop.f32.mrb[6].mxu0 }
 0x141   : > { %v1743_v9 = vadd.f32 %v1742_v7, %v1741_v4  ;;  %v1744_v10 = vpop.f32.mrb[6].mxu1  ;;  %v1705_v11 = vpop.f32.mrb[7].mxu0 }
 0x142   : > { %v1706_v12 = vadd.f32 %v1705_v11, %v1704_v8  ;;  %v1745_v13 = vpop.f32.mrb[7].mxu1  ;;  %v394_v8 = vld [vmem:[#allocation2 + $0x10] sm:$0xff] }
 0x143   : > { %v1132_v14 = vadd.f32 %v1743_v9, %v1703_v6  ;;  %v1746_v15 = vadd.f32 %v1745_v13, %v1744_v10 }
 0x145   : > { %v1135_v16 = vadd.f32 %v1746_v15, %v1706_v12  ;;  %v395_v12 = vld [vmem:[#allocation2 + $0x18] sm:$0xff] }
 0x146   : > { %v1707_v17 = vpop.f32.mrb[8].mxu0 }
 0x147   : > { %v1747_v18 = vpop.f32.mrb[8].mxu1  ;;  %v1708_v19 = vpop.f32.mrb[9].mxu0 }
 0x148   : > { %v1748_v20 = vpop.f32.mrb[9].mxu1  ;;  %v1709_v21 = vadd.f32 %v1708_v19, %v1707_v17  ;;  %v1710_v23 = vpop.f32.mrb[10].mxu0 }
 0x149   : > { %v1749_v22 = vadd.f32 %v1748_v20, %v1747_v18  ;;  %v1750_v24 = vpop.f32.mrb[10].mxu1  ;;  %v1711_v25 = vpop.f32.mrb[11].mxu0 }
 0x14a   : > { %v1751_v26 = vpop.f32.mrb[11].mxu1  ;;  %v1712_v28 = vadd.f32 %v1711_v25, %v1710_v23  ;;  %v396_v25 = vld [vmem:[#allocation2 + $0x20] sm:$0xff] }
 0x14b   : > { %v2298_v27 = vadd.f32 %v1749_v22, %v1709_v21  ;;  %v1752_v29 = vadd.f32 %v1751_v26, %v1750_v24 }
 0x14d   : > { %v2300_v30 = vadd.f32 %v1752_v29, %v1712_v28  ;;  %v397_v28 = vld [vmem:[#allocation2 + $0x28] sm:$0xff] }
 0x14e   : > { %v1713_v31 = vpop.f32.mrb[12].mxu0 }
 0x14f   : > { %v1753_v32 = vpop.f32.mrb[12].mxu1  ;;  %v1714_v33 = vpop.f32.mrb[13].mxu0 }
 0x150   : > { %v1754_v34 = vpop.f32.mrb[13].mxu1  ;;  %v1715_v35 = vadd.f32 %v1714_v33, %v1713_v31  ;;  %v1716_v37 = vpop.f32.mrb[14].mxu0 }
 0x151   : > { %v1755_v36 = vadd.f32 %v1754_v34, %v1753_v32  ;;  %v1756_v38 = vpop.f32.mrb[14].mxu1  ;;  %v1717_v39 = vpop.f32.mrb[15].mxu0 }
 0x152   : > { %v1757_v40 = vpop.f32.mrb[15].mxu1  ;;  %v1718_v42 = vadd.f32 %v1717_v39, %v1716_v37 }
 0x153   : > { %v2302_v41 = vadd.f32 %v1755_v36, %v1715_v35  ;;  %v1758_v43 = vadd.f32 %v1757_v40, %v1756_v38  ;;  %v398_v40 = vld [vmem:[#allocation2 + $0x30] sm:$0xff] }
 0x155   : > { %v2304_v44 = vadd.f32 %v1758_v43, %v1718_v42  ;;  %v399_v43 = vld [vmem:[#allocation2 + $0x38] sm:$0xff] }
 0x156   : > { %v1775_v45 = vpop.f32.mrb[16].mxu0 }
 0x157   : > { %v1776_v46 = vpop.f32.mrb[17].mxu0  ;;  %v1829_v51 = vpop.f32.mrb[16].mxu1 }
 0x158   : > { %v1777_v47 = vadd.f32 %v1776_v46, %v1775_v45  ;;  %v1778_v48 = vpop.f32.mrb[18].mxu0  ;;  %v1253_v54 = vpop.f32.mrb[17].mxu1 }
 0x159   : > { %v1779_v49 = vpop.f32.mrb[19].mxu0  ;;  %v1830_v56 = vpop.f32.mrb[18].mxu1 }
 0x15a   : > { %v1780_v50 = vadd.f32 %v1779_v49, %v1778_v48  ;;  %v1189_v52 = vadd.f32 %v1777_v47, %v1124_v0  ;;  %v1256_v59 = vpop.f32.mrb[19].mxu1 }
 0x15c   : > { %v1254_v55 = vadd.f32 %v1253_v54, %v1189_v52  ;;  %v1192_v57 = vadd.f32 %v1780_v50, %v1127_v2 }
 0x15e   : > { %v1284_v60 = vadd.f32 %v1254_v55, %v392_v53  ;;  %v1257_v61 = vadd.f32 %v1256_v59, %v1192_v57  ;;  %v1781_v62 = vpop.f32.mrb[20].mxu0 }
 0x15f   : > { %v1782_v63 = vpop.f32.mrb[21].mxu0  ;;  %v1833_v0 = vpop.f32.mrb[20].mxu1 }
 0x160   : > { %1292 = vst [vmem:[#allocation2] sm:$0xff] %v1284_v60  ;;  %v1285_v1 = vadd.f32 %v1257_v61, %v393_v58  ;;  %v1783_v3 = vadd.f32 %v1782_v63, %v1781_v62  ;;  %v1784_v4 = vpop.f32.mrb[22].mxu0  ;;  %v1269_v9 = vpop.f32.mrb[21].mxu1 }
 0x161   : > { %v1785_v5 = vpop.f32.mrb[23].mxu0  ;;  %v1834_v2 = vpop.f32.mrb[22].mxu1 }
 0x162   : > { %1293 = vst [vmem:[#allocation2 + $0x8] sm:$0xff] %v1285_v1  ;;  %v1197_v6 = vadd.f32 %v1783_v3, %v1132_v14  ;;  %v1786_v7 = vadd.f32 %v1785_v5, %v1784_v4  ;;  %v1272_v13 = vpop.f32.mrb[23].mxu1 }
 0x164   : > { %v1262_v10 = vadd.f32 %v1829_v51, %v1197_v6  ;;  %v1200_v11 = vadd.f32 %v1786_v7, %v1135_v16 }
 0x166   : > { %v1286_v15 = vadd.f32 %v1262_v10, %v394_v8  ;;  %v1265_v17 = vadd.f32 %v1830_v56, %v1200_v11  ;;  %v1787_v18 = vpop.f32.mrb[24].mxu0 }
 0x167   : > { %v1788_v19 = vpop.f32.mrb[25].mxu0  ;;  %v1304_v47 = vld [vmem:[#allocation2] sm:$0xff] (!%p1636_p13) }
 0x168   : > { %1294 = vst [vmem:[#allocation2 + $0x10] sm:$0xff] %v1286_v15  ;;  %v1287_v20 = vadd.f32 %v1265_v17, %v395_v12  ;;  %v1789_v21 = vadd.f32 %v1788_v19, %v1787_v18  ;;  %v1790_v22 = vpop.f32.mrb[26].mxu0 }
 0x169   : > { %v1791_v23 = vpop.f32.mrb[27].mxu0  ;;  %v1305_v48 = vld [vmem:[#allocation2 + $0x8] sm:$0xff] (!%p1636_p13) }
 0x16a   : > { %1295 = vst [vmem:[#allocation2 + $0x18] sm:$0xff] %v1287_v20  ;;  %v1792_v14 = vadd.f32 %v1791_v23, %v1790_v22  ;;  %v1205_v24 = vadd.f32 %v1789_v21, %v2298_v27 }
 0x16c   : > { %v1270_v26 = vadd.f32 %v1269_v9, %v1205_v24  ;;  %v1208_v16 = vadd.f32 %v1792_v14, %v2300_v30 }
 0x16e   : > { %v1288_v29 = vadd.f32 %v1270_v26, %v396_v25  ;;  %v1273_v31 = vadd.f32 %v1272_v13, %v1208_v16  ;;  %v1793_v32 = vpop.f32.mrb[28].mxu0 }
 0x16f   : > { %v1794_v33 = vpop.f32.mrb[29].mxu0  ;;  %v1306_v51 = vld [vmem:[#allocation2 + $0x10] sm:$0xff] (!%p1636_p13) }
 0x170   : > { %1296 = vst [vmem:[#allocation2 + $0x20] sm:$0xff] %v1288_v29  ;;  %v1289_v34 = vadd.f32 %v1273_v31, %v397_v28  ;;  %v1795_v35 = vadd.f32 %v1794_v33, %v1793_v32  ;;  %v1796_v36 = vpop.f32.mrb[30].mxu0 }
 0x171   : > { %v1797_v37 = vpop.f32.mrb[31].mxu0  ;;  %v1307_v52 = vld [vmem:[#allocation2 + $0x18] sm:$0xff] (!%p1636_p13) }
 0x172   : > { %1297 = vst [vmem:[#allocation2 + $0x28] sm:$0xff] %v1289_v34  ;;  %v1213_v38 = vadd.f32 %v1795_v35, %v2302_v41  ;;  %v1798_v39 = vadd.f32 %v1797_v37, %v1796_v36  ;;  %v1637_v41 = vld [vmem:[%s2341_s2] ss:$0 sm:$0xff] (!%p1636_p13) }
 0x173   : > { %v1319_v49 = vadd.f32 (!%p1636_p13), %v1637_v41, %v1304_v47  ;;  %v1320_v50 = vadd.f32 (!%p1636_p13), %v1637_v41, %v1305_v48  ;;  %v1321_v53 = vadd.f32 (!%p1636_p13), %v1637_v41, %v1306_v51  ;;  %v1322_v54 = vadd.f32 (!%p1636_p13), %v1637_v41, %v1307_v52 }
 0x174   : > { %v1278_v27 = vadd.f32 %v1833_v0, %v1213_v38  ;;  %v1216_v42 = vadd.f32 %v1798_v39, %v2304_v44  ;;  %1303 = sbr.rel (%p1636_p13) target bundleno = 393 (0x189), region = 66 }
 0x175   : > { %v1327_v59 = vmax.f32 (!%p1636_p13), %v1319_v49, 0.0  ;;  %v1328_v60 = vmax.f32 (!%p1636_p13), %v1320_v50, 0.0  ;;  %v1329_v63 = vmax.f32 (!%p1636_p13), %v1321_v53, 0.0  ;;  %v1330_v1 = vmax.f32 (!%p1636_p13), %v1322_v54, 0.0 }
 0x176   : > { %v1290_v30 = vadd.f32 %v1278_v27, %v398_v40  ;;  %v1281_v45 = vadd.f32 %v1834_v2, %v1216_v42 }
 0x177   : > { %v1308_v44 = vld [vmem:[#allocation2 + $0x20] sm:$0xff] (!%p1636_p13)  ;;  %v1659_v5 = vpack.c.bf16 (!%p1636_p13), %v1328_v60, %v1327_v59  ;;  %v1664_v0 = vpack.c.bf16 (!%p1636_p13), %v1330_v1, %v1329_v63 }
 0x178   : > { %1298 = vst [vmem:[#allocation2 + $0x30] sm:$0xff] %v1290_v30  ;;  %v1291_v46 = vadd.f32 %v1281_v45, %v399_v43  ;;  %v1323_v56 = vadd.f32 (!%p1636_p13), %v1637_v41, %v1308_v44 }
 0x179   : > { %v1309_v55 = vld [vmem:[#allocation2 + $0x28] sm:$0xff] (!%p1636_p13)  ;;  %1660 = vst [vmem:[%s2209_s30] sm:$0xff] (!%p1636_p13), %v1659_v5   ;;  %1676 = vst [vmem:[%s2209_s30 + $0x8] sm:$0xff] (!%p1636_p13), %v1664_v0  }
 0x17a   : > { %1299 = vst [vmem:[#allocation2 + $0x38] sm:$0xff] %v1291_v46  ;;  %v1324_v61 = vadd.f32 (!%p1636_p13), %v1637_v41, %v1309_v55  ;;  %v1331_v3 = vmax.f32 (!%p1636_p13), %v1323_v56, 0.0 }
 0x17c   : > { %v1332_v6 = vmax.f32 %v1324_v61, 0.0 }
 0x17e   : > { %v1669_v9 = vpack.c.bf16 %v1332_v6, %v1331_v3 }
 0x17f   : > { %v1310_v57 = vld [vmem:[#allocation2 + $0x30] sm:$0xff] }
 0x180   : > { %v1325_v62 = vadd.f32 %v1637_v41, %v1310_v57  ;;  %1677 = vst [vmem:[%s2209_s30 + $0x10] sm:$0xff] %v1669_v9  }
 0x181   : > { %v1311_v58 = vld [vmem:[#allocation2 + $0x38] sm:$0xff] }
 0x182   : > { %v1326_v4 = vadd.f32 %v1637_v41, %v1311_v58  ;;  %v1333_v7 = vmax.f32 %v1325_v62, 0.0 }
 0x184   : > { %v1334_v8 = vmax.f32 %v1326_v4, 0.0 }
 0x186   : > { %v1674_v10 = vpack.c.bf16 %v1334_v8, %v1333_v7 }
 0x188   : > { %1678 = vst [vmem:[%s2209_s30 + $0x18] sm:$0xff] %v1674_v10  }
 0x189 PF: > { %s13_s18 = sadd.s32 1, %s2045_s18   ;;  %s2343_s12 = smov %s2025_s13 }
 0x18a   : > { %p10_p0 = scmp.ge.s32.totalorder %s13_s18, 8   ;;  %s2344_s13 = smov %s2119_s25 }
 0x18b   : > { %s2345_s14 = smov %s2037_s16  ;;  %s2346_s15 = smov %s2041_s17 }
 0x18c   : > { %s2347_s16 = smov %s2350_s19  ;;  %s2348_s17 = smov %s2354_s20 }
 0x18d   :  { %12 = sbr.rel (!%p10_p0) target bundleno = 4 (0x4), region = 113 }

// kernel: squeeze.6
= control target key start
LH: loop header
LB: loop body
LE: loop exit
PB: predicated region body
PF: predicated region fallthrough
CT: control target
= control target key end

     0   :  { %v259_v9 = vmov 0.0   ;;  %s324_s0 = inlined_call_operand.vmem [shape: bf16[1,16,256], index: 0, kind: input, shape index: {}]   ;;  %s325_s1 = inlined_call_operand.vmem [shape: bf16[2,2,2,2,256], index: 1, kind: output, shape index: {}]  }
   0x1   :  { %v257_v0 = vld [vmem:[%s324_s0 + $0x8] sm:$0xff]   ;;  %v254_v1 = vld [vmem:[%s324_s0] sm:$0xff]  }
   0x2   :  { %v251_v2 = vunpack.c.l.bf16 %v257_v0  ;;  %v252_v3 = vunpack.c.h.bf16 %v257_v0  ;;  %v255_v4 = vunpack.c.l.bf16 %v254_v1  ;;  %v256_v5 = vunpack.c.h.bf16 %v254_v1 }
   0x4   :  { %66 = vst [vmem:[#allocation0] ss:$46 sps:$4 sm:$0xc3] %v255_v4   ;;  %68 = vst [vmem:[#allocation0 + $0xe] ss:$18 sps:$4 sm:$0x3c] %v255_v4  }
   0x5   :  { %76 = vst [vmem:[#allocation0 + $0x8] ss:$46 sps:$4 sm:$0xc3] %v256_v5   ;;  %78 = vst [vmem:[#allocation0 + $0x16] ss:$18 sps:$4 sm:$0x3c] %v256_v5  }
   0x6   :  { %86 = vst [vmem:[#allocation0 + $0x40] ss:$46 sps:$4 sm:$0xc3] %v251_v2   ;;  %88 = vst [vmem:[#allocation0 + $0x4e] ss:$18 sps:$4 sm:$0x3c] %v251_v2  }
   0x7   :  { %96 = vst [vmem:[#allocation0 + $0x48] ss:$46 sps:$4 sm:$0xc3] %v252_v3   ;;  %98 = vst [vmem:[#allocation0 + $0x56] ss:$18 sps:$4 sm:$0x3c] %v252_v3  }
   0xb   :  { %v107_v6 = vld [vmem:[#allocation0] sm:$0x3]  ;;  %v118_v8 = vld [vmem:[#allocation0 + $0x10] sm:$0x3] }
   0xc   :  { %v112_v7 = vld [vmem:[#allocation0 + $0x8] sm:$0x3]  ;;  %v108_v10 = vpack.c.bf16 %v259_v9, %v107_v6  ;;  %v119_v12 = vpack.c.bf16 %v259_v9, %v118_v8  ;;  %v125_v13 = vld [vmem:[#allocation0 + $0x18] sm:$0x3]  ;;  %v132_v14 = vld [vmem:[#allocation0 + $0x20] sm:$0x3] }
   0xd   :  { %v113_v11 = vpack.c.bf16 %v259_v9, %v112_v7  ;;  %v139_v15 = vld [vmem:[#allocation0 + $0x28] sm:$0x3]  ;;  %v126_v16 = vpack.c.bf16 %v259_v9, %v125_v13  ;;  %v133_v17 = vpack.c.bf16 %v259_v9, %v132_v14  ;;  %v146_v19 = vld [vmem:[#allocation0 + $0x30] sm:$0x3]  ;;  %v153_v20 = vld [vmem:[#allocation0 + $0x38] sm:$0x3] }
   0xe   :  { %v140_v18 = vpack.c.bf16 %v259_v9, %v139_v15  ;;  %v160_v21 = vld [vmem:[#allocation0 + $0x40] sm:$0x3]  ;;  %110 = vst [vmem:[%s325_s1] sm:$0x1] %v108_v10  ;;  %235 = vst [vmem:[%s325_s1 + $0x2] sm:$0x1] %v119_v12  ;;  %v147_v22 = vpack.c.bf16 %v259_v9, %v146_v19  ;;  %v154_v23 = vpack.c.bf16 %v259_v9, %v153_v20 }
   0xf   :  { %234 = vst [vmem:[%s325_s1 + $0x1] sm:$0x1] %v113_v11  ;;  %v161_v24 = vpack.c.bf16 %v259_v9, %v160_v21  ;;  %v167_v25 = vld [vmem:[#allocation0 + $0x48] sm:$0x3]  ;;  %v174_v26 = vld [vmem:[#allocation0 + $0x50] sm:$0x3] }
  0x10   :  { %v181_v27 = vld [vmem:[#allocation0 + $0x58] sm:$0x3]  ;;  %236 = vst [vmem:[%s325_s1 + $0x3] sm:$0x1] %v126_v16  ;;  %237 = vst [vmem:[%s325_s1 + $0x4] sm:$0x1] %v133_v17  ;;  %v168_v28 = vpack.c.bf16 %v259_v9, %v167_v25  ;;  %v175_v29 = vpack.c.bf16 %v259_v9, %v174_v26 }
  0x11   :  { %238 = vst [vmem:[%s325_s1 + $0x5] sm:$0x1] %v140_v18  ;;  %v182_v30 = vpack.c.bf16 %v259_v9, %v181_v27  ;;  %v188_v31 = vld [vmem:[#allocation0 + $0x60] sm:$0x3]  ;;  %v195_v32 = vld [vmem:[#allocation0 + $0x68] sm:$0x3] }
  0x12   :  { %v202_v33 = vld [vmem:[#allocation0 + $0x70] sm:$0x3]  ;;  %239 = vst [vmem:[%s325_s1 + $0x6] sm:$0x1] %v147_v22  ;;  %240 = vst [vmem:[%s325_s1 + $0x7] sm:$0x1] %v154_v23  ;;  %v189_v34 = vpack.c.bf16 %v259_v9, %v188_v31  ;;  %v196_v35 = vpack.c.bf16 %v259_v9, %v195_v32 }
  0x13   :  { %241 = vst [vmem:[%s325_s1 + $0x8] sm:$0x1] %v161_v24  ;;  %v203_v36 = vpack.c.bf16 %v259_v9, %v202_v33  ;;  %v209_v37 = vld [vmem:[#allocation0 + $0x78] sm:$0x3]  ;;  %242 = vst [vmem:[%s325_s1 + $0x9] sm:$0x1] %v168_v28 }
  0x14   :  { %243 = vst [vmem:[%s325_s1 + $0xa] sm:$0x1] %v175_v29  ;;  %244 = vst [vmem:[%s325_s1 + $0xb] sm:$0x1] %v182_v30  ;;  %v210_v38 = vpack.c.bf16 %v259_v9, %v209_v37 }
  0x15   :  { %245 = vst [vmem:[%s325_s1 + $0xc] sm:$0x1] %v189_v34  ;;  %246 = vst [vmem:[%s325_s1 + $0xd] sm:$0x1] %v196_v35 }
  0x16   :  { %247 = vst [vmem:[%s325_s1 + $0xe] sm:$0x1] %v203_v36  ;;  %248 = vst [vmem:[%s325_s1 + $0xf] sm:$0x1] %v210_v38 }

// kernel: autoencoder_cov3d_mem_forward.11
= control target key start
LH: loop header
LB: loop body
LE: loop exit
PB: predicated region body
PF: predicated region fallthrough
CT: control target
= control target key end

     0   :  { %s3038_s0 = inlined_call_operand.vmem [shape: bf16[1,16,3456], index: 0, kind: input, shape index: {}]   ;;  %s3039_s1 = inlined_call_operand.vmem [shape: bf16[1,3456,256], index: 1, kind: input, shape index: {}]   ;;  %s3040_s2 = inlined_call_operand.vmem [shape: f32[1,256], index: 2, kind: input, shape index: {}]   ;;  %s3041_s3 = inlined_call_operand.vmem [shape: bf16[1,16,256], index: 3, kind: output, shape index: {}]  }
   0x1   :  { %3043 = sst [smem:[#allocation7_spill]] %s3038_s0 }
   0x2   :  { %3044 = sst [smem:[#allocation8_spill]] %s3039_s1 }
   0x3   :  { %s2483_s12 = smov 0   ;;  %s2485_s13 = smov 0  }
   0x4   :  { %s2487_s14 = smov 0   ;;  %s2489_s15 = smov 0  }
   0x5   :  { %s2491_s16 = smov 0   ;;  %s2493_s17 = smov 0  }
   0x6   :  { %s2495_s18 = smov 0   ;;  %s2497_s19 = smov 0  }
   0x7   :  { %s2499_s20 = smov 0   ;;  %s2501_s21 = smov 0  }
   0x8   :  { %s2503_s22 = smov 0  }
   0x9 LB: > { %s1963_s23 = sadd.s32 4294967295, %s2458_s22   ;;  %s28_s24 = sadd.s32 1, %s2450_s20  ;;  %s2458_s22 = sphi %s2503_s22, %s13_s22   ;;  %s2454_s21 = sphi %s2501_s21, %s3061_s21   ;;  %s2450_s20 = sphi %s2499_s20, %s3060_s20   ;;  %s2446_s19 = sphi %s2497_s19, %s3059_s19   ;;  %s2442_s18 = sphi %s2495_s18, %s3058_s18   ;;  %s2438_s17 = sphi %s2493_s17, %s3057_s17   ;;  %s2434_s16 = sphi %s2491_s16, %s3056_s16   ;;  %s2430_s15 = sphi %s2489_s15, %s3055_s15   ;;  %s2426_s14 = sphi %s2487_s14, %s3054_s14   ;;  %s2422_s13 = sphi %s2485_s13, %s3053_s13   ;;  %s2418_s12 = sphi %s2483_s12, %s3052_s12  }
   0xa   : > { %p29_p0 = scmp.ge.s32.totalorder %s28_s24, 3  ;;  %s31_s25 = sadd.s32 1, %s2454_s21 }
   0xb   : > { %s50_s26 = sadd.s32 1, %s2438_s17  ;;  %p57_p1 = scmp.ne.s32.totalorder %s2438_s17, %s2434_s16 }
   0xc   : > { %s3063_s24 = smov (%p29_p0, %s28_s24), 0  ;;  %s3065_s25 = smov (!%p29_p0, %s31_s25), %s2454_s21 }
   0xd   : > { %s46_s27 = ssub.s32 %s2450_s20, %s3063_s24  ;;  %p58_p2 = scmp.eq.s32.totalorder %s2458_s22, 0 }
   0xe   : > { %p33_p3 = scmp.ge.s32.totalorder %s3065_s25, 2  ;;  %p48_p4 = scmp.eq.s32.totalorder %s46_s27, 0 }
   0xf   : > { %p2550_p5 = por %p58_p2, %p57_p1  ;;  %s80_s29 = sadd.s32 1, %s2430_s15 }
  0x10   : > { %s3067_s25 = smov (%p33_p3, %s3065_s25), 0  ;;  %p87_p6 = scmp.ne.s32.totalorder %s2430_s15, %s2426_s14 }
  0x11   : > { %3046 = sst [smem:[#allocation6_spill]] %s3067_s25  ;;  %s76_s4 = ssub.s32 %s2454_s21, %s3067_s25 }
  0x12   : > { %s2558_s30 = scalar_select %p48_p4, %s2438_s17, %s50_s26  }
  0x13   : > { %s77_s5 = sor.u32 %s76_s4, %s46_s27  ;;  %p134_p7 = scmp.eq.s32.totalorder %s76_s4, 0 }
  0x14   : > { %p78_p8 = scmp.eq.s32.totalorder %s77_s5, 0  ;;  %p2564_p9 = por %p87_p6, %p58_p2 }
  0x15   : > { %s136_s7 = sadd.s32 1, %s2422_s13  ;;  %p146_p10 = scmp.ne.s32.totalorder %s2422_s13, %s2418_s12 }
  0x16   : > { %s2572_s8 = scalar_select %p78_p8, %s2430_s15, %s80_s29  }
  0x17   : > { %s2575_s9 = scalar_select %p134_p7, %s2422_s13, %s136_s7  }
  0x18   : > { %p147_p11 = scmp.eq.s32.totalorder %s1963_s23, 5  ;;  %p1966_p13 = scmp.ge.s32.totalorder %s2458_s22, 6 }
  0x1a   : > { %p2577_p12 = por %p147_p11, %p146_p10  ;;  %169 = sbr.rel (%p1966_p13) target bundleno = 152 (0x98), region = 16 }
  0x21   : > { %172 = sbr.rel (!%p2550_p5) target bundleno = 47 (0x2f), region = 20  ;;  %s174_s11 = sand.u32 (%p2550_p5), 1, %s2438_s17  }
  0x22   : > { %s2066_s26 = smul.u32 (%p2550_p5), 36, %s2450_s20  ;;  %s3049_s0 = sld [smem:[#allocation7_spill]] (%p2550_p5) }
  0x23   : > { %s2192_s27 = smul.u32 (%p2550_p5), 72, %s174_s11 }
  0x25   : > { %s176_s23 = scalar_lea.vmem (%p2550_p5), [#allocation3], %s2192_s27 }
  0x28   : > { %s184_s5 = scalar_lea.vmem %s3049_s0, %s2066_s26 }
  0x29   : > { %v199_v0 = vld [vmem:[%s184_s5] sm:$0xff]  ;;  %v201_v1 = vld [vmem:[%s184_s5 + $0x8] sm:$0xff]  ;;  %v203_v2 = vld [vmem:[%s184_s5 + $0x10] sm:$0xff] }
  0x2a   : > { %200 = vst [vmem:[%s176_s23] sm:$0xff] %v199_v0  ;;  %202 = vst [vmem:[%s176_s23 + $0x8] sm:$0xff] %v201_v1  ;;  %v205_v3 = vld [vmem:[%s184_s5 + $0x18] sm:$0xff]  ;;  %v207_v4 = vld [vmem:[%s184_s5 + $0x6c] sm:$0xff] }
  0x2b   : > { %204 = vst [vmem:[%s176_s23 + $0x10] sm:$0xff] %v203_v2  ;;  %v209_v5 = vld [vmem:[%s184_s5 + $0x74] sm:$0xff]  ;;  %206 = vst [vmem:[%s176_s23 + $0x18] sm:$0xff] %v205_v3  ;;  %v211_v6 = vld [vmem:[%s184_s5 + $0x7c] sm:$0xff] }
  0x2c   : > { %208 = vst [vmem:[%s176_s23 + $0x24] sm:$0xff] %v207_v4  ;;  %210 = vst [vmem:[%s176_s23 + $0x2c] sm:$0xff] %v209_v5  ;;  %v213_v7 = vld [vmem:[%s184_s5 + $0x84] sm:$0xff]  ;;  %v1968_v8 = vld [vmem:[%s184_s5 + $0x20] sm:$0xf] }
  0x2d   : > { %212 = vst [vmem:[%s176_s23 + $0x34] sm:$0xff] %v211_v6  ;;  %214 = vst [vmem:[%s176_s23 + $0x3c] sm:$0xff] %v213_v7  ;;  %v1970_v9 = vld [vmem:[%s184_s5 + $0x8c] sm:$0xf] }
  0x2e   : > { %1969 = vst [vmem:[%s176_s23 + $0x20] sm:$0xf] %v1968_v8  ;;  %1971 = vst [vmem:[%s176_s23 + $0x44] sm:$0xf] %v1970_v9 }
  0x2f PF: > { %231 = sbr.rel (!%p2564_p9) target bundleno = 152 (0x98), region = 46  ;;  %s233_s28 = sand.u32 (%p2564_p9), 1, %s2430_s15  }
  0x30   : > { %s2067_s7 = smul.u32 (%p2564_p9), 288, %s2450_s20  ;;  %s3050_s1 = sld [smem:[#allocation8_spill]] (%p2564_p9) }
  0x31   : > { %s2193_s11 = smul.u32 (%p2564_p9), 576, %s233_s28 }
  0x32   : > { %s238_s26 = sadd.s32 (%p2564_p9), %s2454_s21, %s2067_s7 }
  0x33   : > { %s1973_s27 = sshll.u32 (%p2564_p9), %s238_s26, 2  ;;  %s2602_s6 = scalar_lea.vmem (%p2564_p9), [#allocation4], %s2193_s11 }
  0x36   : > { %s2597_s0 = scalar_lea.vmem %s3050_s1, %s1973_s27 }
  0x37   : > { %v258_v10 = vld [vmem:[%s2597_s0] sm:$0xf]  ;;  %v260_v11 = vld [vmem:[%s2597_s0 + $0x8] sm:$0xf]  ;;  %v262_v12 = vld [vmem:[%s2597_s0 + $0x10] sm:$0xf] }
  0x38   : > { %259 = vst [vmem:[%s2602_s6] sm:$0xf] %v258_v10  ;;  %261 = vst [vmem:[%s2602_s6 + $0x4] sm:$0xf] %v260_v11  ;;  %v264_v13 = vld [vmem:[%s2597_s0 + $0x18] sm:$0xf] }
  0x39   : > { %263 = vst [vmem:[%s2602_s6 + $0x8] sm:$0xf] %v262_v12  ;;  %v266_v14 = vld [vmem:[%s2597_s0 + $0x20] sm:$0xf]  ;;  %v268_v15 = vld [vmem:[%s2597_s0 + $0x28] sm:$0xf] }
  0x3a   : > { %265 = vst [vmem:[%s2602_s6 + $0xc] sm:$0xf] %v264_v13  ;;  %267 = vst [vmem:[%s2602_s6 + $0x10] sm:$0xf] %v266_v14  ;;  %v270_v16 = vld [vmem:[%s2597_s0 + $0x30] sm:$0xf] }
  0x3b   : > { %269 = vst [vmem:[%s2602_s6 + $0x14] sm:$0xf] %v268_v15  ;;  %v272_v17 = vld [vmem:[%s2597_s0 + $0x38] sm:$0xf]  ;;  %v274_v18 = vld [vmem:[%s2597_s0 + $0x40] sm:$0xf] }
  0x3c   : > { %271 = vst [vmem:[%s2602_s6 + $0x18] sm:$0xf] %v270_v16  ;;  %273 = vst [vmem:[%s2602_s6 + $0x1c] sm:$0xf] %v272_v17  ;;  %v276_v19 = vld [vmem:[%s2597_s0 + $0x48] sm:$0xf] }
  0x3d   : > { %275 = vst [vmem:[%s2602_s6 + $0x20] sm:$0xf] %v274_v18  ;;  %v278_v20 = vld [vmem:[%s2597_s0 + $0x50] sm:$0xf]  ;;  %v280_v21 = vld [vmem:[%s2597_s0 + $0x58] sm:$0xf] }
  0x3e   : > { %277 = vst [vmem:[%s2602_s6 + $0x24] sm:$0xf] %v276_v19  ;;  %279 = vst [vmem:[%s2602_s6 + $0x28] sm:$0xf] %v278_v20  ;;  %v282_v22 = vld [vmem:[%s2597_s0 + $0x60] sm:$0xf] }
  0x3f   : > { %281 = vst [vmem:[%s2602_s6 + $0x2c] sm:$0xf] %v280_v21  ;;  %v284_v23 = vld [vmem:[%s2597_s0 + $0x68] sm:$0xf]  ;;  %v286_v24 = vld [vmem:[%s2597_s0 + $0x70] sm:$0xf] }
  0x40   : > { %283 = vst [vmem:[%s2602_s6 + $0x30] sm:$0xf] %v282_v22  ;;  %285 = vst [vmem:[%s2602_s6 + $0x34] sm:$0xf] %v284_v23  ;;  %v288_v25 = vld [vmem:[%s2597_s0 + $0x78] sm:$0xf] }
  0x41   : > { %287 = vst [vmem:[%s2602_s6 + $0x38] sm:$0xf] %v286_v24  ;;  %v290_v26 = vld [vmem:[%s2597_s0 + $0x80] sm:$0xf]  ;;  %v292_v27 = vld [vmem:[%s2597_s0 + $0x88] sm:$0xf] }
  0x42   : > { %289 = vst [vmem:[%s2602_s6 + $0x3c] sm:$0xf] %v288_v25  ;;  %291 = vst [vmem:[%s2602_s6 + $0x40] sm:$0xf] %v290_v26  ;;  %v294_v28 = vld [vmem:[%s2597_s0 + $0x90] sm:$0xf] }
  0x43   : > { %293 = vst [vmem:[%s2602_s6 + $0x44] sm:$0xf] %v292_v27  ;;  %v296_v29 = vld [vmem:[%s2597_s0 + $0x98] sm:$0xf]  ;;  %v298_v30 = vld [vmem:[%s2597_s0 + $0xa0] sm:$0xf] }
  0x44   : > { %295 = vst [vmem:[%s2602_s6 + $0x48] sm:$0xf] %v294_v28  ;;  %297 = vst [vmem:[%s2602_s6 + $0x4c] sm:$0xf] %v296_v29  ;;  %v300_v31 = vld [vmem:[%s2597_s0 + $0xa8] sm:$0xf] }
  0x45   : > { %299 = vst [vmem:[%s2602_s6 + $0x50] sm:$0xf] %v298_v30  ;;  %v302_v32 = vld [vmem:[%s2597_s0 + $0xb0] sm:$0xf]  ;;  %v304_v33 = vld [vmem:[%s2597_s0 + $0xb8] sm:$0xf] }
  0x46   : > { %301 = vst [vmem:[%s2602_s6 + $0x54] sm:$0xf] %v300_v31  ;;  %303 = vst [vmem:[%s2602_s6 + $0x58] sm:$0xf] %v302_v32  ;;  %v306_v34 = vld [vmem:[%s2597_s0 + $0xc0] sm:$0xf] }
  0x47   : > { %305 = vst [vmem:[%s2602_s6 + $0x5c] sm:$0xf] %v304_v33  ;;  %v308_v35 = vld [vmem:[%s2597_s0 + $0xc8] sm:$0xf]  ;;  %v310_v36 = vld [vmem:[%s2597_s0 + $0xd0] sm:$0xf] }
  0x48   : > { %307 = vst [vmem:[%s2602_s6 + $0x60] sm:$0xf] %v306_v34  ;;  %309 = vst [vmem:[%s2602_s6 + $0x64] sm:$0xf] %v308_v35  ;;  %v312_v37 = vld [vmem:[%s2597_s0 + $0xd8] sm:$0xf] }
  0x49   : > { %311 = vst [vmem:[%s2602_s6 + $0x68] sm:$0xf] %v310_v36  ;;  %v314_v38 = vld [vmem:[%s2597_s0 + $0xe0] sm:$0xf]  ;;  %v316_v39 = vld [vmem:[%s2597_s0 + $0xe8] sm:$0xf] }
  0x4a   : > { %313 = vst [vmem:[%s2602_s6 + $0x6c] sm:$0xf] %v312_v37  ;;  %315 = vst [vmem:[%s2602_s6 + $0x70] sm:$0xf] %v314_v38  ;;  %v318_v40 = vld [vmem:[%s2597_s0 + $0xf0] sm:$0xf] }
  0x4b   : > { %317 = vst [vmem:[%s2602_s6 + $0x74] sm:$0xf] %v316_v39  ;;  %v320_v41 = vld [vmem:[%s2597_s0 + $0xf8] sm:$0xf]  ;;  %v322_v42 = vld [vmem:[%s2597_s0 + $0x100] sm:$0xf] }
  0x4c   : > { %319 = vst [vmem:[%s2602_s6 + $0x78] sm:$0xf] %v318_v40  ;;  %321 = vst [vmem:[%s2602_s6 + $0x7c] sm:$0xf] %v320_v41  ;;  %v324_v43 = vld [vmem:[%s2597_s0 + $0x108] sm:$0xf] }
  0x4d   : > { %323 = vst [vmem:[%s2602_s6 + $0x80] sm:$0xf] %v322_v42  ;;  %v326_v44 = vld [vmem:[%s2597_s0 + $0x110] sm:$0xf]  ;;  %v328_v45 = vld [vmem:[%s2597_s0 + $0x118] sm:$0xf] }
  0x4e   : > { %325 = vst [vmem:[%s2602_s6 + $0x84] sm:$0xf] %v324_v43  ;;  %327 = vst [vmem:[%s2602_s6 + $0x88] sm:$0xf] %v326_v44  ;;  %v330_v46 = vld [vmem:[%s2597_s0 + $0x120] sm:$0xf] }
  0x4f   : > { %329 = vst [vmem:[%s2602_s6 + $0x8c] sm:$0xf] %v328_v45  ;;  %v332_v47 = vld [vmem:[%s2597_s0 + $0x128] sm:$0xf]  ;;  %v334_v48 = vld [vmem:[%s2597_s0 + $0x130] sm:$0xf] }
  0x50   : > { %331 = vst [vmem:[%s2602_s6 + $0x90] sm:$0xf] %v330_v46  ;;  %333 = vst [vmem:[%s2602_s6 + $0x94] sm:$0xf] %v332_v47  ;;  %v336_v49 = vld [vmem:[%s2597_s0 + $0x138] sm:$0xf] }
  0x51   : > { %335 = vst [vmem:[%s2602_s6 + $0x98] sm:$0xf] %v334_v48  ;;  %v338_v50 = vld [vmem:[%s2597_s0 + $0x140] sm:$0xf]  ;;  %v340_v51 = vld [vmem:[%s2597_s0 + $0x148] sm:$0xf] }
  0x52   : > { %337 = vst [vmem:[%s2602_s6 + $0x9c] sm:$0xf] %v336_v49  ;;  %339 = vst [vmem:[%s2602_s6 + $0xa0] sm:$0xf] %v338_v50  ;;  %v342_v52 = vld [vmem:[%s2597_s0 + $0x150] sm:$0xf] }
  0x53   : > { %341 = vst [vmem:[%s2602_s6 + $0xa4] sm:$0xf] %v340_v51  ;;  %v344_v53 = vld [vmem:[%s2597_s0 + $0x158] sm:$0xf]  ;;  %v346_v54 = vld [vmem:[%s2597_s0 + $0x160] sm:$0xf] }
  0x54   : > { %343 = vst [vmem:[%s2602_s6 + $0xa8] sm:$0xf] %v342_v52  ;;  %345 = vst [vmem:[%s2602_s6 + $0xac] sm:$0xf] %v344_v53  ;;  %v348_v55 = vld [vmem:[%s2597_s0 + $0x168] sm:$0xf] }
  0x55   : > { %347 = vst [vmem:[%s2602_s6 + $0xb0] sm:$0xf] %v346_v54  ;;  %v350_v56 = vld [vmem:[%s2597_s0 + $0x170] sm:$0xf]  ;;  %v352_v57 = vld [vmem:[%s2597_s0 + $0x178] sm:$0xf] }
  0x56   : > { %349 = vst [vmem:[%s2602_s6 + $0xb4] sm:$0xf] %v348_v55  ;;  %351 = vst [vmem:[%s2602_s6 + $0xb8] sm:$0xf] %v350_v56  ;;  %v354_v58 = vld [vmem:[%s2597_s0 + $0x180] sm:$0xf] }
  0x57   : > { %353 = vst [vmem:[%s2602_s6 + $0xbc] sm:$0xf] %v352_v57  ;;  %v356_v59 = vld [vmem:[%s2597_s0 + $0x188] sm:$0xf]  ;;  %v358_v60 = vld [vmem:[%s2597_s0 + $0x190] sm:$0xf] }
  0x58   : > { %355 = vst [vmem:[%s2602_s6 + $0xc0] sm:$0xf] %v354_v58  ;;  %357 = vst [vmem:[%s2602_s6 + $0xc4] sm:$0xf] %v356_v59  ;;  %v360_v61 = vld [vmem:[%s2597_s0 + $0x198] sm:$0xf] }
  0x59   : > { %359 = vst [vmem:[%s2602_s6 + $0xc8] sm:$0xf] %v358_v60  ;;  %v362_v62 = vld [vmem:[%s2597_s0 + $0x1a0] sm:$0xf]  ;;  %v364_v63 = vld [vmem:[%s2597_s0 + $0x1a8] sm:$0xf] }
  0x5a   : > { %361 = vst [vmem:[%s2602_s6 + $0xcc] sm:$0xf] %v360_v61  ;;  %363 = vst [vmem:[%s2602_s6 + $0xd0] sm:$0xf] %v362_v62  ;;  %v366_v0 = vld [vmem:[%s2597_s0 + $0x1b0] sm:$0xf] }
  0x5b   : > { %365 = vst [vmem:[%s2602_s6 + $0xd4] sm:$0xf] %v364_v63  ;;  %v368_v1 = vld [vmem:[%s2597_s0 + $0x1b8] sm:$0xf]  ;;  %v370_v2 = vld [vmem:[%s2597_s0 + $0x1c0] sm:$0xf] }
  0x5c   : > { %367 = vst [vmem:[%s2602_s6 + $0xd8] sm:$0xf] %v366_v0  ;;  %369 = vst [vmem:[%s2602_s6 + $0xdc] sm:$0xf] %v368_v1  ;;  %v372_v3 = vld [vmem:[%s2597_s0 + $0x1c8] sm:$0xf] }
  0x5d   : > { %371 = vst [vmem:[%s2602_s6 + $0xe0] sm:$0xf] %v370_v2  ;;  %v374_v4 = vld [vmem:[%s2597_s0 + $0x1d0] sm:$0xf]  ;;  %v376_v5 = vld [vmem:[%s2597_s0 + $0x1d8] sm:$0xf] }
  0x5e   : > { %373 = vst [vmem:[%s2602_s6 + $0xe4] sm:$0xf] %v372_v3  ;;  %375 = vst [vmem:[%s2602_s6 + $0xe8] sm:$0xf] %v374_v4  ;;  %v378_v6 = vld [vmem:[%s2597_s0 + $0x1e0] sm:$0xf] }
  0x5f   : > { %377 = vst [vmem:[%s2602_s6 + $0xec] sm:$0xf] %v376_v5  ;;  %v380_v7 = vld [vmem:[%s2597_s0 + $0x1e8] sm:$0xf]  ;;  %v382_v8 = vld [vmem:[%s2597_s0 + $0x1f0] sm:$0xf] }
  0x60   : > { %379 = vst [vmem:[%s2602_s6 + $0xf0] sm:$0xf] %v378_v6  ;;  %381 = vst [vmem:[%s2602_s6 + $0xf4] sm:$0xf] %v380_v7  ;;  %v384_v9 = vld [vmem:[%s2597_s0 + $0x1f8] sm:$0xf] }
  0x61   : > { %383 = vst [vmem:[%s2602_s6 + $0xf8] sm:$0xf] %v382_v8  ;;  %v386_v10 = vld [vmem:[%s2597_s0 + $0x200] sm:$0xf]  ;;  %v388_v11 = vld [vmem:[%s2597_s0 + $0x208] sm:$0xf] }
  0x62   : > { %385 = vst [vmem:[%s2602_s6 + $0xfc] sm:$0xf] %v384_v9  ;;  %387 = vst [vmem:[%s2602_s6 + $0x100] sm:$0xf] %v386_v10  ;;  %v390_v12 = vld [vmem:[%s2597_s0 + $0x210] sm:$0xf] }
  0x63   : > { %389 = vst [vmem:[%s2602_s6 + $0x104] sm:$0xf] %v388_v11  ;;  %v392_v13 = vld [vmem:[%s2597_s0 + $0x218] sm:$0xf]  ;;  %v394_v14 = vld [vmem:[%s2597_s0 + $0x220] sm:$0xf] }
  0x64   : > { %391 = vst [vmem:[%s2602_s6 + $0x108] sm:$0xf] %v390_v12  ;;  %393 = vst [vmem:[%s2602_s6 + $0x10c] sm:$0xf] %v392_v13  ;;  %v396_v15 = vld [vmem:[%s2597_s0 + $0x228] sm:$0xf] }
  0x65   : > { %395 = vst [vmem:[%s2602_s6 + $0x110] sm:$0xf] %v394_v14  ;;  %v398_v16 = vld [vmem:[%s2597_s0 + $0x230] sm:$0xf]  ;;  %v400_v17 = vld [vmem:[%s2597_s0 + $0x238] sm:$0xf] }
  0x66   : > { %397 = vst [vmem:[%s2602_s6 + $0x114] sm:$0xf] %v396_v15  ;;  %399 = vst [vmem:[%s2602_s6 + $0x118] sm:$0xf] %v398_v16  ;;  %v402_v18 = vld [vmem:[%s2597_s0 + $0x240] sm:$0xf] }
  0x67   : > { %401 = vst [vmem:[%s2602_s6 + $0x11c] sm:$0xf] %v400_v17  ;;  %v404_v19 = vld [vmem:[%s2597_s0 + $0x248] sm:$0xf]  ;;  %v406_v20 = vld [vmem:[%s2597_s0 + $0x250] sm:$0xf] }
  0x68   : > { %403 = vst [vmem:[%s2602_s6 + $0x120] sm:$0xf] %v402_v18  ;;  %405 = vst [vmem:[%s2602_s6 + $0x124] sm:$0xf] %v404_v19  ;;  %v408_v21 = vld [vmem:[%s2597_s0 + $0x258] sm:$0xf] }
  0x69   : > { %407 = vst [vmem:[%s2602_s6 + $0x128] sm:$0xf] %v406_v20  ;;  %v410_v22 = vld [vmem:[%s2597_s0 + $0x260] sm:$0xf]  ;;  %v412_v23 = vld [vmem:[%s2597_s0 + $0x268] sm:$0xf] }
  0x6a   : > { %409 = vst [vmem:[%s2602_s6 + $0x12c] sm:$0xf] %v408_v21  ;;  %411 = vst [vmem:[%s2602_s6 + $0x130] sm:$0xf] %v410_v22  ;;  %v414_v24 = vld [vmem:[%s2597_s0 + $0x270] sm:$0xf] }
  0x6b   : > { %413 = vst [vmem:[%s2602_s6 + $0x134] sm:$0xf] %v412_v23  ;;  %v416_v25 = vld [vmem:[%s2597_s0 + $0x278] sm:$0xf]  ;;  %v418_v26 = vld [vmem:[%s2597_s0 + $0x280] sm:$0xf] }
  0x6c   : > { %415 = vst [vmem:[%s2602_s6 + $0x138] sm:$0xf] %v414_v24  ;;  %417 = vst [vmem:[%s2602_s6 + $0x13c] sm:$0xf] %v416_v25  ;;  %v420_v27 = vld [vmem:[%s2597_s0 + $0x288] sm:$0xf] }
  0x6d   : > { %419 = vst [vmem:[%s2602_s6 + $0x140] sm:$0xf] %v418_v26  ;;  %v422_v28 = vld [vmem:[%s2597_s0 + $0x290] sm:$0xf]  ;;  %v424_v29 = vld [vmem:[%s2597_s0 + $0x298] sm:$0xf] }
  0x6e   : > { %421 = vst [vmem:[%s2602_s6 + $0x144] sm:$0xf] %v420_v27  ;;  %423 = vst [vmem:[%s2602_s6 + $0x148] sm:$0xf] %v422_v28  ;;  %v426_v30 = vld [vmem:[%s2597_s0 + $0x2a0] sm:$0xf] }
  0x6f   : > { %425 = vst [vmem:[%s2602_s6 + $0x14c] sm:$0xf] %v424_v29  ;;  %v428_v31 = vld [vmem:[%s2597_s0 + $0x2a8] sm:$0xf]  ;;  %v430_v32 = vld [vmem:[%s2597_s0 + $0x2b0] sm:$0xf] }
  0x70   : > { %427 = vst [vmem:[%s2602_s6 + $0x150] sm:$0xf] %v426_v30  ;;  %429 = vst [vmem:[%s2602_s6 + $0x154] sm:$0xf] %v428_v31  ;;  %v432_v33 = vld [vmem:[%s2597_s0 + $0x2b8] sm:$0xf] }
  0x71   : > { %431 = vst [vmem:[%s2602_s6 + $0x158] sm:$0xf] %v430_v32  ;;  %v434_v34 = vld [vmem:[%s2597_s0 + $0x2c0] sm:$0xf]  ;;  %v436_v35 = vld [vmem:[%s2597_s0 + $0x2c8] sm:$0xf] }
  0x72   : > { %433 = vst [vmem:[%s2602_s6 + $0x15c] sm:$0xf] %v432_v33  ;;  %435 = vst [vmem:[%s2602_s6 + $0x160] sm:$0xf] %v434_v34  ;;  %v438_v36 = vld [vmem:[%s2597_s0 + $0x2d0] sm:$0xf] }
  0x73   : > { %437 = vst [vmem:[%s2602_s6 + $0x164] sm:$0xf] %v436_v35  ;;  %v440_v37 = vld [vmem:[%s2597_s0 + $0x2d8] sm:$0xf]  ;;  %v442_v38 = vld [vmem:[%s2597_s0 + $0x2e0] sm:$0xf] }
  0x74   : > { %439 = vst [vmem:[%s2602_s6 + $0x168] sm:$0xf] %v438_v36  ;;  %441 = vst [vmem:[%s2602_s6 + $0x16c] sm:$0xf] %v440_v37  ;;  %v444_v39 = vld [vmem:[%s2597_s0 + $0x2e8] sm:$0xf] }
  0x75   : > { %443 = vst [vmem:[%s2602_s6 + $0x170] sm:$0xf] %v442_v38  ;;  %v446_v40 = vld [vmem:[%s2597_s0 + $0x2f0] sm:$0xf]  ;;  %v448_v41 = vld [vmem:[%s2597_s0 + $0x2f8] sm:$0xf] }
  0x76   : > { %445 = vst [vmem:[%s2602_s6 + $0x174] sm:$0xf] %v444_v39  ;;  %447 = vst [vmem:[%s2602_s6 + $0x178] sm:$0xf] %v446_v40  ;;  %v450_v42 = vld [vmem:[%s2597_s0 + $0x300] sm:$0xf] }
  0x77   : > { %449 = vst [vmem:[%s2602_s6 + $0x17c] sm:$0xf] %v448_v41  ;;  %v452_v43 = vld [vmem:[%s2597_s0 + $0x308] sm:$0xf]  ;;  %v454_v44 = vld [vmem:[%s2597_s0 + $0x310] sm:$0xf] }
  0x78   : > { %451 = vst [vmem:[%s2602_s6 + $0x180] sm:$0xf] %v450_v42  ;;  %453 = vst [vmem:[%s2602_s6 + $0x184] sm:$0xf] %v452_v43  ;;  %v456_v45 = vld [vmem:[%s2597_s0 + $0x318] sm:$0xf] }
  0x79   : > { %455 = vst [vmem:[%s2602_s6 + $0x188] sm:$0xf] %v454_v44  ;;  %v458_v46 = vld [vmem:[%s2597_s0 + $0x320] sm:$0xf]  ;;  %v460_v47 = vld [vmem:[%s2597_s0 + $0x328] sm:$0xf] }
  0x7a   : > { %457 = vst [vmem:[%s2602_s6 + $0x18c] sm:$0xf] %v456_v45  ;;  %459 = vst [vmem:[%s2602_s6 + $0x190] sm:$0xf] %v458_v46  ;;  %v462_v48 = vld [vmem:[%s2597_s0 + $0x330] sm:$0xf] }
  0x7b   : > { %461 = vst [vmem:[%s2602_s6 + $0x194] sm:$0xf] %v460_v47  ;;  %v464_v49 = vld [vmem:[%s2597_s0 + $0x338] sm:$0xf]  ;;  %v466_v50 = vld [vmem:[%s2597_s0 + $0x340] sm:$0xf] }
  0x7c   : > { %463 = vst [vmem:[%s2602_s6 + $0x198] sm:$0xf] %v462_v48  ;;  %465 = vst [vmem:[%s2602_s6 + $0x19c] sm:$0xf] %v464_v49  ;;  %v468_v51 = vld [vmem:[%s2597_s0 + $0x348] sm:$0xf] }
  0x7d   : > { %467 = vst [vmem:[%s2602_s6 + $0x1a0] sm:$0xf] %v466_v50  ;;  %v470_v52 = vld [vmem:[%s2597_s0 + $0x350] sm:$0xf]  ;;  %v472_v53 = vld [vmem:[%s2597_s0 + $0x358] sm:$0xf] }
  0x7e   : > { %469 = vst [vmem:[%s2602_s6 + $0x1a4] sm:$0xf] %v468_v51  ;;  %471 = vst [vmem:[%s2602_s6 + $0x1a8] sm:$0xf] %v470_v52  ;;  %v474_v54 = vld [vmem:[%s2597_s0 + $0x360] sm:$0xf] }
  0x7f   : > { %473 = vst [vmem:[%s2602_s6 + $0x1ac] sm:$0xf] %v472_v53  ;;  %v476_v55 = vld [vmem:[%s2597_s0 + $0x368] sm:$0xf]  ;;  %v478_v56 = vld [vmem:[%s2597_s0 + $0x370] sm:$0xf] }
  0x80   : > { %475 = vst [vmem:[%s2602_s6 + $0x1b0] sm:$0xf] %v474_v54  ;;  %477 = vst [vmem:[%s2602_s6 + $0x1b4] sm:$0xf] %v476_v55  ;;  %v480_v57 = vld [vmem:[%s2597_s0 + $0x378] sm:$0xf] }
  0x81   : > { %479 = vst [vmem:[%s2602_s6 + $0x1b8] sm:$0xf] %v478_v56  ;;  %v482_v58 = vld [vmem:[%s2597_s0 + $0x380] sm:$0xf]  ;;  %v484_v59 = vld [vmem:[%s2597_s0 + $0x388] sm:$0xf] }
  0x82   : > { %481 = vst [vmem:[%s2602_s6 + $0x1bc] sm:$0xf] %v480_v57  ;;  %483 = vst [vmem:[%s2602_s6 + $0x1c0] sm:$0xf] %v482_v58  ;;  %v486_v60 = vld [vmem:[%s2597_s0 + $0x390] sm:$0xf] }
  0x83   : > { %485 = vst [vmem:[%s2602_s6 + $0x1c4] sm:$0xf] %v484_v59  ;;  %v488_v61 = vld [vmem:[%s2597_s0 + $0x398] sm:$0xf]  ;;  %v490_v62 = vld [vmem:[%s2597_s0 + $0x3a0] sm:$0xf] }
  0x84   : > { %487 = vst [vmem:[%s2602_s6 + $0x1c8] sm:$0xf] %v486_v60  ;;  %489 = vst [vmem:[%s2602_s6 + $0x1cc] sm:$0xf] %v488_v61  ;;  %v492_v63 = vld [vmem:[%s2597_s0 + $0x3a8] sm:$0xf] }
  0x85   : > { %491 = vst [vmem:[%s2602_s6 + $0x1d0] sm:$0xf] %v490_v62  ;;  %v494_v0 = vld [vmem:[%s2597_s0 + $0x3b0] sm:$0xf]  ;;  %v496_v1 = vld [vmem:[%s2597_s0 + $0x3b8] sm:$0xf] }
  0x86   : > { %493 = vst [vmem:[%s2602_s6 + $0x1d4] sm:$0xf] %v492_v63  ;;  %495 = vst [vmem:[%s2602_s6 + $0x1d8] sm:$0xf] %v494_v0  ;;  %v498_v2 = vld [vmem:[%s2597_s0 + $0x3c0] sm:$0xf] }
  0x87   : > { %497 = vst [vmem:[%s2602_s6 + $0x1dc] sm:$0xf] %v496_v1  ;;  %v500_v3 = vld [vmem:[%s2597_s0 + $0x3c8] sm:$0xf]  ;;  %v502_v4 = vld [vmem:[%s2597_s0 + $0x3d0] sm:$0xf] }
  0x88   : > { %499 = vst [vmem:[%s2602_s6 + $0x1e0] sm:$0xf] %v498_v2  ;;  %501 = vst [vmem:[%s2602_s6 + $0x1e4] sm:$0xf] %v500_v3  ;;  %v504_v5 = vld [vmem:[%s2597_s0 + $0x3d8] sm:$0xf] }
  0x89   : > { %503 = vst [vmem:[%s2602_s6 + $0x1e8] sm:$0xf] %v502_v4  ;;  %v506_v6 = vld [vmem:[%s2597_s0 + $0x3e0] sm:$0xf]  ;;  %v508_v7 = vld [vmem:[%s2597_s0 + $0x3e8] sm:$0xf] }
  0x8a   : > { %505 = vst [vmem:[%s2602_s6 + $0x1ec] sm:$0xf] %v504_v5  ;;  %507 = vst [vmem:[%s2602_s6 + $0x1f0] sm:$0xf] %v506_v6  ;;  %v510_v8 = vld [vmem:[%s2597_s0 + $0x3f0] sm:$0xf] }
  0x8b   : > { %509 = vst [vmem:[%s2602_s6 + $0x1f4] sm:$0xf] %v508_v7  ;;  %v512_v9 = vld [vmem:[%s2597_s0 + $0x3f8] sm:$0xf]  ;;  %v514_v10 = vld [vmem:[%s2597_s0 + $0x400] sm:$0xf] }
  0x8c   : > { %511 = vst [vmem:[%s2602_s6 + $0x1f8] sm:$0xf] %v510_v8  ;;  %513 = vst [vmem:[%s2602_s6 + $0x1fc] sm:$0xf] %v512_v9  ;;  %v516_v11 = vld [vmem:[%s2597_s0 + $0x408] sm:$0xf] }
  0x8d   : > { %515 = vst [vmem:[%s2602_s6 + $0x200] sm:$0xf] %v514_v10  ;;  %v518_v12 = vld [vmem:[%s2597_s0 + $0x410] sm:$0xf]  ;;  %v520_v13 = vld [vmem:[%s2597_s0 + $0x418] sm:$0xf] }
  0x8e   : > { %517 = vst [vmem:[%s2602_s6 + $0x204] sm:$0xf] %v516_v11  ;;  %519 = vst [vmem:[%s2602_s6 + $0x208] sm:$0xf] %v518_v12  ;;  %v522_v14 = vld [vmem:[%s2597_s0 + $0x420] sm:$0xf] }
  0x8f   : > { %521 = vst [vmem:[%s2602_s6 + $0x20c] sm:$0xf] %v520_v13  ;;  %v524_v15 = vld [vmem:[%s2597_s0 + $0x428] sm:$0xf]  ;;  %v526_v16 = vld [vmem:[%s2597_s0 + $0x430] sm:$0xf] }
  0x90   : > { %523 = vst [vmem:[%s2602_s6 + $0x210] sm:$0xf] %v522_v14  ;;  %525 = vst [vmem:[%s2602_s6 + $0x214] sm:$0xf] %v524_v15  ;;  %v528_v17 = vld [vmem:[%s2597_s0 + $0x438] sm:$0xf] }
  0x91   : > { %527 = vst [vmem:[%s2602_s6 + $0x218] sm:$0xf] %v526_v16  ;;  %v530_v18 = vld [vmem:[%s2597_s0 + $0x440] sm:$0xf]  ;;  %v532_v19 = vld [vmem:[%s2597_s0 + $0x448] sm:$0xf] }
  0x92   : > { %529 = vst [vmem:[%s2602_s6 + $0x21c] sm:$0xf] %v528_v17  ;;  %531 = vst [vmem:[%s2602_s6 + $0x220] sm:$0xf] %v530_v18  ;;  %v534_v20 = vld [vmem:[%s2597_s0 + $0x450] sm:$0xf] }
  0x93   : > { %533 = vst [vmem:[%s2602_s6 + $0x224] sm:$0xf] %v532_v19  ;;  %v536_v21 = vld [vmem:[%s2597_s0 + $0x458] sm:$0xf]  ;;  %v538_v22 = vld [vmem:[%s2597_s0 + $0x460] sm:$0xf] }
  0x94   : > { %535 = vst [vmem:[%s2602_s6 + $0x228] sm:$0xf] %v534_v20  ;;  %537 = vst [vmem:[%s2602_s6 + $0x22c] sm:$0xf] %v536_v21  ;;  %v540_v23 = vld [vmem:[%s2597_s0 + $0x468] sm:$0xf] }
  0x95   : > { %539 = vst [vmem:[%s2602_s6 + $0x230] sm:$0xf] %v538_v22  ;;  %v542_v24 = vld [vmem:[%s2597_s0 + $0x470] sm:$0xf]  ;;  %v544_v25 = vld [vmem:[%s2597_s0 + $0x478] sm:$0xf] }
  0x96   : > { %541 = vst [vmem:[%s2602_s6 + $0x234] sm:$0xf] %v540_v23  ;;  %543 = vst [vmem:[%s2602_s6 + $0x238] sm:$0xf] %v542_v24 }
  0x97   : > { %545 = vst [vmem:[%s2602_s6 + $0x23c] sm:$0xf] %v544_v25 }
  0x98 PF: > { %p1974_p0 = scmp.ge.s32.totalorder %s2458_s22, 1  ;;  %p861_p1 = scmp.lt.s32.totalorder %s2458_s22, 7 }
  0x9a   : > { %p862_p2 = pnand %p1974_p0, %p861_p1 }
  0x9b   : > { %s868_s5 = sand.u32 (!%p862_p2), 1, %s2434_s16   ;;  %s875_s23 = sand.u32 (!%p862_p2), 1, %s2426_s14  }
  0x9c   : > { %865 = sbr.rel (%p862_p2) target bundleno = 510 (0x1fe), region = 91  ;;  %s901_s0 = sand.u32 (!%p862_p2), 1, %s2418_s12  }
  0x9d   : > { %s2194_s28 = smul.u32 (!%p862_p2), 72, %s868_s5  ;;  %s1975_s11 = sshll.u32 (!%p862_p2), %s901_s0, 3 }
  0x9e   : > { %s2195_s7 = smul.u32 (!%p862_p2), 576, %s875_s23  ;;  %p907_p3 = scmp.lt.s32.totalorder (!%p862_p2), %s2446_s19, 1 }
  0x9f   : > { %s2902_s6 = scalar_lea.vmem (!%p862_p2), [#allocation3], %s2194_s28  ;;  %s2906_s25 = scalar_lea.vmem (!%p862_p2), [#allocation5], %s1975_s11 }
  0xa0   : > { %s2904_s1 = scalar_lea.vmem (!%p862_p2), [#allocation4], %s2195_s7  ;;  %p1976_p4 = scmp.ne.s32.totalorder (!%p862_p2), %s2442_s18, 0 }
  0xa3   : > { %s2896_s26 = scalar_select %p907_p3, %s2446_s19, 1 }
  0xa4   : > { %915 = sbr.rel (%p1976_p4) target bundleno = 171 (0xab), region = 103  ;;  %v2460_v26 = vmov (!%p1976_p4), 0.0  }
  0xa5   : > { %s909_s4 = scalar_lea.vmem %s3040_s2, %s2896_s26  ;;  %916 = vst [vmem:[#allocation2] sm:$0xff] (!%p1976_p4), %v2460_v26  ;;  %917 = vst [vmem:[#allocation2 + $0x8] sm:$0xff] (!%p1976_p4), %v2460_v26 }
  0xab PF: > { %v2287_v27 = vld [vmem:[%s2904_s1 + $0x40] sm:$0xff]   ;;  %v2291_v31 = vld [vmem:[%s2904_s1 + $0x48] sm:$0xff]   ;;  %v2295_v35 = vld [vmem:[%s2904_s1 + $0x50] sm:$0xff]   ;;  %vm2462_vm0 = vmmov 0   ;;  %p2058_p5 = scmp.ne.s32.totalorder %s2442_s18, 2 }
  0xac   : > { %v2288_v28 = vld [vmem:[%s2904_s1 + $0xc0] sm:$0xff]   ;;  %2075 = vmatprep.subr.bf16.mxu0 %v2287_v27  ;;  %v2292_v32 = vld [vmem:[%s2904_s1 + $0xc8] sm:$0xff]   ;;  %v2296_v36 = vld [vmem:[%s2904_s1 + $0xd0] sm:$0xff]  }
  0xad   : > { %v2289_v29 = vld [vmem:[%s2904_s1] sm:$0xff]   ;;  %2097 = vmatprep.subr.bf16.mxu1 %v2288_v28  ;;  %v2293_v33 = vld [vmem:[%s2904_s1 + $0x8] sm:$0xff]   ;;  %v2297_v37 = vld [vmem:[%s2904_s1 + $0x10] sm:$0xff]  }
  0xae   : > { %v2290_v30 = vld [vmem:[%s2904_s1 + $0x80] sm:$0xff]   ;;  %2076 = vmatpush3.bf16.msra.mxu0 %v2289_v29  ;;  %v2294_v34 = vld [vmem:[%s2904_s1 + $0x88] sm:$0xff]   ;;  %v2298_v38 = vld [vmem:[%s2904_s1 + $0x90] sm:$0xff]  }
  0xaf   : > { %2098 = vmatpush3.bf16.msra.mxu1 %v2290_v30  ;;  %2077 = vmatprep.subr.bf16.mxu0 %v2291_v31  ;;  %v2299_v39 = vld [vmem:[%s2904_s1 + $0x58] sm:$0xff]   ;;  %v2303_v43 = vld [vmem:[%s2904_s1 + $0x60] sm:$0xff]   ;;  %v2307_v47 = vld [vmem:[%s2904_s1 + $0x68] sm:$0xff]  }
  0xb0   : > { %2099 = vmatprep.subr.bf16.mxu1 %v2292_v32  ;;  %v2300_v40 = vld [vmem:[%s2904_s1 + $0xd8] sm:$0xff]   ;;  %v2304_v44 = vld [vmem:[%s2904_s1 + $0xe0] sm:$0xff]   ;;  %v2308_v48 = vld [vmem:[%s2904_s1 + $0xe8] sm:$0xff]  }
  0xb1   : > { %v2301_v41 = vld [vmem:[%s2904_s1 + $0x18] sm:$0xff]   ;;  %v2305_v45 = vld [vmem:[%s2904_s1 + $0x20] sm:$0xff]   ;;  %v2309_v49 = vld [vmem:[%s2904_s1 + $0x28] sm:$0xff]  }
  0xb2   : > { %2078 = vmatpush3.bf16.msra.mxu0 %v2293_v33  ;;  %v2302_v42 = vld [vmem:[%s2904_s1 + $0x98] sm:$0xff]   ;;  %v2306_v46 = vld [vmem:[%s2904_s1 + $0xa0] sm:$0xff]   ;;  %v2310_v50 = vld [vmem:[%s2904_s1 + $0xa8] sm:$0xff]   ;;  %v2461_v33 = vmov 0.0  }
  0xb3   : > { %2100 = vmatpush3.bf16.msra.mxu1 %v2294_v34  ;;  %2079 = vmatprep.subr.bf16.mxu0 %v2295_v35  ;;  %v2311_v51 = vld [vmem:[%s2904_s1 + $0x70] sm:$0xff]   ;;  %v2315_v55 = vld [vmem:[%s2904_s1 + $0x78] sm:$0xff]   ;;  %v2325_v63 = vld [vmem:[%s2904_s1 + $0x140] sm:$0xff]  }
  0xb4   : > { %2101 = vmatprep.subr.bf16.mxu1 %v2296_v36  ;;  %v2312_v52 = vld [vmem:[%s2904_s1 + $0xf0] sm:$0xff]   ;;  %v2316_v56 = vld [vmem:[%s2904_s1 + $0xf8] sm:$0xff]   ;;  %v2326_v0 = vld [vmem:[%s2904_s1 + $0x100] sm:$0xff]  }
  0xb5   : > { %v2313_v53 = vld [vmem:[%s2904_s1 + $0x30] sm:$0xff]   ;;  %v2317_v57 = vld [vmem:[%s2904_s1 + $0x38] sm:$0xff]   ;;  %v2327_v1 = vld [vmem:[%s2904_s1 + $0x1c0] sm:$0xff]  }
  0xb6   : > { %2080 = vmatpush3.bf16.msra.mxu0 %v2297_v37  ;;  %v2314_v54 = vld [vmem:[%s2904_s1 + $0xb0] sm:$0xff]   ;;  %v2318_v58 = vld [vmem:[%s2904_s1 + $0xb8] sm:$0xff]   ;;  %v2328_v2 = vld [vmem:[%s2904_s1 + $0x180] sm:$0xff]  }
  0xb7   : > { %2102 = vmatpush3.bf16.msra.mxu1 %v2298_v38  ;;  %2081 = vmatprep.subr.bf16.mxu0 %v2299_v39  ;;  %v2319_v59 = vld [vmem:[%s2902_s6] ss:$36 sps:$4 sm:$0xff]   ;;  %v2322_v61 = vld [vmem:[%s2902_s6 + $0x8] ss:$36 sps:$4 sm:$0xff]   ;;  %v2329_v3 = vld [vmem:[%s2904_s1 + $0x148] sm:$0xff]  }
  0xb8   : > { %2103 = vmatprep.subr.bf16.mxu1 %v2300_v40  ;;  %v2321_v60 = vld [vmem:[%s2902_s6 + $0x4] ss:$36 sps:$4 sm:$0xff]   ;;  %v2324_v62 = vld [vmem:[%s2902_s6 + $0xc] ss:$36 sps:$4 sm:$0xff]   ;;  %v2358_v31 = vld [vmem:[%s2902_s6 + $0x14] ss:$36 sps:$4 sm:$0xff]  }
  0xb9   : > { %1584 = vmatprep.mubr.bf16.mxu0 %v2321_v60  ;;  %1625 = vmatprep.mubr.bf16.mxu1 %v2324_v62  ;;  %v2330_v4 = vld [vmem:[%s2904_s1 + $0x108] sm:$0xff]   ;;  %v2333_v7 = vld [vmem:[%s2904_s1 + $0x150] sm:$0xff]   ;;  %v2337_v11 = vld [vmem:[%s2904_s1 + $0x158] sm:$0xff]  }
  0xba   : > { %2082 = vmatpush3.bf16.msra.mxu0 %v2301_v41  ;;  %v2331_v5 = vld [vmem:[%s2904_s1 + $0x1c8] sm:$0xff]   ;;  %v2334_v8 = vld [vmem:[%s2904_s1 + $0x110] sm:$0xff]   ;;  %v2338_v12 = vld [vmem:[%s2904_s1 + $0x118] sm:$0xff]  }
  0xbb   : > { %2104 = vmatpush3.bf16.msra.mxu1 %v2302_v42  ;;  %2083 = vmatprep.subr.bf16.mxu0 %v2303_v43  ;;  %v2332_v6 = vld [vmem:[%s2904_s1 + $0x188] sm:$0xff]   ;;  %v2335_v9 = vld [vmem:[%s2904_s1 + $0x1d0] sm:$0xff]   ;;  %v2339_v13 = vld [vmem:[%s2904_s1 + $0x1d8] sm:$0xff]  }
  0xbc   : > { %2105 = vmatprep.subr.bf16.mxu1 %v2304_v44  ;;  %v2336_v10 = vld [vmem:[%s2904_s1 + $0x190] sm:$0xff]   ;;  %v2340_v14 = vld [vmem:[%s2904_s1 + $0x198] sm:$0xff]   ;;  %v2341_v15 = vld [vmem:[%s2904_s1 + $0x160] sm:$0xff]  }
  0xbd   : > { %v2342_v16 = vld [vmem:[%s2904_s1 + $0x120] sm:$0xff]   ;;  %v2345_v19 = vld [vmem:[%s2904_s1 + $0x168] sm:$0xff]   ;;  %v2349_v23 = vld [vmem:[%s2904_s1 + $0x170] sm:$0xff]  }
  0xbe   : > { %2084 = vmatpush3.bf16.msra.mxu0 %v2305_v45  ;;  %v2343_v17 = vld [vmem:[%s2904_s1 + $0x1e0] sm:$0xff]   ;;  %v2346_v20 = vld [vmem:[%s2904_s1 + $0x128] sm:$0xff]   ;;  %v2350_v24 = vld [vmem:[%s2904_s1 + $0x130] sm:$0xff]  }
  0xbf   : > { %2106 = vmatpush3.bf16.msra.mxu1 %v2306_v46  ;;  %2085 = vmatprep.subr.bf16.mxu0 %v2307_v47  ;;  %v2344_v18 = vld [vmem:[%s2904_s1 + $0x1a0] sm:$0xff]   ;;  %v2347_v21 = vld [vmem:[%s2904_s1 + $0x1e8] sm:$0xff]   ;;  %v2351_v25 = vld [vmem:[%s2904_s1 + $0x1f0] sm:$0xff]  }
  0xc0   : > { %2107 = vmatprep.subr.bf16.mxu1 %v2308_v48  ;;  %v2348_v22 = vld [vmem:[%s2904_s1 + $0x1a8] sm:$0xff]   ;;  %v2352_v26 = vld [vmem:[%s2904_s1 + $0x1b0] sm:$0xff]   ;;  %v2353_v27 = vld [vmem:[%s2904_s1 + $0x178] sm:$0xff]  }
  0xc1   : > { %v2354_v28 = vld [vmem:[%s2904_s1 + $0x138] sm:$0xff]   ;;  %v2356_v30 = vld [vmem:[%s2902_s6 + $0x10] ss:$36 sps:$4 sm:$0xff]   ;;  %v2360_v34 = vld [vmem:[%s2902_s6 + $0x18] ss:$36 sps:$4 sm:$0xff]  }
  0xc2   : > { %2086 = vmatpush3.bf16.msra.mxu0 %v2309_v49  ;;  %v2355_v29 = vld [vmem:[%s2904_s1 + $0x1f8] sm:$0xff]   ;;  %v2363_v36 = vld [vmem:[%s2904_s1 + $0x200] sm:$0xff]   ;;  %v2364_v37 = vld [vmem:[%s2904_s1 + $0x208] sm:$0xff]  }
  0xc3   : > { %2108 = vmatpush3.bf16.msra.mxu1 %v2310_v50  ;;  %2087 = vmatprep.subr.bf16.mxu0 %v2311_v51  ;;  %v2359_v32 = vld [vmem:[%s2904_s1 + $0x1b8] sm:$0xff]   ;;  %v2365_v38 = vld [vmem:[%s2904_s1 + $0x210] sm:$0xff]   ;;  %v2367_v40 = vld [vmem:[%s2904_s1 + $0x220] sm:$0xff]  }
  0xc4   : > { %2109 = vmatprep.subr.bf16.mxu1 %v2312_v52  ;;  %v2362_v35 = vld [vmem:[%s2902_s6 + $0x1c] ss:$36 sps:$4 sm:$0xff]  }
  0xc5   : > { %v2366_v39 = vld [vmem:[%s2904_s1 + $0x218] sm:$0xff]   ;;  %v2368_v41 = vld [vmem:[%s2904_s1 + $0x228] sm:$0xff]   ;;  %v2369_v42 = vld [vmem:[%s2904_s1 + $0x230] sm:$0xff]  }
  0xc6   : > { %2088 = vmatpush3.bf16.msra.mxu0 %v2313_v53  ;;  %v2370_v43 = vld [vmem:[%s2904_s1 + $0x238] sm:$0xff]  }
  0xc7   : > { %2110 = vmatpush3.bf16.msra.mxu1 %v2314_v54  ;;  %2089 = vmatprep.subr.bf16.mxu0 %v2315_v55  ;;  %v2371_v44 = vld [vmem:[%s2902_s6 + $0x20] ss:$36 sps:$4 sm:$0xff]  }
  0xc8   : > { %2111 = vmatprep.subr.bf16.mxu1 %v2316_v56 }
  0xca   : > { %2090 = vmatpush3.bf16.msra.mxu0 %v2317_v57 }
  0xcb   : > { %2112 = vmatpush3.bf16.msra.mxu1 %v2318_v58  ;;  %2119 = vmatprep.subr.bf16.mxu0 %v2325_v63 }
  0xcc   : > { %2141 = vmatprep.subr.bf16.mxu1 %v2327_v1 }
  0xcd   : > { %1585 = vmatmul.mubr.bf16.vlgmr.msra.gmra.mrb[0].mxu0 %v2319_v59 }
  0xce   : > { %1626 = vmatmul.mubr.bf16.vlgmr.msra.gmra.mrb[0].mxu1 %v2322_v61  ;;  %2120 = vmatpush3.bf16.msra.mxu0 %v2326_v0 }
  0xcf   : > { %2142 = vmatpush3.bf16.msra.mxu1 %v2328_v2  ;;  %2121 = vmatprep.subr.bf16.mxu0 %v2329_v3 }
  0xd0   : > { %2143 = vmatprep.subr.bf16.mxu1 %v2331_v5  ;;  %1666 = vmatprep.mubr.bf16.mxu0 %v2358_v31 }
  0xd1   : > { %1707 = vmatprep.mubr.bf16.mxu1 %v2362_v35 }
  0xd2   : > { %2122 = vmatpush3.bf16.msra.mxu0 %v2330_v4 }
  0xd3   : > { %2144 = vmatpush3.bf16.msra.mxu1 %v2332_v6  ;;  %2123 = vmatprep.subr.bf16.mxu0 %v2333_v7 }
  0xd4   : > { %2145 = vmatprep.subr.bf16.mxu1 %v2335_v9 }
  0xd6   : > { %2124 = vmatpush3.bf16.msra.mxu0 %v2334_v8 }
  0xd7   : > { %2146 = vmatpush3.bf16.msra.mxu1 %v2336_v10  ;;  %2125 = vmatprep.subr.bf16.mxu0 %v2337_v11  ;;  %v918_v11 = vld [vmem:[#allocation2] sm:$0xff] }
  0xd8   : > { %2147 = vmatprep.subr.bf16.mxu1 %v2339_v13 }
  0xda   : > { %2126 = vmatpush3.bf16.msra.mxu0 %v2338_v12 }
  0xdb   : > { %2148 = vmatpush3.bf16.msra.mxu1 %v2340_v14  ;;  %2127 = vmatprep.subr.bf16.mxu0 %v2341_v15  ;;  %v919_v15 = vld [vmem:[#allocation2 + $0x8] sm:$0xff] }
  0xdc   : > { %2149 = vmatprep.subr.bf16.mxu1 %v2343_v17 }
  0xde   : > { %2128 = vmatpush3.bf16.msra.mxu0 %v2342_v16 }
  0xdf   : > { %2150 = vmatpush3.bf16.msra.mxu1 %v2344_v18  ;;  %2129 = vmatprep.subr.bf16.mxu0 %v2345_v19 }
  0xe0   : > { %2151 = vmatprep.subr.bf16.mxu1 %v2347_v21 }
  0xe2   : > { %2130 = vmatpush3.bf16.msra.mxu0 %v2346_v20 }
  0xe3   : > { %2152 = vmatpush3.bf16.msra.mxu1 %v2348_v22  ;;  %2131 = vmatprep.subr.bf16.mxu0 %v2349_v23  ;;  %v2059_v23 = vld [vmem:[%s909_s4] ss:$0 sm:$0xff] (!%p2058_p5) }
  0xe4   : > { %2153 = vmatprep.subr.bf16.mxu1 %v2351_v25 }
  0xe6   : > { %2132 = vmatpush3.bf16.msra.mxu0 %v2350_v24 }
  0xe7   : > { %2154 = vmatpush3.bf16.msra.mxu1 %v2352_v26  ;;  %2133 = vmatprep.subr.bf16.mxu0 %v2353_v27 }
  0xe8   : > { %2155 = vmatprep.subr.bf16.mxu1 %v2355_v29 }
  0xea   : > { %2134 = vmatpush3.bf16.msra.mxu0 %v2354_v28 }
  0xeb   : > { %2172 = vmatprep.subr.bf16.mxu0 %v2461_v33  ;;  %2156 = vmatpush3.bf16.msra.mxu1 %v2359_v32 }
  0xed   : > { %1667 = vmatmul.mubr.bf16.vlgmr.msra.gmra.mrb[4].mxu0 %v2356_v30 }
  0xee   : > { %2188 = vmatprep.mubr.msk.bf16.mxu0 %vm2462_vm0, %v2461_v33  ;;  %2173 = vmatpush3.bf16.msra.mxu0 %v2363_v36 }
  0xef   : > { %1708 = vmatmul.mubr.bf16.vlgmr.msra.gmra.mrb[4].mxu1 %v2360_v34  ;;  %2174 = vmatprep.subr.bf16.mxu0 %v2461_v33 }
  0xf2   : > { %2175 = vmatpush3.bf16.msra.mxu0 %v2364_v37 }
  0xf3   : > { %2176 = vmatprep.subr.bf16.mxu0 %v2461_v33 }
  0xf6   : > { %2177 = vmatpush3.bf16.msra.mxu0 %v2365_v38 }
  0xf7   : > { %2178 = vmatprep.subr.bf16.mxu0 %v2461_v33 }
  0xfa   : > { %2179 = vmatpush3.bf16.msra.mxu0 %v2366_v39 }
  0xfb   : > { %2180 = vmatprep.subr.bf16.mxu0 %v2461_v33 }
  0xfe   : > { %2181 = vmatpush3.bf16.msra.mxu0 %v2367_v40 }
  0xff   : > { %2182 = vmatprep.subr.bf16.mxu0 %v2461_v33 }
 0x102   : > { %2183 = vmatpush3.bf16.msra.mxu0 %v2368_v41 }
 0x103   : > { %2184 = vmatprep.subr.bf16.mxu0 %v2461_v33 }
 0x106   : > { %2185 = vmatpush3.bf16.msra.mxu0 %v2369_v42 }
 0x107   : > { %2186 = vmatprep.subr.bf16.mxu0 %v2461_v33 }
 0x10a   : > { %2187 = vmatpush3.bf16.msra.mxu0 %v2370_v43 }
 0x10d   : > { %2189 = vmatmul.mubr.bf16.vlgmr.msra.gmra.mrb[8].mxu0 %v2371_v44 }
 0x1a0   : > { %v2091_v45 = vpop.f32.mrb[0].mxu0 }
 0x1a1   : > { %v2113_v46 = vpop.f32.mrb[0].mxu1  ;;  %v2092_v47 = vpop.f32.mrb[1].mxu0 }
 0x1a2   : > { %v2093_v48 = vadd.f32 %v2092_v47, %v2091_v45  ;;  %v2114_v49 = vpop.f32.mrb[1].mxu1  ;;  %v2094_v50 = vpop.f32.mrb[2].mxu0 }
 0x1a3   : > { %v2115_v51 = vadd.f32 %v2114_v49, %v2113_v46  ;;  %v2116_v52 = vpop.f32.mrb[2].mxu1  ;;  %v2095_v53 = vpop.f32.mrb[3].mxu0 }
 0x1a4   : > { %v2096_v54 = vadd.f32 %v2095_v53, %v2094_v50  ;;  %v2117_v55 = vpop.f32.mrb[3].mxu1 }
 0x1a5   : > { %v1628_v56 = vadd.f32 %v2115_v51, %v2093_v48  ;;  %v2118_v57 = vadd.f32 %v2117_v55, %v2116_v52 }
 0x1a7   : > { %v1631_v58 = vadd.f32 %v2118_v57, %v2096_v54 }
 0x1c0   : > { %v2135_v59 = vpop.f32.mrb[4].mxu0 }
 0x1c1   : > { %v2136_v60 = vpop.f32.mrb[5].mxu0 }
 0x1c2   : > { %v2137_v61 = vadd.f32 %v2136_v60, %v2135_v59  ;;  %v2138_v62 = vpop.f32.mrb[6].mxu0  ;;  %v2157_v63 = vpop.f32.mrb[4].mxu1 }
 0x1c3   : > { %v2139_v0 = vpop.f32.mrb[7].mxu0  ;;  %v2158_v3 = vpop.f32.mrb[5].mxu1 }
 0x1c4   : > { %v1669_v1 = vadd.f32 %v2137_v61, %v1628_v56  ;;  %v2140_v2 = vadd.f32 %v2139_v0, %v2138_v62  ;;  %v2159_v4 = vadd.f32 %v2158_v3, %v2157_v63  ;;  %v2160_v5 = vpop.f32.mrb[6].mxu1 }
 0x1c5   : > { %v2161_v7 = vpop.f32.mrb[7].mxu1 }
 0x1c6   : > { %v1672_v6 = vadd.f32 %v2140_v2, %v1631_v58  ;;  %v2162_v8 = vadd.f32 %v2161_v7, %v2160_v5  ;;  %v1710_v9 = vadd.f32 %v2159_v4, %v1669_v1 }
 0x1c8   : > { %v1713_v10 = vadd.f32 %v2162_v8, %v1672_v6 }
 0x1e0   : > { %v1750_v12 = vpop.f32.mrb[8].mxu0 }
 0x1e1   : > { %v1751_v13 = vadd.f32 %v1750_v12, %v1710_v9  ;;  %v2190_v14 = vpop.f32.mrb[9].mxu0  ;;  %1764 = sbr.rel (%p2058_p5) target bundleno = 502 (0x1f6), region = 107 }
 0x1e2   : > { %v1753_v16 = vpop.f32.mrb[10].mxu0 }
 0x1e3   : > { %v1757_v17 = vadd.f32 %v1751_v13, %v918_v11  ;;  %v1754_v18 = vadd.f32 %v1753_v16, %v1713_v10  ;;  %v2191_v19 = vpop.f32.mrb[11].mxu0 }
 0x1e5   : > { %1759 = vst [vmem:[#allocation2] sm:$0xff] %v1757_v17  ;;  %v1758_v20 = vadd.f32 %v1754_v18, %v919_v15 }
 0x1e7   : > { %1760 = vst [vmem:[#allocation2 + $0x8] sm:$0xff] %v1758_v20 }
 0x1ec   : > { %v1765_v21 = vld [vmem:[#allocation2] sm:$0xff] }
 0x1ed   : > { %v1774_v24 = vadd.f32 %v2059_v23, %v1765_v21 }
 0x1ee   : > { %v1766_v22 = vld [vmem:[#allocation2 + $0x8] sm:$0xff] }
 0x1ef   : > { %v1775_v25 = vadd.f32 %v2059_v23, %v1766_v22  ;;  %v1776_v26 = vmax.f32 %v1774_v24, 0.0 }
 0x1f1   : > { %v1777_v27 = vmax.f32 %v1775_v25, 0.0 }
 0x1f3   : > { %v2073_v28 = vpack.c.bf16 %v1777_v27, %v1776_v26 }
 0x1f5   : > { %2074 = vst [vmem:[%s2906_s25] sm:$0xff] %v2073_v28  }
 0x1f6 PF: > { %1794 = sbr.rel (!%p2577_p12) target bundleno = 510 (0x1fe), region = 111  ;;  %s2063_s14 = sshll.u32 (%p2577_p12), %s2446_s19, 2 }
 0x1f7   : > { %s1801_s5 = scalar_lea.vmem (%p2577_p12), %s3041_s3, %s2063_s14 }
 0x1fc   : > { %v1817_v29 = vld [vmem:[%s2906_s25] sm:$0xf] (%p2577_p12)  ;;  %v1819_v30 = vld [vmem:[%s2906_s25 + $0x4] sm:$0xf] (%p2577_p12) }
 0x1fd   : > { %1818 = vst [vmem:[%s1801_s5] sm:$0xf] %v1817_v29  ;;  %1820 = vst [vmem:[%s1801_s5 + $0x8] sm:$0xf] %v1819_v30 }
 0x1fe PF: > { %s13_s22 = sadd.s32 1, %s2458_s22   ;;  %s3051_s25 = sld [smem:[#allocation6_spill]] }
 0x1ff   : > { %p10_p6 = scmp.ge.s32.totalorder %s13_s22, 8   ;;  %s3052_s12 = smov %s2422_s13 }
 0x200   : > { %s3053_s13 = smov %s2575_s9  ;;  %s3054_s14 = smov %s2430_s15 }
 0x201   : > { %s3055_s15 = smov %s2572_s8  ;;  %s3056_s16 = smov %s2438_s17 }
 0x202   : > { %s3057_s17 = smov %s2558_s30  ;;  %s3058_s18 = smov %s2450_s20 }
 0x203   : > { %s3059_s19 = smov %s2454_s21  ;;  %s3060_s20 = smov %s3063_s24 }
 0x204   : > { %s3061_s21 = smov %s3051_s25  ;;  %12 = sbr.rel (!%p10_p6) target bundleno = 9 (0x9), region = 200 }

// kernel: autoencoder_cov3d_mem_forward.12
= control target key start
LH: loop header
LB: loop body
LE: loop exit
PB: predicated region body
PF: predicated region fallthrough
CT: control target
= control target key end

     0   :  { %s2319_s12 = smov 0   ;;  %s2321_s13 = smov 0   ;;  %s2802_s0 = inlined_call_operand.vmem [shape: bf16[1,8,6912], index: 0, kind: input, shape index: {}]   ;;  %s2803_s1 = inlined_call_operand.vmem [shape: bf16[1,6912,256], index: 1, kind: input, shape index: {}]   ;;  %s2804_s2 = inlined_call_operand.vmem [shape: f32[1,256], index: 2, kind: input, shape index: {}]   ;;  %s2805_s3 = inlined_call_operand.vmem [shape: bf16[1,8,256], index: 3, kind: output, shape index: {}]  }
   0x1   :  { %s2323_s14 = smov 0   ;;  %s2325_s15 = smov 0  }
   0x2   :  { %s2327_s16 = smov 0   ;;  %s2329_s17 = smov 0  }
   0x3   :  { %s2331_s18 = smov 0  }
   0x4 LB: > { %s28_s19 = sadd.s32 1, %s2286_s16  ;;  %s31_s20 = sadd.s32 1, %s2290_s17  ;;  %s2294_s18 = sphi %s2331_s18, %s13_s18   ;;  %s2290_s17 = sphi %s2329_s17, %s2811_s17   ;;  %s2286_s16 = sphi %s2327_s16, %s2810_s16   ;;  %s2282_s15 = sphi %s2325_s15, %s2809_s15   ;;  %s2278_s14 = sphi %s2323_s14, %s2808_s14   ;;  %s2274_s13 = sphi %s2321_s13, %s2807_s13   ;;  %s2270_s12 = sphi %s2319_s12, %s2806_s12  }
   0x5   : > { %p29_p0 = scmp.ge.s32.totalorder %s28_s19, 6  ;;  %p87_p1 = scmp.ne.s32.totalorder %s2274_s13, %s2270_s12 }
   0x6   : > { %p88_p2 = scmp.eq.s32.totalorder %s2294_s18, 0  ;;  %s80_s24 = sadd.s32 1, %s2274_s13 }
   0x7   : > { %s2813_s19 = smov (%p29_p0, %s28_s19), 0  ;;  %s2815_s20 = smov (!%p29_p0, %s31_s20), %s2290_s17 }
   0x8   : > { %p89_p3 = por %p88_p2, %p87_p1  ;;  %p33_p4 = scmp.ge.s32.totalorder %s2815_s20, 2 }
   0x9   : > { %s74_s21 = ssub.s32 %s2286_s16, %s2813_s19  ;;  %p1888_p6 = scmp.ge.s32.totalorder %s2294_s18, 12 }
   0xa   : > { %s2817_s20 = smov (%p33_p4, %s2815_s20), 0 }
   0xb   : > { %s76_s22 = ssub.s32 %s2290_s17, %s2817_s20  ;;  %169 = sbr.rel (%p1888_p6) target bundleno = 121 (0x79), region = 16 }
   0xc   : > { %s77_s23 = sor.u32 %s76_s22, %s74_s21 }
   0xd   : > { %p78_p5 = scmp.eq.s32.totalorder %s77_s23, 0 }
   0xf   : > { %s2370_s25 = scalar_select %p78_p5, %s2274_s13, %s80_s24  }
  0x12   : > { %189 = sbr.rel (!%p89_p3) target bundleno = 121 (0x79), region = 24  ;;  %s191_s26 = sand.u32 (%p89_p3), 1, %s2274_s13  }
  0x13   : > { %s1980_s27 = smul.u32 (%p89_p3), 288, %s2286_s16 }
  0x14   : > { %s2098_s28 = smul.u32 (%p89_p3), 576, %s191_s26 }
  0x15   : > { %s196_s29 = sadd.s32 (%p89_p3), %s2290_s17, %s1980_s27 }
  0x16   : > { %s1890_s30 = sshll.u32 (%p89_p3), %s196_s29, 2  ;;  %s2384_s7 = scalar_lea.vmem (%p89_p3), [#allocation3], %s2098_s28 }
  0x17   : > { %s2379_s6 = scalar_lea.vmem (%p89_p3), %s2803_s1, %s1890_s30 }
  0x18   : > { %v216_v0 = vld [vmem:[%s2379_s6] sm:$0xf] (%p89_p3)  ;;  %v218_v1 = vld [vmem:[%s2379_s6 + $0x8] sm:$0xf] (%p89_p3)  ;;  %v220_v2 = vld [vmem:[%s2379_s6 + $0x10] sm:$0xf] (%p89_p3) }
  0x19   : > { %217 = vst [vmem:[%s2384_s7] sm:$0xf] %v216_v0  ;;  %219 = vst [vmem:[%s2384_s7 + $0x4] sm:$0xf] %v218_v1  ;;  %v222_v3 = vld [vmem:[%s2379_s6 + $0x18] sm:$0xf] }
  0x1a   : > { %221 = vst [vmem:[%s2384_s7 + $0x8] sm:$0xf] %v220_v2  ;;  %v224_v4 = vld [vmem:[%s2379_s6 + $0x20] sm:$0xf]  ;;  %v226_v5 = vld [vmem:[%s2379_s6 + $0x28] sm:$0xf] }
  0x1b   : > { %223 = vst [vmem:[%s2384_s7 + $0xc] sm:$0xf] %v222_v3  ;;  %225 = vst [vmem:[%s2384_s7 + $0x10] sm:$0xf] %v224_v4  ;;  %v228_v6 = vld [vmem:[%s2379_s6 + $0x30] sm:$0xf] }
  0x1c   : > { %227 = vst [vmem:[%s2384_s7 + $0x14] sm:$0xf] %v226_v5  ;;  %v230_v7 = vld [vmem:[%s2379_s6 + $0x38] sm:$0xf]  ;;  %v232_v8 = vld [vmem:[%s2379_s6 + $0x40] sm:$0xf] }
  0x1d   : > { %229 = vst [vmem:[%s2384_s7 + $0x18] sm:$0xf] %v228_v6  ;;  %231 = vst [vmem:[%s2384_s7 + $0x1c] sm:$0xf] %v230_v7  ;;  %v234_v9 = vld [vmem:[%s2379_s6 + $0x48] sm:$0xf] }
  0x1e   : > { %233 = vst [vmem:[%s2384_s7 + $0x20] sm:$0xf] %v232_v8  ;;  %v236_v10 = vld [vmem:[%s2379_s6 + $0x50] sm:$0xf]  ;;  %v238_v11 = vld [vmem:[%s2379_s6 + $0x58] sm:$0xf] }
  0x1f   : > { %235 = vst [vmem:[%s2384_s7 + $0x24] sm:$0xf] %v234_v9  ;;  %237 = vst [vmem:[%s2384_s7 + $0x28] sm:$0xf] %v236_v10  ;;  %v240_v12 = vld [vmem:[%s2379_s6 + $0x60] sm:$0xf] }
  0x20   : > { %239 = vst [vmem:[%s2384_s7 + $0x2c] sm:$0xf] %v238_v11  ;;  %v242_v13 = vld [vmem:[%s2379_s6 + $0x68] sm:$0xf]  ;;  %v244_v14 = vld [vmem:[%s2379_s6 + $0x70] sm:$0xf] }
  0x21   : > { %241 = vst [vmem:[%s2384_s7 + $0x30] sm:$0xf] %v240_v12  ;;  %243 = vst [vmem:[%s2384_s7 + $0x34] sm:$0xf] %v242_v13  ;;  %v246_v15 = vld [vmem:[%s2379_s6 + $0x78] sm:$0xf] }
  0x22   : > { %245 = vst [vmem:[%s2384_s7 + $0x38] sm:$0xf] %v244_v14  ;;  %v248_v16 = vld [vmem:[%s2379_s6 + $0x80] sm:$0xf]  ;;  %v250_v17 = vld [vmem:[%s2379_s6 + $0x88] sm:$0xf] }
  0x23   : > { %247 = vst [vmem:[%s2384_s7 + $0x3c] sm:$0xf] %v246_v15  ;;  %249 = vst [vmem:[%s2384_s7 + $0x40] sm:$0xf] %v248_v16  ;;  %v252_v18 = vld [vmem:[%s2379_s6 + $0x90] sm:$0xf] }
  0x24   : > { %251 = vst [vmem:[%s2384_s7 + $0x44] sm:$0xf] %v250_v17  ;;  %v254_v19 = vld [vmem:[%s2379_s6 + $0x98] sm:$0xf]  ;;  %v256_v20 = vld [vmem:[%s2379_s6 + $0xa0] sm:$0xf] }
  0x25   : > { %253 = vst [vmem:[%s2384_s7 + $0x48] sm:$0xf] %v252_v18  ;;  %255 = vst [vmem:[%s2384_s7 + $0x4c] sm:$0xf] %v254_v19  ;;  %v258_v21 = vld [vmem:[%s2379_s6 + $0xa8] sm:$0xf] }
  0x26   : > { %257 = vst [vmem:[%s2384_s7 + $0x50] sm:$0xf] %v256_v20  ;;  %v260_v22 = vld [vmem:[%s2379_s6 + $0xb0] sm:$0xf]  ;;  %v262_v23 = vld [vmem:[%s2379_s6 + $0xb8] sm:$0xf] }
  0x27   : > { %259 = vst [vmem:[%s2384_s7 + $0x54] sm:$0xf] %v258_v21  ;;  %261 = vst [vmem:[%s2384_s7 + $0x58] sm:$0xf] %v260_v22  ;;  %v264_v24 = vld [vmem:[%s2379_s6 + $0xc0] sm:$0xf] }
  0x28   : > { %263 = vst [vmem:[%s2384_s7 + $0x5c] sm:$0xf] %v262_v23  ;;  %v266_v25 = vld [vmem:[%s2379_s6 + $0xc8] sm:$0xf]  ;;  %v268_v26 = vld [vmem:[%s2379_s6 + $0xd0] sm:$0xf] }
  0x29   : > { %265 = vst [vmem:[%s2384_s7 + $0x60] sm:$0xf] %v264_v24  ;;  %267 = vst [vmem:[%s2384_s7 + $0x64] sm:$0xf] %v266_v25  ;;  %v270_v27 = vld [vmem:[%s2379_s6 + $0xd8] sm:$0xf] }
  0x2a   : > { %269 = vst [vmem:[%s2384_s7 + $0x68] sm:$0xf] %v268_v26  ;;  %v272_v28 = vld [vmem:[%s2379_s6 + $0xe0] sm:$0xf]  ;;  %v274_v29 = vld [vmem:[%s2379_s6 + $0xe8] sm:$0xf] }
  0x2b   : > { %271 = vst [vmem:[%s2384_s7 + $0x6c] sm:$0xf] %v270_v27  ;;  %273 = vst [vmem:[%s2384_s7 + $0x70] sm:$0xf] %v272_v28  ;;  %v276_v30 = vld [vmem:[%s2379_s6 + $0xf0] sm:$0xf] }
  0x2c   : > { %275 = vst [vmem:[%s2384_s7 + $0x74] sm:$0xf] %v274_v29  ;;  %v278_v31 = vld [vmem:[%s2379_s6 + $0xf8] sm:$0xf]  ;;  %v280_v32 = vld [vmem:[%s2379_s6 + $0x100] sm:$0xf] }
  0x2d   : > { %277 = vst [vmem:[%s2384_s7 + $0x78] sm:$0xf] %v276_v30  ;;  %279 = vst [vmem:[%s2384_s7 + $0x7c] sm:$0xf] %v278_v31  ;;  %v282_v33 = vld [vmem:[%s2379_s6 + $0x108] sm:$0xf] }
  0x2e   : > { %281 = vst [vmem:[%s2384_s7 + $0x80] sm:$0xf] %v280_v32  ;;  %v284_v34 = vld [vmem:[%s2379_s6 + $0x110] sm:$0xf]  ;;  %v286_v35 = vld [vmem:[%s2379_s6 + $0x118] sm:$0xf] }
  0x2f   : > { %283 = vst [vmem:[%s2384_s7 + $0x84] sm:$0xf] %v282_v33  ;;  %285 = vst [vmem:[%s2384_s7 + $0x88] sm:$0xf] %v284_v34  ;;  %v288_v36 = vld [vmem:[%s2379_s6 + $0x120] sm:$0xf] }
  0x30   : > { %287 = vst [vmem:[%s2384_s7 + $0x8c] sm:$0xf] %v286_v35  ;;  %v290_v37 = vld [vmem:[%s2379_s6 + $0x128] sm:$0xf]  ;;  %v292_v38 = vld [vmem:[%s2379_s6 + $0x130] sm:$0xf] }
  0x31   : > { %289 = vst [vmem:[%s2384_s7 + $0x90] sm:$0xf] %v288_v36  ;;  %291 = vst [vmem:[%s2384_s7 + $0x94] sm:$0xf] %v290_v37  ;;  %v294_v39 = vld [vmem:[%s2379_s6 + $0x138] sm:$0xf] }
  0x32   : > { %293 = vst [vmem:[%s2384_s7 + $0x98] sm:$0xf] %v292_v38  ;;  %v296_v40 = vld [vmem:[%s2379_s6 + $0x140] sm:$0xf]  ;;  %v298_v41 = vld [vmem:[%s2379_s6 + $0x148] sm:$0xf] }
  0x33   : > { %295 = vst [vmem:[%s2384_s7 + $0x9c] sm:$0xf] %v294_v39  ;;  %297 = vst [vmem:[%s2384_s7 + $0xa0] sm:$0xf] %v296_v40  ;;  %v300_v42 = vld [vmem:[%s2379_s6 + $0x150] sm:$0xf] }
  0x34   : > { %299 = vst [vmem:[%s2384_s7 + $0xa4] sm:$0xf] %v298_v41  ;;  %v302_v43 = vld [vmem:[%s2379_s6 + $0x158] sm:$0xf]  ;;  %v304_v44 = vld [vmem:[%s2379_s6 + $0x160] sm:$0xf] }
  0x35   : > { %301 = vst [vmem:[%s2384_s7 + $0xa8] sm:$0xf] %v300_v42  ;;  %303 = vst [vmem:[%s2384_s7 + $0xac] sm:$0xf] %v302_v43  ;;  %v306_v45 = vld [vmem:[%s2379_s6 + $0x168] sm:$0xf] }
  0x36   : > { %305 = vst [vmem:[%s2384_s7 + $0xb0] sm:$0xf] %v304_v44  ;;  %v308_v46 = vld [vmem:[%s2379_s6 + $0x170] sm:$0xf]  ;;  %v310_v47 = vld [vmem:[%s2379_s6 + $0x178] sm:$0xf] }
  0x37   : > { %307 = vst [vmem:[%s2384_s7 + $0xb4] sm:$0xf] %v306_v45  ;;  %309 = vst [vmem:[%s2384_s7 + $0xb8] sm:$0xf] %v308_v46  ;;  %v312_v48 = vld [vmem:[%s2379_s6 + $0x180] sm:$0xf] }
  0x38   : > { %311 = vst [vmem:[%s2384_s7 + $0xbc] sm:$0xf] %v310_v47  ;;  %v314_v49 = vld [vmem:[%s2379_s6 + $0x188] sm:$0xf]  ;;  %v316_v50 = vld [vmem:[%s2379_s6 + $0x190] sm:$0xf] }
  0x39   : > { %313 = vst [vmem:[%s2384_s7 + $0xc0] sm:$0xf] %v312_v48  ;;  %315 = vst [vmem:[%s2384_s7 + $0xc4] sm:$0xf] %v314_v49  ;;  %v318_v51 = vld [vmem:[%s2379_s6 + $0x198] sm:$0xf] }
  0x3a   : > { %317 = vst [vmem:[%s2384_s7 + $0xc8] sm:$0xf] %v316_v50  ;;  %v320_v52 = vld [vmem:[%s2379_s6 + $0x1a0] sm:$0xf]  ;;  %v322_v53 = vld [vmem:[%s2379_s6 + $0x1a8] sm:$0xf] }
  0x3b   : > { %319 = vst [vmem:[%s2384_s7 + $0xcc] sm:$0xf] %v318_v51  ;;  %321 = vst [vmem:[%s2384_s7 + $0xd0] sm:$0xf] %v320_v52  ;;  %v324_v54 = vld [vmem:[%s2379_s6 + $0x1b0] sm:$0xf] }
  0x3c   : > { %323 = vst [vmem:[%s2384_s7 + $0xd4] sm:$0xf] %v322_v53  ;;  %v326_v55 = vld [vmem:[%s2379_s6 + $0x1b8] sm:$0xf]  ;;  %v328_v56 = vld [vmem:[%s2379_s6 + $0x1c0] sm:$0xf] }
  0x3d   : > { %325 = vst [vmem:[%s2384_s7 + $0xd8] sm:$0xf] %v324_v54  ;;  %327 = vst [vmem:[%s2384_s7 + $0xdc] sm:$0xf] %v326_v55  ;;  %v330_v57 = vld [vmem:[%s2379_s6 + $0x1c8] sm:$0xf] }
  0x3e   : > { %329 = vst [vmem:[%s2384_s7 + $0xe0] sm:$0xf] %v328_v56  ;;  %v332_v58 = vld [vmem:[%s2379_s6 + $0x1d0] sm:$0xf]  ;;  %v334_v59 = vld [vmem:[%s2379_s6 + $0x1d8] sm:$0xf] }
  0x3f   : > { %331 = vst [vmem:[%s2384_s7 + $0xe4] sm:$0xf] %v330_v57  ;;  %333 = vst [vmem:[%s2384_s7 + $0xe8] sm:$0xf] %v332_v58  ;;  %v336_v60 = vld [vmem:[%s2379_s6 + $0x1e0] sm:$0xf] }
  0x40   : > { %335 = vst [vmem:[%s2384_s7 + $0xec] sm:$0xf] %v334_v59  ;;  %v338_v61 = vld [vmem:[%s2379_s6 + $0x1e8] sm:$0xf]  ;;  %v340_v62 = vld [vmem:[%s2379_s6 + $0x1f0] sm:$0xf] }
  0x41   : > { %337 = vst [vmem:[%s2384_s7 + $0xf0] sm:$0xf] %v336_v60  ;;  %339 = vst [vmem:[%s2384_s7 + $0xf4] sm:$0xf] %v338_v61  ;;  %v342_v63 = vld [vmem:[%s2379_s6 + $0x1f8] sm:$0xf] }
  0x42   : > { %341 = vst [vmem:[%s2384_s7 + $0xf8] sm:$0xf] %v340_v62  ;;  %v344_v0 = vld [vmem:[%s2379_s6 + $0x200] sm:$0xf]  ;;  %v346_v1 = vld [vmem:[%s2379_s6 + $0x208] sm:$0xf] }
  0x43   : > { %343 = vst [vmem:[%s2384_s7 + $0xfc] sm:$0xf] %v342_v63  ;;  %345 = vst [vmem:[%s2384_s7 + $0x100] sm:$0xf] %v344_v0  ;;  %v348_v2 = vld [vmem:[%s2379_s6 + $0x210] sm:$0xf] }
  0x44   : > { %347 = vst [vmem:[%s2384_s7 + $0x104] sm:$0xf] %v346_v1  ;;  %v350_v3 = vld [vmem:[%s2379_s6 + $0x218] sm:$0xf]  ;;  %v352_v4 = vld [vmem:[%s2379_s6 + $0x220] sm:$0xf] }
  0x45   : > { %349 = vst [vmem:[%s2384_s7 + $0x108] sm:$0xf] %v348_v2  ;;  %351 = vst [vmem:[%s2384_s7 + $0x10c] sm:$0xf] %v350_v3  ;;  %v354_v5 = vld [vmem:[%s2379_s6 + $0x228] sm:$0xf] }
  0x46   : > { %353 = vst [vmem:[%s2384_s7 + $0x110] sm:$0xf] %v352_v4  ;;  %v356_v6 = vld [vmem:[%s2379_s6 + $0x230] sm:$0xf]  ;;  %v358_v7 = vld [vmem:[%s2379_s6 + $0x238] sm:$0xf] }
  0x47   : > { %355 = vst [vmem:[%s2384_s7 + $0x114] sm:$0xf] %v354_v5  ;;  %357 = vst [vmem:[%s2384_s7 + $0x118] sm:$0xf] %v356_v6  ;;  %v360_v8 = vld [vmem:[%s2379_s6 + $0x240] sm:$0xf] }
  0x48   : > { %359 = vst [vmem:[%s2384_s7 + $0x11c] sm:$0xf] %v358_v7  ;;  %v362_v9 = vld [vmem:[%s2379_s6 + $0x248] sm:$0xf]  ;;  %v364_v10 = vld [vmem:[%s2379_s6 + $0x250] sm:$0xf] }
  0x49   : > { %361 = vst [vmem:[%s2384_s7 + $0x120] sm:$0xf] %v360_v8  ;;  %363 = vst [vmem:[%s2384_s7 + $0x124] sm:$0xf] %v362_v9  ;;  %v366_v11 = vld [vmem:[%s2379_s6 + $0x258] sm:$0xf] }
  0x4a   : > { %365 = vst [vmem:[%s2384_s7 + $0x128] sm:$0xf] %v364_v10  ;;  %v368_v12 = vld [vmem:[%s2379_s6 + $0x260] sm:$0xf]  ;;  %v370_v13 = vld [vmem:[%s2379_s6 + $0x268] sm:$0xf] }
  0x4b   : > { %367 = vst [vmem:[%s2384_s7 + $0x12c] sm:$0xf] %v366_v11  ;;  %369 = vst [vmem:[%s2384_s7 + $0x130] sm:$0xf] %v368_v12  ;;  %v372_v14 = vld [vmem:[%s2379_s6 + $0x270] sm:$0xf] }
  0x4c   : > { %371 = vst [vmem:[%s2384_s7 + $0x134] sm:$0xf] %v370_v13  ;;  %v374_v15 = vld [vmem:[%s2379_s6 + $0x278] sm:$0xf]  ;;  %v376_v16 = vld [vmem:[%s2379_s6 + $0x280] sm:$0xf] }
  0x4d   : > { %373 = vst [vmem:[%s2384_s7 + $0x138] sm:$0xf] %v372_v14  ;;  %375 = vst [vmem:[%s2384_s7 + $0x13c] sm:$0xf] %v374_v15  ;;  %v378_v17 = vld [vmem:[%s2379_s6 + $0x288] sm:$0xf] }
  0x4e   : > { %377 = vst [vmem:[%s2384_s7 + $0x140] sm:$0xf] %v376_v16  ;;  %v380_v18 = vld [vmem:[%s2379_s6 + $0x290] sm:$0xf]  ;;  %v382_v19 = vld [vmem:[%s2379_s6 + $0x298] sm:$0xf] }
  0x4f   : > { %379 = vst [vmem:[%s2384_s7 + $0x144] sm:$0xf] %v378_v17  ;;  %381 = vst [vmem:[%s2384_s7 + $0x148] sm:$0xf] %v380_v18  ;;  %v384_v20 = vld [vmem:[%s2379_s6 + $0x2a0] sm:$0xf] }
  0x50   : > { %383 = vst [vmem:[%s2384_s7 + $0x14c] sm:$0xf] %v382_v19  ;;  %v386_v21 = vld [vmem:[%s2379_s6 + $0x2a8] sm:$0xf]  ;;  %v388_v22 = vld [vmem:[%s2379_s6 + $0x2b0] sm:$0xf] }
  0x51   : > { %385 = vst [vmem:[%s2384_s7 + $0x150] sm:$0xf] %v384_v20  ;;  %387 = vst [vmem:[%s2384_s7 + $0x154] sm:$0xf] %v386_v21  ;;  %v390_v23 = vld [vmem:[%s2379_s6 + $0x2b8] sm:$0xf] }
  0x52   : > { %389 = vst [vmem:[%s2384_s7 + $0x158] sm:$0xf] %v388_v22  ;;  %v392_v24 = vld [vmem:[%s2379_s6 + $0x2c0] sm:$0xf]  ;;  %v394_v25 = vld [vmem:[%s2379_s6 + $0x2c8] sm:$0xf] }
  0x53   : > { %391 = vst [vmem:[%s2384_s7 + $0x15c] sm:$0xf] %v390_v23  ;;  %393 = vst [vmem:[%s2384_s7 + $0x160] sm:$0xf] %v392_v24  ;;  %v396_v26 = vld [vmem:[%s2379_s6 + $0x2d0] sm:$0xf] }
  0x54   : > { %395 = vst [vmem:[%s2384_s7 + $0x164] sm:$0xf] %v394_v25  ;;  %v398_v27 = vld [vmem:[%s2379_s6 + $0x2d8] sm:$0xf]  ;;  %v400_v28 = vld [vmem:[%s2379_s6 + $0x2e0] sm:$0xf] }
  0x55   : > { %397 = vst [vmem:[%s2384_s7 + $0x168] sm:$0xf] %v396_v26  ;;  %399 = vst [vmem:[%s2384_s7 + $0x16c] sm:$0xf] %v398_v27  ;;  %v402_v29 = vld [vmem:[%s2379_s6 + $0x2e8] sm:$0xf] }
  0x56   : > { %401 = vst [vmem:[%s2384_s7 + $0x170] sm:$0xf] %v400_v28  ;;  %v404_v30 = vld [vmem:[%s2379_s6 + $0x2f0] sm:$0xf]  ;;  %v406_v31 = vld [vmem:[%s2379_s6 + $0x2f8] sm:$0xf] }
  0x57   : > { %403 = vst [vmem:[%s2384_s7 + $0x174] sm:$0xf] %v402_v29  ;;  %405 = vst [vmem:[%s2384_s7 + $0x178] sm:$0xf] %v404_v30  ;;  %v408_v32 = vld [vmem:[%s2379_s6 + $0x300] sm:$0xf] }
  0x58   : > { %407 = vst [vmem:[%s2384_s7 + $0x17c] sm:$0xf] %v406_v31  ;;  %v410_v33 = vld [vmem:[%s2379_s6 + $0x308] sm:$0xf]  ;;  %v412_v34 = vld [vmem:[%s2379_s6 + $0x310] sm:$0xf] }
  0x59   : > { %409 = vst [vmem:[%s2384_s7 + $0x180] sm:$0xf] %v408_v32  ;;  %411 = vst [vmem:[%s2384_s7 + $0x184] sm:$0xf] %v410_v33  ;;  %v414_v35 = vld [vmem:[%s2379_s6 + $0x318] sm:$0xf] }
  0x5a   : > { %413 = vst [vmem:[%s2384_s7 + $0x188] sm:$0xf] %v412_v34  ;;  %v416_v36 = vld [vmem:[%s2379_s6 + $0x320] sm:$0xf]  ;;  %v418_v37 = vld [vmem:[%s2379_s6 + $0x328] sm:$0xf] }
  0x5b   : > { %415 = vst [vmem:[%s2384_s7 + $0x18c] sm:$0xf] %v414_v35  ;;  %417 = vst [vmem:[%s2384_s7 + $0x190] sm:$0xf] %v416_v36  ;;  %v420_v38 = vld [vmem:[%s2379_s6 + $0x330] sm:$0xf] }
  0x5c   : > { %419 = vst [vmem:[%s2384_s7 + $0x194] sm:$0xf] %v418_v37  ;;  %v422_v39 = vld [vmem:[%s2379_s6 + $0x338] sm:$0xf]  ;;  %v424_v40 = vld [vmem:[%s2379_s6 + $0x340] sm:$0xf] }
  0x5d   : > { %421 = vst [vmem:[%s2384_s7 + $0x198] sm:$0xf] %v420_v38  ;;  %423 = vst [vmem:[%s2384_s7 + $0x19c] sm:$0xf] %v422_v39  ;;  %v426_v41 = vld [vmem:[%s2379_s6 + $0x348] sm:$0xf] }
  0x5e   : > { %425 = vst [vmem:[%s2384_s7 + $0x1a0] sm:$0xf] %v424_v40  ;;  %v428_v42 = vld [vmem:[%s2379_s6 + $0x350] sm:$0xf]  ;;  %v430_v43 = vld [vmem:[%s2379_s6 + $0x358] sm:$0xf] }
  0x5f   : > { %427 = vst [vmem:[%s2384_s7 + $0x1a4] sm:$0xf] %v426_v41  ;;  %429 = vst [vmem:[%s2384_s7 + $0x1a8] sm:$0xf] %v428_v42  ;;  %v432_v44 = vld [vmem:[%s2379_s6 + $0x360] sm:$0xf] }
  0x60   : > { %431 = vst [vmem:[%s2384_s7 + $0x1ac] sm:$0xf] %v430_v43  ;;  %v434_v45 = vld [vmem:[%s2379_s6 + $0x368] sm:$0xf]  ;;  %v436_v46 = vld [vmem:[%s2379_s6 + $0x370] sm:$0xf] }
  0x61   : > { %433 = vst [vmem:[%s2384_s7 + $0x1b0] sm:$0xf] %v432_v44  ;;  %435 = vst [vmem:[%s2384_s7 + $0x1b4] sm:$0xf] %v434_v45  ;;  %v438_v47 = vld [vmem:[%s2379_s6 + $0x378] sm:$0xf] }
  0x62   : > { %437 = vst [vmem:[%s2384_s7 + $0x1b8] sm:$0xf] %v436_v46  ;;  %v440_v48 = vld [vmem:[%s2379_s6 + $0x380] sm:$0xf]  ;;  %v442_v49 = vld [vmem:[%s2379_s6 + $0x388] sm:$0xf] }
  0x63   : > { %439 = vst [vmem:[%s2384_s7 + $0x1bc] sm:$0xf] %v438_v47  ;;  %441 = vst [vmem:[%s2384_s7 + $0x1c0] sm:$0xf] %v440_v48  ;;  %v444_v50 = vld [vmem:[%s2379_s6 + $0x390] sm:$0xf] }
  0x64   : > { %443 = vst [vmem:[%s2384_s7 + $0x1c4] sm:$0xf] %v442_v49  ;;  %v446_v51 = vld [vmem:[%s2379_s6 + $0x398] sm:$0xf]  ;;  %v448_v52 = vld [vmem:[%s2379_s6 + $0x3a0] sm:$0xf] }
  0x65   : > { %445 = vst [vmem:[%s2384_s7 + $0x1c8] sm:$0xf] %v444_v50  ;;  %447 = vst [vmem:[%s2384_s7 + $0x1cc] sm:$0xf] %v446_v51  ;;  %v450_v53 = vld [vmem:[%s2379_s6 + $0x3a8] sm:$0xf] }
  0x66   : > { %449 = vst [vmem:[%s2384_s7 + $0x1d0] sm:$0xf] %v448_v52  ;;  %v452_v54 = vld [vmem:[%s2379_s6 + $0x3b0] sm:$0xf]  ;;  %v454_v55 = vld [vmem:[%s2379_s6 + $0x3b8] sm:$0xf] }
  0x67   : > { %451 = vst [vmem:[%s2384_s7 + $0x1d4] sm:$0xf] %v450_v53  ;;  %453 = vst [vmem:[%s2384_s7 + $0x1d8] sm:$0xf] %v452_v54  ;;  %v456_v56 = vld [vmem:[%s2379_s6 + $0x3c0] sm:$0xf] }
  0x68   : > { %455 = vst [vmem:[%s2384_s7 + $0x1dc] sm:$0xf] %v454_v55  ;;  %v458_v57 = vld [vmem:[%s2379_s6 + $0x3c8] sm:$0xf]  ;;  %v460_v58 = vld [vmem:[%s2379_s6 + $0x3d0] sm:$0xf] }
  0x69   : > { %457 = vst [vmem:[%s2384_s7 + $0x1e0] sm:$0xf] %v456_v56  ;;  %459 = vst [vmem:[%s2384_s7 + $0x1e4] sm:$0xf] %v458_v57  ;;  %v462_v59 = vld [vmem:[%s2379_s6 + $0x3d8] sm:$0xf] }
  0x6a   : > { %461 = vst [vmem:[%s2384_s7 + $0x1e8] sm:$0xf] %v460_v58  ;;  %v464_v60 = vld [vmem:[%s2379_s6 + $0x3e0] sm:$0xf]  ;;  %v466_v61 = vld [vmem:[%s2379_s6 + $0x3e8] sm:$0xf] }
  0x6b   : > { %463 = vst [vmem:[%s2384_s7 + $0x1ec] sm:$0xf] %v462_v59  ;;  %465 = vst [vmem:[%s2384_s7 + $0x1f0] sm:$0xf] %v464_v60  ;;  %v468_v62 = vld [vmem:[%s2379_s6 + $0x3f0] sm:$0xf] }
  0x6c   : > { %467 = vst [vmem:[%s2384_s7 + $0x1f4] sm:$0xf] %v466_v61  ;;  %v470_v63 = vld [vmem:[%s2379_s6 + $0x3f8] sm:$0xf]  ;;  %v472_v0 = vld [vmem:[%s2379_s6 + $0x400] sm:$0xf] }
  0x6d   : > { %469 = vst [vmem:[%s2384_s7 + $0x1f8] sm:$0xf] %v468_v62  ;;  %471 = vst [vmem:[%s2384_s7 + $0x1fc] sm:$0xf] %v470_v63  ;;  %v474_v1 = vld [vmem:[%s2379_s6 + $0x408] sm:$0xf] }
  0x6e   : > { %473 = vst [vmem:[%s2384_s7 + $0x200] sm:$0xf] %v472_v0  ;;  %v476_v2 = vld [vmem:[%s2379_s6 + $0x410] sm:$0xf]  ;;  %v478_v3 = vld [vmem:[%s2379_s6 + $0x418] sm:$0xf] }
  0x6f   : > { %475 = vst [vmem:[%s2384_s7 + $0x204] sm:$0xf] %v474_v1  ;;  %477 = vst [vmem:[%s2384_s7 + $0x208] sm:$0xf] %v476_v2  ;;  %v480_v4 = vld [vmem:[%s2379_s6 + $0x420] sm:$0xf] }
  0x70   : > { %479 = vst [vmem:[%s2384_s7 + $0x20c] sm:$0xf] %v478_v3  ;;  %v482_v5 = vld [vmem:[%s2379_s6 + $0x428] sm:$0xf]  ;;  %v484_v6 = vld [vmem:[%s2379_s6 + $0x430] sm:$0xf] }
  0x71   : > { %481 = vst [vmem:[%s2384_s7 + $0x210] sm:$0xf] %v480_v4  ;;  %483 = vst [vmem:[%s2384_s7 + $0x214] sm:$0xf] %v482_v5  ;;  %v486_v7 = vld [vmem:[%s2379_s6 + $0x438] sm:$0xf] }
  0x72   : > { %485 = vst [vmem:[%s2384_s7 + $0x218] sm:$0xf] %v484_v6  ;;  %v488_v8 = vld [vmem:[%s2379_s6 + $0x440] sm:$0xf]  ;;  %v490_v9 = vld [vmem:[%s2379_s6 + $0x448] sm:$0xf] }
  0x73   : > { %487 = vst [vmem:[%s2384_s7 + $0x21c] sm:$0xf] %v486_v7  ;;  %489 = vst [vmem:[%s2384_s7 + $0x220] sm:$0xf] %v488_v8  ;;  %v492_v10 = vld [vmem:[%s2379_s6 + $0x450] sm:$0xf] }
  0x74   : > { %491 = vst [vmem:[%s2384_s7 + $0x224] sm:$0xf] %v490_v9  ;;  %v494_v11 = vld [vmem:[%s2379_s6 + $0x458] sm:$0xf]  ;;  %v496_v12 = vld [vmem:[%s2379_s6 + $0x460] sm:$0xf] }
  0x75   : > { %493 = vst [vmem:[%s2384_s7 + $0x228] sm:$0xf] %v492_v10  ;;  %495 = vst [vmem:[%s2384_s7 + $0x22c] sm:$0xf] %v494_v11  ;;  %v498_v13 = vld [vmem:[%s2379_s6 + $0x468] sm:$0xf] }
  0x76   : > { %497 = vst [vmem:[%s2384_s7 + $0x230] sm:$0xf] %v496_v12  ;;  %v500_v14 = vld [vmem:[%s2379_s6 + $0x470] sm:$0xf]  ;;  %v502_v15 = vld [vmem:[%s2379_s6 + $0x478] sm:$0xf] }
  0x77   : > { %499 = vst [vmem:[%s2384_s7 + $0x234] sm:$0xf] %v498_v13  ;;  %501 = vst [vmem:[%s2384_s7 + $0x238] sm:$0xf] %v500_v14 }
  0x78   : > { %503 = vst [vmem:[%s2384_s7 + $0x23c] sm:$0xf] %v502_v15 }
  0x79 PF: > { %p1891_p7 = scmp.ge.s32.totalorder %s2294_s18, 1  ;;  %p819_p8 = scmp.lt.s32.totalorder %s2294_s18, 13 }
  0x7b   : > { %p820_p9 = pnand %p1891_p7, %p819_p8 }
  0x7c   : > { %s826_s8 = sand.u32 (!%p820_p9), 1, %s2270_s12   ;;  %s872_s9 = smul.u32 (!%p820_p9), 9, %s2278_s14 }
  0x7d   : > { %823 = sbr.rel (%p820_p9) target bundleno = 471 (0x1d7), region = 69  ;;  %p887_p10 = scmp.lt.s32.totalorder (!%p820_p9), %s2282_s15, 1 }
  0x7e   : > { %s2099_s10 = smul.u32 (!%p820_p9), 576, %s826_s8  ;;  %p877_p11 = scmp.lt.s32.totalorder (!%p820_p9), %s872_s9, 53 }
  0x7f   : > { %p1894_p12 = scmp.ne.s32.totalorder (!%p820_p9), %s2278_s14, 0 }
  0x80   : > { %s2694_s4 = scalar_lea.vmem (!%p820_p9), [#allocation3], %s2099_s10 }
  0x84   : > { %s2819_s9 = smov (!%p877_p11, %s872_s9), 53  ;;  %s2821_s15 = smov (!%p887_p10, %s2282_s15), 1 }
  0x85   : > { %s1892_s11 = sshll.u32 %s2819_s9, 2  ;;  %s889_s27 = scalar_lea.vmem %s2804_s2, %s2821_s15  ;;  %v2296_v16 = vmov (!%p1894_p12), 0.0  }
  0x86   : > { %s2682_s23 = scalar_lea.vmem %s2802_s0, %s1892_s11  ;;  %s1893_s12 = sshll.u32 %s2821_s15, 2  ;;  %907 = vst [vmem:[#allocation2] sm:$0xff] (!%p1894_p12), %v2296_v16 }
  0x87   : > { %s2692_s30 = scalar_lea.vmem %s2805_s3, %s1893_s12  ;;  %906 = sbr.rel (%p1894_p12) target bundleno = 142 (0x8e), region = 77 }
  0x8e PF: > { %v2159_v17 = vld [vmem:[%s2694_s4 + $0x40] sm:$0xff]   ;;  %v2163_v21 = vld [vmem:[%s2694_s4 + $0x48] sm:$0xff]   ;;  %v2167_v25 = vld [vmem:[%s2694_s4 + $0x50] sm:$0xff]   ;;  %vm2298_vm0 = vmmov 0   ;;  %p1976_p13 = scmp.ne.s32.totalorder %s2278_s14, 5 }
  0x8f   : > { %v2160_v18 = vld [vmem:[%s2694_s4 + $0xc0] sm:$0xff]   ;;  %1981 = vmatprep.subr.bf16.mxu0 %v2159_v17  ;;  %v2164_v22 = vld [vmem:[%s2694_s4 + $0xc8] sm:$0xff]   ;;  %v2168_v26 = vld [vmem:[%s2694_s4 + $0xd0] sm:$0xff]  }
  0x90   : > { %v2161_v19 = vld [vmem:[%s2694_s4] sm:$0xff]   ;;  %2003 = vmatprep.subr.bf16.mxu1 %v2160_v18  ;;  %v2165_v23 = vld [vmem:[%s2694_s4 + $0x8] sm:$0xff]   ;;  %v2169_v27 = vld [vmem:[%s2694_s4 + $0x10] sm:$0xff]  }
  0x91   : > { %v2162_v20 = vld [vmem:[%s2694_s4 + $0x80] sm:$0xff]   ;;  %1982 = vmatpush3.bf16.msra.mxu0 %v2161_v19  ;;  %v2166_v24 = vld [vmem:[%s2694_s4 + $0x88] sm:$0xff]   ;;  %v2170_v28 = vld [vmem:[%s2694_s4 + $0x90] sm:$0xff]  }
  0x92   : > { %2004 = vmatpush3.bf16.msra.mxu1 %v2162_v20  ;;  %1983 = vmatprep.subr.bf16.mxu0 %v2163_v21  ;;  %v2171_v29 = vld [vmem:[%s2694_s4 + $0x58] sm:$0xff]   ;;  %v2175_v33 = vld [vmem:[%s2694_s4 + $0x60] sm:$0xff]   ;;  %v2179_v37 = vld [vmem:[%s2694_s4 + $0x68] sm:$0xff]  }
  0x93   : > { %2005 = vmatprep.subr.bf16.mxu1 %v2164_v22  ;;  %v2172_v30 = vld [vmem:[%s2694_s4 + $0xd8] sm:$0xff]   ;;  %v2176_v34 = vld [vmem:[%s2694_s4 + $0xe0] sm:$0xff]   ;;  %v2180_v38 = vld [vmem:[%s2694_s4 + $0xe8] sm:$0xff]  }
  0x94   : > { %v2173_v31 = vld [vmem:[%s2694_s4 + $0x18] sm:$0xff]   ;;  %v2177_v35 = vld [vmem:[%s2694_s4 + $0x20] sm:$0xff]   ;;  %v2181_v39 = vld [vmem:[%s2694_s4 + $0x28] sm:$0xff]  }
  0x95   : > { %1984 = vmatpush3.bf16.msra.mxu0 %v2165_v23  ;;  %v2174_v32 = vld [vmem:[%s2694_s4 + $0x98] sm:$0xff]   ;;  %v2178_v36 = vld [vmem:[%s2694_s4 + $0xa0] sm:$0xff]   ;;  %v2182_v40 = vld [vmem:[%s2694_s4 + $0xa8] sm:$0xff]  }
  0x96   : > { %2006 = vmatpush3.bf16.msra.mxu1 %v2166_v24  ;;  %1985 = vmatprep.subr.bf16.mxu0 %v2167_v25  ;;  %v2183_v41 = vld [vmem:[%s2694_s4 + $0x70] sm:$0xff]   ;;  %v2187_v45 = vld [vmem:[%s2694_s4 + $0x78] sm:$0xff]   ;;  %v910_v50 = vld [vmem:[%s2682_s23 + $0x8] sm:$0xff] }
  0x97   : > { %2007 = vmatprep.subr.bf16.mxu1 %v2168_v26  ;;  %v2184_v42 = vld [vmem:[%s2694_s4 + $0xf0] sm:$0xff]   ;;  %v2188_v46 = vld [vmem:[%s2694_s4 + $0xf8] sm:$0xff]   ;;  %v1897_v53 = vcombine.low %v910_v50, %v910_v50  ;;  %v1898_v54 = vcombine.high %v910_v50, %v910_v50  ;;  %v2195_v55 = vld [vmem:[%s2694_s4 + $0x140] sm:$0xff]  }
  0x98   : > { %v2185_v43 = vld [vmem:[%s2694_s4 + $0x30] sm:$0xff]   ;;  %v2189_v47 = vld [vmem:[%s2694_s4 + $0x38] sm:$0xff]   ;;  %v2196_v56 = vld [vmem:[%s2694_s4 + $0x100] sm:$0xff]  }
  0x99   : > { %1986 = vmatpush3.bf16.msra.mxu0 %v2169_v27  ;;  %v2186_v44 = vld [vmem:[%s2694_s4 + $0xb0] sm:$0xff]   ;;  %v2190_v48 = vld [vmem:[%s2694_s4 + $0xb8] sm:$0xff]   ;;  %1594 = vmatprep.mubr.bf16.mxu1 %v1898_v54  ;;  %v2197_v57 = vld [vmem:[%s2694_s4 + $0x1c0] sm:$0xff]  }
  0x9a   : > { %2008 = vmatpush3.bf16.msra.mxu1 %v2170_v28  ;;  %1987 = vmatprep.subr.bf16.mxu0 %v2171_v29  ;;  %v909_v49 = vld [vmem:[%s2682_s23] sm:$0xff]  ;;  %v2198_v58 = vld [vmem:[%s2694_s4 + $0x180] sm:$0xff]   ;;  %v2199_v59 = vld [vmem:[%s2694_s4 + $0x148] sm:$0xff]  }
  0x9b   : > { %2009 = vmatprep.subr.bf16.mxu1 %v2172_v30  ;;  %v1895_v51 = vcombine.low %v909_v49, %v909_v49  ;;  %v1896_v52 = vcombine.high %v909_v49, %v909_v49  ;;  %v2200_v60 = vld [vmem:[%s2694_s4 + $0x108] sm:$0xff]   ;;  %v2203_v63 = vld [vmem:[%s2694_s4 + $0x150] sm:$0xff]   ;;  %v2207_v3 = vld [vmem:[%s2694_s4 + $0x158] sm:$0xff]   ;;  %v2297_v30 = vmov 0.0  }
  0x9c   : > { %v2201_v61 = vld [vmem:[%s2694_s4 + $0x1c8] sm:$0xff]   ;;  %v2204_v0 = vld [vmem:[%s2694_s4 + $0x110] sm:$0xff]   ;;  %v2208_v4 = vld [vmem:[%s2694_s4 + $0x118] sm:$0xff]  }
  0x9d   : > { %1988 = vmatpush3.bf16.msra.mxu0 %v2173_v31  ;;  %1554 = vmatprep.mubr.bf16.mxu0 %v1896_v52  ;;  %v2202_v62 = vld [vmem:[%s2694_s4 + $0x188] sm:$0xff]   ;;  %v2205_v1 = vld [vmem:[%s2694_s4 + $0x1d0] sm:$0xff]   ;;  %v2209_v5 = vld [vmem:[%s2694_s4 + $0x1d8] sm:$0xff]  }
  0x9e   : > { %2010 = vmatpush3.bf16.msra.mxu1 %v2174_v32  ;;  %1989 = vmatprep.subr.bf16.mxu0 %v2175_v33  ;;  %v2206_v2 = vld [vmem:[%s2694_s4 + $0x190] sm:$0xff]   ;;  %v2210_v6 = vld [vmem:[%s2694_s4 + $0x198] sm:$0xff]   ;;  %v2211_v7 = vld [vmem:[%s2694_s4 + $0x160] sm:$0xff]  }
  0x9f   : > { %2011 = vmatprep.subr.bf16.mxu1 %v2176_v34  ;;  %v2212_v8 = vld [vmem:[%s2694_s4 + $0x120] sm:$0xff]   ;;  %v2215_v11 = vld [vmem:[%s2694_s4 + $0x168] sm:$0xff]   ;;  %v2219_v15 = vld [vmem:[%s2694_s4 + $0x170] sm:$0xff]  }
  0xa0   : > { %v2213_v9 = vld [vmem:[%s2694_s4 + $0x1e0] sm:$0xff]   ;;  %v2216_v12 = vld [vmem:[%s2694_s4 + $0x128] sm:$0xff]   ;;  %v2220_v16 = vld [vmem:[%s2694_s4 + $0x130] sm:$0xff]  }
  0xa1   : > { %1990 = vmatpush3.bf16.msra.mxu0 %v2177_v35  ;;  %v2214_v10 = vld [vmem:[%s2694_s4 + $0x1a0] sm:$0xff]   ;;  %v2217_v13 = vld [vmem:[%s2694_s4 + $0x1e8] sm:$0xff]   ;;  %v2221_v17 = vld [vmem:[%s2694_s4 + $0x1f0] sm:$0xff]  }
  0xa2   : > { %2012 = vmatpush3.bf16.msra.mxu1 %v2178_v36  ;;  %1991 = vmatprep.subr.bf16.mxu0 %v2179_v37  ;;  %v2218_v14 = vld [vmem:[%s2694_s4 + $0x1a8] sm:$0xff]   ;;  %v2222_v18 = vld [vmem:[%s2694_s4 + $0x1b0] sm:$0xff]   ;;  %v2223_v19 = vld [vmem:[%s2694_s4 + $0x178] sm:$0xff]  }
  0xa3   : > { %2013 = vmatprep.subr.bf16.mxu1 %v2180_v38  ;;  %v2224_v20 = vld [vmem:[%s2694_s4 + $0x138] sm:$0xff]   ;;  %v911_v22 = vld [vmem:[%s2682_s23 + $0x10] sm:$0xff]  ;;  %v912_v26 = vld [vmem:[%s2682_s23 + $0x18] sm:$0xff] }
  0xa4   : > { %v2225_v21 = vld [vmem:[%s2694_s4 + $0x1f8] sm:$0xff]   ;;  %v1900_v23 = vcombine.high %v911_v22, %v911_v22  ;;  %v1899_v25 = vcombine.low %v911_v22, %v911_v22  ;;  %v1901_v27 = vcombine.low %v912_v26, %v912_v26  ;;  %v1902_v28 = vcombine.high %v912_v26, %v912_v26  ;;  %v2231_v29 = vld [vmem:[%s2694_s4 + $0x200] sm:$0xff]   ;;  %v2232_v31 = vld [vmem:[%s2694_s4 + $0x208] sm:$0xff]  }
  0xa5   : > { %1992 = vmatpush3.bf16.msra.mxu0 %v2181_v39  ;;  %v2228_v24 = vld [vmem:[%s2694_s4 + $0x1b8] sm:$0xff]   ;;  %v2233_v32 = vld [vmem:[%s2694_s4 + $0x210] sm:$0xff]   ;;  %v2235_v34 = vld [vmem:[%s2694_s4 + $0x220] sm:$0xff]  }
  0xa6   : > { %2014 = vmatpush3.bf16.msra.mxu1 %v2182_v40  ;;  %1993 = vmatprep.subr.bf16.mxu0 %v2183_v41  ;;  %v2234_v33 = vld [vmem:[%s2694_s4 + $0x218] sm:$0xff]   ;;  %v2236_v35 = vld [vmem:[%s2694_s4 + $0x228] sm:$0xff]   ;;  %v2237_v36 = vld [vmem:[%s2694_s4 + $0x230] sm:$0xff]  }
  0xa7   : > { %2015 = vmatprep.subr.bf16.mxu1 %v2184_v42  ;;  %v2238_v37 = vld [vmem:[%s2694_s4 + $0x238] sm:$0xff]  }
  0xa8   : > { %v2239_v38 = vld [vmem:[%s2682_s23 + $0x20] ss:$0 sps:$4 sm:$0xff]  }
  0xa9   : > { %1994 = vmatpush3.bf16.msra.mxu0 %v2185_v43 }
  0xaa   : > { %2016 = vmatpush3.bf16.msra.mxu1 %v2186_v44  ;;  %1995 = vmatprep.subr.bf16.mxu0 %v2187_v45 }
  0xab   : > { %2017 = vmatprep.subr.bf16.mxu1 %v2188_v46 }
  0xad   : > { %1996 = vmatpush3.bf16.msra.mxu0 %v2189_v47 }
  0xae   : > { %2018 = vmatpush3.bf16.msra.mxu1 %v2190_v48  ;;  %2025 = vmatprep.subr.bf16.mxu0 %v2195_v55 }
  0xaf   : > { %2047 = vmatprep.subr.bf16.mxu1 %v2197_v57 }
  0xb0   : > { %1555 = vmatmul.mubr.bf16.vlgmr.msra.gmra.mrb[0].mxu0 %v1895_v51 }
  0xb1   : > { %1595 = vmatmul.mubr.bf16.vlgmr.msra.gmra.mrb[0].mxu1 %v1897_v53  ;;  %2026 = vmatpush3.bf16.msra.mxu0 %v2196_v56 }
  0xb2   : > { %2048 = vmatpush3.bf16.msra.mxu1 %v2198_v58  ;;  %2027 = vmatprep.subr.bf16.mxu0 %v2199_v59 }
  0xb3   : > { %2049 = vmatprep.subr.bf16.mxu1 %v2201_v61  ;;  %1634 = vmatprep.mubr.bf16.mxu0 %v1900_v23 }
  0xb4   : > { %1674 = vmatprep.mubr.bf16.mxu1 %v1902_v28 }
  0xb5   : > { %2028 = vmatpush3.bf16.msra.mxu0 %v2200_v60 }
  0xb6   : > { %2050 = vmatpush3.bf16.msra.mxu1 %v2202_v62  ;;  %2029 = vmatprep.subr.bf16.mxu0 %v2203_v63  ;;  %v908_v62 = vld [vmem:[#allocation2] sm:$0xff] }
  0xb7   : > { %2051 = vmatprep.subr.bf16.mxu1 %v2205_v1 }
  0xb9   : > { %2030 = vmatpush3.bf16.msra.mxu0 %v2204_v0 }
  0xba   : > { %2052 = vmatpush3.bf16.msra.mxu1 %v2206_v2  ;;  %2031 = vmatprep.subr.bf16.mxu0 %v2207_v3 }
  0xbb   : > { %2053 = vmatprep.subr.bf16.mxu1 %v2209_v5 }
  0xbd   : > { %2032 = vmatpush3.bf16.msra.mxu0 %v2208_v4 }
  0xbe   : > { %2054 = vmatpush3.bf16.msra.mxu1 %v2210_v6  ;;  %2033 = vmatprep.subr.bf16.mxu0 %v2211_v7  ;;  %v1977_v6 = vld [vmem:[%s889_s27] ss:$0 sm:$0xff] (!%p1976_p13) }
  0xbf   : > { %2055 = vmatprep.subr.bf16.mxu1 %v2213_v9 }
  0xc1   : > { %2034 = vmatpush3.bf16.msra.mxu0 %v2212_v8 }
  0xc2   : > { %2056 = vmatpush3.bf16.msra.mxu1 %v2214_v10  ;;  %2035 = vmatprep.subr.bf16.mxu0 %v2215_v11 }
  0xc3   : > { %2057 = vmatprep.subr.bf16.mxu1 %v2217_v13 }
  0xc5   : > { %2036 = vmatpush3.bf16.msra.mxu0 %v2216_v12 }
  0xc6   : > { %2058 = vmatpush3.bf16.msra.mxu1 %v2218_v14  ;;  %2037 = vmatprep.subr.bf16.mxu0 %v2219_v15 }
  0xc7   : > { %2059 = vmatprep.subr.bf16.mxu1 %v2221_v17 }
  0xc9   : > { %2038 = vmatpush3.bf16.msra.mxu0 %v2220_v16 }
  0xca   : > { %2060 = vmatpush3.bf16.msra.mxu1 %v2222_v18  ;;  %2039 = vmatprep.subr.bf16.mxu0 %v2223_v19 }
  0xcb   : > { %2061 = vmatprep.subr.bf16.mxu1 %v2225_v21 }
  0xcd   : > { %2040 = vmatpush3.bf16.msra.mxu0 %v2224_v20 }
  0xce   : > { %2062 = vmatpush3.bf16.msra.mxu1 %v2228_v24  ;;  %2078 = vmatprep.subr.bf16.mxu0 %v2297_v30 }
  0xd0   : > { %1635 = vmatmul.mubr.bf16.vlgmr.msra.gmra.mrb[4].mxu0 %v1899_v25 }
  0xd1   : > { %2079 = vmatpush3.bf16.msra.mxu0 %v2231_v29  ;;  %1675 = vmatmul.mubr.bf16.vlgmr.msra.gmra.mrb[4].mxu1 %v1901_v27 }
  0xd2   : > { %2080 = vmatprep.subr.bf16.mxu0 %v2297_v30  ;;  %2094 = vmatprep.mubr.msk.bf16.mxu0 %vm2298_vm0, %v2297_v30 }
  0xd5   : > { %2081 = vmatpush3.bf16.msra.mxu0 %v2232_v31 }
  0xd6   : > { %2082 = vmatprep.subr.bf16.mxu0 %v2297_v30 }
  0xd9   : > { %2083 = vmatpush3.bf16.msra.mxu0 %v2233_v32 }
  0xda   : > { %2084 = vmatprep.subr.bf16.mxu0 %v2297_v30 }
  0xdd   : > { %2085 = vmatpush3.bf16.msra.mxu0 %v2234_v33 }
  0xde   : > { %2086 = vmatprep.subr.bf16.mxu0 %v2297_v30 }
  0xe1   : > { %2087 = vmatpush3.bf16.msra.mxu0 %v2235_v34 }
  0xe2   : > { %2088 = vmatprep.subr.bf16.mxu0 %v2297_v30 }
  0xe5   : > { %2089 = vmatpush3.bf16.msra.mxu0 %v2236_v35 }
  0xe6   : > { %2090 = vmatprep.subr.bf16.mxu0 %v2297_v30 }
  0xe9   : > { %2091 = vmatpush3.bf16.msra.mxu0 %v2237_v36 }
  0xea   : > { %2092 = vmatprep.subr.bf16.mxu0 %v2297_v30 }
  0xed   : > { %2093 = vmatpush3.bf16.msra.mxu0 %v2238_v37 }
  0xf0   : > { %2095 = vmatmul.mubr.bf16.vlgmr.msra.gmra.mrb[8].mxu0 %v2239_v38 }
 0x183   : > { %v1997_v39 = vpop.f32.mrb[0].mxu0 }
 0x184   : > { %v2019_v40 = vpop.f32.mrb[0].mxu1  ;;  %v1998_v41 = vpop.f32.mrb[1].mxu0 }
 0x185   : > { %v2020_v42 = vpop.f32.mrb[1].mxu1  ;;  %v1999_v43 = vadd.f32 %v1998_v41, %v1997_v39  ;;  %v2000_v45 = vpop.f32.mrb[2].mxu0 }
 0x186   : > { %v2021_v44 = vadd.f32 %v2020_v42, %v2019_v40  ;;  %v2022_v46 = vpop.f32.mrb[2].mxu1  ;;  %v2001_v47 = vpop.f32.mrb[3].mxu0 }
 0x187   : > { %v2023_v48 = vpop.f32.mrb[3].mxu1 }
 0x188   : > { %v1597_v49 = vadd.f32 %v2021_v44, %v1999_v43 }
 0x1a3   : > { %v2041_v50 = vpop.f32.mrb[4].mxu0 }
 0x1a4   : > { %v2042_v51 = vpop.f32.mrb[5].mxu0  ;;  %v2063_v52 = vpop.f32.mrb[4].mxu1 }
 0x1a5   : > { %v2043_v53 = vadd.f32 %v2042_v51, %v2041_v50  ;;  %v2044_v54 = vpop.f32.mrb[6].mxu0  ;;  %v2064_v55 = vpop.f32.mrb[5].mxu1 }
 0x1a6   : > { %v2045_v56 = vpop.f32.mrb[7].mxu0  ;;  %v2065_v57 = vadd.f32 %v2064_v55, %v2063_v52  ;;  %v2066_v58 = vpop.f32.mrb[6].mxu1 }
 0x1a7   : > { %v1637_v59 = vadd.f32 %v2043_v53, %v1597_v49  ;;  %v2067_v60 = vpop.f32.mrb[7].mxu1 }
 0x1a9   : > { %v1677_v61 = vadd.f32 %v2065_v57, %v1637_v59 }
 0x1c2   : > { %1727 = sbr.rel (%p1976_p13) target bundleno = 471 (0x1d7), region = 81 }
 0x1c3   : > { %v1716_v63 = vpop.f32.mrb[8].mxu0 }
 0x1c4   : > { %v1717_v0 = vadd.f32 %v1716_v63, %v1677_v61  ;;  %v2096_v1 = vpop.f32.mrb[9].mxu0 }
 0x1c5   : > { %v1719_v2 = vpop.f32.mrb[10].mxu0 }
 0x1c6   : > { %v1722_v3 = vadd.f32 %v1717_v0, %v908_v62  ;;  %v2097_v4 = vpop.f32.mrb[11].mxu0 }
 0x1c8   : > { %1723 = vst [vmem:[#allocation2] sm:$0xff] %v1722_v3 }
 0x1cf   : > { %v1728_v5 = vld [vmem:[#allocation2] sm:$0xff] }
 0x1d0   : > { %v1736_v7 = vadd.f32 %v1977_v6, %v1728_v5 }
 0x1d2   : > { %v1737_v8 = vmax.f32 %v1736_v7, 0.0 }
 0x1d4   : > { %v1738_v9 = vpack.c.bf16 %v1737_v8, %v1737_v8 }
 0x1d6   : > { %1739 = vst [vmem:[%s2692_s30] sm:$0xf] %v1738_v9 }
 0x1d7 PF: > { %s13_s18 = sadd.s32 1, %s2294_s18   ;;  %s2806_s12 = smov %s2274_s13 }
 0x1d8   : > { %p10_p0 = scmp.ge.s32.totalorder %s13_s18, 14   ;;  %s2807_s13 = smov %s2370_s25 }
 0x1d9   : > { %s2808_s14 = smov %s2286_s16  ;;  %s2809_s15 = smov %s2290_s17 }
 0x1da   : > { %s2810_s16 = smov %s2813_s19  ;;  %s2811_s17 = smov %s2817_s20 }
 0x1db   :  { %12 = sbr.rel (!%p10_p0) target bundleno = 4 (0x4), region = 122 }

// kernel: autoencoder_cov3d_mem_forward.13
= control target key start
LH: loop header
LB: loop body
LE: loop exit
PB: predicated region body
PF: predicated region fallthrough
CT: control target
= control target key end

     0   :  { %vm86_vm0 = vcmask 261120   ;;  %v193_v29 = vmov 0   ;;  %s243_s1 = inlined_call_operand.vmem [shape: bf16[32,256], index: 1, kind: input, shape index: {}]   ;;  %s244_s0 = inlined_call_operand.vmem [shape: bf16[8,256], index: 0, kind: input, shape index: {}]   ;;  %s245_s3 = inlined_call_operand.vmem [shape: f32[8,32], index: 3, kind: output, shape index: {1}]   ;;  %s246_s2 = inlined_call_operand.vmem [shape: f32[8,256], index: 2, kind: output, shape index: {0}]  }
   0x1   :  { %v177_v0 = vld [vmem:[%s243_s1 + $0x4] ss:$8 sps:$4 sm:$0xff]   ;;  %v179_v1 = vld [vmem:[%s243_s1] ss:$8 sps:$4 sm:$0xff]   ;;  %v180_v2 = vld [vmem:[%s243_s1 + $0x14] ss:$8 sps:$4 sm:$0xff]   ;;  %148 = vmatprep.mubr.bf16.mxu1 %v193_v29 }
   0x2   :  { %46 = vmatprep.subr.bf16.mxu0 %v177_v0  ;;  %v14_v3 = vld [vmem:[%s244_s0] sm:$0xff]  ;;  %116 = vmatprep.subr.bf16.mxu1 %v177_v0  ;;  %v182_v5 = vld [vmem:[%s243_s1 + $0x10] ss:$8 sps:$4 sm:$0xff]  }
   0x3   :  { %47 = vmatpush1.bf16.xpose.msra.mxu0 %v179_v1  ;;  %v169_v4 = vcombine.high %v14_v3, %v14_v3  ;;  %117 = vmatpush1.bf16.msra.mxu1 %v179_v1  ;;  %v168_v6 = vcombine.low %v14_v3, %v14_v3 }
   0x4   :  { %48 = vmatprep.subr.bf16.mxu0 %v180_v2  ;;  %118 = vmatprep.subr.bf16.mxu1 %v180_v2 }
   0x5   :  { %78 = vmatprep.mubr.bf16.mxu0 %v169_v4 }
   0x7   :  { %119 = vmatpush1.bf16.msra.mxu1 %v182_v5 }
   0xb   :  { %49 = vmatpush1.bf16.xpose.msra.mxu0 %v182_v5 }
  0x12   :  { %79 = vmatmul.mubr.bf16.vlgmr.msra.gmra.mrb[0].mxu0 %v168_v6 }
  0xe5   :  { %v80_v7 = vpop.f32.mrb[0].mxu0 }
  0xe6   :  { %v82_v8 = vpop.f32.mrb[1].mxu0  ;;  %v87_v9 = vsel %vm86_vm0, %v80_v7, -inf }
  0xe7   :  { %88 = vmax.xlane.f32.xlu0 %v87_v9  ;;  %v83_v10 = vpop.f32.mrb[2].mxu0 }
  0xe8   :  { %v84_v11 = vpop.f32.mrb[3].mxu0 }
 0x174   :  { %v89_v12 = vpop.xlane.xlu0 %88 }
 0x175   :  { %v90_v13 = vsub.f32 %v80_v7, %v89_v12 }
 0x177   :  { %v91_v14 = vmul.f32 1.442695, %v90_v13 }
 0x179   :  { %185 = vpow2.f32 %v91_v14 }
 0x183   :  { %v186_v15 = vpop.eup %185 }
 0x184   :  { %v93_v16 = vsel %vm86_vm0, %v186_v15, 0.0 }
 0x185   :  { %94 = vadd.xlane.f32.xlu0 %v93_v16 }
 0x212   :  { %v95_v17 = vpop.xlane.xlu0 %94 }
 0x213   :  { %187 = vrcp.f32 %v95_v17 }
 0x21d   :  { %v188_v18 = vpop.eup %187 }
 0x21e   :  { %v97_v19 = vmul.f32 %v188_v18, %v186_v15 }
 0x220   :  { %v174_v20 = vadd.f32 -0.0025, %v97_v19 }
 0x222   :  { %v101_v21 = vand.u32 2147483647, %v174_v20  ;;  %v99_v23 = vmax.f32 %v174_v20, 0.0 }
 0x224   :  { %v102_v22 = vadd.f32 1e-12, %v101_v21  ;;  %v100_v24 = vmul.f32 %v99_v23, %v97_v19 }
 0x226   :  { %189 = vrcp.f32 %v102_v22 }
 0x230   :  { %v190_v25 = vpop.eup %189 }
 0x231   :  { %v104_v26 = vmul.f32 %v190_v25, %v100_v24 }
 0x233   :  { %v105_v27 = vand.u32 2147483647, %v104_v26 }
 0x235   :  { %v106_v28 = vsel %vm86_vm0, %v105_v27, 0.0 }
 0x236   :  { %107 = vadd.xlane.f32.xlu1 %v106_v28 }
 0x2c3   :  { %v108_v30 = vpop.xlane.xlu1 %107 }
 0x2c4   :  { %v109_v31 = vmax.f32 %v108_v30, 1e-12 }
 0x2c6   :  { %191 = vrcp.f32 %v109_v31 }
 0x2d0   :  { %v192_v32 = vpop.eup %191 }
 0x2d1   :  { %v111_v33 = vmul.f32 %v192_v32, %v104_v26 }
 0x2d3   :  { %v112_v34 = vpack.c.bf16 %v111_v33, %v111_v33  ;;  %159 = vst.msk [vmem:[%s245_s3] sm:$0xff] %vm86_vm0, %v111_v33 }
 0x2d5   :  { %175 = vmatmul.mubr.msk.bf16.vlgmr.msra.gmra.mrb[0].mxu1 %vm86_vm0, %v112_v34 }
 0x3a8   :  { %v150_v35 = vpop.f32.mrb[0].mxu1 }
 0x3a9   :  { %157 = vst [vmem:[%s246_s2] sm:$0xff] %v150_v35  ;;  %v152_v36 = vpop.f32.mrb[1].mxu1 }
 0x3aa   :  { %158 = vst [vmem:[%s246_s2 + $0x8] sm:$0xff] %v152_v36  ;;  %v154_v37 = vpop.f32.mrb[2].mxu1 }
 0x3ab   :  { %v155_v38 = vpop.f32.mrb[3].mxu1 }

// kernel: autoencoder_cov3d_mem_forward.14
= control target key start
LH: loop header
LB: loop body
LE: loop exit
PB: predicated region body
PF: predicated region fallthrough
CT: control target
= control target key end

     0   :  { %s3206_s12 = smov 0   ;;  %s3208_s13 = smov 0   ;;  %s3554_s0 = inlined_call_operand.vmem [shape: bf16[8,8,2048], index: 0, kind: input, shape index: {}]   ;;  %s3555_s1 = inlined_call_operand.vmem [shape: bf16[8,2048,256], index: 1, kind: input, shape index: {}]   ;;  %s3556_s2 = inlined_call_operand.vmem [shape: f32[1,256], index: 2, kind: input, shape index: {}]   ;;  %s3557_s3 = inlined_call_operand.vmem [shape: bf16[8,8,256], index: 3, kind: output, shape index: {}]  }
   0x1   :  { %s3210_s14 = smov 0  }
   0x2 LB: > { %s39_s15 = sadd.s32 1, %s3180_s13  ;;  %p2452_p0 = scmp.ge.s32.totalorder %s3184_s14, 1  ;;  %s3184_s14 = sphi %s3210_s14, %s13_s14   ;;  %s3180_s13 = sphi %s3208_s13, %s3559_s13   ;;  %s3176_s12 = sphi %s3206_s12, %s3558_s12  }
   0x3   : > { %p41_p1 = scmp.ge.s32.totalorder %s39_s15, 8  ;;  %p215_p2 = scmp.lt.s32.totalorder %s3184_s14, 9 }
   0x5   : > { %s3561_s15 = smov (%p41_p1, %s39_s15), 0  ;;  %p216_p3 = pnand %p2452_p0, %p215_p2 }
   0x6   : > { %p274_p4 = scmp.lt.s32.totalorder (!%p216_p3), %s3176_s12, 7 }
   0x7   : > { %219 = sbr.rel (%p216_p3) target bundleno = 499 (0x1f3), region = 32 }
   0xe   : > { %s3563_s12 = smov (!%p274_p4, %s3176_s12), 7 }
   0xf   : > { %s2735_s16 = sshll.u32 %s3563_s12, 11  ;;  %s2734_s20 = sshll.u32 %s3563_s12, 6 }
  0x10   : > { %s3230_s19 = scalar_lea.vmem %s3555_s1, %s2735_s16  ;;  %s3280_s23 = scalar_lea.vmem %s3554_s0, %s2734_s20 }
  0x11   : > { %v2762_v0 = vld [vmem:[%s3230_s19 + $0x4] ss:$8 sps:$4 sm:$0xff]   ;;  %v2766_v2 = vld [vmem:[%s3230_s19] ss:$8 sps:$4 sm:$0xff]   ;;  %v2768_v4 = vld [vmem:[%s3230_s19 + $0x14] ss:$8 sps:$4 sm:$0xff]  }
  0x12   : > { %v2764_v1 = vld [vmem:[%s3230_s19 + $0x104] ss:$8 sps:$4 sm:$0xff]   ;;  %1930 = vmatprep.subr.bf16.mxu0 %v2762_v0  ;;  %v2767_v3 = vld [vmem:[%s3230_s19 + $0x100] ss:$8 sps:$4 sm:$0xff]   ;;  %v2770_v5 = vld [vmem:[%s3230_s19 + $0x114] ss:$8 sps:$4 sm:$0xff]  }
  0x13   : > { %1971 = vmatprep.subr.bf16.mxu1 %v2764_v1  ;;  %1931 = vmatpush1.bf16.msra.mxu0 %v2766_v2  ;;  %v2772_v6 = vld [vmem:[%s3230_s19 + $0x10] ss:$8 sps:$4 sm:$0xff]   ;;  %v2774_v8 = vld [vmem:[%s3230_s19 + $0x24] ss:$8 sps:$4 sm:$0xff]   ;;  %v2778_v10 = vld [vmem:[%s3230_s19 + $0x20] ss:$8 sps:$4 sm:$0xff]  }
  0x14   : > { %1972 = vmatpush1.bf16.msra.mxu1 %v2767_v3  ;;  %1932 = vmatprep.subr.bf16.mxu0 %v2768_v4  ;;  %v2773_v7 = vld [vmem:[%s3230_s19 + $0x110] ss:$8 sps:$4 sm:$0xff]   ;;  %v2776_v9 = vld [vmem:[%s3230_s19 + $0x124] ss:$8 sps:$4 sm:$0xff]   ;;  %v2779_v11 = vld [vmem:[%s3230_s19 + $0x120] ss:$8 sps:$4 sm:$0xff]  }
  0x15   : > { %1973 = vmatprep.subr.bf16.mxu1 %v2770_v5  ;;  %v2780_v12 = vld [vmem:[%s3230_s19 + $0x34] ss:$8 sps:$4 sm:$0xff]   ;;  %v2784_v14 = vld [vmem:[%s3230_s19 + $0x30] ss:$8 sps:$4 sm:$0xff]   ;;  %v2786_v16 = vld [vmem:[%s3230_s19 + $0x44] ss:$8 sps:$4 sm:$0xff]  }
  0x16   : > { %v2782_v13 = vld [vmem:[%s3230_s19 + $0x134] ss:$8 sps:$4 sm:$0xff]   ;;  %v2785_v15 = vld [vmem:[%s3230_s19 + $0x130] ss:$8 sps:$4 sm:$0xff]   ;;  %v2788_v17 = vld [vmem:[%s3230_s19 + $0x144] ss:$8 sps:$4 sm:$0xff]  }
  0x17   : > { %1933 = vmatpush1.bf16.msra.mxu0 %v2772_v6  ;;  %v2790_v18 = vld [vmem:[%s3230_s19 + $0x40] ss:$8 sps:$4 sm:$0xff]   ;;  %v2792_v20 = vld [vmem:[%s3230_s19 + $0x54] ss:$8 sps:$4 sm:$0xff]   ;;  %v2796_v22 = vld [vmem:[%s3230_s19 + $0x50] ss:$8 sps:$4 sm:$0xff]  }
  0x18   : > { %1974 = vmatpush1.bf16.msra.mxu1 %v2773_v7  ;;  %1934 = vmatprep.subr.bf16.mxu0 %v2774_v8  ;;  %v2791_v19 = vld [vmem:[%s3230_s19 + $0x140] ss:$8 sps:$4 sm:$0xff]   ;;  %v2794_v21 = vld [vmem:[%s3230_s19 + $0x154] ss:$8 sps:$4 sm:$0xff]   ;;  %v2797_v23 = vld [vmem:[%s3230_s19 + $0x150] ss:$8 sps:$4 sm:$0xff]  }
  0x19   : > { %1975 = vmatprep.subr.bf16.mxu1 %v2776_v9  ;;  %v2798_v24 = vld [vmem:[%s3230_s19 + $0x64] ss:$8 sps:$4 sm:$0xff]   ;;  %v2802_v26 = vld [vmem:[%s3230_s19 + $0x60] ss:$8 sps:$4 sm:$0xff]   ;;  %v2804_v28 = vld [vmem:[%s3230_s19 + $0x74] ss:$8 sps:$4 sm:$0xff]  }
  0x1a   : > { %v2800_v25 = vld [vmem:[%s3230_s19 + $0x164] ss:$8 sps:$4 sm:$0xff]   ;;  %v2803_v27 = vld [vmem:[%s3230_s19 + $0x160] ss:$8 sps:$4 sm:$0xff]   ;;  %v2806_v29 = vld [vmem:[%s3230_s19 + $0x174] ss:$8 sps:$4 sm:$0xff]  }
  0x1b   : > { %1935 = vmatpush1.bf16.msra.mxu0 %v2778_v10  ;;  %v2808_v30 = vld [vmem:[%s3230_s19 + $0x70] ss:$8 sps:$4 sm:$0xff]   ;;  %v2810_v32 = vld [vmem:[%s3230_s19 + $0x84] ss:$8 sps:$4 sm:$0xff]   ;;  %v2814_v34 = vld [vmem:[%s3230_s19 + $0x80] ss:$8 sps:$4 sm:$0xff]  }
  0x1c   : > { %1976 = vmatpush1.bf16.msra.mxu1 %v2779_v11  ;;  %1936 = vmatprep.subr.bf16.mxu0 %v2780_v12  ;;  %v2809_v31 = vld [vmem:[%s3230_s19 + $0x170] ss:$8 sps:$4 sm:$0xff]   ;;  %v2812_v33 = vld [vmem:[%s3230_s19 + $0x184] ss:$8 sps:$4 sm:$0xff]   ;;  %v2815_v35 = vld [vmem:[%s3230_s19 + $0x180] ss:$8 sps:$4 sm:$0xff]  }
  0x1d   : > { %1977 = vmatprep.subr.bf16.mxu1 %v2782_v13  ;;  %v2816_v36 = vld [vmem:[%s3230_s19 + $0x94] ss:$8 sps:$4 sm:$0xff]   ;;  %v2820_v38 = vld [vmem:[%s3230_s19 + $0x90] ss:$8 sps:$4 sm:$0xff]   ;;  %v2822_v40 = vld [vmem:[%s3230_s19 + $0xa4] ss:$8 sps:$4 sm:$0xff]  }
  0x1e   : > { %v2818_v37 = vld [vmem:[%s3230_s19 + $0x194] ss:$8 sps:$4 sm:$0xff]   ;;  %v2821_v39 = vld [vmem:[%s3230_s19 + $0x190] ss:$8 sps:$4 sm:$0xff]   ;;  %v2824_v41 = vld [vmem:[%s3230_s19 + $0x1a4] ss:$8 sps:$4 sm:$0xff]  }
  0x1f   : > { %1937 = vmatpush1.bf16.msra.mxu0 %v2784_v14  ;;  %v2826_v42 = vld [vmem:[%s3230_s19 + $0xa0] ss:$8 sps:$4 sm:$0xff]   ;;  %v2828_v44 = vld [vmem:[%s3230_s19 + $0xb4] ss:$8 sps:$4 sm:$0xff]   ;;  %v2832_v49 = vld [vmem:[%s3230_s19 + $0xb0] ss:$8 sps:$4 sm:$0xff]  }
  0x20   : > { %1978 = vmatpush1.bf16.msra.mxu1 %v2785_v15  ;;  %1938 = vmatprep.subr.bf16.mxu0 %v2786_v16  ;;  %v2827_v43 = vld [vmem:[%s3230_s19 + $0x1a0] ss:$8 sps:$4 sm:$0xff]   ;;  %v2830_v45 = vld [vmem:[%s3230_s19 + $0x1b4] ss:$8 sps:$4 sm:$0xff]   ;;  %v2833_v50 = vld [vmem:[%s3230_s19 + $0x1b0] ss:$8 sps:$4 sm:$0xff]  }
  0x21   : > { %1979 = vmatprep.subr.bf16.mxu1 %v2788_v17  ;;  %v330_v46 = vld [vmem:[%s3280_s23] sm:$0xff]  ;;  %v331_v48 = vld [vmem:[%s3280_s23 + $0x8] sm:$0xff]  ;;  %v2840_v56 = vld [vmem:[%s3230_s19 + $0xd4] ss:$8 sps:$4 sm:$0xff]   ;;  %s2736_s26 = sshll.u32 %s3563_s12, 3 }
  0x22   : > { %v2460_v47 = vcombine.high %v330_v46, %v330_v46  ;;  %v2462_v51 = vcombine.high %v331_v48, %v331_v48  ;;  %v2834_v52 = vld [vmem:[%s3230_s19 + $0xc4] ss:$8 sps:$4 sm:$0xff]   ;;  %v2838_v54 = vld [vmem:[%s3230_s19 + $0xc0] ss:$8 sps:$4 sm:$0xff]   ;;  %v2842_v57 = vld [vmem:[%s3230_s19 + $0x1d4] ss:$8 sps:$4 sm:$0xff]   ;;  %v2459_v6 = vcombine.low %v330_v46, %v330_v46  ;;  %v2461_v7 = vcombine.low %v331_v48, %v331_v48  ;;  %s320_s29 = scalar_lea.vmem %s3557_s3, %s2736_s26 }
  0x23   : > { %1939 = vmatpush1.bf16.msra.mxu0 %v2790_v18  ;;  %v2836_v53 = vld [vmem:[%s3230_s19 + $0x1c4] ss:$8 sps:$4 sm:$0xff]   ;;  %v2839_v55 = vld [vmem:[%s3230_s19 + $0x1c0] ss:$8 sps:$4 sm:$0xff]   ;;  %v2844_v58 = vld [vmem:[%s3230_s19 + $0xd0] ss:$8 sps:$4 sm:$0xff]  }
  0x24   : > { %1980 = vmatpush1.bf16.msra.mxu1 %v2791_v19  ;;  %1940 = vmatprep.subr.bf16.mxu0 %v2792_v20  ;;  %v2845_v59 = vld [vmem:[%s3230_s19 + $0x1d0] ss:$8 sps:$4 sm:$0xff]   ;;  %v2846_v60 = vld [vmem:[%s3230_s19 + $0xe4] ss:$8 sps:$4 sm:$0xff]   ;;  %v2850_v62 = vld [vmem:[%s3230_s19 + $0xe0] ss:$8 sps:$4 sm:$0xff]  }
  0x25   : > { %1981 = vmatprep.subr.bf16.mxu1 %v2794_v21  ;;  %1962 = vmatprep.mubr.bf16.mxu0 %v2460_v47  ;;  %v2848_v61 = vld [vmem:[%s3230_s19 + $0x1e4] ss:$8 sps:$4 sm:$0xff]   ;;  %v2851_v63 = vld [vmem:[%s3230_s19 + $0x1e0] ss:$8 sps:$4 sm:$0xff]   ;;  %v2852_v0 = vld [vmem:[%s3230_s19 + $0xf4] ss:$8 sps:$4 sm:$0xff]  }
  0x26   : > { %2003 = vmatprep.mubr.bf16.mxu1 %v2462_v51  ;;  %v2854_v1 = vld [vmem:[%s3230_s19 + $0x1f4] ss:$8 sps:$4 sm:$0xff]   ;;  %v2856_v2 = vld [vmem:[%s3230_s19 + $0xf0] ss:$8 sps:$4 sm:$0xff]   ;;  %v2864_v4 = vld [vmem:[%s3230_s19 + $0x204] ss:$8 sps:$4 sm:$0xff]  }
  0x27   : > { %1941 = vmatpush1.bf16.msra.mxu0 %v2796_v22  ;;  %v2857_v3 = vld [vmem:[%s3230_s19 + $0x1f0] ss:$8 sps:$4 sm:$0xff]   ;;  %v2867_v5 = vld [vmem:[%s3230_s19 + $0x304] ss:$8 sps:$4 sm:$0xff]   ;;  %v2862_v8 = vld [vmem:[%s3230_s19 + $0x200] ss:$8 sps:$4 sm:$0xff]  }
  0x28   : > { %1982 = vmatpush1.bf16.msra.mxu1 %v2797_v23  ;;  %1942 = vmatprep.subr.bf16.mxu0 %v2798_v24  ;;  %v2865_v9 = vld [vmem:[%s3230_s19 + $0x300] ss:$8 sps:$4 sm:$0xff]   ;;  %v2870_v10 = vld [vmem:[%s3230_s19 + $0x214] ss:$8 sps:$4 sm:$0xff]   ;;  %v2868_v12 = vld [vmem:[%s3230_s19 + $0x210] ss:$8 sps:$4 sm:$0xff]  }
  0x29   : > { %1983 = vmatprep.subr.bf16.mxu1 %v2800_v25  ;;  %v2873_v11 = vld [vmem:[%s3230_s19 + $0x314] ss:$8 sps:$4 sm:$0xff]   ;;  %v2871_v13 = vld [vmem:[%s3230_s19 + $0x310] ss:$8 sps:$4 sm:$0xff]   ;;  %v2876_v14 = vld [vmem:[%s3230_s19 + $0x224] ss:$8 sps:$4 sm:$0xff]  }
  0x2a   : > { %v2879_v15 = vld [vmem:[%s3230_s19 + $0x324] ss:$8 sps:$4 sm:$0xff]   ;;  %v2874_v16 = vld [vmem:[%s3230_s19 + $0x220] ss:$8 sps:$4 sm:$0xff]   ;;  %v2882_v18 = vld [vmem:[%s3230_s19 + $0x234] ss:$8 sps:$4 sm:$0xff]  }
  0x2b   : > { %1943 = vmatpush1.bf16.msra.mxu0 %v2802_v26  ;;  %v2877_v17 = vld [vmem:[%s3230_s19 + $0x320] ss:$8 sps:$4 sm:$0xff]   ;;  %v2885_v19 = vld [vmem:[%s3230_s19 + $0x334] ss:$8 sps:$4 sm:$0xff]   ;;  %v2880_v20 = vld [vmem:[%s3230_s19 + $0x230] ss:$8 sps:$4 sm:$0xff]  }
  0x2c   : > { %1984 = vmatpush1.bf16.msra.mxu1 %v2803_v27  ;;  %1944 = vmatprep.subr.bf16.mxu0 %v2804_v28  ;;  %v2883_v21 = vld [vmem:[%s3230_s19 + $0x330] ss:$8 sps:$4 sm:$0xff]   ;;  %v2888_v22 = vld [vmem:[%s3230_s19 + $0x244] ss:$8 sps:$4 sm:$0xff]   ;;  %v2886_v24 = vld [vmem:[%s3230_s19 + $0x240] ss:$8 sps:$4 sm:$0xff]  }
  0x2d   : > { %1985 = vmatprep.subr.bf16.mxu1 %v2806_v29  ;;  %v2891_v23 = vld [vmem:[%s3230_s19 + $0x344] ss:$8 sps:$4 sm:$0xff]   ;;  %v2889_v25 = vld [vmem:[%s3230_s19 + $0x340] ss:$8 sps:$4 sm:$0xff]   ;;  %v2894_v26 = vld [vmem:[%s3230_s19 + $0x254] ss:$8 sps:$4 sm:$0xff]  }
  0x2e   : > { %v2897_v27 = vld [vmem:[%s3230_s19 + $0x354] ss:$8 sps:$4 sm:$0xff]   ;;  %v2892_v28 = vld [vmem:[%s3230_s19 + $0x250] ss:$8 sps:$4 sm:$0xff]   ;;  %v2927_v51 = vld [vmem:[%s3230_s19 + $0x3a4] ss:$8 sps:$4 sm:$0xff]  }
  0x2f   : > { %1945 = vmatpush1.bf16.msra.mxu0 %v2808_v30  ;;  %v2895_v29 = vld [vmem:[%s3230_s19 + $0x350] ss:$8 sps:$4 sm:$0xff]   ;;  %v2900_v30 = vld [vmem:[%s3230_s19 + $0x264] ss:$8 sps:$4 sm:$0xff]   ;;  %v2918_v46 = vld [vmem:[%s3230_s19 + $0x294] ss:$8 sps:$4 sm:$0xff]  }
  0x30   : > { %1986 = vmatpush1.bf16.msra.mxu1 %v2809_v31  ;;  %1946 = vmatprep.subr.bf16.mxu0 %v2810_v32  ;;  %v2903_v31 = vld [vmem:[%s3230_s19 + $0x364] ss:$8 sps:$4 sm:$0xff]   ;;  %v3331_v32 = vld [vmem:[%s3280_s23 + $0x10] sm:$0xff] }
  0x31   : > { %1987 = vmatprep.subr.bf16.mxu1 %v2812_v33  ;;  %v3334_v33 = vld [vmem:[%s3280_s23 + $0x18] sm:$0xff] }
  0x32   : > { %v2921_v47 = vld [vmem:[%s3230_s19 + $0x394] ss:$8 sps:$4 sm:$0xff]   ;;  %v2916_v48 = vld [vmem:[%s3230_s19 + $0x290] ss:$8 sps:$4 sm:$0xff]  }
  0x33   : > { %1947 = vmatpush1.bf16.msra.mxu0 %v2814_v34  ;;  %v2898_v34 = vld [vmem:[%s3230_s19 + $0x260] ss:$8 sps:$4 sm:$0xff]  }
  0x34   : > { %1988 = vmatpush1.bf16.msra.mxu1 %v2815_v35  ;;  %1948 = vmatprep.subr.bf16.mxu0 %v2816_v36  ;;  %v2901_v35 = vld [vmem:[%s3230_s19 + $0x360] ss:$8 sps:$4 sm:$0xff]   ;;  %v2464_v36 = vcombine.high %v3331_v32, %v3331_v32 }
  0x35   : > { %1989 = vmatprep.subr.bf16.mxu1 %v2818_v37  ;;  %v2466_v37 = vcombine.high %v3334_v33, %v3334_v33 }
  0x37   : > { %1949 = vmatpush1.bf16.msra.mxu0 %v2820_v38  ;;  %v2906_v38 = vld [vmem:[%s3230_s19 + $0x274] ss:$8 sps:$4 sm:$0xff]  }
  0x38   : > { %1990 = vmatpush1.bf16.msra.mxu1 %v2821_v39  ;;  %1950 = vmatprep.subr.bf16.mxu0 %v2822_v40  ;;  %v2909_v39 = vld [vmem:[%s3230_s19 + $0x374] ss:$8 sps:$4 sm:$0xff]   ;;  %v2904_v40 = vld [vmem:[%s3230_s19 + $0x270] ss:$8 sps:$4 sm:$0xff]  }
  0x39   : > { %1991 = vmatprep.subr.bf16.mxu1 %v2824_v41  ;;  %v2907_v41 = vld [vmem:[%s3230_s19 + $0x370] ss:$8 sps:$4 sm:$0xff]  }
  0x3b   : > { %1951 = vmatpush1.bf16.msra.mxu0 %v2826_v42  ;;  %v2912_v42 = vld [vmem:[%s3230_s19 + $0x284] ss:$8 sps:$4 sm:$0xff]  }
  0x3c   : > { %1992 = vmatpush1.bf16.msra.mxu1 %v2827_v43  ;;  %1952 = vmatprep.subr.bf16.mxu0 %v2828_v44  ;;  %v2915_v43 = vld [vmem:[%s3230_s19 + $0x384] ss:$8 sps:$4 sm:$0xff]   ;;  %v2910_v44 = vld [vmem:[%s3230_s19 + $0x280] ss:$8 sps:$4 sm:$0xff]  }
  0x3d   : > { %1993 = vmatprep.subr.bf16.mxu1 %v2830_v45  ;;  %v2913_v45 = vld [vmem:[%s3230_s19 + $0x380] ss:$8 sps:$4 sm:$0xff]  }
  0x3f   : > { %1953 = vmatpush1.bf16.msra.mxu0 %v2832_v49  ;;  %v2919_v49 = vld [vmem:[%s3230_s19 + $0x390] ss:$8 sps:$4 sm:$0xff]  }
  0x40   : > { %1994 = vmatpush1.bf16.msra.mxu1 %v2833_v50  ;;  %1954 = vmatprep.subr.bf16.mxu0 %v2834_v52  ;;  %v2924_v50 = vld [vmem:[%s3230_s19 + $0x2a4] ss:$8 sps:$4 sm:$0xff]   ;;  %v2922_v52 = vld [vmem:[%s3230_s19 + $0x2a0] ss:$8 sps:$4 sm:$0xff]  }
  0x41   : > { %1995 = vmatprep.subr.bf16.mxu1 %v2836_v53  ;;  %v2925_v53 = vld [vmem:[%s3230_s19 + $0x3a0] ss:$8 sps:$4 sm:$0xff]  }
  0x43   : > { %1955 = vmatpush1.bf16.msra.mxu0 %v2838_v54  ;;  %v2930_v54 = vld [vmem:[%s3230_s19 + $0x2b4] ss:$8 sps:$4 sm:$0xff]  }
  0x44   : > { %1996 = vmatpush1.bf16.msra.mxu1 %v2839_v55  ;;  %1956 = vmatprep.subr.bf16.mxu0 %v2840_v56  ;;  %v2933_v55 = vld [vmem:[%s3230_s19 + $0x3b4] ss:$8 sps:$4 sm:$0xff]   ;;  %v2928_v56 = vld [vmem:[%s3230_s19 + $0x2b0] ss:$8 sps:$4 sm:$0xff]  }
  0x45   : > { %1997 = vmatprep.subr.bf16.mxu1 %v2842_v57  ;;  %v2931_v57 = vld [vmem:[%s3230_s19 + $0x3b0] ss:$8 sps:$4 sm:$0xff]  }
  0x47   : > { %1957 = vmatpush1.bf16.msra.mxu0 %v2844_v58  ;;  %v2936_v58 = vld [vmem:[%s3230_s19 + $0x2c4] ss:$8 sps:$4 sm:$0xff]  }
  0x48   : > { %1998 = vmatpush1.bf16.msra.mxu1 %v2845_v59  ;;  %1958 = vmatprep.subr.bf16.mxu0 %v2846_v60  ;;  %v2939_v59 = vld [vmem:[%s3230_s19 + $0x3c4] ss:$8 sps:$4 sm:$0xff]   ;;  %v2934_v60 = vld [vmem:[%s3230_s19 + $0x2c0] ss:$8 sps:$4 sm:$0xff]  }
  0x49   : > { %1999 = vmatprep.subr.bf16.mxu1 %v2848_v61  ;;  %v2937_v61 = vld [vmem:[%s3230_s19 + $0x3c0] ss:$8 sps:$4 sm:$0xff]  }
  0x4b   : > { %1959 = vmatpush1.bf16.msra.mxu0 %v2850_v62  ;;  %v2942_v62 = vld [vmem:[%s3230_s19 + $0x2d4] ss:$8 sps:$4 sm:$0xff]  }
  0x4c   : > { %2000 = vmatpush1.bf16.msra.mxu1 %v2851_v63  ;;  %1960 = vmatprep.subr.bf16.mxu0 %v2852_v0  ;;  %v2945_v63 = vld [vmem:[%s3230_s19 + $0x3d4] ss:$8 sps:$4 sm:$0xff]   ;;  %v2940_v0 = vld [vmem:[%s3230_s19 + $0x2d0] ss:$8 sps:$4 sm:$0xff]  }
  0x4d   : > { %2001 = vmatprep.subr.bf16.mxu1 %v2854_v1  ;;  %v2943_v1 = vld [vmem:[%s3230_s19 + $0x3d0] ss:$8 sps:$4 sm:$0xff]  }
  0x4f   : > { %1961 = vmatpush1.bf16.msra.mxu0 %v2856_v2  ;;  %v2948_v2 = vld [vmem:[%s3230_s19 + $0x2e4] ss:$8 sps:$4 sm:$0xff]  }
  0x50   : > { %2002 = vmatpush1.bf16.msra.mxu1 %v2857_v3  ;;  %2012 = vmatprep.subr.bf16.mxu0 %v2864_v4  ;;  %v2951_v3 = vld [vmem:[%s3230_s19 + $0x3e4] ss:$8 sps:$4 sm:$0xff]   ;;  %v2946_v4 = vld [vmem:[%s3230_s19 + $0x2e0] ss:$8 sps:$4 sm:$0xff]  }
  0x51   : > { %2053 = vmatprep.subr.bf16.mxu1 %v2867_v5  ;;  %v2949_v5 = vld [vmem:[%s3230_s19 + $0x3e0] ss:$8 sps:$4 sm:$0xff]  }
  0x52   : > { %1963 = vmatmul.mubr.bf16.vlgmr.msra.gmra.mrb[0].mxu0 %v2459_v6  ;;  %v2954_v6 = vld [vmem:[%s3230_s19 + $0x2f4] ss:$8 sps:$4 sm:$0xff]  }
  0x53   : > { %2004 = vmatmul.mubr.bf16.vlgmr.msra.gmra.mrb[0].mxu1 %v2461_v7  ;;  %2013 = vmatpush1.bf16.msra.mxu0 %v2862_v8  ;;  %v2957_v7 = vld [vmem:[%s3230_s19 + $0x3f4] ss:$8 sps:$4 sm:$0xff]   ;;  %v2952_v8 = vld [vmem:[%s3230_s19 + $0x2f0] ss:$8 sps:$4 sm:$0xff]  }
  0x54   : > { %2054 = vmatpush1.bf16.msra.mxu1 %v2865_v9  ;;  %2014 = vmatprep.subr.bf16.mxu0 %v2870_v10  ;;  %v2955_v9 = vld [vmem:[%s3230_s19 + $0x3f0] ss:$8 sps:$4 sm:$0xff]   ;;  %v2964_v10 = vld [vmem:[%s3230_s19 + $0x404] ss:$8 sps:$4 sm:$0xff]  }
  0x55   : > { %2055 = vmatprep.subr.bf16.mxu1 %v2873_v11  ;;  %2044 = vmatprep.mubr.bf16.mxu0 %v2464_v36  ;;  %v2967_v11 = vld [vmem:[%s3230_s19 + $0x504] ss:$8 sps:$4 sm:$0xff]   ;;  %v2994_v36 = vld [vmem:[%s3230_s19 + $0x454] ss:$8 sps:$4 sm:$0xff]  }
  0x56   : > { %2085 = vmatprep.mubr.bf16.mxu1 %v2466_v37  ;;  %v2997_v37 = vld [vmem:[%s3230_s19 + $0x554] ss:$8 sps:$4 sm:$0xff]  }
  0x57   : > { %2015 = vmatpush1.bf16.msra.mxu0 %v2868_v12  ;;  %v2463_v12 = vcombine.low %v3331_v32, %v3331_v32  ;;  %v2988_v32 = vld [vmem:[%s3230_s19 + $0x444] ss:$8 sps:$4 sm:$0xff]  }
  0x58   : > { %2056 = vmatpush1.bf16.msra.mxu1 %v2871_v13  ;;  %2016 = vmatprep.subr.bf16.mxu0 %v2876_v14  ;;  %v2465_v13 = vcombine.low %v3334_v33, %v3334_v33  ;;  %v2962_v14 = vld [vmem:[%s3230_s19 + $0x400] ss:$8 sps:$4 sm:$0xff]   ;;  %v2991_v33 = vld [vmem:[%s3230_s19 + $0x544] ss:$8 sps:$4 sm:$0xff]  }
  0x59   : > { %2057 = vmatprep.subr.bf16.mxu1 %v2879_v15  ;;  %v2965_v15 = vld [vmem:[%s3230_s19 + $0x500] ss:$8 sps:$4 sm:$0xff]  }
  0x5b   : > { %2017 = vmatpush1.bf16.msra.mxu0 %v2874_v16  ;;  %v2970_v16 = vld [vmem:[%s3230_s19 + $0x414] ss:$8 sps:$4 sm:$0xff]  }
  0x5c   : > { %2058 = vmatpush1.bf16.msra.mxu1 %v2877_v17  ;;  %2018 = vmatprep.subr.bf16.mxu0 %v2882_v18  ;;  %v2973_v17 = vld [vmem:[%s3230_s19 + $0x514] ss:$8 sps:$4 sm:$0xff]   ;;  %v3389_v18 = vld [vmem:[%s3280_s23 + $0x20] sm:$0xff] }
  0x5d   : > { %2059 = vmatprep.subr.bf16.mxu1 %v2885_v19  ;;  %v3392_v19 = vld [vmem:[%s3280_s23 + $0x28] sm:$0xff] }
  0x5f   : > { %2019 = vmatpush1.bf16.msra.mxu0 %v2880_v20  ;;  %v2468_v20 = vcombine.high %v3389_v18, %v3389_v18 }
  0x60   : > { %2060 = vmatpush1.bf16.msra.mxu1 %v2883_v21  ;;  %2020 = vmatprep.subr.bf16.mxu0 %v2888_v22  ;;  %v2470_v21 = vcombine.high %v3392_v19, %v3392_v19  ;;  %v2968_v22 = vld [vmem:[%s3230_s19 + $0x410] ss:$8 sps:$4 sm:$0xff]  }
  0x61   : > { %2061 = vmatprep.subr.bf16.mxu1 %v2891_v23  ;;  %v2971_v23 = vld [vmem:[%s3230_s19 + $0x510] ss:$8 sps:$4 sm:$0xff]  }
  0x63   : > { %2021 = vmatpush1.bf16.msra.mxu0 %v2886_v24  ;;  %v2976_v24 = vld [vmem:[%s3230_s19 + $0x424] ss:$8 sps:$4 sm:$0xff]  }
  0x64   : > { %2062 = vmatpush1.bf16.msra.mxu1 %v2889_v25  ;;  %2022 = vmatprep.subr.bf16.mxu0 %v2894_v26  ;;  %v2979_v25 = vld [vmem:[%s3230_s19 + $0x524] ss:$8 sps:$4 sm:$0xff]   ;;  %v2974_v26 = vld [vmem:[%s3230_s19 + $0x420] ss:$8 sps:$4 sm:$0xff]  }
  0x65   : > { %2063 = vmatprep.subr.bf16.mxu1 %v2897_v27  ;;  %v2977_v27 = vld [vmem:[%s3230_s19 + $0x520] ss:$8 sps:$4 sm:$0xff]  }
  0x67   : > { %2023 = vmatpush1.bf16.msra.mxu0 %v2892_v28  ;;  %v2982_v28 = vld [vmem:[%s3230_s19 + $0x434] ss:$8 sps:$4 sm:$0xff]  }
  0x68   : > { %2064 = vmatpush1.bf16.msra.mxu1 %v2895_v29  ;;  %2024 = vmatprep.subr.bf16.mxu0 %v2900_v30  ;;  %v2985_v29 = vld [vmem:[%s3230_s19 + $0x534] ss:$8 sps:$4 sm:$0xff]   ;;  %v2980_v30 = vld [vmem:[%s3230_s19 + $0x430] ss:$8 sps:$4 sm:$0xff]  }
  0x69   : > { %2065 = vmatprep.subr.bf16.mxu1 %v2903_v31  ;;  %v2983_v31 = vld [vmem:[%s3230_s19 + $0x530] ss:$8 sps:$4 sm:$0xff]  }
  0x6b   : > { %2025 = vmatpush1.bf16.msra.mxu0 %v2898_v34  ;;  %v2986_v34 = vld [vmem:[%s3230_s19 + $0x440] ss:$8 sps:$4 sm:$0xff]  }
  0x6c   : > { %2066 = vmatpush1.bf16.msra.mxu1 %v2901_v35  ;;  %2026 = vmatprep.subr.bf16.mxu0 %v2906_v38  ;;  %v2989_v35 = vld [vmem:[%s3230_s19 + $0x540] ss:$8 sps:$4 sm:$0xff]   ;;  %v2992_v38 = vld [vmem:[%s3230_s19 + $0x450] ss:$8 sps:$4 sm:$0xff]  }
  0x6d   : > { %2067 = vmatprep.subr.bf16.mxu1 %v2909_v39  ;;  %v2995_v39 = vld [vmem:[%s3230_s19 + $0x550] ss:$8 sps:$4 sm:$0xff]  }
  0x6f   : > { %2027 = vmatpush1.bf16.msra.mxu0 %v2904_v40  ;;  %v3000_v40 = vld [vmem:[%s3230_s19 + $0x464] ss:$8 sps:$4 sm:$0xff]  }
  0x70   : > { %2068 = vmatpush1.bf16.msra.mxu1 %v2907_v41  ;;  %2028 = vmatprep.subr.bf16.mxu0 %v2912_v42  ;;  %v3003_v41 = vld [vmem:[%s3230_s19 + $0x564] ss:$8 sps:$4 sm:$0xff]   ;;  %v2998_v42 = vld [vmem:[%s3230_s19 + $0x460] ss:$8 sps:$4 sm:$0xff]  }
  0x71   : > { %2069 = vmatprep.subr.bf16.mxu1 %v2915_v43  ;;  %v3001_v43 = vld [vmem:[%s3230_s19 + $0x560] ss:$8 sps:$4 sm:$0xff]  }
  0x73   : > { %2029 = vmatpush1.bf16.msra.mxu0 %v2910_v44  ;;  %v3006_v44 = vld [vmem:[%s3230_s19 + $0x474] ss:$8 sps:$4 sm:$0xff]  }
  0x74   : > { %2070 = vmatpush1.bf16.msra.mxu1 %v2913_v45  ;;  %2030 = vmatprep.subr.bf16.mxu0 %v2918_v46  ;;  %v3009_v45 = vld [vmem:[%s3230_s19 + $0x574] ss:$8 sps:$4 sm:$0xff]   ;;  %v3004_v46 = vld [vmem:[%s3230_s19 + $0x470] ss:$8 sps:$4 sm:$0xff]  }
  0x75   : > { %2071 = vmatprep.subr.bf16.mxu1 %v2921_v47  ;;  %v3007_v47 = vld [vmem:[%s3230_s19 + $0x570] ss:$8 sps:$4 sm:$0xff]  }
  0x77   : > { %2031 = vmatpush1.bf16.msra.mxu0 %v2916_v48  ;;  %v3012_v48 = vld [vmem:[%s3230_s19 + $0x484] ss:$8 sps:$4 sm:$0xff]  }
  0x78   : > { %2072 = vmatpush1.bf16.msra.mxu1 %v2919_v49  ;;  %2032 = vmatprep.subr.bf16.mxu0 %v2924_v50  ;;  %v3015_v49 = vld [vmem:[%s3230_s19 + $0x584] ss:$8 sps:$4 sm:$0xff]   ;;  %v3010_v50 = vld [vmem:[%s3230_s19 + $0x480] ss:$8 sps:$4 sm:$0xff]  }
  0x79   : > { %2073 = vmatprep.subr.bf16.mxu1 %v2927_v51  ;;  %v3013_v51 = vld [vmem:[%s3230_s19 + $0x580] ss:$8 sps:$4 sm:$0xff]  }
  0x7b   : > { %2033 = vmatpush1.bf16.msra.mxu0 %v2922_v52  ;;  %v3018_v52 = vld [vmem:[%s3230_s19 + $0x494] ss:$8 sps:$4 sm:$0xff]  }
  0x7c   : > { %2074 = vmatpush1.bf16.msra.mxu1 %v2925_v53  ;;  %2034 = vmatprep.subr.bf16.mxu0 %v2930_v54  ;;  %v3021_v53 = vld [vmem:[%s3230_s19 + $0x594] ss:$8 sps:$4 sm:$0xff]   ;;  %v3016_v54 = vld [vmem:[%s3230_s19 + $0x490] ss:$8 sps:$4 sm:$0xff]  }
  0x7d   : > { %2075 = vmatprep.subr.bf16.mxu1 %v2933_v55  ;;  %v3019_v55 = vld [vmem:[%s3230_s19 + $0x590] ss:$8 sps:$4 sm:$0xff]  }
  0x7f   : > { %2035 = vmatpush1.bf16.msra.mxu0 %v2928_v56  ;;  %v3024_v56 = vld [vmem:[%s3230_s19 + $0x4a4] ss:$8 sps:$4 sm:$0xff]  }
  0x80   : > { %2076 = vmatpush1.bf16.msra.mxu1 %v2931_v57  ;;  %2036 = vmatprep.subr.bf16.mxu0 %v2936_v58  ;;  %v3027_v57 = vld [vmem:[%s3230_s19 + $0x5a4] ss:$8 sps:$4 sm:$0xff]   ;;  %v3022_v58 = vld [vmem:[%s3230_s19 + $0x4a0] ss:$8 sps:$4 sm:$0xff]  }
  0x81   : > { %2077 = vmatprep.subr.bf16.mxu1 %v2939_v59  ;;  %v3025_v59 = vld [vmem:[%s3230_s19 + $0x5a0] ss:$8 sps:$4 sm:$0xff]  }
  0x83   : > { %2037 = vmatpush1.bf16.msra.mxu0 %v2934_v60  ;;  %v3030_v60 = vld [vmem:[%s3230_s19 + $0x4b4] ss:$8 sps:$4 sm:$0xff]  }
  0x84   : > { %2078 = vmatpush1.bf16.msra.mxu1 %v2937_v61  ;;  %2038 = vmatprep.subr.bf16.mxu0 %v2942_v62  ;;  %v3033_v61 = vld [vmem:[%s3230_s19 + $0x5b4] ss:$8 sps:$4 sm:$0xff]   ;;  %v3028_v62 = vld [vmem:[%s3230_s19 + $0x4b0] ss:$8 sps:$4 sm:$0xff]  }
  0x85   : > { %2079 = vmatprep.subr.bf16.mxu1 %v2945_v63  ;;  %v3031_v63 = vld [vmem:[%s3230_s19 + $0x5b0] ss:$8 sps:$4 sm:$0xff]  }
  0x87   : > { %2039 = vmatpush1.bf16.msra.mxu0 %v2940_v0  ;;  %v3036_v0 = vld [vmem:[%s3230_s19 + $0x4c4] ss:$8 sps:$4 sm:$0xff]  }
  0x88   : > { %2080 = vmatpush1.bf16.msra.mxu1 %v2943_v1  ;;  %2040 = vmatprep.subr.bf16.mxu0 %v2948_v2  ;;  %v3039_v1 = vld [vmem:[%s3230_s19 + $0x5c4] ss:$8 sps:$4 sm:$0xff]   ;;  %v3034_v2 = vld [vmem:[%s3230_s19 + $0x4c0] ss:$8 sps:$4 sm:$0xff]  }
  0x89   : > { %2081 = vmatprep.subr.bf16.mxu1 %v2951_v3  ;;  %v3037_v3 = vld [vmem:[%s3230_s19 + $0x5c0] ss:$8 sps:$4 sm:$0xff]  }
  0x8b   : > { %2041 = vmatpush1.bf16.msra.mxu0 %v2946_v4  ;;  %v3042_v4 = vld [vmem:[%s3230_s19 + $0x4d4] ss:$8 sps:$4 sm:$0xff]  }
  0x8c   : > { %2082 = vmatpush1.bf16.msra.mxu1 %v2949_v5  ;;  %2042 = vmatprep.subr.bf16.mxu0 %v2954_v6  ;;  %v3045_v5 = vld [vmem:[%s3230_s19 + $0x5d4] ss:$8 sps:$4 sm:$0xff]   ;;  %v3040_v6 = vld [vmem:[%s3230_s19 + $0x4d0] ss:$8 sps:$4 sm:$0xff]  }
  0x8d   : > { %2083 = vmatprep.subr.bf16.mxu1 %v2957_v7  ;;  %v3043_v7 = vld [vmem:[%s3230_s19 + $0x5d0] ss:$8 sps:$4 sm:$0xff]  }
  0x8f   : > { %2043 = vmatpush1.bf16.msra.mxu0 %v2952_v8  ;;  %v3048_v8 = vld [vmem:[%s3230_s19 + $0x4e4] ss:$8 sps:$4 sm:$0xff]  }
  0x90   : > { %2084 = vmatpush1.bf16.msra.mxu1 %v2955_v9  ;;  %2094 = vmatprep.subr.bf16.mxu0 %v2964_v10  ;;  %v3051_v9 = vld [vmem:[%s3230_s19 + $0x5e4] ss:$8 sps:$4 sm:$0xff]   ;;  %v3046_v10 = vld [vmem:[%s3230_s19 + $0x4e0] ss:$8 sps:$4 sm:$0xff]  }
  0x91   : > { %2135 = vmatprep.subr.bf16.mxu1 %v2967_v11  ;;  %v3049_v11 = vld [vmem:[%s3230_s19 + $0x5e0] ss:$8 sps:$4 sm:$0xff]  }
  0x92   : > { %2045 = vmatmul.mubr.bf16.vlgmr.msra.gmra.mrb[4].mxu0 %v2463_v12  ;;  %v3054_v12 = vld [vmem:[%s3230_s19 + $0x4f4] ss:$8 sps:$4 sm:$0xff]  }
  0x93   : > { %2086 = vmatmul.mubr.bf16.vlgmr.msra.gmra.mrb[4].mxu1 %v2465_v13  ;;  %2095 = vmatpush1.bf16.msra.mxu0 %v2962_v14  ;;  %v3057_v13 = vld [vmem:[%s3230_s19 + $0x5f4] ss:$8 sps:$4 sm:$0xff]   ;;  %v3052_v14 = vld [vmem:[%s3230_s19 + $0x4f0] ss:$8 sps:$4 sm:$0xff]  }
  0x94   : > { %2136 = vmatpush1.bf16.msra.mxu1 %v2965_v15  ;;  %2096 = vmatprep.subr.bf16.mxu0 %v2970_v16  ;;  %v3055_v15 = vld [vmem:[%s3230_s19 + $0x5f0] ss:$8 sps:$4 sm:$0xff]   ;;  %v3064_v16 = vld [vmem:[%s3230_s19 + $0x604] ss:$8 sps:$4 sm:$0xff]  }
  0x95   : > { %2137 = vmatprep.subr.bf16.mxu1 %v2973_v17  ;;  %2126 = vmatprep.mubr.bf16.mxu0 %v2468_v20  ;;  %v3067_v17 = vld [vmem:[%s3230_s19 + $0x704] ss:$8 sps:$4 sm:$0xff]   ;;  %v2467_v20 = vcombine.low %v3389_v18, %v3389_v18 }
  0x96   : > { %2167 = vmatprep.mubr.bf16.mxu1 %v2470_v21  ;;  %v2469_v21 = vcombine.low %v3392_v19, %v3392_v19 }
  0x97   : > { %2097 = vmatpush1.bf16.msra.mxu0 %v2968_v22  ;;  %v3463_v22 = vld [vmem:[%s3280_s23 + $0x30] sm:$0xff] }
  0x98   : > { %2138 = vmatpush1.bf16.msra.mxu1 %v2971_v23  ;;  %2098 = vmatprep.subr.bf16.mxu0 %v2976_v24  ;;  %v3466_v23 = vld [vmem:[%s3280_s23 + $0x38] sm:$0xff]  ;;  %v3062_v24 = vld [vmem:[%s3230_s19 + $0x600] ss:$8 sps:$4 sm:$0xff]   ;;  %v2472_v18 = vcombine.high %v3463_v22, %v3463_v22 }
  0x99   : > { %2139 = vmatprep.subr.bf16.mxu1 %v2979_v25  ;;  %v3065_v25 = vld [vmem:[%s3230_s19 + $0x700] ss:$8 sps:$4 sm:$0xff]   ;;  %v2474_v19 = vcombine.high %v3466_v23, %v3466_v23 }
  0x9b   : > { %2099 = vmatpush1.bf16.msra.mxu0 %v2974_v26  ;;  %v3070_v26 = vld [vmem:[%s3230_s19 + $0x614] ss:$8 sps:$4 sm:$0xff]  }
  0x9c   : > { %2140 = vmatpush1.bf16.msra.mxu1 %v2977_v27  ;;  %2100 = vmatprep.subr.bf16.mxu0 %v2982_v28  ;;  %v3073_v27 = vld [vmem:[%s3230_s19 + $0x714] ss:$8 sps:$4 sm:$0xff]   ;;  %v3068_v28 = vld [vmem:[%s3230_s19 + $0x610] ss:$8 sps:$4 sm:$0xff]  }
  0x9d   : > { %2141 = vmatprep.subr.bf16.mxu1 %v2985_v29  ;;  %v3071_v29 = vld [vmem:[%s3230_s19 + $0x710] ss:$8 sps:$4 sm:$0xff]  }
  0x9f   : > { %2101 = vmatpush1.bf16.msra.mxu0 %v2980_v30  ;;  %v3076_v30 = vld [vmem:[%s3230_s19 + $0x624] ss:$8 sps:$4 sm:$0xff]  }
  0xa0   : > { %2142 = vmatpush1.bf16.msra.mxu1 %v2983_v31  ;;  %2102 = vmatprep.subr.bf16.mxu0 %v2988_v32  ;;  %v3079_v31 = vld [vmem:[%s3230_s19 + $0x724] ss:$8 sps:$4 sm:$0xff]   ;;  %v3074_v32 = vld [vmem:[%s3230_s19 + $0x620] ss:$8 sps:$4 sm:$0xff]  }
  0xa1   : > { %2143 = vmatprep.subr.bf16.mxu1 %v2991_v33  ;;  %v3077_v33 = vld [vmem:[%s3230_s19 + $0x720] ss:$8 sps:$4 sm:$0xff]  }
  0xa3   : > { %2103 = vmatpush1.bf16.msra.mxu0 %v2986_v34  ;;  %v3082_v34 = vld [vmem:[%s3230_s19 + $0x634] ss:$8 sps:$4 sm:$0xff]  }
  0xa4   : > { %2144 = vmatpush1.bf16.msra.mxu1 %v2989_v35  ;;  %2104 = vmatprep.subr.bf16.mxu0 %v2994_v36  ;;  %v3085_v35 = vld [vmem:[%s3230_s19 + $0x734] ss:$8 sps:$4 sm:$0xff]   ;;  %v3080_v36 = vld [vmem:[%s3230_s19 + $0x630] ss:$8 sps:$4 sm:$0xff]  }
  0xa5   : > { %2145 = vmatprep.subr.bf16.mxu1 %v2997_v37  ;;  %v3083_v37 = vld [vmem:[%s3230_s19 + $0x730] ss:$8 sps:$4 sm:$0xff]  }
  0xa7   : > { %2105 = vmatpush1.bf16.msra.mxu0 %v2992_v38  ;;  %v3088_v38 = vld [vmem:[%s3230_s19 + $0x644] ss:$8 sps:$4 sm:$0xff]  }
  0xa8   : > { %2146 = vmatpush1.bf16.msra.mxu1 %v2995_v39  ;;  %2106 = vmatprep.subr.bf16.mxu0 %v3000_v40  ;;  %v3091_v39 = vld [vmem:[%s3230_s19 + $0x744] ss:$8 sps:$4 sm:$0xff]   ;;  %v3086_v40 = vld [vmem:[%s3230_s19 + $0x640] ss:$8 sps:$4 sm:$0xff]  }
  0xa9   : > { %2147 = vmatprep.subr.bf16.mxu1 %v3003_v41  ;;  %v3089_v41 = vld [vmem:[%s3230_s19 + $0x740] ss:$8 sps:$4 sm:$0xff]  }
  0xab   : > { %2107 = vmatpush1.bf16.msra.mxu0 %v2998_v42  ;;  %v3094_v42 = vld [vmem:[%s3230_s19 + $0x654] ss:$8 sps:$4 sm:$0xff]  }
  0xac   : > { %2148 = vmatpush1.bf16.msra.mxu1 %v3001_v43  ;;  %2108 = vmatprep.subr.bf16.mxu0 %v3006_v44  ;;  %v3097_v43 = vld [vmem:[%s3230_s19 + $0x754] ss:$8 sps:$4 sm:$0xff]   ;;  %v3092_v44 = vld [vmem:[%s3230_s19 + $0x650] ss:$8 sps:$4 sm:$0xff]  }
  0xad   : > { %2149 = vmatprep.subr.bf16.mxu1 %v3009_v45  ;;  %v3095_v45 = vld [vmem:[%s3230_s19 + $0x750] ss:$8 sps:$4 sm:$0xff]  }
  0xaf   : > { %2109 = vmatpush1.bf16.msra.mxu0 %v3004_v46  ;;  %v3100_v46 = vld [vmem:[%s3230_s19 + $0x664] ss:$8 sps:$4 sm:$0xff]  }
  0xb0   : > { %2150 = vmatpush1.bf16.msra.mxu1 %v3007_v47  ;;  %2110 = vmatprep.subr.bf16.mxu0 %v3012_v48  ;;  %v3103_v47 = vld [vmem:[%s3230_s19 + $0x764] ss:$8 sps:$4 sm:$0xff]   ;;  %v3098_v48 = vld [vmem:[%s3230_s19 + $0x660] ss:$8 sps:$4 sm:$0xff]  }
  0xb1   : > { %2151 = vmatprep.subr.bf16.mxu1 %v3015_v49  ;;  %v3101_v49 = vld [vmem:[%s3230_s19 + $0x760] ss:$8 sps:$4 sm:$0xff]  }
  0xb3   : > { %2111 = vmatpush1.bf16.msra.mxu0 %v3010_v50  ;;  %v3106_v50 = vld [vmem:[%s3230_s19 + $0x674] ss:$8 sps:$4 sm:$0xff]  }
  0xb4   : > { %2152 = vmatpush1.bf16.msra.mxu1 %v3013_v51  ;;  %2112 = vmatprep.subr.bf16.mxu0 %v3018_v52  ;;  %v3109_v51 = vld [vmem:[%s3230_s19 + $0x774] ss:$8 sps:$4 sm:$0xff]   ;;  %v3104_v52 = vld [vmem:[%s3230_s19 + $0x670] ss:$8 sps:$4 sm:$0xff]  }
  0xb5   : > { %2153 = vmatprep.subr.bf16.mxu1 %v3021_v53  ;;  %v3107_v53 = vld [vmem:[%s3230_s19 + $0x770] ss:$8 sps:$4 sm:$0xff]  }
  0xb7   : > { %2113 = vmatpush1.bf16.msra.mxu0 %v3016_v54  ;;  %v3112_v54 = vld [vmem:[%s3230_s19 + $0x684] ss:$8 sps:$4 sm:$0xff]  }
  0xb8   : > { %2154 = vmatpush1.bf16.msra.mxu1 %v3019_v55  ;;  %2114 = vmatprep.subr.bf16.mxu0 %v3024_v56  ;;  %v3115_v55 = vld [vmem:[%s3230_s19 + $0x784] ss:$8 sps:$4 sm:$0xff]   ;;  %v3110_v56 = vld [vmem:[%s3230_s19 + $0x680] ss:$8 sps:$4 sm:$0xff]  }
  0xb9   : > { %2155 = vmatprep.subr.bf16.mxu1 %v3027_v57  ;;  %v3113_v57 = vld [vmem:[%s3230_s19 + $0x780] ss:$8 sps:$4 sm:$0xff]  }
  0xbb   : > { %2115 = vmatpush1.bf16.msra.mxu0 %v3022_v58  ;;  %v3118_v58 = vld [vmem:[%s3230_s19 + $0x694] ss:$8 sps:$4 sm:$0xff]  }
  0xbc   : > { %2156 = vmatpush1.bf16.msra.mxu1 %v3025_v59  ;;  %2116 = vmatprep.subr.bf16.mxu0 %v3030_v60  ;;  %v3121_v59 = vld [vmem:[%s3230_s19 + $0x794] ss:$8 sps:$4 sm:$0xff]   ;;  %v3116_v60 = vld [vmem:[%s3230_s19 + $0x690] ss:$8 sps:$4 sm:$0xff]  }
  0xbd   : > { %2157 = vmatprep.subr.bf16.mxu1 %v3033_v61  ;;  %v3119_v61 = vld [vmem:[%s3230_s19 + $0x790] ss:$8 sps:$4 sm:$0xff]  }
  0xbf   : > { %2117 = vmatpush1.bf16.msra.mxu0 %v3028_v62  ;;  %v3124_v62 = vld [vmem:[%s3230_s19 + $0x6a4] ss:$8 sps:$4 sm:$0xff]  }
  0xc0   : > { %2158 = vmatpush1.bf16.msra.mxu1 %v3031_v63  ;;  %2118 = vmatprep.subr.bf16.mxu0 %v3036_v0  ;;  %v3127_v63 = vld [vmem:[%s3230_s19 + $0x7a4] ss:$8 sps:$4 sm:$0xff]   ;;  %v3122_v0 = vld [vmem:[%s3230_s19 + $0x6a0] ss:$8 sps:$4 sm:$0xff]  }
  0xc1   : > { %2159 = vmatprep.subr.bf16.mxu1 %v3039_v1  ;;  %v3125_v1 = vld [vmem:[%s3230_s19 + $0x7a0] ss:$8 sps:$4 sm:$0xff]  }
  0xc3   : > { %2119 = vmatpush1.bf16.msra.mxu0 %v3034_v2  ;;  %v3130_v2 = vld [vmem:[%s3230_s19 + $0x6b4] ss:$8 sps:$4 sm:$0xff]  }
  0xc4   : > { %2160 = vmatpush1.bf16.msra.mxu1 %v3037_v3  ;;  %2120 = vmatprep.subr.bf16.mxu0 %v3042_v4  ;;  %v3133_v3 = vld [vmem:[%s3230_s19 + $0x7b4] ss:$8 sps:$4 sm:$0xff]   ;;  %v3128_v4 = vld [vmem:[%s3230_s19 + $0x6b0] ss:$8 sps:$4 sm:$0xff]  }
  0xc5   : > { %2161 = vmatprep.subr.bf16.mxu1 %v3045_v5  ;;  %v3131_v5 = vld [vmem:[%s3230_s19 + $0x7b0] ss:$8 sps:$4 sm:$0xff]  }
  0xc7   : > { %2121 = vmatpush1.bf16.msra.mxu0 %v3040_v6  ;;  %v3136_v6 = vld [vmem:[%s3230_s19 + $0x6c4] ss:$8 sps:$4 sm:$0xff]  }
  0xc8   : > { %2162 = vmatpush1.bf16.msra.mxu1 %v3043_v7  ;;  %2122 = vmatprep.subr.bf16.mxu0 %v3048_v8  ;;  %v3139_v7 = vld [vmem:[%s3230_s19 + $0x7c4] ss:$8 sps:$4 sm:$0xff]   ;;  %v3134_v8 = vld [vmem:[%s3230_s19 + $0x6c0] ss:$8 sps:$4 sm:$0xff]  }
  0xc9   : > { %2163 = vmatprep.subr.bf16.mxu1 %v3051_v9  ;;  %v3137_v9 = vld [vmem:[%s3230_s19 + $0x7c0] ss:$8 sps:$4 sm:$0xff]  }
  0xcb   : > { %2123 = vmatpush1.bf16.msra.mxu0 %v3046_v10  ;;  %v3142_v10 = vld [vmem:[%s3230_s19 + $0x6d4] ss:$8 sps:$4 sm:$0xff]  }
  0xcc   : > { %2164 = vmatpush1.bf16.msra.mxu1 %v3049_v11  ;;  %2124 = vmatprep.subr.bf16.mxu0 %v3054_v12  ;;  %v3145_v11 = vld [vmem:[%s3230_s19 + $0x7d4] ss:$8 sps:$4 sm:$0xff]   ;;  %v3140_v12 = vld [vmem:[%s3230_s19 + $0x6d0] ss:$8 sps:$4 sm:$0xff]  }
  0xcd   : > { %2165 = vmatprep.subr.bf16.mxu1 %v3057_v13  ;;  %v3143_v13 = vld [vmem:[%s3230_s19 + $0x7d0] ss:$8 sps:$4 sm:$0xff]  }
  0xcf   : > { %2125 = vmatpush1.bf16.msra.mxu0 %v3052_v14  ;;  %v3148_v14 = vld [vmem:[%s3230_s19 + $0x6e4] ss:$8 sps:$4 sm:$0xff]  }
  0xd0   : > { %2166 = vmatpush1.bf16.msra.mxu1 %v3055_v15  ;;  %2176 = vmatprep.subr.bf16.mxu0 %v3064_v16  ;;  %v3151_v15 = vld [vmem:[%s3230_s19 + $0x7e4] ss:$8 sps:$4 sm:$0xff]   ;;  %v3146_v16 = vld [vmem:[%s3230_s19 + $0x6e0] ss:$8 sps:$4 sm:$0xff]  }
  0xd1   : > { %2217 = vmatprep.subr.bf16.mxu1 %v3067_v17  ;;  %v3149_v17 = vld [vmem:[%s3230_s19 + $0x7e0] ss:$8 sps:$4 sm:$0xff]  }
  0xd2   : > { %2127 = vmatmul.mubr.bf16.vlgmr.msra.gmra.mrb[8].mxu0 %v2467_v20  ;;  %v3154_v20 = vld [vmem:[%s3230_s19 + $0x6f4] ss:$8 sps:$4 sm:$0xff]  }
  0xd3   : > { %2168 = vmatmul.mubr.bf16.vlgmr.msra.gmra.mrb[8].mxu1 %v2469_v21  ;;  %2177 = vmatpush1.bf16.msra.mxu0 %v3062_v24  ;;  %v3157_v21 = vld [vmem:[%s3230_s19 + $0x7f4] ss:$8 sps:$4 sm:$0xff]   ;;  %v3152_v24 = vld [vmem:[%s3230_s19 + $0x6f0] ss:$8 sps:$4 sm:$0xff]  }
  0xd4   : > { %2218 = vmatpush1.bf16.msra.mxu1 %v3065_v25  ;;  %2178 = vmatprep.subr.bf16.mxu0 %v3070_v26  ;;  %v3155_v25 = vld [vmem:[%s3230_s19 + $0x7f0] ss:$8 sps:$4 sm:$0xff]   ;;  %v2471_v26 = vcombine.low %v3463_v22, %v3463_v22 }
  0xd5   : > { %2219 = vmatprep.subr.bf16.mxu1 %v3073_v27  ;;  %2208 = vmatprep.mubr.bf16.mxu0 %v2472_v18  ;;  %v2473_v27 = vcombine.low %v3466_v23, %v3466_v23 }
  0xd6   : > { %2249 = vmatprep.mubr.bf16.mxu1 %v2474_v19 }
  0xd7   : > { %2179 = vmatpush1.bf16.msra.mxu0 %v3068_v28 }
  0xd8   : > { %2220 = vmatpush1.bf16.msra.mxu1 %v3071_v29  ;;  %2180 = vmatprep.subr.bf16.mxu0 %v3076_v30 }
  0xd9   : > { %2221 = vmatprep.subr.bf16.mxu1 %v3079_v31 }
  0xdb   : > { %2181 = vmatpush1.bf16.msra.mxu0 %v3074_v32 }
  0xdc   : > { %2222 = vmatpush1.bf16.msra.mxu1 %v3077_v33  ;;  %2182 = vmatprep.subr.bf16.mxu0 %v3082_v34 }
  0xdd   : > { %2223 = vmatprep.subr.bf16.mxu1 %v3085_v35 }
  0xdf   : > { %2183 = vmatpush1.bf16.msra.mxu0 %v3080_v36 }
  0xe0   : > { %2224 = vmatpush1.bf16.msra.mxu1 %v3083_v37  ;;  %2184 = vmatprep.subr.bf16.mxu0 %v3088_v38 }
  0xe1   : > { %2225 = vmatprep.subr.bf16.mxu1 %v3091_v39 }
  0xe3   : > { %2185 = vmatpush1.bf16.msra.mxu0 %v3086_v40 }
  0xe4   : > { %2226 = vmatpush1.bf16.msra.mxu1 %v3089_v41  ;;  %2186 = vmatprep.subr.bf16.mxu0 %v3094_v42 }
  0xe5   : > { %2227 = vmatprep.subr.bf16.mxu1 %v3097_v43 }
  0xe7   : > { %2187 = vmatpush1.bf16.msra.mxu0 %v3092_v44 }
  0xe8   : > { %2228 = vmatpush1.bf16.msra.mxu1 %v3095_v45  ;;  %2188 = vmatprep.subr.bf16.mxu0 %v3100_v46 }
  0xe9   : > { %2229 = vmatprep.subr.bf16.mxu1 %v3103_v47 }
  0xeb   : > { %2189 = vmatpush1.bf16.msra.mxu0 %v3098_v48 }
  0xec   : > { %2230 = vmatpush1.bf16.msra.mxu1 %v3101_v49  ;;  %2190 = vmatprep.subr.bf16.mxu0 %v3106_v50 }
  0xed   : > { %2231 = vmatprep.subr.bf16.mxu1 %v3109_v51 }
  0xef   : > { %2191 = vmatpush1.bf16.msra.mxu0 %v3104_v52 }
  0xf0   : > { %2232 = vmatpush1.bf16.msra.mxu1 %v3107_v53  ;;  %2192 = vmatprep.subr.bf16.mxu0 %v3112_v54 }
  0xf1   : > { %2233 = vmatprep.subr.bf16.mxu1 %v3115_v55 }
  0xf3   : > { %2193 = vmatpush1.bf16.msra.mxu0 %v3110_v56 }
  0xf4   : > { %2234 = vmatpush1.bf16.msra.mxu1 %v3113_v57  ;;  %2194 = vmatprep.subr.bf16.mxu0 %v3118_v58  ;;  %v2269_v58 = vlaneseq }
  0xf5   : > { %2235 = vmatprep.subr.bf16.mxu1 %v3121_v59 }
  0xf6   : > { %v2270_v59 = vshrl.u32 %v2269_v58, 7 }
  0xf7   : > { %2195 = vmatpush1.bf16.msra.mxu0 %v3116_v60 }
  0xf8   : > { %2236 = vmatpush1.bf16.msra.mxu1 %v3119_v61  ;;  %2196 = vmatprep.subr.bf16.mxu0 %v3124_v62  ;;  %v2271_v60 = vsub.s32 0, %v2270_v59  ;;  %v2267_v61 = vld [vmem:[%s3556_s2] sm:$0x3]  ;;  %v2275_v62 = vsub.s32 1, %v2270_v59 }
  0xf9   : > { %2237 = vmatprep.subr.bf16.mxu1 %v3127_v63 }
  0xfb   : > { %2197 = vmatpush1.bf16.msra.mxu0 %v3122_v0 }
  0xfc   : > { %2238 = vmatpush1.bf16.msra.mxu1 %v3125_v1  ;;  %2198 = vmatprep.subr.bf16.mxu0 %v3130_v2  ;;  %v2272_v2 = vrot.slane %v2267_v61, %v2271_v60 }
  0xfd   : > { %2239 = vmatprep.subr.bf16.mxu1 %v3133_v3 }
  0xff   : > { %2199 = vmatpush1.bf16.msra.mxu0 %v3128_v4 }
 0x100   : > { %2240 = vmatpush1.bf16.msra.mxu1 %v3131_v5  ;;  %2200 = vmatprep.subr.bf16.mxu0 %v3136_v6  ;;  %v2276_v6 = vrot.slane %v2267_v61, %v2275_v62 }
 0x101   : > { %2241 = vmatprep.subr.bf16.mxu1 %v3139_v7 }
 0x103   : > { %2201 = vmatpush1.bf16.msra.mxu0 %v3134_v8 }
 0x104   : > { %2242 = vmatpush1.bf16.msra.mxu1 %v3137_v9  ;;  %2202 = vmatprep.subr.bf16.mxu0 %v3142_v10 }
 0x105   : > { %2243 = vmatprep.subr.bf16.mxu1 %v3145_v11 }
 0x107   : > { %2203 = vmatpush1.bf16.msra.mxu0 %v3140_v12 }
 0x108   : > { %2244 = vmatpush1.bf16.msra.mxu1 %v3143_v13  ;;  %2204 = vmatprep.subr.bf16.mxu0 %v3148_v14 }
 0x109   : > { %2245 = vmatprep.subr.bf16.mxu1 %v3151_v15 }
 0x10b   : > { %2205 = vmatpush1.bf16.msra.mxu0 %v3146_v16 }
 0x10c   : > { %2246 = vmatpush1.bf16.msra.mxu1 %v3149_v17  ;;  %2206 = vmatprep.subr.bf16.mxu0 %v3154_v20 }
 0x10d   : > { %2247 = vmatprep.subr.bf16.mxu1 %v3157_v21 }
 0x10f   : > { %2207 = vmatpush1.bf16.msra.mxu0 %v3152_v24 }
 0x110   : > { %2248 = vmatpush1.bf16.msra.mxu1 %v3155_v25 }
 0x112   : > { %2209 = vmatmul.mubr.bf16.vlgmr.msra.gmra.mrb[12].mxu0 %v2471_v26 }
 0x113   : > { %2250 = vmatmul.mubr.bf16.vlgmr.msra.gmra.mrb[12].mxu1 %v2473_v27 }
 0x125   : > { %v1964_v18 = vpop.f32.mrb[0].mxu0 }
 0x126   : > { %v2005_v19 = vpop.f32.mrb[0].mxu1  ;;  %v1966_v29 = vpop.f32.mrb[1].mxu0 }
 0x127   : > { %v2006_v28 = vadd.f32 %v2005_v19, %v1964_v18  ;;  %v2007_v30 = vpop.f32.mrb[1].mxu1  ;;  %v1968_v32 = vpop.f32.mrb[2].mxu0 }
 0x128   : > { %v2008_v31 = vadd.f32 %v2007_v30, %v1966_v29  ;;  %v2009_v33 = vpop.f32.mrb[2].mxu1  ;;  %v1969_v34 = vpop.f32.mrb[3].mxu0 }
 0x129   : > { %v2010_v35 = vpop.f32.mrb[3].mxu1 }
 0x165   : > { %v2046_v36 = vpop.f32.mrb[4].mxu0 }
 0x166   : > { %v2087_v37 = vpop.f32.mrb[4].mxu1  ;;  %v2047_v22 = vadd.f32 %v2046_v36, %v2006_v28  ;;  %v2048_v38 = vpop.f32.mrb[5].mxu0 }
 0x167   : > { %v2089_v39 = vpop.f32.mrb[5].mxu1  ;;  %v2049_v23 = vadd.f32 %v2048_v38, %v2008_v31  ;;  %v2050_v40 = vpop.f32.mrb[6].mxu0 }
 0x168   : > { %v2091_v41 = vpop.f32.mrb[6].mxu1  ;;  %v2088_v42 = vadd.f32 %v2087_v37, %v2047_v22  ;;  %v2051_v43 = vpop.f32.mrb[7].mxu0 }
 0x169   : > { %v2092_v44 = vpop.f32.mrb[7].mxu1  ;;  %v2090_v45 = vadd.f32 %v2089_v39, %v2049_v23 }
 0x1a5   : > { %v2128_v46 = vpop.f32.mrb[8].mxu0 }
 0x1a6   : > { %v2169_v47 = vpop.f32.mrb[8].mxu1  ;;  %v2129_v48 = vadd.f32 %v2128_v46, %v2088_v42  ;;  %v2130_v49 = vpop.f32.mrb[9].mxu0 }
 0x1a7   : > { %v2171_v50 = vpop.f32.mrb[9].mxu1  ;;  %v2131_v51 = vadd.f32 %v2130_v49, %v2090_v45  ;;  %v2132_v52 = vpop.f32.mrb[10].mxu0 }
 0x1a8   : > { %v2173_v53 = vpop.f32.mrb[10].mxu1  ;;  %v2170_v54 = vadd.f32 %v2169_v47, %v2129_v48  ;;  %v2133_v55 = vpop.f32.mrb[11].mxu0 }
 0x1a9   : > { %v2174_v56 = vpop.f32.mrb[11].mxu1  ;;  %v2172_v57 = vadd.f32 %v2171_v50, %v2131_v51 }
 0x1e5   : > { %v2210_v63 = vpop.f32.mrb[12].mxu0 }
 0x1e6   : > { %v2251_v0 = vpop.f32.mrb[12].mxu1  ;;  %v2211_v1 = vadd.f32 %v2210_v63, %v2170_v54  ;;  %v2212_v3 = vpop.f32.mrb[13].mxu0 }
 0x1e7   : > { %v2253_v4 = vpop.f32.mrb[13].mxu1  ;;  %v2213_v5 = vadd.f32 %v2212_v3, %v2172_v57  ;;  %v2214_v7 = vpop.f32.mrb[14].mxu0 }
 0x1e8   : > { %v2255_v8 = vpop.f32.mrb[14].mxu1  ;;  %v2252_v9 = vadd.f32 %v2251_v0, %v2211_v1  ;;  %v2215_v10 = vpop.f32.mrb[15].mxu0 }
 0x1e9   : > { %v2256_v11 = vpop.f32.mrb[15].mxu1  ;;  %v2254_v12 = vadd.f32 %v2253_v4, %v2213_v5 }
 0x1ea   : > { %v2279_v13 = vadd.f32 %v2272_v2, %v2252_v9 }
 0x1eb   : > { %v2280_v14 = vadd.f32 %v2276_v6, %v2254_v12 }
 0x1ec   : > { %vm2281_vm0 = vcmp.ge.f32.partialorder %v2279_v13, 0.0  ;;  %v2283_v15 = vmul.f32 0.2, %v2279_v13 }
 0x1ed   : > { %vm2282_vm1 = vcmp.ge.f32.partialorder %v2280_v14, 0.0  ;;  %v2284_v16 = vmul.f32 0.2, %v2280_v14 }
 0x1ee   : > { %v2285_v17 = vsel %vm2281_vm0, %v2279_v13, %v2283_v15 }
 0x1ef   : > { %v2286_v20 = vsel %vm2282_vm1, %v2280_v14, %v2284_v16 }
 0x1f0   : > { %v2737_v21 = vpack.c.bf16 %v2286_v20, %v2285_v17 }
 0x1f2   : > { %2295 = vst [vmem:[%s320_s29] sm:$0xff] %v2737_v21 }
 0x1f3 PF: > { %s13_s14 = sadd.s32 1, %s3184_s14   ;;  %s3558_s12 = smov %s3180_s13 }
 0x1f4   : > { %p10_p5 = scmp.ge.s32.totalorder %s13_s14, 10   ;;  %s3559_s13 = smov %s3561_s15 }
 0x1f6   :  { %12 = sbr.rel (!%p10_p5) target bundleno = 2 (0x2), region = 76 }

// kernel: autoencoder_cov3d_mem_forward.15
= control target key start
LH: loop header
LB: loop body
LE: loop exit
PB: predicated region body
PF: predicated region fallthrough
CT: control target
= control target key end

     0   :  { %s3302_s12 = smov 0   ;;  %s3304_s13 = smov 0   ;;  %s3670_s0 = inlined_call_operand.vmem [shape: bf16[8,16,2048], index: 0, kind: input, shape index: {}]   ;;  %s3671_s1 = inlined_call_operand.vmem [shape: bf16[8,2048,256], index: 1, kind: input, shape index: {}]   ;;  %s3672_s2 = inlined_call_operand.vmem [shape: f32[1,256], index: 2, kind: input, shape index: {}]   ;;  %s3673_s3 = inlined_call_operand.vmem [shape: bf16[8,16,256], index: 3, kind: output, shape index: {}]  }
   0x1   :  { %s3306_s14 = smov 0  }
   0x2 LB: > { %s39_s15 = sadd.s32 1, %s3276_s13  ;;  %p2534_p0 = scmp.ge.s32.totalorder %s3280_s14, 1  ;;  %s3280_s14 = sphi %s3306_s14, %s13_s14   ;;  %s3276_s13 = sphi %s3304_s13, %s3675_s13   ;;  %s3272_s12 = sphi %s3302_s12, %s3674_s12  }
   0x3   : > { %p41_p1 = scmp.ge.s32.totalorder %s39_s15, 8  ;;  %p217_p2 = scmp.lt.s32.totalorder %s3280_s14, 9 }
   0x5   : > { %s3677_s15 = smov (%p41_p1, %s39_s15), 0  ;;  %p218_p3 = pnand %p2534_p0, %p217_p2 }
   0x6   : > { %p279_p4 = scmp.lt.s32.totalorder (!%p218_p3), %s3272_s12, 7 }
   0x7   : > { %221 = sbr.rel (%p218_p3) target bundleno = 500 (0x1f4), region = 32 }
   0xe   : > { %s3679_s12 = smov (!%p279_p4, %s3272_s12), 7 }
   0xf   : > { %s2818_s16 = sshll.u32 %s3679_s12, 11  ;;  %s2817_s20 = sshll.u32 %s3679_s12, 7 }
  0x10   : > { %s3326_s19 = scalar_lea.vmem %s3671_s1, %s2818_s16  ;;  %s3376_s23 = scalar_lea.vmem %s3670_s0, %s2817_s20 }
  0x11   : > { %v2874_v0 = vld [vmem:[%s3326_s19 + $0x4] ss:$8 sps:$4 sm:$0xff]   ;;  %v2878_v2 = vld [vmem:[%s3326_s19] ss:$8 sps:$4 sm:$0xff]   ;;  %v2880_v4 = vld [vmem:[%s3326_s19 + $0x14] ss:$8 sps:$4 sm:$0xff]  }
  0x12   : > { %v2876_v1 = vld [vmem:[%s3326_s19 + $0x404] ss:$8 sps:$4 sm:$0xff]   ;;  %1974 = vmatprep.subr.bf16.mxu1 %v2874_v0  ;;  %v2879_v3 = vld [vmem:[%s3326_s19 + $0x400] ss:$8 sps:$4 sm:$0xff]   ;;  %v2882_v5 = vld [vmem:[%s3326_s19 + $0x414] ss:$8 sps:$4 sm:$0xff]  }
  0x13   : > { %2146 = vmatprep.subr.bf16.mxu0 %v2876_v1  ;;  %1975 = vmatpush1.bf16.msra.mxu1 %v2878_v2  ;;  %v2884_v6 = vld [vmem:[%s3326_s19 + $0x10] ss:$8 sps:$4 sm:$0xff]   ;;  %v2886_v8 = vld [vmem:[%s3326_s19 + $0x24] ss:$8 sps:$4 sm:$0xff]   ;;  %v2890_v10 = vld [vmem:[%s3326_s19 + $0x20] ss:$8 sps:$4 sm:$0xff]  }
  0x14   : > { %2147 = vmatpush1.bf16.msra.mxu0 %v2879_v3  ;;  %1976 = vmatprep.subr.bf16.mxu1 %v2880_v4  ;;  %v2885_v7 = vld [vmem:[%s3326_s19 + $0x410] ss:$8 sps:$4 sm:$0xff]   ;;  %v2888_v9 = vld [vmem:[%s3326_s19 + $0x424] ss:$8 sps:$4 sm:$0xff]   ;;  %v2891_v11 = vld [vmem:[%s3326_s19 + $0x420] ss:$8 sps:$4 sm:$0xff]  }
  0x15   : > { %2148 = vmatprep.subr.bf16.mxu0 %v2882_v5  ;;  %v2892_v12 = vld [vmem:[%s3326_s19 + $0x34] ss:$8 sps:$4 sm:$0xff]   ;;  %v2896_v14 = vld [vmem:[%s3326_s19 + $0x30] ss:$8 sps:$4 sm:$0xff]   ;;  %v2898_v16 = vld [vmem:[%s3326_s19 + $0x44] ss:$8 sps:$4 sm:$0xff]  }
  0x16   : > { %v2894_v13 = vld [vmem:[%s3326_s19 + $0x434] ss:$8 sps:$4 sm:$0xff]   ;;  %v2897_v15 = vld [vmem:[%s3326_s19 + $0x430] ss:$8 sps:$4 sm:$0xff]   ;;  %v2900_v17 = vld [vmem:[%s3326_s19 + $0x444] ss:$8 sps:$4 sm:$0xff]  }
  0x17   : > { %1977 = vmatpush1.bf16.msra.mxu1 %v2884_v6  ;;  %v2902_v18 = vld [vmem:[%s3326_s19 + $0x40] ss:$8 sps:$4 sm:$0xff]   ;;  %v2904_v20 = vld [vmem:[%s3326_s19 + $0x54] ss:$8 sps:$4 sm:$0xff]   ;;  %v2908_v22 = vld [vmem:[%s3326_s19 + $0x50] ss:$8 sps:$4 sm:$0xff]  }
  0x18   : > { %2149 = vmatpush1.bf16.msra.mxu0 %v2885_v7  ;;  %1978 = vmatprep.subr.bf16.mxu1 %v2886_v8  ;;  %v2903_v19 = vld [vmem:[%s3326_s19 + $0x440] ss:$8 sps:$4 sm:$0xff]   ;;  %v2906_v21 = vld [vmem:[%s3326_s19 + $0x454] ss:$8 sps:$4 sm:$0xff]   ;;  %v2909_v23 = vld [vmem:[%s3326_s19 + $0x450] ss:$8 sps:$4 sm:$0xff]  }
  0x19   : > { %2150 = vmatprep.subr.bf16.mxu0 %v2888_v9  ;;  %v2910_v24 = vld [vmem:[%s3326_s19 + $0x64] ss:$8 sps:$4 sm:$0xff]   ;;  %v2914_v26 = vld [vmem:[%s3326_s19 + $0x60] ss:$8 sps:$4 sm:$0xff]   ;;  %v2916_v28 = vld [vmem:[%s3326_s19 + $0x74] ss:$8 sps:$4 sm:$0xff]  }
  0x1a   : > { %v2912_v25 = vld [vmem:[%s3326_s19 + $0x464] ss:$8 sps:$4 sm:$0xff]   ;;  %v2915_v27 = vld [vmem:[%s3326_s19 + $0x460] ss:$8 sps:$4 sm:$0xff]   ;;  %v2918_v29 = vld [vmem:[%s3326_s19 + $0x474] ss:$8 sps:$4 sm:$0xff]  }
  0x1b   : > { %1979 = vmatpush1.bf16.msra.mxu1 %v2890_v10  ;;  %v2920_v30 = vld [vmem:[%s3326_s19 + $0x70] ss:$8 sps:$4 sm:$0xff]   ;;  %v2922_v32 = vld [vmem:[%s3326_s19 + $0x84] ss:$8 sps:$4 sm:$0xff]   ;;  %v2926_v34 = vld [vmem:[%s3326_s19 + $0x80] ss:$8 sps:$4 sm:$0xff]  }
  0x1c   : > { %2151 = vmatpush1.bf16.msra.mxu0 %v2891_v11  ;;  %1980 = vmatprep.subr.bf16.mxu1 %v2892_v12  ;;  %v2921_v31 = vld [vmem:[%s3326_s19 + $0x470] ss:$8 sps:$4 sm:$0xff]   ;;  %v2924_v33 = vld [vmem:[%s3326_s19 + $0x484] ss:$8 sps:$4 sm:$0xff]   ;;  %v2927_v35 = vld [vmem:[%s3326_s19 + $0x480] ss:$8 sps:$4 sm:$0xff]  }
  0x1d   : > { %2152 = vmatprep.subr.bf16.mxu0 %v2894_v13  ;;  %v2928_v36 = vld [vmem:[%s3326_s19 + $0x94] ss:$8 sps:$4 sm:$0xff]   ;;  %v2932_v38 = vld [vmem:[%s3326_s19 + $0x90] ss:$8 sps:$4 sm:$0xff]   ;;  %v2934_v40 = vld [vmem:[%s3326_s19 + $0xa4] ss:$8 sps:$4 sm:$0xff]  }
  0x1e   : > { %v2930_v37 = vld [vmem:[%s3326_s19 + $0x494] ss:$8 sps:$4 sm:$0xff]   ;;  %v2933_v39 = vld [vmem:[%s3326_s19 + $0x490] ss:$8 sps:$4 sm:$0xff]   ;;  %v2936_v41 = vld [vmem:[%s3326_s19 + $0x4a4] ss:$8 sps:$4 sm:$0xff]  }
  0x1f   : > { %1981 = vmatpush1.bf16.msra.mxu1 %v2896_v14  ;;  %v2938_v42 = vld [vmem:[%s3326_s19 + $0xa0] ss:$8 sps:$4 sm:$0xff]   ;;  %v2940_v44 = vld [vmem:[%s3326_s19 + $0xb4] ss:$8 sps:$4 sm:$0xff]   ;;  %v2944_v46 = vld [vmem:[%s3326_s19 + $0xb0] ss:$8 sps:$4 sm:$0xff]  }
  0x20   : > { %2153 = vmatpush1.bf16.msra.mxu0 %v2897_v15  ;;  %1982 = vmatprep.subr.bf16.mxu1 %v2898_v16  ;;  %v2939_v43 = vld [vmem:[%s3326_s19 + $0x4a0] ss:$8 sps:$4 sm:$0xff]   ;;  %v2942_v45 = vld [vmem:[%s3326_s19 + $0x4b4] ss:$8 sps:$4 sm:$0xff]   ;;  %v2945_v47 = vld [vmem:[%s3326_s19 + $0x4b0] ss:$8 sps:$4 sm:$0xff]  }
  0x21   : > { %2154 = vmatprep.subr.bf16.mxu0 %v2900_v17  ;;  %v342_v48 = vld [vmem:[%s3376_s23] sm:$0xff]  ;;  %v2952_v58 = vld [vmem:[%s3326_s19 + $0xd4] ss:$8 sps:$4 sm:$0xff]   ;;  %v2956_v60 = vld [vmem:[%s3326_s19 + $0xd0] ss:$8 sps:$4 sm:$0xff]   ;;  %s2819_s26 = sshll.u32 %s3679_s12, 4 }
  0x22   : > { %v350_v49 = vld [vmem:[%s3376_s23 + $0x40] sm:$0xff]  ;;  %v2954_v59 = vld [vmem:[%s3326_s19 + $0x4d4] ss:$8 sps:$4 sm:$0xff]   ;;  %v2957_v61 = vld [vmem:[%s3326_s19 + $0x4d0] ss:$8 sps:$4 sm:$0xff]   ;;  %s327_s29 = scalar_lea.vmem %s3673_s3, %s2819_s26 }
  0x23   : > { %1983 = vmatpush1.bf16.msra.mxu1 %v2902_v18  ;;  %v2946_v50 = vld [vmem:[%s3326_s19 + $0xc4] ss:$8 sps:$4 sm:$0xff]   ;;  %v2542_v52 = vcombine.high %v342_v48, %v350_v49  ;;  %v2950_v56 = vld [vmem:[%s3326_s19 + $0xc0] ss:$8 sps:$4 sm:$0xff]   ;;  %v2964_v2 = vld [vmem:[%s3326_s19 + $0xf4] ss:$8 sps:$4 sm:$0xff]   ;;  %v2541_v8 = vcombine.low %v342_v48, %v350_v49 }
  0x24   : > { %2155 = vmatpush1.bf16.msra.mxu0 %v2903_v19  ;;  %1984 = vmatprep.subr.bf16.mxu1 %v2904_v20  ;;  %v2948_v51 = vld [vmem:[%s3326_s19 + $0x4c4] ss:$8 sps:$4 sm:$0xff]   ;;  %v2951_v57 = vld [vmem:[%s3326_s19 + $0x4c0] ss:$8 sps:$4 sm:$0xff]   ;;  %v2966_v3 = vld [vmem:[%s3326_s19 + $0x4f4] ss:$8 sps:$4 sm:$0xff]  }
  0x25   : > { %2156 = vmatprep.subr.bf16.mxu0 %v2906_v21  ;;  %v346_v53 = vld [vmem:[%s3376_s23 + $0x20] sm:$0xff]  ;;  %2006 = vmatprep.mubr.bf16.mxu1 %v2542_v52  ;;  %v2968_v4 = vld [vmem:[%s3326_s19 + $0xf0] ss:$8 sps:$4 sm:$0xff]   ;;  %v2978_v12 = vld [vmem:[%s3326_s19 + $0x114] ss:$8 sps:$4 sm:$0xff]  }
  0x26   : > { %v354_v54 = vld [vmem:[%s3376_s23 + $0x60] sm:$0xff]  ;;  %v2969_v5 = vld [vmem:[%s3326_s19 + $0x4f0] ss:$8 sps:$4 sm:$0xff]   ;;  %v2981_v13 = vld [vmem:[%s3326_s19 + $0x514] ss:$8 sps:$4 sm:$0xff]  }
  0x27   : > { %1985 = vmatpush1.bf16.msra.mxu1 %v2908_v22  ;;  %v2550_v55 = vcombine.high %v346_v53, %v354_v54  ;;  %v2958_v62 = vld [vmem:[%s3326_s19 + $0xe4] ss:$8 sps:$4 sm:$0xff]   ;;  %v2962_v0 = vld [vmem:[%s3326_s19 + $0xe0] ss:$8 sps:$4 sm:$0xff]   ;;  %v2549_v10 = vcombine.low %v346_v53, %v354_v54  ;;  %v2976_v14 = vld [vmem:[%s3326_s19 + $0x110] ss:$8 sps:$4 sm:$0xff]  }
  0x28   : > { %2157 = vmatpush1.bf16.msra.mxu0 %v2909_v23  ;;  %1986 = vmatprep.subr.bf16.mxu1 %v2910_v24  ;;  %v2960_v63 = vld [vmem:[%s3326_s19 + $0x4e4] ss:$8 sps:$4 sm:$0xff]   ;;  %v2963_v1 = vld [vmem:[%s3326_s19 + $0x4e0] ss:$8 sps:$4 sm:$0xff]   ;;  %v2979_v15 = vld [vmem:[%s3326_s19 + $0x510] ss:$8 sps:$4 sm:$0xff]  }
  0x29   : > { %2158 = vmatprep.subr.bf16.mxu0 %v2912_v25  ;;  %2178 = vmatprep.mubr.bf16.mxu0 %v2550_v55  ;;  %v2972_v6 = vld [vmem:[%s3326_s19 + $0x104] ss:$8 sps:$4 sm:$0xff]   ;;  %v2970_v9 = vld [vmem:[%s3326_s19 + $0x100] ss:$8 sps:$4 sm:$0xff]   ;;  %v2990_v20 = vld [vmem:[%s3326_s19 + $0x134] ss:$8 sps:$4 sm:$0xff]  }
  0x2a   : > { %v2975_v7 = vld [vmem:[%s3326_s19 + $0x504] ss:$8 sps:$4 sm:$0xff]   ;;  %v2973_v11 = vld [vmem:[%s3326_s19 + $0x500] ss:$8 sps:$4 sm:$0xff]   ;;  %v2993_v21 = vld [vmem:[%s3326_s19 + $0x534] ss:$8 sps:$4 sm:$0xff]  }
  0x2b   : > { %1987 = vmatpush1.bf16.msra.mxu1 %v2914_v26  ;;  %v2984_v16 = vld [vmem:[%s3326_s19 + $0x124] ss:$8 sps:$4 sm:$0xff]   ;;  %v2982_v18 = vld [vmem:[%s3326_s19 + $0x120] ss:$8 sps:$4 sm:$0xff]   ;;  %v2988_v22 = vld [vmem:[%s3326_s19 + $0x130] ss:$8 sps:$4 sm:$0xff]  }
  0x2c   : > { %2159 = vmatpush1.bf16.msra.mxu0 %v2915_v27  ;;  %1988 = vmatprep.subr.bf16.mxu1 %v2916_v28  ;;  %v2987_v17 = vld [vmem:[%s3326_s19 + $0x524] ss:$8 sps:$4 sm:$0xff]   ;;  %v2985_v19 = vld [vmem:[%s3326_s19 + $0x520] ss:$8 sps:$4 sm:$0xff]   ;;  %v2991_v23 = vld [vmem:[%s3326_s19 + $0x530] ss:$8 sps:$4 sm:$0xff]  }
  0x2d   : > { %2160 = vmatprep.subr.bf16.mxu0 %v2918_v29  ;;  %v2996_v24 = vld [vmem:[%s3326_s19 + $0x144] ss:$8 sps:$4 sm:$0xff]   ;;  %v2994_v26 = vld [vmem:[%s3326_s19 + $0x140] ss:$8 sps:$4 sm:$0xff]   ;;  %v3002_v28 = vld [vmem:[%s3326_s19 + $0x154] ss:$8 sps:$4 sm:$0xff]  }
  0x2e   : > { %v2999_v25 = vld [vmem:[%s3326_s19 + $0x544] ss:$8 sps:$4 sm:$0xff]   ;;  %v2997_v27 = vld [vmem:[%s3326_s19 + $0x540] ss:$8 sps:$4 sm:$0xff]   ;;  %v3005_v29 = vld [vmem:[%s3326_s19 + $0x554] ss:$8 sps:$4 sm:$0xff]  }
  0x2f   : > { %1989 = vmatpush1.bf16.msra.mxu1 %v2920_v30  ;;  %v3000_v30 = vld [vmem:[%s3326_s19 + $0x150] ss:$8 sps:$4 sm:$0xff]   ;;  %v3018_v48 = vld [vmem:[%s3326_s19 + $0x180] ss:$8 sps:$4 sm:$0xff]   ;;  %v3032_v54 = vld [vmem:[%s3326_s19 + $0x1a4] ss:$8 sps:$4 sm:$0xff]  }
  0x30   : > { %2161 = vmatpush1.bf16.msra.mxu0 %v2921_v31  ;;  %1990 = vmatprep.subr.bf16.mxu1 %v2922_v32  ;;  %v3003_v31 = vld [vmem:[%s3326_s19 + $0x550] ss:$8 sps:$4 sm:$0xff]   ;;  %v3008_v32 = vld [vmem:[%s3326_s19 + $0x164] ss:$8 sps:$4 sm:$0xff]   ;;  %v3021_v49 = vld [vmem:[%s3326_s19 + $0x580] ss:$8 sps:$4 sm:$0xff]  }
  0x31   : > { %2162 = vmatprep.subr.bf16.mxu0 %v2924_v33  ;;  %v3011_v33 = vld [vmem:[%s3326_s19 + $0x564] ss:$8 sps:$4 sm:$0xff]   ;;  %v3024_v52 = vld [vmem:[%s3326_s19 + $0x190] ss:$8 sps:$4 sm:$0xff]  }
  0x32   : > { %v3027_v53 = vld [vmem:[%s3326_s19 + $0x590] ss:$8 sps:$4 sm:$0xff]   ;;  %v3035_v55 = vld [vmem:[%s3326_s19 + $0x5a4] ss:$8 sps:$4 sm:$0xff]  }
  0x33   : > { %1991 = vmatpush1.bf16.msra.mxu1 %v2926_v34  ;;  %v3006_v34 = vld [vmem:[%s3326_s19 + $0x160] ss:$8 sps:$4 sm:$0xff]  }
  0x34   : > { %2163 = vmatpush1.bf16.msra.mxu0 %v2927_v35  ;;  %1992 = vmatprep.subr.bf16.mxu1 %v2928_v36  ;;  %v3009_v35 = vld [vmem:[%s3326_s19 + $0x560] ss:$8 sps:$4 sm:$0xff]  }
  0x35   : > { %2164 = vmatprep.subr.bf16.mxu0 %v2930_v37  ;;  %v3431_v36 = vld [vmem:[%s3376_s23 + $0x8] sm:$0xff] }
  0x36   : > { %v3434_v37 = vld [vmem:[%s3376_s23 + $0x48] sm:$0xff] }
  0x37   : > { %1993 = vmatpush1.bf16.msra.mxu1 %v2932_v38  ;;  %v3014_v38 = vld [vmem:[%s3326_s19 + $0x174] ss:$8 sps:$4 sm:$0xff]  }
  0x38   : > { %2165 = vmatpush1.bf16.msra.mxu0 %v2933_v39  ;;  %1994 = vmatprep.subr.bf16.mxu1 %v2934_v40  ;;  %v3017_v39 = vld [vmem:[%s3326_s19 + $0x574] ss:$8 sps:$4 sm:$0xff]   ;;  %v2544_v40 = vcombine.high %v3431_v36, %v3434_v37 }
  0x39   : > { %2166 = vmatprep.subr.bf16.mxu0 %v2936_v41  ;;  %v3441_v41 = vld [vmem:[%s3376_s23 + $0x28] sm:$0xff] }
  0x3b   : > { %1995 = vmatpush1.bf16.msra.mxu1 %v2938_v42  ;;  %v3444_v42 = vld [vmem:[%s3376_s23 + $0x68] sm:$0xff] }
  0x3c   : > { %2167 = vmatpush1.bf16.msra.mxu0 %v2939_v43  ;;  %1996 = vmatprep.subr.bf16.mxu1 %v2940_v44  ;;  %v2552_v43 = vcombine.high %v3441_v41, %v3444_v42  ;;  %v3012_v44 = vld [vmem:[%s3326_s19 + $0x170] ss:$8 sps:$4 sm:$0xff]  }
  0x3d   : > { %2168 = vmatprep.subr.bf16.mxu0 %v2942_v45  ;;  %v3015_v45 = vld [vmem:[%s3326_s19 + $0x570] ss:$8 sps:$4 sm:$0xff]  }
  0x3f   : > { %1997 = vmatpush1.bf16.msra.mxu1 %v2944_v46  ;;  %v3020_v46 = vld [vmem:[%s3326_s19 + $0x184] ss:$8 sps:$4 sm:$0xff]  }
  0x40   : > { %2169 = vmatpush1.bf16.msra.mxu0 %v2945_v47  ;;  %1998 = vmatprep.subr.bf16.mxu1 %v2946_v50  ;;  %v3023_v47 = vld [vmem:[%s3326_s19 + $0x584] ss:$8 sps:$4 sm:$0xff]   ;;  %v3026_v50 = vld [vmem:[%s3326_s19 + $0x194] ss:$8 sps:$4 sm:$0xff]  }
  0x41   : > { %2170 = vmatprep.subr.bf16.mxu0 %v2948_v51  ;;  %v3029_v51 = vld [vmem:[%s3326_s19 + $0x594] ss:$8 sps:$4 sm:$0xff]  }
  0x43   : > { %1999 = vmatpush1.bf16.msra.mxu1 %v2950_v56  ;;  %v3030_v56 = vld [vmem:[%s3326_s19 + $0x1a0] ss:$8 sps:$4 sm:$0xff]  }
  0x44   : > { %2171 = vmatpush1.bf16.msra.mxu0 %v2951_v57  ;;  %2000 = vmatprep.subr.bf16.mxu1 %v2952_v58  ;;  %v3033_v57 = vld [vmem:[%s3326_s19 + $0x5a0] ss:$8 sps:$4 sm:$0xff]   ;;  %v3038_v58 = vld [vmem:[%s3326_s19 + $0x1b4] ss:$8 sps:$4 sm:$0xff]  }
  0x45   : > { %2172 = vmatprep.subr.bf16.mxu0 %v2954_v59  ;;  %v3041_v59 = vld [vmem:[%s3326_s19 + $0x5b4] ss:$8 sps:$4 sm:$0xff]  }
  0x47   : > { %2001 = vmatpush1.bf16.msra.mxu1 %v2956_v60  ;;  %v3036_v60 = vld [vmem:[%s3326_s19 + $0x1b0] ss:$8 sps:$4 sm:$0xff]  }
  0x48   : > { %2173 = vmatpush1.bf16.msra.mxu0 %v2957_v61  ;;  %2002 = vmatprep.subr.bf16.mxu1 %v2958_v62  ;;  %v3039_v61 = vld [vmem:[%s3326_s19 + $0x5b0] ss:$8 sps:$4 sm:$0xff]   ;;  %v3044_v62 = vld [vmem:[%s3326_s19 + $0x1c4] ss:$8 sps:$4 sm:$0xff]  }
  0x49   : > { %2174 = vmatprep.subr.bf16.mxu0 %v2960_v63  ;;  %v3047_v63 = vld [vmem:[%s3326_s19 + $0x5c4] ss:$8 sps:$4 sm:$0xff]  }
  0x4b   : > { %2003 = vmatpush1.bf16.msra.mxu1 %v2962_v0  ;;  %v3042_v0 = vld [vmem:[%s3326_s19 + $0x1c0] ss:$8 sps:$4 sm:$0xff]  }
  0x4c   : > { %2175 = vmatpush1.bf16.msra.mxu0 %v2963_v1  ;;  %2004 = vmatprep.subr.bf16.mxu1 %v2964_v2  ;;  %v3045_v1 = vld [vmem:[%s3326_s19 + $0x5c0] ss:$8 sps:$4 sm:$0xff]   ;;  %v3050_v2 = vld [vmem:[%s3326_s19 + $0x1d4] ss:$8 sps:$4 sm:$0xff]  }
  0x4d   : > { %2176 = vmatprep.subr.bf16.mxu0 %v2966_v3  ;;  %v3053_v3 = vld [vmem:[%s3326_s19 + $0x5d4] ss:$8 sps:$4 sm:$0xff]  }
  0x4f   : > { %2005 = vmatpush1.bf16.msra.mxu1 %v2968_v4  ;;  %v3048_v4 = vld [vmem:[%s3326_s19 + $0x1d0] ss:$8 sps:$4 sm:$0xff]  }
  0x50   : > { %2177 = vmatpush1.bf16.msra.mxu0 %v2969_v5  ;;  %2017 = vmatprep.subr.bf16.mxu1 %v2972_v6  ;;  %v3051_v5 = vld [vmem:[%s3326_s19 + $0x5d0] ss:$8 sps:$4 sm:$0xff]   ;;  %v3056_v6 = vld [vmem:[%s3326_s19 + $0x1e4] ss:$8 sps:$4 sm:$0xff]  }
  0x51   : > { %2189 = vmatprep.subr.bf16.mxu0 %v2975_v7  ;;  %v3059_v7 = vld [vmem:[%s3326_s19 + $0x5e4] ss:$8 sps:$4 sm:$0xff]  }
  0x52   : > { %2007 = vmatmul.mubr.bf16.vlgmr.msra.gmra.mrb[0].mxu1 %v2541_v8  ;;  %v3054_v8 = vld [vmem:[%s3326_s19 + $0x1e0] ss:$8 sps:$4 sm:$0xff]  }
  0x53   : > { %2179 = vmatmul.mubr.bf16.vlgmr.msra.gmra.mrb[0].mxu0 %v2549_v10  ;;  %2018 = vmatpush1.bf16.msra.mxu1 %v2970_v9  ;;  %v3057_v9 = vld [vmem:[%s3326_s19 + $0x5e0] ss:$8 sps:$4 sm:$0xff]   ;;  %v3062_v10 = vld [vmem:[%s3326_s19 + $0x1f4] ss:$8 sps:$4 sm:$0xff]  }
  0x54   : > { %2190 = vmatpush1.bf16.msra.mxu0 %v2973_v11  ;;  %2019 = vmatprep.subr.bf16.mxu1 %v2978_v12  ;;  %v3065_v11 = vld [vmem:[%s3326_s19 + $0x5f4] ss:$8 sps:$4 sm:$0xff]   ;;  %v3060_v12 = vld [vmem:[%s3326_s19 + $0x1f0] ss:$8 sps:$4 sm:$0xff]  }
  0x55   : > { %2191 = vmatprep.subr.bf16.mxu0 %v2981_v13  ;;  %2049 = vmatprep.mubr.bf16.mxu1 %v2544_v40  ;;  %v3063_v13 = vld [vmem:[%s3326_s19 + $0x5f0] ss:$8 sps:$4 sm:$0xff]   ;;  %v3090_v40 = vld [vmem:[%s3326_s19 + $0x240] ss:$8 sps:$4 sm:$0xff]  }
  0x56   : > { %2221 = vmatprep.mubr.bf16.mxu0 %v2552_v43  ;;  %v3101_v43 = vld [vmem:[%s3326_s19 + $0x654] ss:$8 sps:$4 sm:$0xff]  }
  0x57   : > { %2020 = vmatpush1.bf16.msra.mxu1 %v2976_v14  ;;  %v3068_v14 = vld [vmem:[%s3326_s19 + $0x204] ss:$8 sps:$4 sm:$0xff]  }
  0x58   : > { %2192 = vmatpush1.bf16.msra.mxu0 %v2979_v15  ;;  %2021 = vmatprep.subr.bf16.mxu1 %v2984_v16  ;;  %v3071_v15 = vld [vmem:[%s3326_s19 + $0x604] ss:$8 sps:$4 sm:$0xff]   ;;  %v2543_v16 = vcombine.low %v3431_v36, %v3434_v37  ;;  %v3084_v36 = vld [vmem:[%s3326_s19 + $0x230] ss:$8 sps:$4 sm:$0xff]  }
  0x59   : > { %2193 = vmatprep.subr.bf16.mxu0 %v2987_v17  ;;  %v3066_v17 = vld [vmem:[%s3326_s19 + $0x200] ss:$8 sps:$4 sm:$0xff]   ;;  %v3087_v37 = vld [vmem:[%s3326_s19 + $0x630] ss:$8 sps:$4 sm:$0xff]  }
  0x5b   : > { %2022 = vmatpush1.bf16.msra.mxu1 %v2982_v18  ;;  %v2551_v18 = vcombine.low %v3441_v41, %v3444_v42  ;;  %v3093_v41 = vld [vmem:[%s3326_s19 + $0x640] ss:$8 sps:$4 sm:$0xff]   ;;  %v3098_v42 = vld [vmem:[%s3326_s19 + $0x254] ss:$8 sps:$4 sm:$0xff]  }
  0x5c   : > { %2194 = vmatpush1.bf16.msra.mxu0 %v2985_v19  ;;  %2023 = vmatprep.subr.bf16.mxu1 %v2990_v20  ;;  %v3069_v19 = vld [vmem:[%s3326_s19 + $0x600] ss:$8 sps:$4 sm:$0xff]   ;;  %v3074_v20 = vld [vmem:[%s3326_s19 + $0x214] ss:$8 sps:$4 sm:$0xff]  }
  0x5d   : > { %2195 = vmatprep.subr.bf16.mxu0 %v2993_v21  ;;  %v3077_v21 = vld [vmem:[%s3326_s19 + $0x614] ss:$8 sps:$4 sm:$0xff]  }
  0x5f   : > { %2024 = vmatpush1.bf16.msra.mxu1 %v2988_v22  ;;  %v3072_v22 = vld [vmem:[%s3326_s19 + $0x210] ss:$8 sps:$4 sm:$0xff]  }
  0x60   : > { %2196 = vmatpush1.bf16.msra.mxu0 %v2991_v23  ;;  %2025 = vmatprep.subr.bf16.mxu1 %v2996_v24  ;;  %v3075_v23 = vld [vmem:[%s3326_s19 + $0x610] ss:$8 sps:$4 sm:$0xff]  }
  0x61   : > { %2197 = vmatprep.subr.bf16.mxu0 %v2999_v25  ;;  %v3495_v24 = vld [vmem:[%s3376_s23 + $0x10] sm:$0xff] }
  0x62   : > { %v3498_v25 = vld [vmem:[%s3376_s23 + $0x50] sm:$0xff] }
  0x63   : > { %2026 = vmatpush1.bf16.msra.mxu1 %v2994_v26  ;;  %v3080_v26 = vld [vmem:[%s3326_s19 + $0x224] ss:$8 sps:$4 sm:$0xff]  }
  0x64   : > { %2198 = vmatpush1.bf16.msra.mxu0 %v2997_v27  ;;  %2027 = vmatprep.subr.bf16.mxu1 %v3002_v28  ;;  %v3083_v27 = vld [vmem:[%s3326_s19 + $0x624] ss:$8 sps:$4 sm:$0xff]   ;;  %v2546_v28 = vcombine.high %v3495_v24, %v3498_v25 }
  0x65   : > { %2199 = vmatprep.subr.bf16.mxu0 %v3005_v29  ;;  %v3505_v29 = vld [vmem:[%s3376_s23 + $0x30] sm:$0xff] }
  0x67   : > { %2028 = vmatpush1.bf16.msra.mxu1 %v3000_v30  ;;  %v3508_v30 = vld [vmem:[%s3376_s23 + $0x70] sm:$0xff] }
  0x68   : > { %2200 = vmatpush1.bf16.msra.mxu0 %v3003_v31  ;;  %2029 = vmatprep.subr.bf16.mxu1 %v3008_v32  ;;  %v2554_v31 = vcombine.high %v3505_v29, %v3508_v30  ;;  %v3078_v32 = vld [vmem:[%s3326_s19 + $0x220] ss:$8 sps:$4 sm:$0xff]  }
  0x69   : > { %2201 = vmatprep.subr.bf16.mxu0 %v3011_v33  ;;  %v3081_v33 = vld [vmem:[%s3326_s19 + $0x620] ss:$8 sps:$4 sm:$0xff]  }
  0x6b   : > { %2030 = vmatpush1.bf16.msra.mxu1 %v3006_v34  ;;  %v3086_v34 = vld [vmem:[%s3326_s19 + $0x234] ss:$8 sps:$4 sm:$0xff]  }
  0x6c   : > { %2202 = vmatpush1.bf16.msra.mxu0 %v3009_v35  ;;  %2031 = vmatprep.subr.bf16.mxu1 %v3014_v38  ;;  %v3089_v35 = vld [vmem:[%s3326_s19 + $0x634] ss:$8 sps:$4 sm:$0xff]   ;;  %v3092_v38 = vld [vmem:[%s3326_s19 + $0x244] ss:$8 sps:$4 sm:$0xff]  }
  0x6d   : > { %2203 = vmatprep.subr.bf16.mxu0 %v3017_v39  ;;  %v3095_v39 = vld [vmem:[%s3326_s19 + $0x644] ss:$8 sps:$4 sm:$0xff]  }
  0x6f   : > { %2032 = vmatpush1.bf16.msra.mxu1 %v3012_v44  ;;  %v3096_v44 = vld [vmem:[%s3326_s19 + $0x250] ss:$8 sps:$4 sm:$0xff]  }
  0x70   : > { %2204 = vmatpush1.bf16.msra.mxu0 %v3015_v45  ;;  %2033 = vmatprep.subr.bf16.mxu1 %v3020_v46  ;;  %v3099_v45 = vld [vmem:[%s3326_s19 + $0x650] ss:$8 sps:$4 sm:$0xff]   ;;  %v3104_v46 = vld [vmem:[%s3326_s19 + $0x264] ss:$8 sps:$4 sm:$0xff]  }
  0x71   : > { %2205 = vmatprep.subr.bf16.mxu0 %v3023_v47  ;;  %v3107_v47 = vld [vmem:[%s3326_s19 + $0x664] ss:$8 sps:$4 sm:$0xff]  }
  0x73   : > { %2034 = vmatpush1.bf16.msra.mxu1 %v3018_v48  ;;  %v3102_v48 = vld [vmem:[%s3326_s19 + $0x260] ss:$8 sps:$4 sm:$0xff]  }
  0x74   : > { %2206 = vmatpush1.bf16.msra.mxu0 %v3021_v49  ;;  %2035 = vmatprep.subr.bf16.mxu1 %v3026_v50  ;;  %v3105_v49 = vld [vmem:[%s3326_s19 + $0x660] ss:$8 sps:$4 sm:$0xff]   ;;  %v3110_v50 = vld [vmem:[%s3326_s19 + $0x274] ss:$8 sps:$4 sm:$0xff]  }
  0x75   : > { %2207 = vmatprep.subr.bf16.mxu0 %v3029_v51  ;;  %v3113_v51 = vld [vmem:[%s3326_s19 + $0x674] ss:$8 sps:$4 sm:$0xff]  }
  0x77   : > { %2036 = vmatpush1.bf16.msra.mxu1 %v3024_v52  ;;  %v3108_v52 = vld [vmem:[%s3326_s19 + $0x270] ss:$8 sps:$4 sm:$0xff]  }
  0x78   : > { %2208 = vmatpush1.bf16.msra.mxu0 %v3027_v53  ;;  %2037 = vmatprep.subr.bf16.mxu1 %v3032_v54  ;;  %v3111_v53 = vld [vmem:[%s3326_s19 + $0x670] ss:$8 sps:$4 sm:$0xff]   ;;  %v3116_v54 = vld [vmem:[%s3326_s19 + $0x284] ss:$8 sps:$4 sm:$0xff]  }
  0x79   : > { %2209 = vmatprep.subr.bf16.mxu0 %v3035_v55  ;;  %v3119_v55 = vld [vmem:[%s3326_s19 + $0x684] ss:$8 sps:$4 sm:$0xff]  }
  0x7b   : > { %2038 = vmatpush1.bf16.msra.mxu1 %v3030_v56  ;;  %v3114_v56 = vld [vmem:[%s3326_s19 + $0x280] ss:$8 sps:$4 sm:$0xff]  }
  0x7c   : > { %2210 = vmatpush1.bf16.msra.mxu0 %v3033_v57  ;;  %2039 = vmatprep.subr.bf16.mxu1 %v3038_v58  ;;  %v3117_v57 = vld [vmem:[%s3326_s19 + $0x680] ss:$8 sps:$4 sm:$0xff]   ;;  %v3122_v58 = vld [vmem:[%s3326_s19 + $0x294] ss:$8 sps:$4 sm:$0xff]  }
  0x7d   : > { %2211 = vmatprep.subr.bf16.mxu0 %v3041_v59  ;;  %v3125_v59 = vld [vmem:[%s3326_s19 + $0x694] ss:$8 sps:$4 sm:$0xff]  }
  0x7f   : > { %2040 = vmatpush1.bf16.msra.mxu1 %v3036_v60  ;;  %v3120_v60 = vld [vmem:[%s3326_s19 + $0x290] ss:$8 sps:$4 sm:$0xff]  }
  0x80   : > { %2212 = vmatpush1.bf16.msra.mxu0 %v3039_v61  ;;  %2041 = vmatprep.subr.bf16.mxu1 %v3044_v62  ;;  %v3123_v61 = vld [vmem:[%s3326_s19 + $0x690] ss:$8 sps:$4 sm:$0xff]   ;;  %v3128_v62 = vld [vmem:[%s3326_s19 + $0x2a4] ss:$8 sps:$4 sm:$0xff]  }
  0x81   : > { %2213 = vmatprep.subr.bf16.mxu0 %v3047_v63  ;;  %v3131_v63 = vld [vmem:[%s3326_s19 + $0x6a4] ss:$8 sps:$4 sm:$0xff]  }
  0x83   : > { %2042 = vmatpush1.bf16.msra.mxu1 %v3042_v0  ;;  %v3126_v0 = vld [vmem:[%s3326_s19 + $0x2a0] ss:$8 sps:$4 sm:$0xff]  }
  0x84   : > { %2214 = vmatpush1.bf16.msra.mxu0 %v3045_v1  ;;  %2043 = vmatprep.subr.bf16.mxu1 %v3050_v2  ;;  %v3129_v1 = vld [vmem:[%s3326_s19 + $0x6a0] ss:$8 sps:$4 sm:$0xff]   ;;  %v3134_v2 = vld [vmem:[%s3326_s19 + $0x2b4] ss:$8 sps:$4 sm:$0xff]  }
  0x85   : > { %2215 = vmatprep.subr.bf16.mxu0 %v3053_v3  ;;  %v3137_v3 = vld [vmem:[%s3326_s19 + $0x6b4] ss:$8 sps:$4 sm:$0xff]  }
  0x87   : > { %2044 = vmatpush1.bf16.msra.mxu1 %v3048_v4  ;;  %v3132_v4 = vld [vmem:[%s3326_s19 + $0x2b0] ss:$8 sps:$4 sm:$0xff]  }
  0x88   : > { %2216 = vmatpush1.bf16.msra.mxu0 %v3051_v5  ;;  %2045 = vmatprep.subr.bf16.mxu1 %v3056_v6  ;;  %v3135_v5 = vld [vmem:[%s3326_s19 + $0x6b0] ss:$8 sps:$4 sm:$0xff]   ;;  %v3140_v6 = vld [vmem:[%s3326_s19 + $0x2c4] ss:$8 sps:$4 sm:$0xff]  }
  0x89   : > { %2217 = vmatprep.subr.bf16.mxu0 %v3059_v7  ;;  %v3143_v7 = vld [vmem:[%s3326_s19 + $0x6c4] ss:$8 sps:$4 sm:$0xff]  }
  0x8b   : > { %2046 = vmatpush1.bf16.msra.mxu1 %v3054_v8  ;;  %v3138_v8 = vld [vmem:[%s3326_s19 + $0x2c0] ss:$8 sps:$4 sm:$0xff]  }
  0x8c   : > { %2218 = vmatpush1.bf16.msra.mxu0 %v3057_v9  ;;  %2047 = vmatprep.subr.bf16.mxu1 %v3062_v10  ;;  %v3141_v9 = vld [vmem:[%s3326_s19 + $0x6c0] ss:$8 sps:$4 sm:$0xff]   ;;  %v3146_v10 = vld [vmem:[%s3326_s19 + $0x2d4] ss:$8 sps:$4 sm:$0xff]  }
  0x8d   : > { %2219 = vmatprep.subr.bf16.mxu0 %v3065_v11  ;;  %v3149_v11 = vld [vmem:[%s3326_s19 + $0x6d4] ss:$8 sps:$4 sm:$0xff]  }
  0x8f   : > { %2048 = vmatpush1.bf16.msra.mxu1 %v3060_v12  ;;  %v3144_v12 = vld [vmem:[%s3326_s19 + $0x2d0] ss:$8 sps:$4 sm:$0xff]  }
  0x90   : > { %2220 = vmatpush1.bf16.msra.mxu0 %v3063_v13  ;;  %2060 = vmatprep.subr.bf16.mxu1 %v3068_v14  ;;  %v3147_v13 = vld [vmem:[%s3326_s19 + $0x6d0] ss:$8 sps:$4 sm:$0xff]   ;;  %v3152_v14 = vld [vmem:[%s3326_s19 + $0x2e4] ss:$8 sps:$4 sm:$0xff]  }
  0x91   : > { %2232 = vmatprep.subr.bf16.mxu0 %v3071_v15  ;;  %v3155_v15 = vld [vmem:[%s3326_s19 + $0x6e4] ss:$8 sps:$4 sm:$0xff]  }
  0x92   : > { %2050 = vmatmul.mubr.bf16.vlgmr.msra.gmra.mrb[0].mxu1 %v2543_v16  ;;  %v3150_v16 = vld [vmem:[%s3326_s19 + $0x2e0] ss:$8 sps:$4 sm:$0xff]  }
  0x93   : > { %2222 = vmatmul.mubr.bf16.vlgmr.msra.gmra.mrb[0].mxu0 %v2551_v18  ;;  %2061 = vmatpush1.bf16.msra.mxu1 %v3066_v17  ;;  %v3153_v17 = vld [vmem:[%s3326_s19 + $0x6e0] ss:$8 sps:$4 sm:$0xff]   ;;  %v3158_v18 = vld [vmem:[%s3326_s19 + $0x2f4] ss:$8 sps:$4 sm:$0xff]  }
  0x94   : > { %2233 = vmatpush1.bf16.msra.mxu0 %v3069_v19  ;;  %2062 = vmatprep.subr.bf16.mxu1 %v3074_v20  ;;  %v3161_v19 = vld [vmem:[%s3326_s19 + $0x6f4] ss:$8 sps:$4 sm:$0xff]   ;;  %v3156_v20 = vld [vmem:[%s3326_s19 + $0x2f0] ss:$8 sps:$4 sm:$0xff]  }
  0x95   : > { %2234 = vmatprep.subr.bf16.mxu0 %v3077_v21  ;;  %2092 = vmatprep.mubr.bf16.mxu1 %v2546_v28  ;;  %v3159_v21 = vld [vmem:[%s3326_s19 + $0x6f0] ss:$8 sps:$4 sm:$0xff]   ;;  %v2553_v28 = vcombine.low %v3505_v29, %v3508_v30 }
  0x96   : > { %2264 = vmatprep.mubr.bf16.mxu0 %v2554_v31  ;;  %v3576_v31 = vld [vmem:[%s3376_s23 + $0x58] sm:$0xff] }
  0x97   : > { %2063 = vmatpush1.bf16.msra.mxu1 %v3072_v22  ;;  %v3164_v22 = vld [vmem:[%s3326_s19 + $0x304] ss:$8 sps:$4 sm:$0xff]  }
  0x98   : > { %2235 = vmatpush1.bf16.msra.mxu0 %v3075_v23  ;;  %2064 = vmatprep.subr.bf16.mxu1 %v3080_v26  ;;  %v3167_v23 = vld [vmem:[%s3326_s19 + $0x704] ss:$8 sps:$4 sm:$0xff]   ;;  %v3569_v26 = vld [vmem:[%s3376_s23 + $0x18] sm:$0xff] }
  0x99   : > { %2236 = vmatprep.subr.bf16.mxu0 %v3083_v27  ;;  %v2545_v27 = vcombine.low %v3495_v24, %v3498_v25  ;;  %v3170_v24 = vld [vmem:[%s3326_s19 + $0x314] ss:$8 sps:$4 sm:$0xff]   ;;  %v2548_v29 = vcombine.high %v3569_v26, %v3576_v31 }
  0x9a   : > { %v3173_v25 = vld [vmem:[%s3326_s19 + $0x714] ss:$8 sps:$4 sm:$0xff]  }
  0x9b   : > { %2065 = vmatpush1.bf16.msra.mxu1 %v3078_v32  ;;  %v3579_v32 = vld [vmem:[%s3376_s23 + $0x38] sm:$0xff] }
  0x9c   : > { %2237 = vmatpush1.bf16.msra.mxu0 %v3081_v33  ;;  %2066 = vmatprep.subr.bf16.mxu1 %v3086_v34  ;;  %v3582_v33 = vld [vmem:[%s3376_s23 + $0x78] sm:$0xff]  ;;  %v3162_v34 = vld [vmem:[%s3326_s19 + $0x300] ss:$8 sps:$4 sm:$0xff]  }
  0x9d   : > { %2238 = vmatprep.subr.bf16.mxu0 %v3089_v35  ;;  %v3165_v35 = vld [vmem:[%s3326_s19 + $0x700] ss:$8 sps:$4 sm:$0xff]   ;;  %v2556_v30 = vcombine.high %v3579_v32, %v3582_v33 }
  0x9f   : > { %2067 = vmatpush1.bf16.msra.mxu1 %v3084_v36  ;;  %v3168_v36 = vld [vmem:[%s3326_s19 + $0x310] ss:$8 sps:$4 sm:$0xff]  }
  0xa0   : > { %2239 = vmatpush1.bf16.msra.mxu0 %v3087_v37  ;;  %2068 = vmatprep.subr.bf16.mxu1 %v3092_v38  ;;  %v3171_v37 = vld [vmem:[%s3326_s19 + $0x710] ss:$8 sps:$4 sm:$0xff]   ;;  %v3176_v38 = vld [vmem:[%s3326_s19 + $0x324] ss:$8 sps:$4 sm:$0xff]  }
  0xa1   : > { %2240 = vmatprep.subr.bf16.mxu0 %v3095_v39  ;;  %v3179_v39 = vld [vmem:[%s3326_s19 + $0x724] ss:$8 sps:$4 sm:$0xff]  }
  0xa3   : > { %2069 = vmatpush1.bf16.msra.mxu1 %v3090_v40  ;;  %v3174_v40 = vld [vmem:[%s3326_s19 + $0x320] ss:$8 sps:$4 sm:$0xff]  }
  0xa4   : > { %2241 = vmatpush1.bf16.msra.mxu0 %v3093_v41  ;;  %2070 = vmatprep.subr.bf16.mxu1 %v3098_v42  ;;  %v3177_v41 = vld [vmem:[%s3326_s19 + $0x720] ss:$8 sps:$4 sm:$0xff]   ;;  %v3182_v42 = vld [vmem:[%s3326_s19 + $0x334] ss:$8 sps:$4 sm:$0xff]  }
  0xa5   : > { %2242 = vmatprep.subr.bf16.mxu0 %v3101_v43  ;;  %v3185_v43 = vld [vmem:[%s3326_s19 + $0x734] ss:$8 sps:$4 sm:$0xff]  }
  0xa7   : > { %2071 = vmatpush1.bf16.msra.mxu1 %v3096_v44  ;;  %v3180_v44 = vld [vmem:[%s3326_s19 + $0x330] ss:$8 sps:$4 sm:$0xff]  }
  0xa8   : > { %2243 = vmatpush1.bf16.msra.mxu0 %v3099_v45  ;;  %2072 = vmatprep.subr.bf16.mxu1 %v3104_v46  ;;  %v3183_v45 = vld [vmem:[%s3326_s19 + $0x730] ss:$8 sps:$4 sm:$0xff]   ;;  %v3188_v46 = vld [vmem:[%s3326_s19 + $0x344] ss:$8 sps:$4 sm:$0xff]  }
  0xa9   : > { %2244 = vmatprep.subr.bf16.mxu0 %v3107_v47  ;;  %v3191_v47 = vld [vmem:[%s3326_s19 + $0x744] ss:$8 sps:$4 sm:$0xff]  }
  0xab   : > { %2073 = vmatpush1.bf16.msra.mxu1 %v3102_v48  ;;  %v3186_v48 = vld [vmem:[%s3326_s19 + $0x340] ss:$8 sps:$4 sm:$0xff]  }
  0xac   : > { %2245 = vmatpush1.bf16.msra.mxu0 %v3105_v49  ;;  %2074 = vmatprep.subr.bf16.mxu1 %v3110_v50  ;;  %v3189_v49 = vld [vmem:[%s3326_s19 + $0x740] ss:$8 sps:$4 sm:$0xff]   ;;  %v3194_v50 = vld [vmem:[%s3326_s19 + $0x354] ss:$8 sps:$4 sm:$0xff]  }
  0xad   : > { %2246 = vmatprep.subr.bf16.mxu0 %v3113_v51  ;;  %v3197_v51 = vld [vmem:[%s3326_s19 + $0x754] ss:$8 sps:$4 sm:$0xff]  }
  0xaf   : > { %2075 = vmatpush1.bf16.msra.mxu1 %v3108_v52  ;;  %v3192_v52 = vld [vmem:[%s3326_s19 + $0x350] ss:$8 sps:$4 sm:$0xff]  }
  0xb0   : > { %2247 = vmatpush1.bf16.msra.mxu0 %v3111_v53  ;;  %2076 = vmatprep.subr.bf16.mxu1 %v3116_v54  ;;  %v3195_v53 = vld [vmem:[%s3326_s19 + $0x750] ss:$8 sps:$4 sm:$0xff]   ;;  %v3200_v54 = vld [vmem:[%s3326_s19 + $0x364] ss:$8 sps:$4 sm:$0xff]  }
  0xb1   : > { %2248 = vmatprep.subr.bf16.mxu0 %v3119_v55  ;;  %v3203_v55 = vld [vmem:[%s3326_s19 + $0x764] ss:$8 sps:$4 sm:$0xff]  }
  0xb3   : > { %2077 = vmatpush1.bf16.msra.mxu1 %v3114_v56  ;;  %v3198_v56 = vld [vmem:[%s3326_s19 + $0x360] ss:$8 sps:$4 sm:$0xff]  }
  0xb4   : > { %2249 = vmatpush1.bf16.msra.mxu0 %v3117_v57  ;;  %2078 = vmatprep.subr.bf16.mxu1 %v3122_v58  ;;  %v3201_v57 = vld [vmem:[%s3326_s19 + $0x760] ss:$8 sps:$4 sm:$0xff]   ;;  %v3206_v58 = vld [vmem:[%s3326_s19 + $0x374] ss:$8 sps:$4 sm:$0xff]  }
  0xb5   : > { %2250 = vmatprep.subr.bf16.mxu0 %v3125_v59  ;;  %v3209_v59 = vld [vmem:[%s3326_s19 + $0x774] ss:$8 sps:$4 sm:$0xff]  }
  0xb7   : > { %2079 = vmatpush1.bf16.msra.mxu1 %v3120_v60  ;;  %v3204_v60 = vld [vmem:[%s3326_s19 + $0x370] ss:$8 sps:$4 sm:$0xff]  }
  0xb8   : > { %2251 = vmatpush1.bf16.msra.mxu0 %v3123_v61  ;;  %2080 = vmatprep.subr.bf16.mxu1 %v3128_v62  ;;  %v3207_v61 = vld [vmem:[%s3326_s19 + $0x770] ss:$8 sps:$4 sm:$0xff]   ;;  %v3212_v62 = vld [vmem:[%s3326_s19 + $0x384] ss:$8 sps:$4 sm:$0xff]  }
  0xb9   : > { %2252 = vmatprep.subr.bf16.mxu0 %v3131_v63  ;;  %v3215_v63 = vld [vmem:[%s3326_s19 + $0x784] ss:$8 sps:$4 sm:$0xff]  }
  0xbb   : > { %2081 = vmatpush1.bf16.msra.mxu1 %v3126_v0  ;;  %v3210_v0 = vld [vmem:[%s3326_s19 + $0x380] ss:$8 sps:$4 sm:$0xff]  }
  0xbc   : > { %2253 = vmatpush1.bf16.msra.mxu0 %v3129_v1  ;;  %2082 = vmatprep.subr.bf16.mxu1 %v3134_v2  ;;  %v3213_v1 = vld [vmem:[%s3326_s19 + $0x780] ss:$8 sps:$4 sm:$0xff]   ;;  %v3218_v2 = vld [vmem:[%s3326_s19 + $0x394] ss:$8 sps:$4 sm:$0xff]  }
  0xbd   : > { %2254 = vmatprep.subr.bf16.mxu0 %v3137_v3  ;;  %v3221_v3 = vld [vmem:[%s3326_s19 + $0x794] ss:$8 sps:$4 sm:$0xff]  }
  0xbf   : > { %2083 = vmatpush1.bf16.msra.mxu1 %v3132_v4  ;;  %v3216_v4 = vld [vmem:[%s3326_s19 + $0x390] ss:$8 sps:$4 sm:$0xff]  }
  0xc0   : > { %2255 = vmatpush1.bf16.msra.mxu0 %v3135_v5  ;;  %2084 = vmatprep.subr.bf16.mxu1 %v3140_v6  ;;  %v3219_v5 = vld [vmem:[%s3326_s19 + $0x790] ss:$8 sps:$4 sm:$0xff]   ;;  %v3224_v6 = vld [vmem:[%s3326_s19 + $0x3a4] ss:$8 sps:$4 sm:$0xff]  }
  0xc1   : > { %2256 = vmatprep.subr.bf16.mxu0 %v3143_v7  ;;  %v3227_v7 = vld [vmem:[%s3326_s19 + $0x7a4] ss:$8 sps:$4 sm:$0xff]  }
  0xc3   : > { %2085 = vmatpush1.bf16.msra.mxu1 %v3138_v8  ;;  %v3222_v8 = vld [vmem:[%s3326_s19 + $0x3a0] ss:$8 sps:$4 sm:$0xff]  }
  0xc4   : > { %2257 = vmatpush1.bf16.msra.mxu0 %v3141_v9  ;;  %2086 = vmatprep.subr.bf16.mxu1 %v3146_v10  ;;  %v3225_v9 = vld [vmem:[%s3326_s19 + $0x7a0] ss:$8 sps:$4 sm:$0xff]   ;;  %v3230_v10 = vld [vmem:[%s3326_s19 + $0x3b4] ss:$8 sps:$4 sm:$0xff]  }
  0xc5   : > { %2258 = vmatprep.subr.bf16.mxu0 %v3149_v11  ;;  %v3233_v11 = vld [vmem:[%s3326_s19 + $0x7b4] ss:$8 sps:$4 sm:$0xff]  }
  0xc7   : > { %2087 = vmatpush1.bf16.msra.mxu1 %v3144_v12  ;;  %v3228_v12 = vld [vmem:[%s3326_s19 + $0x3b0] ss:$8 sps:$4 sm:$0xff]  }
  0xc8   : > { %2259 = vmatpush1.bf16.msra.mxu0 %v3147_v13  ;;  %2088 = vmatprep.subr.bf16.mxu1 %v3152_v14  ;;  %v3231_v13 = vld [vmem:[%s3326_s19 + $0x7b0] ss:$8 sps:$4 sm:$0xff]   ;;  %v3236_v14 = vld [vmem:[%s3326_s19 + $0x3c4] ss:$8 sps:$4 sm:$0xff]  }
  0xc9   : > { %2260 = vmatprep.subr.bf16.mxu0 %v3155_v15  ;;  %v3239_v15 = vld [vmem:[%s3326_s19 + $0x7c4] ss:$8 sps:$4 sm:$0xff]  }
  0xcb   : > { %2089 = vmatpush1.bf16.msra.mxu1 %v3150_v16  ;;  %v3234_v16 = vld [vmem:[%s3326_s19 + $0x3c0] ss:$8 sps:$4 sm:$0xff]  }
  0xcc   : > { %2261 = vmatpush1.bf16.msra.mxu0 %v3153_v17  ;;  %2090 = vmatprep.subr.bf16.mxu1 %v3158_v18  ;;  %v3237_v17 = vld [vmem:[%s3326_s19 + $0x7c0] ss:$8 sps:$4 sm:$0xff]   ;;  %v3242_v18 = vld [vmem:[%s3326_s19 + $0x3d4] ss:$8 sps:$4 sm:$0xff]  }
  0xcd   : > { %2262 = vmatprep.subr.bf16.mxu0 %v3161_v19  ;;  %v3245_v19 = vld [vmem:[%s3326_s19 + $0x7d4] ss:$8 sps:$4 sm:$0xff]  }
  0xcf   : > { %2091 = vmatpush1.bf16.msra.mxu1 %v3156_v20  ;;  %v3240_v20 = vld [vmem:[%s3326_s19 + $0x3d0] ss:$8 sps:$4 sm:$0xff]  }
  0xd0   : > { %2263 = vmatpush1.bf16.msra.mxu0 %v3159_v21  ;;  %2103 = vmatprep.subr.bf16.mxu1 %v3164_v22  ;;  %v3243_v21 = vld [vmem:[%s3326_s19 + $0x7d0] ss:$8 sps:$4 sm:$0xff]   ;;  %v3248_v22 = vld [vmem:[%s3326_s19 + $0x3e4] ss:$8 sps:$4 sm:$0xff]  }
  0xd1   : > { %2275 = vmatprep.subr.bf16.mxu0 %v3167_v23  ;;  %v3251_v23 = vld [vmem:[%s3326_s19 + $0x7e4] ss:$8 sps:$4 sm:$0xff]  }
  0xd2   : > { %2093 = vmatmul.mubr.bf16.vlgmr.msra.gmra.mrb[0].mxu1 %v2545_v27  ;;  %v3246_v27 = vld [vmem:[%s3326_s19 + $0x3e0] ss:$8 sps:$4 sm:$0xff]  }
  0xd3   : > { %2265 = vmatmul.mubr.bf16.vlgmr.msra.gmra.mrb[0].mxu0 %v2553_v28  ;;  %2104 = vmatpush1.bf16.msra.mxu1 %v3162_v34  ;;  %v3249_v28 = vld [vmem:[%s3326_s19 + $0x7e0] ss:$8 sps:$4 sm:$0xff]   ;;  %v3254_v34 = vld [vmem:[%s3326_s19 + $0x3f4] ss:$8 sps:$4 sm:$0xff]  }
  0xd4   : > { %2276 = vmatpush1.bf16.msra.mxu0 %v3165_v35  ;;  %2105 = vmatprep.subr.bf16.mxu1 %v3170_v24  ;;  %v3257_v35 = vld [vmem:[%s3326_s19 + $0x7f4] ss:$8 sps:$4 sm:$0xff]   ;;  %v3252_v24 = vld [vmem:[%s3326_s19 + $0x3f0] ss:$8 sps:$4 sm:$0xff]  }
  0xd5   : > { %2277 = vmatprep.subr.bf16.mxu0 %v3173_v25  ;;  %2135 = vmatprep.mubr.bf16.mxu1 %v2548_v29  ;;  %v3255_v25 = vld [vmem:[%s3326_s19 + $0x7f0] ss:$8 sps:$4 sm:$0xff]   ;;  %v2547_v29 = vcombine.low %v3569_v26, %v3576_v31 }
  0xd6   : > { %2307 = vmatprep.mubr.bf16.mxu0 %v2556_v30  ;;  %v2555_v30 = vcombine.low %v3579_v32, %v3582_v33 }
  0xd7   : > { %2106 = vmatpush1.bf16.msra.mxu1 %v3168_v36  ;;  %v2335_v36 = vlaneseq }
  0xd8   : > { %2278 = vmatpush1.bf16.msra.mxu0 %v3171_v37  ;;  %2107 = vmatprep.subr.bf16.mxu1 %v3176_v38 }
  0xd9   : > { %2279 = vmatprep.subr.bf16.mxu0 %v3179_v39  ;;  %v2336_v37 = vshrl.u32 %v2335_v36, 7  ;;  %v2333_v39 = vld [vmem:[%s3672_s2] sm:$0x3] }
  0xdb   : > { %2108 = vmatpush1.bf16.msra.mxu1 %v3174_v40  ;;  %v2337_v38 = vsub.s32 0, %v2336_v37  ;;  %v2341_v40 = vsub.s32 1, %v2336_v37 }
  0xdc   : > { %2280 = vmatpush1.bf16.msra.mxu0 %v3177_v41  ;;  %2109 = vmatprep.subr.bf16.mxu1 %v3182_v42 }
  0xdd   : > { %2281 = vmatprep.subr.bf16.mxu0 %v3185_v43  ;;  %v2338_v41 = vrot.slane %v2333_v39, %v2337_v38  ;;  %v2342_v26 = vrot.slane %v2333_v39, %v2341_v40 }
  0xdf   : > { %2110 = vmatpush1.bf16.msra.mxu1 %v3180_v44 }
  0xe0   : > { %2282 = vmatpush1.bf16.msra.mxu0 %v3183_v45  ;;  %2111 = vmatprep.subr.bf16.mxu1 %v3188_v46 }
  0xe1   : > { %2283 = vmatprep.subr.bf16.mxu0 %v3191_v47 }
  0xe3   : > { %2112 = vmatpush1.bf16.msra.mxu1 %v3186_v48 }
  0xe4   : > { %2284 = vmatpush1.bf16.msra.mxu0 %v3189_v49  ;;  %2113 = vmatprep.subr.bf16.mxu1 %v3194_v50 }
  0xe5   : > { %2285 = vmatprep.subr.bf16.mxu0 %v3197_v51 }
  0xe7   : > { %2114 = vmatpush1.bf16.msra.mxu1 %v3192_v52 }
  0xe8   : > { %2286 = vmatpush1.bf16.msra.mxu0 %v3195_v53  ;;  %2115 = vmatprep.subr.bf16.mxu1 %v3200_v54 }
  0xe9   : > { %2287 = vmatprep.subr.bf16.mxu0 %v3203_v55 }
  0xeb   : > { %2116 = vmatpush1.bf16.msra.mxu1 %v3198_v56 }
  0xec   : > { %2288 = vmatpush1.bf16.msra.mxu0 %v3201_v57  ;;  %2117 = vmatprep.subr.bf16.mxu1 %v3206_v58 }
  0xed   : > { %2289 = vmatprep.subr.bf16.mxu0 %v3209_v59 }
  0xef   : > { %2118 = vmatpush1.bf16.msra.mxu1 %v3204_v60 }
  0xf0   : > { %2290 = vmatpush1.bf16.msra.mxu0 %v3207_v61  ;;  %2119 = vmatprep.subr.bf16.mxu1 %v3212_v62 }
  0xf1   : > { %2291 = vmatprep.subr.bf16.mxu0 %v3215_v63 }
  0xf3   : > { %2120 = vmatpush1.bf16.msra.mxu1 %v3210_v0 }
  0xf4   : > { %2292 = vmatpush1.bf16.msra.mxu0 %v3213_v1  ;;  %2121 = vmatprep.subr.bf16.mxu1 %v3218_v2 }
  0xf5   : > { %2293 = vmatprep.subr.bf16.mxu0 %v3221_v3 }
  0xf7   : > { %2122 = vmatpush1.bf16.msra.mxu1 %v3216_v4 }
  0xf8   : > { %2294 = vmatpush1.bf16.msra.mxu0 %v3219_v5  ;;  %2123 = vmatprep.subr.bf16.mxu1 %v3224_v6 }
  0xf9   : > { %2295 = vmatprep.subr.bf16.mxu0 %v3227_v7 }
  0xfb   : > { %2124 = vmatpush1.bf16.msra.mxu1 %v3222_v8 }
  0xfc   : > { %2296 = vmatpush1.bf16.msra.mxu0 %v3225_v9  ;;  %2125 = vmatprep.subr.bf16.mxu1 %v3230_v10 }
  0xfd   : > { %2297 = vmatprep.subr.bf16.mxu0 %v3233_v11 }
  0xff   : > { %2126 = vmatpush1.bf16.msra.mxu1 %v3228_v12 }
 0x100   : > { %2298 = vmatpush1.bf16.msra.mxu0 %v3231_v13  ;;  %2127 = vmatprep.subr.bf16.mxu1 %v3236_v14 }
 0x101   : > { %2299 = vmatprep.subr.bf16.mxu0 %v3239_v15 }
 0x103   : > { %2128 = vmatpush1.bf16.msra.mxu1 %v3234_v16 }
 0x104   : > { %2300 = vmatpush1.bf16.msra.mxu0 %v3237_v17  ;;  %2129 = vmatprep.subr.bf16.mxu1 %v3242_v18 }
 0x105   : > { %2301 = vmatprep.subr.bf16.mxu0 %v3245_v19 }
 0x107   : > { %2130 = vmatpush1.bf16.msra.mxu1 %v3240_v20 }
 0x108   : > { %2302 = vmatpush1.bf16.msra.mxu0 %v3243_v21  ;;  %2131 = vmatprep.subr.bf16.mxu1 %v3248_v22 }
 0x109   : > { %2303 = vmatprep.subr.bf16.mxu0 %v3251_v23 }
 0x10b   : > { %2132 = vmatpush1.bf16.msra.mxu1 %v3246_v27 }
 0x10c   : > { %2304 = vmatpush1.bf16.msra.mxu0 %v3249_v28  ;;  %2133 = vmatprep.subr.bf16.mxu1 %v3254_v34 }
 0x10d   : > { %2305 = vmatprep.subr.bf16.mxu0 %v3257_v35 }
 0x10f   : > { %2134 = vmatpush1.bf16.msra.mxu1 %v3252_v24 }
 0x110   : > { %2306 = vmatpush1.bf16.msra.mxu0 %v3255_v25 }
 0x112   : > { %2136 = vmatmul.mubr.bf16.vlgmr.msra.gmra.mrb[0].mxu1 %v2547_v29 }
 0x113   : > { %2308 = vmatmul.mubr.bf16.vlgmr.msra.gmra.mrb[0].mxu0 %v2555_v30 }
 0x1e5   : > { %v2137_v42 = vpop.f32.mrb[0].mxu1 }
 0x1e6   : > { %v2309_v43 = vpop.f32.mrb[0].mxu0  ;;  %v2139_v44 = vpop.f32.mrb[1].mxu1 }
 0x1e7   : > { %v2822_v31 = vadd.f32 %v2309_v43, %v2137_v42  ;;  %v2311_v32 = vpop.f32.mrb[1].mxu0  ;;  %v2141_v45 = vpop.f32.mrb[2].mxu1 }
 0x1e8   : > { %v2823_v33 = vadd.f32 %v2311_v32, %v2139_v44  ;;  %v2313_v46 = vpop.f32.mrb[2].mxu0  ;;  %v2143_v49 = vpop.f32.mrb[3].mxu1 }
 0x1e9   : > { %v2345_v47 = vadd.f32 %v2822_v31, %v2338_v41  ;;  %v2824_v48 = vadd.f32 %v2313_v46, %v2141_v45  ;;  %v2315_v50 = vpop.f32.mrb[3].mxu0 }
 0x1ea   : > { %v2346_v51 = vadd.f32 %v2823_v33, %v2342_v26  ;;  %v2825_v52 = vadd.f32 %v2315_v50, %v2143_v49 }
 0x1eb   : > { %vm2349_vm0 = vcmp.ge.f32.partialorder %v2345_v47, 0.0  ;;  %v2353_v53 = vmul.f32 0.2, %v2345_v47  ;;  %v2347_v54 = vadd.f32 %v2824_v48, %v2338_v41 }
 0x1ec   : > { %vm2350_vm1 = vcmp.ge.f32.partialorder %v2346_v51, 0.0  ;;  %v2354_v55 = vmul.f32 0.2, %v2346_v51  ;;  %v2348_v56 = vadd.f32 %v2825_v52, %v2342_v26 }
 0x1ed   : > { %v2357_v57 = vsel %vm2349_vm0, %v2345_v47, %v2353_v53  ;;  %vm2351_vm2 = vcmp.ge.f32.partialorder %v2347_v54, 0.0  ;;  %v2355_v58 = vmul.f32 0.2, %v2347_v54 }
 0x1ee   : > { %v2358_v59 = vsel %vm2350_vm1, %v2346_v51, %v2354_v55  ;;  %vm2352_vm3 = vcmp.ge.f32.partialorder %v2348_v56, 0.0  ;;  %v2356_v60 = vmul.f32 0.2, %v2348_v56 }
 0x1ef   : > { %v2820_v61 = vpack.c.bf16 %v2358_v59, %v2357_v57  ;;  %v2359_v62 = vsel %vm2351_vm2, %v2347_v54, %v2355_v58 }
 0x1f0   : > { %v2360_v63 = vsel %vm2352_vm3, %v2348_v56, %v2356_v60 }
 0x1f1   : > { %2373 = vst [vmem:[%s327_s29] sm:$0xff] %v2820_v61  ;;  %v2821_v0 = vpack.c.bf16 %v2360_v63, %v2359_v62 }
 0x1f3   : > { %2374 = vst [vmem:[%s327_s29 + $0x8] sm:$0xff] %v2821_v0 }
 0x1f4 PF: > { %s13_s14 = sadd.s32 1, %s3280_s14   ;;  %s3674_s12 = smov %s3276_s13 }
 0x1f5   : > { %p10_p5 = scmp.ge.s32.totalorder %s13_s14, 10   ;;  %s3675_s13 = smov %s3677_s15 }
 0x1f7   :  { %12 = sbr.rel (!%p10_p5) target bundleno = 2 (0x2), region = 76 }

// kernel: autoencoder_cov3d_mem_forward.16
= control target key start
LH: loop header
LB: loop body
LE: loop exit
PB: predicated region body
PF: predicated region fallthrough
CT: control target
= control target key end

     0   :  { %s4322_s12 = smov 0   ;;  %s4324_s13 = smov 0   ;;  %s4801_s0 = inlined_call_operand.vmem [shape: bf16[8,128,2048], index: 0, kind: input, shape index: {}]   ;;  %s4802_s1 = inlined_call_operand.vmem [shape: bf16[8,2048,128], index: 1, kind: input, shape index: {}]   ;;  %s4803_s2 = inlined_call_operand.vmem [shape: f32[1,128], index: 2, kind: input, shape index: {}]   ;;  %s4804_s3 = inlined_call_operand.vmem [shape: bf16[8,128,128], index: 3, kind: output, shape index: {}]  }
   0x1   :  { %s4326_s14 = smov 0  }
   0x2 LB: > { %s39_s15 = sadd.s32 1, %s4296_s13  ;;  %p3266_p0 = scmp.ge.s32.totalorder %s4300_s14, 1  ;;  %s4300_s14 = sphi %s4326_s14, %s13_s14   ;;  %s4296_s13 = sphi %s4324_s13, %s4806_s13   ;;  %s4292_s12 = sphi %s4322_s12, %s4805_s12  }
   0x3   : > { %p41_p1 = scmp.ge.s32.totalorder %s39_s15, 8  ;;  %p212_p2 = scmp.lt.s32.totalorder %s4300_s14, 9 }
   0x5   : > { %s4808_s15 = smov (%p41_p1, %s39_s15), 0  ;;  %p213_p3 = pnand %p3266_p0, %p212_p2 }
   0x6   : > { %p269_p4 = scmp.lt.s32.totalorder (!%p213_p3), %s4292_s12, 7 }
   0x7   : > { %216 = sbr.rel (%p213_p3) target bundleno = 528 (0x210), region = 32 }
   0xe   : > { %s4810_s12 = smov (!%p269_p4, %s4292_s12), 7 }
   0xf   : > { %s3548_s16 = sshll.u32 %s4810_s12, 10  ;;  %s3550_s25 = sshll.u32 %s4810_s12, 6 }
  0x10   : > { %s4348_s19 = scalar_lea.vmem %s4802_s1, %s3548_s16  ;;  %s4385_s22 = scalar_lea.vmem %s4801_s0, %s3548_s16 }
  0x11   : > { %v4150_v0 = vld [vmem:[%s4348_s19 + $0x40] sm:$0xff]   ;;  %v4154_v4 = vld [vmem:[%s4348_s19 + $0x48] sm:$0xff]   ;;  %v4158_v8 = vld [vmem:[%s4348_s19 + $0x50] sm:$0xff]   ;;  %s4755_s28 = scalar_lea.vmem %s4804_s3, %s3550_s25 }
  0x12   : > { %v4151_v1 = vld [vmem:[%s4348_s19 + $0xc0] sm:$0xff]   ;;  %3614 = vmatprep.subr.bf16.mxu0 %v4150_v0  ;;  %v4155_v5 = vld [vmem:[%s4348_s19 + $0xc8] sm:$0xff]   ;;  %v4159_v9 = vld [vmem:[%s4348_s19 + $0xd0] sm:$0xff]  }
  0x13   : > { %v4152_v2 = vld [vmem:[%s4348_s19] sm:$0xff]   ;;  %3678 = vmatprep.subr.bf16.mxu1 %v4151_v1  ;;  %v4156_v6 = vld [vmem:[%s4348_s19 + $0x8] sm:$0xff]   ;;  %v4160_v10 = vld [vmem:[%s4348_s19 + $0x10] sm:$0xff]  }
  0x14   : > { %v4153_v3 = vld [vmem:[%s4348_s19 + $0x80] sm:$0xff]   ;;  %3615 = vmatpush3.bf16.msra.mxu0 %v4152_v2  ;;  %v4157_v7 = vld [vmem:[%s4348_s19 + $0x88] sm:$0xff]   ;;  %v4161_v11 = vld [vmem:[%s4348_s19 + $0x90] sm:$0xff]  }
  0x15   : > { %3679 = vmatpush3.bf16.msra.mxu1 %v4153_v3  ;;  %3616 = vmatprep.subr.bf16.mxu0 %v4154_v4  ;;  %v4162_v12 = vld [vmem:[%s4348_s19 + $0x58] sm:$0xff]   ;;  %v4166_v16 = vld [vmem:[%s4348_s19 + $0x60] sm:$0xff]   ;;  %v4170_v20 = vld [vmem:[%s4348_s19 + $0x68] sm:$0xff]  }
  0x16   : > { %3680 = vmatprep.subr.bf16.mxu1 %v4155_v5  ;;  %v4163_v13 = vld [vmem:[%s4348_s19 + $0xd8] sm:$0xff]   ;;  %v4167_v17 = vld [vmem:[%s4348_s19 + $0xe0] sm:$0xff]   ;;  %v4171_v21 = vld [vmem:[%s4348_s19 + $0xe8] sm:$0xff]  }
  0x17   : > { %v4164_v14 = vld [vmem:[%s4348_s19 + $0x18] sm:$0xff]   ;;  %v4168_v18 = vld [vmem:[%s4348_s19 + $0x20] sm:$0xff]   ;;  %v4172_v22 = vld [vmem:[%s4348_s19 + $0x28] sm:$0xff]  }
  0x18   : > { %3617 = vmatpush3.bf16.msra.mxu0 %v4156_v6  ;;  %v4165_v15 = vld [vmem:[%s4348_s19 + $0x98] sm:$0xff]   ;;  %v4169_v19 = vld [vmem:[%s4348_s19 + $0xa0] sm:$0xff]   ;;  %v4173_v23 = vld [vmem:[%s4348_s19 + $0xa8] sm:$0xff]  }
  0x19   : > { %3681 = vmatpush3.bf16.msra.mxu1 %v4157_v7  ;;  %3618 = vmatprep.subr.bf16.mxu0 %v4158_v8  ;;  %v4174_v24 = vld [vmem:[%s4348_s19 + $0x70] sm:$0xff]   ;;  %v4178_v28 = vld [vmem:[%s4348_s19 + $0x78] sm:$0xff]   ;;  %v349_v32 = vld [vmem:[%s4385_s22] sm:$0xff] }
  0x1a   : > { %3682 = vmatprep.subr.bf16.mxu1 %v4159_v9  ;;  %v4175_v25 = vld [vmem:[%s4348_s19 + $0xf0] sm:$0xff]   ;;  %v4179_v29 = vld [vmem:[%s4348_s19 + $0xf8] sm:$0xff]   ;;  %v357_v33 = vld [vmem:[%s4385_s22 + $0x40] sm:$0xff] }
  0x1b   : > { %v4176_v26 = vld [vmem:[%s4348_s19 + $0x30] sm:$0xff]   ;;  %v4180_v30 = vld [vmem:[%s4348_s19 + $0x38] sm:$0xff]   ;;  %v350_v34 = vld [vmem:[%s4385_s22 + $0x8] sm:$0xff]  ;;  %v3273_v35 = vcombine.low %v349_v32, %v357_v33  ;;  %v3274_v36 = vcombine.high %v349_v32, %v357_v33 }
  0x1c   : > { %3619 = vmatpush3.bf16.msra.mxu0 %v4160_v10  ;;  %v4177_v27 = vld [vmem:[%s4348_s19 + $0xb0] sm:$0xff]   ;;  %v4181_v31 = vld [vmem:[%s4348_s19 + $0xb8] sm:$0xff]   ;;  %v358_v37 = vld [vmem:[%s4385_s22 + $0x48] sm:$0xff] }
  0x1d   : > { %3683 = vmatpush3.bf16.msra.mxu1 %v4161_v11  ;;  %3620 = vmatprep.subr.bf16.mxu0 %v4162_v12  ;;  %v3275_v38 = vcombine.low %v350_v34, %v358_v37  ;;  %v3276_v39 = vcombine.high %v350_v34, %v358_v37  ;;  %v4182_v40 = vld [vmem:[%s4348_s19 + $0x140] sm:$0xff]   ;;  %v366_v47 = vld [vmem:[%s4385_s22 + $0x88] sm:$0xff]  ;;  %v4190_v62 = vld [vmem:[%s4348_s19 + $0x150] sm:$0xff]  }
  0x1e   : > { %3684 = vmatprep.subr.bf16.mxu1 %v4163_v13  ;;  %2173 = vmatprep.mubr.bf16.mxu0 %v3274_v36  ;;  %v4183_v41 = vld [vmem:[%s4348_s19 + $0x100] sm:$0xff]   ;;  %v374_v48 = vld [vmem:[%s4385_s22 + $0xc8] sm:$0xff]  ;;  %v4191_v63 = vld [vmem:[%s4348_s19 + $0x110] sm:$0xff]  }
  0x1f   : > { %2270 = vmatprep.mubr.bf16.mxu1 %v3276_v39  ;;  %v4184_v42 = vld [vmem:[%s4348_s19 + $0x1c0] sm:$0xff]   ;;  %v3292_v49 = vcombine.high %v366_v47, %v374_v48  ;;  %v4186_v50 = vld [vmem:[%s4348_s19 + $0x148] sm:$0xff]   ;;  %v3291_v53 = vcombine.low %v366_v47, %v374_v48  ;;  %v4192_v0 = vld [vmem:[%s4348_s19 + $0x1d0] sm:$0xff]  }
  0x20   : > { %3621 = vmatpush3.bf16.msra.mxu0 %v4164_v14  ;;  %v4185_v43 = vld [vmem:[%s4348_s19 + $0x180] sm:$0xff]   ;;  %v4187_v52 = vld [vmem:[%s4348_s19 + $0x108] sm:$0xff]   ;;  %v4193_v1 = vld [vmem:[%s4348_s19 + $0x190] sm:$0xff]  }
  0x21   : > { %3685 = vmatpush3.bf16.msra.mxu1 %v4165_v15  ;;  %3622 = vmatprep.subr.bf16.mxu0 %v4166_v16  ;;  %v365_v44 = vld [vmem:[%s4385_s22 + $0x80] sm:$0xff]  ;;  %v4188_v54 = vld [vmem:[%s4348_s19 + $0x1c8] sm:$0xff]   ;;  %v4194_v10 = vld [vmem:[%s4348_s19 + $0x158] sm:$0xff]  }
  0x22   : > { %3686 = vmatprep.subr.bf16.mxu1 %v4167_v17  ;;  %v373_v45 = vld [vmem:[%s4385_s22 + $0xc0] sm:$0xff]  ;;  %v4189_v55 = vld [vmem:[%s4348_s19 + $0x188] sm:$0xff]   ;;  %v4195_v11 = vld [vmem:[%s4348_s19 + $0x118] sm:$0xff]  }
  0x23   : > { %v3290_v46 = vcombine.high %v365_v44, %v373_v45  ;;  %v3289_v51 = vcombine.low %v365_v44, %v373_v45  ;;  %v381_v56 = vld [vmem:[%s4385_s22 + $0x100] sm:$0xff]  ;;  %v382_v58 = vld [vmem:[%s4385_s22 + $0x108] sm:$0xff]  ;;  %v4196_v12 = vld [vmem:[%s4348_s19 + $0x1d8] sm:$0xff]  }
  0x24   : > { %3623 = vmatpush3.bf16.msra.mxu0 %v4168_v18  ;;  %v389_v57 = vld [vmem:[%s4385_s22 + $0x140] sm:$0xff]  ;;  %v390_v59 = vld [vmem:[%s4385_s22 + $0x148] sm:$0xff]  ;;  %v4197_v13 = vld [vmem:[%s4348_s19 + $0x198] sm:$0xff]  }
  0x25   : > { %3687 = vmatpush3.bf16.msra.mxu1 %v4169_v19  ;;  %3624 = vmatprep.subr.bf16.mxu0 %v4170_v20  ;;  %v3306_v60 = vcombine.high %v381_v56, %v389_v57  ;;  %v3308_v61 = vcombine.high %v382_v58, %v390_v59  ;;  %v3305_v2 = vcombine.low %v381_v56, %v389_v57  ;;  %v397_v3 = vld [vmem:[%s4385_s22 + $0x180] sm:$0xff]  ;;  %v398_v5 = vld [vmem:[%s4385_s22 + $0x188] sm:$0xff]  ;;  %v4207_v39 = vld [vmem:[%s4348_s19 + $0x130] sm:$0xff]  }
  0x26   : > { %3688 = vmatprep.subr.bf16.mxu1 %v4171_v21  ;;  %v405_v4 = vld [vmem:[%s4385_s22 + $0x1c0] sm:$0xff]  ;;  %v3307_v6 = vcombine.low %v382_v58, %v390_v59  ;;  %v406_v8 = vld [vmem:[%s4385_s22 + $0x1c8] sm:$0xff]  ;;  %v4211_v48 = vld [vmem:[%s4348_s19 + $0x138] sm:$0xff]  }
  0x27   : > { %v3322_v7 = vcombine.high %v397_v3, %v405_v4  ;;  %v3324_v9 = vcombine.high %v398_v5, %v406_v8  ;;  %v413_v14 = vld [vmem:[%s4385_s22 + $0x200] sm:$0xff]  ;;  %v414_v16 = vld [vmem:[%s4385_s22 + $0x208] sm:$0xff]  ;;  %v3321_v19 = vcombine.low %v397_v3, %v405_v4  ;;  %v3323_v21 = vcombine.low %v398_v5, %v406_v8  ;;  %v360_v3 = vld [vmem:[%s4385_s22 + $0x58] sm:$0xff] }
  0x28   : > { %3625 = vmatpush3.bf16.msra.mxu0 %v4172_v22  ;;  %v421_v15 = vld [vmem:[%s4385_s22 + $0x240] sm:$0xff]  ;;  %v422_v17 = vld [vmem:[%s4385_s22 + $0x248] sm:$0xff]  ;;  %v367_v8 = vld [vmem:[%s4385_s22 + $0x90] sm:$0xff] }
  0x29   : > { %3689 = vmatpush3.bf16.msra.mxu1 %v4173_v23  ;;  %3626 = vmatprep.subr.bf16.mxu0 %v4174_v24  ;;  %v4198_v18 = vld [vmem:[%s4348_s19 + $0x160] sm:$0xff]   ;;  %v3338_v22 = vcombine.high %v413_v14, %v421_v15  ;;  %v3340_v24 = vcombine.high %v414_v16, %v422_v17  ;;  %v4204_v32 = vld [vmem:[%s4348_s19 + $0x1e8] sm:$0xff]   ;;  %v3337_v34 = vcombine.low %v413_v14, %v421_v15 }
  0x2a   : > { %3690 = vmatprep.subr.bf16.mxu1 %v4175_v25  ;;  %v4199_v20 = vld [vmem:[%s4348_s19 + $0x120] sm:$0xff]   ;;  %v4205_v33 = vld [vmem:[%s4348_s19 + $0x1a8] sm:$0xff]  }
  0x2b   : > { %v4200_v23 = vld [vmem:[%s4348_s19 + $0x1e0] sm:$0xff]   ;;  %v446_v44 = vld [vmem:[%s4385_s22 + $0x308] sm:$0xff] }
  0x2c   : > { %3627 = vmatpush3.bf16.msra.mxu0 %v4176_v26  ;;  %v4201_v25 = vld [vmem:[%s4348_s19 + $0x1a0] sm:$0xff]   ;;  %v454_v45 = vld [vmem:[%s4385_s22 + $0x348] sm:$0xff] }
  0x2d   : > { %3691 = vmatpush3.bf16.msra.mxu1 %v4177_v27  ;;  %3628 = vmatprep.subr.bf16.mxu0 %v4178_v28  ;;  %v429_v26 = vld [vmem:[%s4385_s22 + $0x280] sm:$0xff]  ;;  %v4202_v28 = vld [vmem:[%s4348_s19 + $0x168] sm:$0xff]  }
  0x2e   : > { %3692 = vmatprep.subr.bf16.mxu1 %v4179_v29  ;;  %v437_v27 = vld [vmem:[%s4385_s22 + $0x2c0] sm:$0xff]  ;;  %v430_v29 = vld [vmem:[%s4385_s22 + $0x288] sm:$0xff] }
  0x2f   : > { %v3354_v36 = vcombine.high %v429_v26, %v437_v27  ;;  %v3353_v47 = vcombine.low %v429_v26, %v437_v27  ;;  %v4214_v56 = vld [vmem:[%s4348_s19 + $0x240] sm:$0xff]   ;;  %v462_v57 = vld [vmem:[%s4385_s22 + $0x388] sm:$0xff]  ;;  %v4222_v26 = vld [vmem:[%s4348_s19 + $0x250] sm:$0xff]  }
  0x30   : > { %3629 = vmatpush3.bf16.msra.mxu0 %v4180_v30  ;;  %v438_v30 = vld [vmem:[%s4385_s22 + $0x2c8] sm:$0xff]  ;;  %v4216_v58 = vld [vmem:[%s4348_s19 + $0x2c0] sm:$0xff]   ;;  %v4224_v27 = vld [vmem:[%s4348_s19 + $0x2d0] sm:$0xff]  }
  0x31   : > { %3693 = vmatpush3.bf16.msra.mxu1 %v4181_v31  ;;  %3742 = vmatprep.subr.bf16.mxu0 %v4182_v40  ;;  %v4203_v31 = vld [vmem:[%s4348_s19 + $0x128] sm:$0xff]   ;;  %v3356_v37 = vcombine.high %v430_v29, %v438_v30  ;;  %v4208_v40 = vld [vmem:[%s4348_s19 + $0x1f0] sm:$0xff]   ;;  %v4217_v15 = vld [vmem:[%s4348_s19 + $0x280] sm:$0xff]  }
  0x32   : > { %3806 = vmatprep.subr.bf16.mxu1 %v4184_v42  ;;  %v453_v42 = vld [vmem:[%s4385_s22 + $0x340] sm:$0xff]  ;;  %v470_v59 = vld [vmem:[%s4385_s22 + $0x3c8] sm:$0xff] }
  0x33   : > { %2174 = vmatmul.mubr.bf16.vlgmr.msra.gmra.mrb[0].mxu0 %v3273_v35  ;;  %v3339_v35 = vcombine.low %v414_v16, %v422_v17  ;;  %v3387_v5 = vcombine.low %v462_v57, %v470_v59  ;;  %v4218_v17 = vld [vmem:[%s4348_s19 + $0x248] sm:$0xff]  }
  0x34   : > { %2271 = vmatmul.mubr.bf16.vlgmr.msra.gmra.mrb[0].mxu1 %v3275_v38  ;;  %3743 = vmatpush3.bf16.msra.mxu0 %v4183_v41  ;;  %v4206_v38 = vld [vmem:[%s4348_s19 + $0x170] sm:$0xff]   ;;  %v445_v41 = vld [vmem:[%s4385_s22 + $0x300] sm:$0xff] }
  0x35   : > { %3807 = vmatpush3.bf16.msra.mxu1 %v4185_v43  ;;  %2181 = vmatprep.mubr.bf16.mxu0 %v3290_v46  ;;  %v4209_v43 = vld [vmem:[%s4348_s19 + $0x1b0] sm:$0xff]   ;;  %v4210_v46 = vld [vmem:[%s4348_s19 + $0x178] sm:$0xff]  }
  0x36   : > { %2278 = vmatprep.mubr.bf16.mxu1 %v3292_v49  ;;  %3744 = vmatprep.subr.bf16.mxu0 %v4186_v50  ;;  %v3355_v49 = vcombine.low %v430_v29, %v438_v30  ;;  %v3370_v50 = vcombine.high %v445_v41, %v453_v42 }
  0x37   : > { %3808 = vmatprep.subr.bf16.mxu1 %v4188_v54  ;;  %v461_v54 = vld [vmem:[%s4385_s22 + $0x380] sm:$0xff] }
  0x38   : > { %3745 = vmatpush3.bf16.msra.mxu0 %v4187_v52  ;;  %v3372_v52 = vcombine.high %v446_v44, %v454_v45 }
  0x39   : > { %3809 = vmatpush3.bf16.msra.mxu1 %v4189_v55  ;;  %3746 = vmatprep.subr.bf16.mxu0 %v4190_v62  ;;  %v469_v55 = vld [vmem:[%s4385_s22 + $0x3c0] sm:$0xff] }
  0x3a   : > { %3810 = vmatprep.subr.bf16.mxu1 %v4192_v0  ;;  %v3386_v62 = vcombine.high %v461_v54, %v469_v55  ;;  %v351_v0 = vld [vmem:[%s4385_s22 + $0x10] sm:$0xff]  ;;  %v3385_v4 = vcombine.low %v461_v54, %v469_v55  ;;  %v416_v54 = vld [vmem:[%s4385_s22 + $0x218] sm:$0xff] }
  0x3b   : > { %2182 = vmatmul.mubr.bf16.gmra.mrb[4].mxu0 %v3289_v51  ;;  %v4212_v51 = vld [vmem:[%s4348_s19 + $0x1f8] sm:$0xff]  }
  0x3c   : > { %2279 = vmatmul.mubr.bf16.gmra.mrb[4].mxu1 %v3291_v53  ;;  %2189 = vmatprep.mubr.bf16.mxu0 %v3306_v60  ;;  %v4213_v53 = vld [vmem:[%s4348_s19 + $0x1b8] sm:$0xff]   ;;  %v3369_v60 = vcombine.low %v445_v41, %v453_v42  ;;  %v4230_v42 = vld [vmem:[%s4348_s19 + $0x260] sm:$0xff]  }
  0x3d   : > { %2286 = vmatprep.mubr.bf16.mxu1 %v3308_v61  ;;  %3747 = vmatpush3.bf16.msra.mxu0 %v4191_v63  ;;  %v3371_v61 = vcombine.low %v446_v44, %v454_v45  ;;  %v3388_v63 = vcombine.high %v462_v57, %v470_v59  ;;  %v4229_v41 = vld [vmem:[%s4348_s19 + $0x298] sm:$0xff]   ;;  %v4232_v44 = vld [vmem:[%s4348_s19 + $0x2e0] sm:$0xff]   ;;  %v4237_v57 = vld [vmem:[%s4348_s19 + $0x2a8] sm:$0xff]  }
  0x3e   : > { %3811 = vmatpush3.bf16.msra.mxu1 %v4193_v1  ;;  %3748 = vmatprep.subr.bf16.mxu0 %v4194_v10  ;;  %v359_v1 = vld [vmem:[%s4385_s22 + $0x50] sm:$0xff]  ;;  %v424_v55 = vld [vmem:[%s4385_s22 + $0x258] sm:$0xff] }
  0x3f   : > { %3812 = vmatprep.subr.bf16.mxu1 %v4196_v12  ;;  %v3277_v10 = vcombine.low %v351_v0, %v359_v1  ;;  %v368_v12 = vld [vmem:[%s4385_s22 + $0x98] sm:$0xff] }
  0x41   : > { %3749 = vmatpush3.bf16.msra.mxu0 %v4195_v11  ;;  %v4215_v11 = vld [vmem:[%s4348_s19 + $0x200] sm:$0xff]  }
  0x42   : > { %3813 = vmatpush3.bf16.msra.mxu1 %v4197_v13  ;;  %3750 = vmatprep.subr.bf16.mxu0 %v4198_v18  ;;  %v376_v13 = vld [vmem:[%s4385_s22 + $0xd8] sm:$0xff] }
  0x43   : > { %2190 = vmatmul.mubr.bf16.gmra.mrb[8].mxu0 %v3305_v2  ;;  %3814 = vmatprep.subr.bf16.mxu1 %v4200_v23  ;;  %v352_v2 = vld [vmem:[%s4385_s22 + $0x18] sm:$0xff]  ;;  %v3296_v18 = vcombine.high %v368_v12, %v376_v13  ;;  %v391_v23 = vld [vmem:[%s4385_s22 + $0x150] sm:$0xff]  ;;  %v3295_v29 = vcombine.low %v368_v12, %v376_v13  ;;  %v4248_v12 = vld [vmem:[%s4348_s19 + $0x3c0] sm:$0xff]   ;;  %v3343_v13 = vcombine.low %v416_v54, %v424_v55 }
  0x44   : > { %2287 = vmatmul.mubr.bf16.gmra.mrb[8].mxu1 %v3307_v6  ;;  %2197 = vmatprep.mubr.bf16.mxu0 %v3322_v7  ;;  %v3278_v6 = vcombine.high %v351_v0, %v359_v1  ;;  %v3280_v7 = vcombine.high %v352_v2, %v360_v3  ;;  %v3279_v14 = vcombine.low %v352_v2, %v360_v3  ;;  %v4239_v0 = vld [vmem:[%s4348_s19 + $0x230] sm:$0xff]   ;;  %v4242_v2 = vld [vmem:[%s4348_s19 + $0x278] sm:$0xff]  }
  0x45   : > { %2294 = vmatprep.mubr.bf16.mxu1 %v3324_v9  ;;  %3751 = vmatpush3.bf16.msra.mxu0 %v4199_v20  ;;  %v375_v9 = vld [vmem:[%s4385_s22 + $0xd0] sm:$0xff]  ;;  %v4220_v20 = vld [vmem:[%s4348_s19 + $0x2c8] sm:$0xff]  }
  0x46   : > { %3815 = vmatpush3.bf16.msra.mxu1 %v4201_v25  ;;  %3752 = vmatprep.subr.bf16.mxu0 %v4202_v28  ;;  %v3294_v16 = vcombine.high %v367_v8, %v375_v9  ;;  %v392_v25 = vld [vmem:[%s4385_s22 + $0x158] sm:$0xff]  ;;  %v3293_v28 = vcombine.low %v367_v8, %v375_v9  ;;  %v4241_v1 = vld [vmem:[%s4348_s19 + $0x2b0] sm:$0xff]  }
  0x47   : > { %3816 = vmatprep.subr.bf16.mxu1 %v4204_v32  ;;  %v4223_v32 = vld [vmem:[%s4348_s19 + $0x210] sm:$0xff]   ;;  %v4243_v8 = vld [vmem:[%s4348_s19 + $0x238] sm:$0xff]  }
  0x48   : > { %v431_v3 = vld [vmem:[%s4385_s22 + $0x290] sm:$0xff]  ;;  %v4245_v9 = vld [vmem:[%s4348_s19 + $0x2b8] sm:$0xff]  }
  0x49   : > { %3753 = vmatpush3.bf16.msra.mxu0 %v4203_v31 }
  0x4a   : > { %3817 = vmatpush3.bf16.msra.mxu1 %v4205_v33  ;;  %3754 = vmatprep.subr.bf16.mxu0 %v4206_v38  ;;  %v4225_v33 = vld [vmem:[%s4348_s19 + $0x290] sm:$0xff]   ;;  %v400_v38 = vld [vmem:[%s4385_s22 + $0x198] sm:$0xff] }
  0x4b   : > { %2198 = vmatmul.mubr.bf16.gmra.mrb[12].mxu0 %v3321_v19  ;;  %3818 = vmatprep.subr.bf16.mxu1 %v4208_v40  ;;  %v4219_v19 = vld [vmem:[%s4348_s19 + $0x208] sm:$0xff]   ;;  %v4227_v40 = vld [vmem:[%s4348_s19 + $0x218] sm:$0xff]  }
  0x4c   : > { %2295 = vmatmul.mubr.bf16.gmra.mrb[12].mxu1 %v3323_v21  ;;  %2205 = vmatprep.mubr.bf16.mxu0 %v3338_v22  ;;  %v4221_v21 = vld [vmem:[%s4348_s19 + $0x288] sm:$0xff]   ;;  %v383_v22 = vld [vmem:[%s4385_s22 + $0x110] sm:$0xff] }
  0x4d   : > { %2302 = vmatprep.mubr.bf16.mxu1 %v3340_v24  ;;  %3755 = vmatpush3.bf16.msra.mxu0 %v4207_v39  ;;  %v384_v24 = vld [vmem:[%s4385_s22 + $0x118] sm:$0xff]  ;;  %v3310_v30 = vcombine.high %v383_v22, %v391_v23 }
  0x4e   : > { %3819 = vmatpush3.bf16.msra.mxu1 %v4209_v43  ;;  %3756 = vmatprep.subr.bf16.mxu0 %v4210_v46  ;;  %v3312_v31 = vcombine.high %v384_v24, %v392_v25  ;;  %v408_v39 = vld [vmem:[%s4385_s22 + $0x1d8] sm:$0xff]  ;;  %v3309_v43 = vcombine.low %v383_v22, %v391_v23  ;;  %v3311_v45 = vcombine.low %v384_v24, %v392_v25  ;;  %v463_v24 = vld [vmem:[%s4385_s22 + $0x390] sm:$0xff] }
  0x4f   : > { %3820 = vmatprep.subr.bf16.mxu1 %v4212_v51  ;;  %v415_v51 = vld [vmem:[%s4385_s22 + $0x210] sm:$0xff] }
  0x50   : > { %v471_v25 = vld [vmem:[%s4385_s22 + $0x3d0] sm:$0xff] }
  0x51   : > { %3757 = vmatpush3.bf16.msra.mxu0 %v4211_v48  ;;  %v3328_v48 = vcombine.high %v400_v38, %v408_v39 }
  0x52   : > { %3821 = vmatpush3.bf16.msra.mxu1 %v4213_v53  ;;  %3870 = vmatprep.subr.bf16.mxu0 %v4214_v56  ;;  %v423_v53 = vld [vmem:[%s4385_s22 + $0x250] sm:$0xff]  ;;  %v4235_v56 = vld [vmem:[%s4348_s19 + $0x228] sm:$0xff]  }
  0x53   : > { %2206 = vmatmul.mubr.bf16.gmra.mrb[16].mxu0 %v3337_v34  ;;  %3934 = vmatprep.subr.bf16.mxu1 %v4216_v58  ;;  %v4226_v34 = vld [vmem:[%s4348_s19 + $0x258] sm:$0xff]   ;;  %v4238_v58 = vld [vmem:[%s4348_s19 + $0x270] sm:$0xff]  }
  0x54   : > { %2303 = vmatmul.mubr.bf16.gmra.mrb[16].mxu1 %v3339_v35  ;;  %2213 = vmatprep.mubr.bf16.mxu0 %v3354_v36  ;;  %v399_v35 = vld [vmem:[%s4385_s22 + $0x190] sm:$0xff] }
  0x55   : > { %2310 = vmatprep.mubr.bf16.mxu1 %v3356_v37  ;;  %v407_v36 = vld [vmem:[%s4385_s22 + $0x1d0] sm:$0xff]  ;;  %v4228_v37 = vld [vmem:[%s4348_s19 + $0x2d8] sm:$0xff]  }
  0x56   : > { %v3326_v46 = vcombine.high %v399_v35, %v407_v36  ;;  %v3325_v59 = vcombine.low %v399_v35, %v407_v36  ;;  %v362_v35 = vld [vmem:[%s4385_s22 + $0x68] sm:$0xff]  ;;  %v3389_v36 = vcombine.low %v463_v24, %v471_v25 }
  0x5b   : > { %2214 = vmatmul.mubr.bf16.gmra.mrb[20].mxu0 %v3353_v47  ;;  %v4231_v47 = vld [vmem:[%s4348_s19 + $0x220] sm:$0xff]  }
  0x5c   : > { %2311 = vmatmul.mubr.bf16.gmra.mrb[20].mxu1 %v3355_v49  ;;  %2221 = vmatprep.mubr.bf16.mxu0 %v3370_v50  ;;  %v4233_v49 = vld [vmem:[%s4348_s19 + $0x2a0] sm:$0xff]   ;;  %v4234_v50 = vld [vmem:[%s4348_s19 + $0x268] sm:$0xff]  }
  0x5d   : > { %2318 = vmatprep.mubr.bf16.mxu1 %v3372_v52  ;;  %v4236_v52 = vld [vmem:[%s4348_s19 + $0x2e8] sm:$0xff]  }
  0x63   : > { %2222 = vmatmul.mubr.bf16.gmra.mrb[24].mxu0 %v3369_v60  ;;  %v4240_v60 = vld [vmem:[%s4348_s19 + $0x2f0] sm:$0xff]  }
  0x64   : > { %2319 = vmatmul.mubr.bf16.gmra.mrb[24].mxu1 %v3371_v61  ;;  %2229 = vmatprep.mubr.bf16.mxu0 %v3386_v62  ;;  %v3327_v61 = vcombine.low %v400_v38, %v408_v39  ;;  %v3342_v62 = vcombine.high %v415_v51, %v423_v53 }
  0x65   : > { %2326 = vmatprep.mubr.bf16.mxu1 %v3388_v63  ;;  %v3344_v63 = vcombine.high %v416_v54, %v424_v55  ;;  %v385_v54 = vld [vmem:[%s4385_s22 + $0x120] sm:$0xff] }
  0x66   : > { %v393_v55 = vld [vmem:[%s4385_s22 + $0x160] sm:$0xff] }
  0x6b   : > { %2230 = vmatmul.mubr.bf16.gmra.mrb[28].mxu0 %v3385_v4  ;;  %v439_v4 = vld [vmem:[%s4385_s22 + $0x2d0] sm:$0xff] }
  0x6c   : > { %2327 = vmatmul.mubr.bf16.gmra.mrb[28].mxu1 %v3387_v5  ;;  %2367 = vmatprep.mubr.bf16.mxu0 %v3278_v6  ;;  %v4244_v5 = vld [vmem:[%s4348_s19 + $0x2f8] sm:$0xff]  }
  0x6d   : > { %2464 = vmatprep.mubr.bf16.mxu1 %v3280_v7  ;;  %v432_v6 = vld [vmem:[%s4385_s22 + $0x298] sm:$0xff] }
  0x6e   : > { %v440_v7 = vld [vmem:[%s4385_s22 + $0x2d8] sm:$0xff] }
  0x73   : > { %2368 = vmatmul.mubr.bf16.vlgmr.msra.gmra.mrb[32].mxu0 %v3277_v10  ;;  %v4246_v10 = vld [vmem:[%s4348_s19 + $0x340] sm:$0xff]  }
  0x74   : > { %2465 = vmatmul.mubr.bf16.vlgmr.msra.gmra.mrb[32].mxu1 %v3279_v14  ;;  %3871 = vmatpush3.bf16.msra.mxu0 %v4215_v11  ;;  %v3341_v11 = vcombine.low %v415_v51, %v423_v53  ;;  %v3358_v14 = vcombine.high %v431_v3, %v439_v4  ;;  %v4252_v51 = vld [vmem:[%s4348_s19 + $0x3c8] sm:$0xff]  }
  0x75   : > { %3935 = vmatpush3.bf16.msra.mxu1 %v4217_v15  ;;  %2375 = vmatprep.mubr.bf16.mxu0 %v3294_v16  ;;  %v3360_v15 = vcombine.high %v432_v6, %v440_v7  ;;  %v447_v16 = vld [vmem:[%s4385_s22 + $0x310] sm:$0xff]  ;;  %v4253_v53 = vld [vmem:[%s4348_s19 + $0x388] sm:$0xff]  }
  0x76   : > { %2472 = vmatprep.mubr.bf16.mxu1 %v3296_v18  ;;  %3872 = vmatprep.subr.bf16.mxu0 %v4218_v17  ;;  %v455_v17 = vld [vmem:[%s4385_s22 + $0x350] sm:$0xff]  ;;  %v448_v18 = vld [vmem:[%s4385_s22 + $0x318] sm:$0xff] }
  0x77   : > { %3936 = vmatprep.subr.bf16.mxu1 %v4220_v20  ;;  %v3357_v20 = vcombine.low %v431_v3, %v439_v4  ;;  %v3374_v22 = vcombine.high %v447_v16, %v455_v17  ;;  %v4260_v3 = vld [vmem:[%s4348_s19 + $0x3d8] sm:$0xff]   ;;  %v401_v4 = vld [vmem:[%s4385_s22 + $0x1a0] sm:$0xff] }
  0x78   : > { %3873 = vmatpush3.bf16.msra.mxu0 %v4219_v19  ;;  %v456_v19 = vld [vmem:[%s4385_s22 + $0x358] sm:$0xff] }
  0x79   : > { %3937 = vmatpush3.bf16.msra.mxu1 %v4221_v21  ;;  %3874 = vmatprep.subr.bf16.mxu0 %v4222_v26  ;;  %v3359_v21 = vcombine.low %v432_v6, %v440_v7  ;;  %v3376_v23 = vcombine.high %v448_v18, %v456_v19  ;;  %v464_v26 = vld [vmem:[%s4385_s22 + $0x398] sm:$0xff]  ;;  %v402_v6 = vld [vmem:[%s4385_s22 + $0x1a8] sm:$0xff] }
  0x7a   : > { %3938 = vmatprep.subr.bf16.mxu1 %v4224_v27  ;;  %v472_v27 = vld [vmem:[%s4385_s22 + $0x3d8] sm:$0xff] }
  0x7b   : > { %2376 = vmatmul.mubr.bf16.gmra.mrb[36].mxu0 %v3293_v28  ;;  %v3373_v28 = vcombine.low %v447_v16, %v455_v17  ;;  %v4259_v7 = vld [vmem:[%s4348_s19 + $0x318] sm:$0xff]   ;;  %v4263_v16 = vld [vmem:[%s4348_s19 + $0x320] sm:$0xff]  }
  0x7c   : > { %2473 = vmatmul.mubr.bf16.gmra.mrb[36].mxu1 %v3295_v29  ;;  %2383 = vmatprep.mubr.bf16.mxu0 %v3310_v30  ;;  %v3375_v29 = vcombine.low %v448_v18, %v456_v19  ;;  %v3390_v30 = vcombine.high %v463_v24, %v471_v25  ;;  %v4265_v17 = vld [vmem:[%s4348_s19 + $0x3a0] sm:$0xff]   ;;  %v4266_v18 = vld [vmem:[%s4348_s19 + $0x368] sm:$0xff]  }
  0x7d   : > { %2480 = vmatprep.mubr.bf16.mxu1 %v3312_v31  ;;  %3875 = vmatpush3.bf16.msra.mxu0 %v4223_v32  ;;  %v3392_v31 = vcombine.high %v464_v26, %v472_v27  ;;  %v353_v32 = vld [vmem:[%s4385_s22 + $0x20] sm:$0xff]  ;;  %v4268_v19 = vld [vmem:[%s4348_s19 + $0x3e8] sm:$0xff]  }
  0x7e   : > { %3939 = vmatpush3.bf16.msra.mxu1 %v4225_v33  ;;  %3876 = vmatprep.subr.bf16.mxu0 %v4226_v34  ;;  %v361_v33 = vld [vmem:[%s4385_s22 + $0x60] sm:$0xff]  ;;  %v354_v34 = vld [vmem:[%s4385_s22 + $0x28] sm:$0xff] }
  0x7f   : > { %3940 = vmatprep.subr.bf16.mxu1 %v4228_v37  ;;  %v3391_v37 = vcombine.low %v464_v26, %v472_v27  ;;  %v3282_v38 = vcombine.high %v353_v32, %v361_v33  ;;  %v3284_v39 = vcombine.high %v354_v34, %v362_v35  ;;  %v426_v24 = vld [vmem:[%s4385_s22 + $0x268] sm:$0xff]  ;;  %v4270_v26 = vld [vmem:[%s4348_s19 + $0x370] sm:$0xff]  }
  0x80   : > { %v4269_v25 = vld [vmem:[%s4348_s19 + $0x3a8] sm:$0xff]  }
  0x81   : > { %3877 = vmatpush3.bf16.msra.mxu0 %v4227_v40  ;;  %v369_v40 = vld [vmem:[%s4385_s22 + $0xa0] sm:$0xff] }
  0x82   : > { %3941 = vmatpush3.bf16.msra.mxu1 %v4229_v41  ;;  %3878 = vmatprep.subr.bf16.mxu0 %v4230_v42  ;;  %v377_v41 = vld [vmem:[%s4385_s22 + $0xe0] sm:$0xff]  ;;  %v3281_v42 = vcombine.low %v353_v32, %v361_v33  ;;  %v4271_v32 = vld [vmem:[%s4348_s19 + $0x330] sm:$0xff]  }
  0x83   : > { %2384 = vmatmul.mubr.bf16.gmra.mrb[40].mxu0 %v3309_v43  ;;  %3942 = vmatprep.subr.bf16.mxu1 %v4232_v44  ;;  %v370_v43 = vld [vmem:[%s4385_s22 + $0xa8] sm:$0xff]  ;;  %v4273_v33 = vld [vmem:[%s4348_s19 + $0x3b0] sm:$0xff]  }
  0x84   : > { %2481 = vmatmul.mubr.bf16.gmra.mrb[40].mxu1 %v3311_v45  ;;  %2391 = vmatprep.mubr.bf16.mxu0 %v3326_v46  ;;  %v378_v44 = vld [vmem:[%s4385_s22 + $0xe8] sm:$0xff]  ;;  %v3283_v45 = vcombine.low %v354_v34, %v362_v35  ;;  %v4247_v46 = vld [vmem:[%s4348_s19 + $0x300] sm:$0xff]   ;;  %v4274_v34 = vld [vmem:[%s4348_s19 + $0x378] sm:$0xff]  }
  0x85   : > { %2488 = vmatprep.mubr.bf16.mxu1 %v3328_v48  ;;  %3879 = vmatpush3.bf16.msra.mxu0 %v4231_v47  ;;  %v4249_v47 = vld [vmem:[%s4348_s19 + $0x380] sm:$0xff]   ;;  %v3298_v48 = vcombine.high %v369_v40, %v377_v41  ;;  %v4276_v35 = vld [vmem:[%s4348_s19 + $0x3f8] sm:$0xff]  }
  0x86   : > { %3943 = vmatpush3.bf16.msra.mxu1 %v4233_v49  ;;  %3880 = vmatprep.subr.bf16.mxu0 %v4234_v50  ;;  %v3300_v49 = vcombine.high %v370_v43, %v378_v44  ;;  %v4250_v50 = vld [vmem:[%s4348_s19 + $0x348] sm:$0xff]  }
  0x87   : > { %3944 = vmatprep.subr.bf16.mxu1 %v4236_v52  ;;  %v4251_v52 = vld [vmem:[%s4348_s19 + $0x308] sm:$0xff]  }
  0x89   : > { %3881 = vmatpush3.bf16.msra.mxu0 %v4235_v56  ;;  %v4254_v56 = vld [vmem:[%s4348_s19 + $0x350] sm:$0xff]  }
  0x8a   : > { %3945 = vmatpush3.bf16.msra.mxu1 %v4237_v57  ;;  %3882 = vmatprep.subr.bf16.mxu0 %v4238_v58  ;;  %v386_v57 = vld [vmem:[%s4385_s22 + $0x128] sm:$0xff] }
  0x8b   : > { %2392 = vmatmul.mubr.bf16.gmra.mrb[44].mxu0 %v3325_v59  ;;  %3946 = vmatprep.subr.bf16.mxu1 %v4240_v60  ;;  %v394_v58 = vld [vmem:[%s4385_s22 + $0x168] sm:$0xff]  ;;  %v4256_v59 = vld [vmem:[%s4348_s19 + $0x3d0] sm:$0xff]   ;;  %v3297_v60 = vcombine.low %v369_v40, %v377_v41  ;;  %v4277_v41 = vld [vmem:[%s4348_s19 + $0x3b8] sm:$0xff]  }
  0x8c   : > { %2489 = vmatmul.mubr.bf16.gmra.mrb[44].mxu1 %v3327_v61  ;;  %2399 = vmatprep.mubr.bf16.mxu0 %v3342_v62  ;;  %v3299_v61 = vcombine.low %v370_v43, %v378_v44  ;;  %v3314_v62 = vcombine.high %v385_v54, %v393_v55  ;;  %v442_v40 = vld [vmem:[%s4385_s22 + $0x2e8] sm:$0xff] }
  0x8d   : > { %2496 = vmatprep.mubr.bf16.mxu1 %v3344_v63  ;;  %3883 = vmatpush3.bf16.msra.mxu0 %v4239_v0  ;;  %v3316_v63 = vcombine.high %v386_v57, %v394_v58  ;;  %v4255_v0 = vld [vmem:[%s4348_s19 + $0x310] sm:$0xff]  }
  0x8e   : > { %3947 = vmatpush3.bf16.msra.mxu1 %v4241_v1  ;;  %3884 = vmatprep.subr.bf16.mxu0 %v4242_v2  ;;  %v4257_v1 = vld [vmem:[%s4348_s19 + $0x390] sm:$0xff]   ;;  %v4258_v2 = vld [vmem:[%s4348_s19 + $0x358] sm:$0xff]  }
  0x8f   : > { %3948 = vmatprep.subr.bf16.mxu1 %v4244_v5  ;;  %v409_v5 = vld [vmem:[%s4385_s22 + $0x1e0] sm:$0xff] }
  0x90   : > { %v3329_v27 = vcombine.low %v401_v4, %v409_v5 }
  0x91   : > { %3885 = vmatpush3.bf16.msra.mxu0 %v4243_v8  ;;  %v410_v8 = vld [vmem:[%s4385_s22 + $0x1e8] sm:$0xff] }
  0x92   : > { %3949 = vmatpush3.bf16.msra.mxu1 %v4245_v9  ;;  %3998 = vmatprep.subr.bf16.mxu0 %v4246_v10  ;;  %v4261_v9 = vld [vmem:[%s4348_s19 + $0x398] sm:$0xff]   ;;  %v4262_v10 = vld [vmem:[%s4348_s19 + $0x360] sm:$0xff]  }
  0x93   : > { %2400 = vmatmul.mubr.bf16.gmra.mrb[48].mxu0 %v3341_v11  ;;  %4062 = vmatprep.subr.bf16.mxu1 %v4248_v12  ;;  %v3313_v11 = vcombine.low %v385_v54, %v393_v55  ;;  %v4264_v12 = vld [vmem:[%s4348_s19 + $0x3e0] sm:$0xff]  }
  0x94   : > { %2497 = vmatmul.mubr.bf16.gmra.mrb[48].mxu1 %v3343_v13  ;;  %2407 = vmatprep.mubr.bf16.mxu0 %v3358_v14  ;;  %v3315_v13 = vcombine.low %v386_v57, %v394_v58  ;;  %v3330_v14 = vcombine.high %v401_v4, %v409_v5  ;;  %v465_v54 = vld [vmem:[%s4385_s22 + $0x3a0] sm:$0xff]  ;;  %v474_v57 = vld [vmem:[%s4385_s22 + $0x3e8] sm:$0xff] }
  0x95   : > { %2504 = vmatprep.mubr.bf16.mxu1 %v3360_v15  ;;  %v3332_v15 = vcombine.high %v402_v6, %v410_v8  ;;  %v473_v55 = vld [vmem:[%s4385_s22 + $0x3e0] sm:$0xff] }
  0x9b   : > { %2408 = vmatmul.mubr.bf16.gmra.mrb[52].mxu0 %v3357_v20  ;;  %v417_v20 = vld [vmem:[%s4385_s22 + $0x220] sm:$0xff] }
  0x9c   : > { %2505 = vmatmul.mubr.bf16.gmra.mrb[52].mxu1 %v3359_v21  ;;  %2415 = vmatprep.mubr.bf16.mxu0 %v3374_v22  ;;  %v425_v21 = vld [vmem:[%s4385_s22 + $0x260] sm:$0xff]  ;;  %v418_v22 = vld [vmem:[%s4385_s22 + $0x228] sm:$0xff] }
  0x9d   : > { %2512 = vmatprep.mubr.bf16.mxu1 %v3376_v23  ;;  %v4267_v23 = vld [vmem:[%s4348_s19 + $0x328] sm:$0xff]   ;;  %v3347_v43 = vcombine.low %v418_v22, %v426_v24 }
  0xa3   : > { %2416 = vmatmul.mubr.bf16.gmra.mrb[56].mxu0 %v3373_v28  ;;  %v4272_v28 = vld [vmem:[%s4348_s19 + $0x3f0] sm:$0xff]  }
  0xa4   : > { %2513 = vmatmul.mubr.bf16.gmra.mrb[56].mxu1 %v3375_v29  ;;  %2423 = vmatprep.mubr.bf16.mxu0 %v3390_v30  ;;  %v3331_v29 = vcombine.low %v402_v6, %v410_v8  ;;  %v3346_v30 = vcombine.high %v417_v20, %v425_v21  ;;  %v371_v6 = vld [vmem:[%s4385_s22 + $0xb0] sm:$0xff]  ;;  %v372_v8 = vld [vmem:[%s4385_s22 + $0xb8] sm:$0xff] }
  0xa5   : > { %2520 = vmatprep.mubr.bf16.mxu1 %v3392_v31  ;;  %v3348_v31 = vcombine.high %v418_v22, %v426_v24  ;;  %v403_v22 = vld [vmem:[%s4385_s22 + $0x1b0] sm:$0xff]  ;;  %v404_v24 = vld [vmem:[%s4385_s22 + $0x1b8] sm:$0xff] }
  0xab   : > { %2424 = vmatmul.mubr.bf16.gmra.mrb[60].mxu0 %v3389_v36  ;;  %v433_v36 = vld [vmem:[%s4385_s22 + $0x2a0] sm:$0xff] }
  0xac   : > { %2521 = vmatmul.mubr.bf16.gmra.mrb[60].mxu1 %v3391_v37  ;;  %2561 = vmatprep.mubr.bf16.mxu0 %v3282_v38  ;;  %v441_v37 = vld [vmem:[%s4385_s22 + $0x2e0] sm:$0xff]  ;;  %v4275_v38 = vld [vmem:[%s4348_s19 + $0x338] sm:$0xff]  }
  0xad   : > { %2658 = vmatprep.mubr.bf16.mxu1 %v3284_v39  ;;  %v434_v39 = vld [vmem:[%s4385_s22 + $0x2a8] sm:$0xff]  ;;  %v3362_v44 = vcombine.high %v433_v36, %v441_v37 }
  0xb3   : > { %2562 = vmatmul.mubr.bf16.vlgmr.msra.gmra.mrb[64].mxu0 %v3281_v42  ;;  %v3345_v42 = vcombine.low %v417_v20, %v425_v21 }
  0xb4   : > { %2659 = vmatmul.mubr.bf16.vlgmr.msra.gmra.mrb[64].mxu1 %v3283_v45  ;;  %3999 = vmatpush3.bf16.msra.mxu0 %v4247_v46  ;;  %v3364_v45 = vcombine.high %v434_v39, %v442_v40  ;;  %v449_v46 = vld [vmem:[%s4385_s22 + $0x320] sm:$0xff] }
  0xb5   : > { %4063 = vmatpush3.bf16.msra.mxu1 %v4249_v47  ;;  %2569 = vmatprep.mubr.bf16.mxu0 %v3298_v48  ;;  %v457_v47 = vld [vmem:[%s4385_s22 + $0x360] sm:$0xff]  ;;  %v450_v48 = vld [vmem:[%s4385_s22 + $0x328] sm:$0xff] }
  0xb6   : > { %2666 = vmatprep.mubr.bf16.mxu1 %v3300_v49  ;;  %4000 = vmatprep.subr.bf16.mxu0 %v4250_v50  ;;  %v458_v49 = vld [vmem:[%s4385_s22 + $0x368] sm:$0xff]  ;;  %v3361_v50 = vcombine.low %v433_v36, %v441_v37  ;;  %v3377_v58 = vcombine.low %v449_v46, %v457_v47 }
  0xb7   : > { %4064 = vmatprep.subr.bf16.mxu1 %v4252_v51  ;;  %v3363_v51 = vcombine.low %v434_v39, %v442_v40 }
  0xb8   : > { %4001 = vmatpush3.bf16.msra.mxu0 %v4251_v52  ;;  %v3378_v52 = vcombine.high %v449_v46, %v457_v47 }
  0xb9   : > { %4065 = vmatpush3.bf16.msra.mxu1 %v4253_v53  ;;  %4002 = vmatprep.subr.bf16.mxu0 %v4254_v56  ;;  %v3380_v53 = vcombine.high %v450_v48, %v458_v49  ;;  %v466_v56 = vld [vmem:[%s4385_s22 + $0x3a8] sm:$0xff] }
  0xba   : > { %4066 = vmatprep.subr.bf16.mxu1 %v4256_v59  ;;  %v3379_v59 = vcombine.low %v450_v48, %v458_v49 }
  0xbb   : > { %2570 = vmatmul.mubr.bf16.gmra.mrb[68].mxu0 %v3297_v60  ;;  %v3394_v60 = vcombine.high %v465_v54, %v473_v55 }
  0xbc   : > { %2667 = vmatmul.mubr.bf16.gmra.mrb[68].mxu1 %v3299_v61  ;;  %2577 = vmatprep.mubr.bf16.mxu0 %v3314_v62  ;;  %v3396_v61 = vcombine.high %v466_v56, %v474_v57  ;;  %v355_v62 = vld [vmem:[%s4385_s22 + $0x30] sm:$0xff] }
  0xbd   : > { %2674 = vmatprep.mubr.bf16.mxu1 %v3316_v63  ;;  %4003 = vmatpush3.bf16.msra.mxu0 %v4255_v0  ;;  %v363_v63 = vld [vmem:[%s4385_s22 + $0x70] sm:$0xff]  ;;  %v356_v0 = vld [vmem:[%s4385_s22 + $0x38] sm:$0xff] }
  0xbe   : > { %4067 = vmatpush3.bf16.msra.mxu1 %v4257_v1  ;;  %4004 = vmatprep.subr.bf16.mxu0 %v4258_v2  ;;  %v364_v1 = vld [vmem:[%s4385_s22 + $0x78] sm:$0xff]  ;;  %v3393_v2 = vcombine.low %v465_v54, %v473_v55  ;;  %v3286_v4 = vcombine.high %v355_v62, %v363_v63 }
  0xbf   : > { %4068 = vmatprep.subr.bf16.mxu1 %v4260_v3  ;;  %v3395_v3 = vcombine.low %v466_v56, %v474_v57  ;;  %v3288_v5 = vcombine.high %v356_v0, %v364_v1  ;;  %v436_v55 = vld [vmem:[%s4385_s22 + $0x2b8] sm:$0xff] }
  0xc0   : > { %v444_v56 = vld [vmem:[%s4385_s22 + $0x2f8] sm:$0xff] }
  0xc1   : > { %4005 = vmatpush3.bf16.msra.mxu0 %v4259_v7  ;;  %v379_v7 = vld [vmem:[%s4385_s22 + $0xf0] sm:$0xff] }
  0xc2   : > { %4069 = vmatpush3.bf16.msra.mxu1 %v4261_v9  ;;  %4006 = vmatprep.subr.bf16.mxu0 %v4262_v10  ;;  %v380_v9 = vld [vmem:[%s4385_s22 + $0xf8] sm:$0xff]  ;;  %v3285_v10 = vcombine.low %v355_v62, %v363_v63 }
  0xc3   : > { %2578 = vmatmul.mubr.bf16.gmra.mrb[72].mxu0 %v3313_v11  ;;  %4070 = vmatprep.subr.bf16.mxu1 %v4264_v12  ;;  %v3287_v11 = vcombine.low %v356_v0, %v364_v1  ;;  %v3302_v12 = vcombine.high %v371_v6, %v379_v7 }
  0xc4   : > { %2675 = vmatmul.mubr.bf16.gmra.mrb[72].mxu1 %v3315_v13  ;;  %2585 = vmatprep.mubr.bf16.mxu0 %v3330_v14  ;;  %v3304_v13 = vcombine.high %v372_v8, %v380_v9  ;;  %v387_v14 = vld [vmem:[%s4385_s22 + $0x130] sm:$0xff] }
  0xc5   : > { %2682 = vmatprep.mubr.bf16.mxu1 %v3332_v15  ;;  %4007 = vmatpush3.bf16.msra.mxu0 %v4263_v16  ;;  %v395_v15 = vld [vmem:[%s4385_s22 + $0x170] sm:$0xff]  ;;  %v388_v16 = vld [vmem:[%s4385_s22 + $0x138] sm:$0xff] }
  0xc6   : > { %4071 = vmatpush3.bf16.msra.mxu1 %v4265_v17  ;;  %4008 = vmatprep.subr.bf16.mxu0 %v4266_v18  ;;  %v396_v17 = vld [vmem:[%s4385_s22 + $0x178] sm:$0xff]  ;;  %v3301_v18 = vcombine.low %v371_v6, %v379_v7  ;;  %v3318_v20 = vcombine.high %v387_v14, %v395_v15 }
  0xc7   : > { %4072 = vmatprep.subr.bf16.mxu1 %v4268_v19  ;;  %v3303_v19 = vcombine.low %v372_v8, %v380_v9  ;;  %v3320_v21 = vcombine.high %v388_v16, %v396_v17 }
  0xc9   : > { %4009 = vmatpush3.bf16.msra.mxu0 %v4267_v23  ;;  %v411_v23 = vld [vmem:[%s4385_s22 + $0x1f0] sm:$0xff] }
  0xca   : > { %4073 = vmatpush3.bf16.msra.mxu1 %v4269_v25  ;;  %4010 = vmatprep.subr.bf16.mxu0 %v4270_v26  ;;  %v412_v25 = vld [vmem:[%s4385_s22 + $0x1f8] sm:$0xff]  ;;  %v3317_v26 = vcombine.low %v387_v14, %v395_v15  ;;  %v3333_v37 = vcombine.low %v403_v22, %v411_v23 }
  0xcb   : > { %2586 = vmatmul.mubr.bf16.gmra.mrb[76].mxu0 %v3329_v27  ;;  %4074 = vmatprep.subr.bf16.mxu1 %v4272_v28  ;;  %v3319_v27 = vcombine.low %v388_v16, %v396_v17  ;;  %v3334_v28 = vcombine.high %v403_v22, %v411_v23  ;;  %v460_v14 = vld [vmem:[%s4385_s22 + $0x378] sm:$0xff] }
  0xcc   : > { %2683 = vmatmul.mubr.bf16.gmra.mrb[76].mxu1 %v3331_v29  ;;  %2593 = vmatprep.mubr.bf16.mxu0 %v3346_v30  ;;  %v3336_v29 = vcombine.high %v404_v24, %v412_v25  ;;  %v419_v30 = vld [vmem:[%s4385_s22 + $0x230] sm:$0xff] }
  0xcd   : > { %2690 = vmatprep.mubr.bf16.mxu1 %v3348_v31  ;;  %4011 = vmatpush3.bf16.msra.mxu0 %v4271_v32  ;;  %v427_v31 = vld [vmem:[%s4385_s22 + $0x270] sm:$0xff] }
  0xce   : > { %4075 = vmatpush3.bf16.msra.mxu1 %v4273_v33  ;;  %4012 = vmatprep.subr.bf16.mxu0 %v4274_v34  ;;  %v420_v33 = vld [vmem:[%s4385_s22 + $0x238] sm:$0xff] }
  0xcf   : > { %4076 = vmatprep.subr.bf16.mxu1 %v4276_v35  ;;  %v428_v34 = vld [vmem:[%s4385_s22 + $0x278] sm:$0xff] }
  0xd0   : > { %v3352_v46 = vcombine.high %v420_v33, %v428_v34  ;;  %v3351_v63 = vcombine.low %v420_v33, %v428_v34  ;;  %v475_v33 = vld [vmem:[%s4385_s22 + $0x3f0] sm:$0xff] }
  0xd1   : > { %4013 = vmatpush3.bf16.msra.mxu0 %v4275_v38 }
  0xd2   : > { %4077 = vmatpush3.bf16.msra.mxu1 %v4277_v41  ;;  %v3335_v41 = vcombine.low %v404_v24, %v412_v25 }
  0xd3   : > { %2594 = vmatmul.mubr.bf16.gmra.mrb[80].mxu0 %v3345_v42  ;;  %v3350_v42 = vcombine.high %v419_v30, %v427_v31 }
  0xd4   : > { %2691 = vmatmul.mubr.bf16.gmra.mrb[80].mxu1 %v3347_v43  ;;  %2601 = vmatprep.mubr.bf16.mxu0 %v3362_v44 }
  0xd5   : > { %2698 = vmatprep.mubr.bf16.mxu1 %v3364_v45 }
  0xdb   : > { %2602 = vmatmul.mubr.bf16.gmra.mrb[84].mxu0 %v3361_v50 }
  0xdc   : > { %2699 = vmatmul.mubr.bf16.gmra.mrb[84].mxu1 %v3363_v51  ;;  %2609 = vmatprep.mubr.bf16.mxu0 %v3378_v52  ;;  %v435_v52 = vld [vmem:[%s4385_s22 + $0x2b0] sm:$0xff] }
  0xdd   : > { %2706 = vmatprep.mubr.bf16.mxu1 %v3380_v53  ;;  %v443_v53 = vld [vmem:[%s4385_s22 + $0x2f0] sm:$0xff] }
  0xde   : > { %v3366_v0 = vcombine.high %v435_v52, %v443_v53  ;;  %v3365_v17 = vcombine.low %v435_v52, %v443_v53 }
  0xe3   : > { %2610 = vmatmul.mubr.bf16.gmra.mrb[88].mxu0 %v3377_v58 }
  0xe4   : > { %2707 = vmatmul.mubr.bf16.gmra.mrb[88].mxu1 %v3379_v59  ;;  %2617 = vmatprep.mubr.bf16.mxu0 %v3394_v60  ;;  %v3349_v59 = vcombine.low %v419_v30, %v427_v31 }
  0xe5   : > { %2714 = vmatprep.mubr.bf16.mxu1 %v3396_v61 }
  0xeb   : > { %2618 = vmatmul.mubr.bf16.gmra.mrb[92].mxu0 %v3393_v2 }
  0xec   : > { %2715 = vmatmul.mubr.bf16.gmra.mrb[92].mxu1 %v3395_v3  ;;  %2755 = vmatprep.mubr.bf16.mxu0 %v3286_v4  ;;  %v3368_v4 = vcombine.high %v436_v55, %v444_v56 }
  0xed   : > { %2852 = vmatprep.mubr.bf16.mxu1 %v3288_v5 }
  0xf3   : > { %2756 = vmatmul.mubr.bf16.vlgmr.msra.gmra.mrb[96].mxu0 %v3285_v10  ;;  %v451_v10 = vld [vmem:[%s4385_s22 + $0x330] sm:$0xff] }
  0xf4   : > { %2853 = vmatmul.mubr.bf16.vlgmr.msra.gmra.mrb[96].mxu1 %v3287_v11  ;;  %2763 = vmatprep.mubr.bf16.mxu0 %v3302_v12  ;;  %v459_v11 = vld [vmem:[%s4385_s22 + $0x370] sm:$0xff] }
  0xf5   : > { %2860 = vmatprep.mubr.bf16.mxu1 %v3304_v13  ;;  %v452_v13 = vld [vmem:[%s4385_s22 + $0x338] sm:$0xff]  ;;  %v3382_v22 = vcombine.high %v451_v10, %v459_v11 }
  0xfb   : > { %2764 = vmatmul.mubr.bf16.gmra.mrb[100].mxu0 %v3301_v18 }
  0xfc   : > { %2861 = vmatmul.mubr.bf16.gmra.mrb[100].mxu1 %v3303_v19  ;;  %2771 = vmatprep.mubr.bf16.mxu0 %v3318_v20 }
  0xfd   : > { %2868 = vmatprep.mubr.bf16.mxu1 %v3320_v21  ;;  %v3367_v21 = vcombine.low %v436_v55, %v444_v56 }
 0x103   : > { %2772 = vmatmul.mubr.bf16.gmra.mrb[104].mxu0 %v3317_v26  ;;  %v3384_v26 = vcombine.high %v452_v13, %v460_v14 }
 0x104   : > { %2869 = vmatmul.mubr.bf16.gmra.mrb[104].mxu1 %v3319_v27  ;;  %2779 = vmatprep.mubr.bf16.mxu0 %v3334_v28 }
 0x105   : > { %2876 = vmatprep.mubr.bf16.mxu1 %v3336_v29 }
 0x106   : > { %v3630_v32 = vpop.f32.mrb[0].mxu0 }
 0x107   : > { %v3694_v35 = vpop.f32.mrb[0].mxu1  ;;  %v3631_v36 = vpop.f32.mrb[1].mxu0 }
 0x108   : > { %v3632_v38 = vadd.f32 %v3631_v36, %v3630_v32  ;;  %v3695_v39 = vpop.f32.mrb[1].mxu1  ;;  %v3633_v40 = vpop.f32.mrb[2].mxu0  ;;  %v467_v32 = vld [vmem:[%s4385_s22 + $0x3b0] sm:$0xff]  ;;  %v476_v36 = vld [vmem:[%s4385_s22 + $0x3f8] sm:$0xff] }
 0x109   : > { %v3696_v43 = vadd.f32 %v3695_v39, %v3694_v35  ;;  %v3697_v44 = vpop.f32.mrb[2].mxu1  ;;  %v3634_v45 = vpop.f32.mrb[3].mxu0  ;;  %v468_v35 = vld [vmem:[%s4385_s22 + $0x3b8] sm:$0xff]  ;;  %v3381_v39 = vcombine.low %v451_v10, %v459_v11 }
 0x10a   : > { %v3635_v47 = vadd.f32 %v3634_v45, %v3633_v40  ;;  %v3698_v48 = vpop.f32.mrb[3].mxu1 }
 0x10b   : > { %v4601_v49 = vadd.f32 %v3696_v43, %v3632_v38  ;;  %v3699_v50 = vadd.f32 %v3698_v48, %v3697_v44  ;;  %2780 = vmatmul.mubr.bf16.gmra.mrb[108].mxu0 %v3333_v37  ;;  %v3383_v43 = vcombine.low %v452_v13, %v460_v14  ;;  %v3398_v44 = vcombine.high %v467_v32, %v475_v33 }
 0x10c   : > { %2877 = vmatmul.mubr.bf16.gmra.mrb[108].mxu1 %v3335_v41  ;;  %2787 = vmatprep.mubr.bf16.mxu0 %v3350_v42  ;;  %v3400_v48 = vcombine.high %v468_v35, %v476_v36 }
 0x10d   : > { %v4603_v51 = vadd.f32 %v3699_v50, %v3635_v47  ;;  %2884 = vmatprep.mubr.bf16.mxu1 %v3352_v46 }
 0x10e   : > { %v3636_v54 = vpop.f32.mrb[4].mxu0 }
 0x10f   : > { %v3700_v57 = vpop.f32.mrb[4].mxu1  ;;  %v3637_v58 = vpop.f32.mrb[5].mxu0 }
 0x110   : > { %v3638_v60 = vadd.f32 %v3637_v58, %v3636_v54  ;;  %v3701_v61 = vpop.f32.mrb[5].mxu1  ;;  %v3639_v62 = vpop.f32.mrb[6].mxu0 }
 0x111   : > { %v3702_v1 = vadd.f32 %v3701_v61, %v3700_v57  ;;  %v3703_v2 = vpop.f32.mrb[6].mxu1  ;;  %v3640_v3 = vpop.f32.mrb[7].mxu0 }
 0x112   : > { %v3641_v5 = vadd.f32 %v3640_v3, %v3639_v62  ;;  %v3704_v6 = vpop.f32.mrb[7].mxu1 }
 0x113   : > { %v4609_v7 = vadd.f32 %v3702_v1, %v3638_v60  ;;  %v3705_v8 = vadd.f32 %v3704_v6, %v3703_v2  ;;  %2788 = vmatmul.mubr.bf16.gmra.mrb[112].mxu0 %v3349_v59  ;;  %v3397_v59 = vcombine.low %v467_v32, %v475_v33 }
 0x114   : > { %2885 = vmatmul.mubr.bf16.gmra.mrb[112].mxu1 %v3351_v63  ;;  %2795 = vmatprep.mubr.bf16.mxu0 %v3366_v0  ;;  %v3399_v63 = vcombine.low %v468_v35, %v476_v36 }
 0x115   : > { %v4611_v9 = vadd.f32 %v3705_v8, %v3641_v5  ;;  %2892 = vmatprep.mubr.bf16.mxu1 %v3368_v4 }
 0x116   : > { %v3642_v12 = vpop.f32.mrb[8].mxu0 }
 0x117   : > { %v3706_v15 = vpop.f32.mrb[8].mxu1  ;;  %v3643_v16 = vpop.f32.mrb[9].mxu0 }
 0x118   : > { %v3644_v18 = vadd.f32 %v3643_v16, %v3642_v12  ;;  %v3707_v19 = vpop.f32.mrb[9].mxu1  ;;  %v3645_v20 = vpop.f32.mrb[10].mxu0 }
 0x119   : > { %v3708_v23 = vadd.f32 %v3707_v19, %v3706_v15  ;;  %v3709_v24 = vpop.f32.mrb[10].mxu1  ;;  %v3646_v25 = vpop.f32.mrb[11].mxu0 }
 0x11a   : > { %v3647_v27 = vadd.f32 %v3646_v25, %v3645_v20  ;;  %v3710_v28 = vpop.f32.mrb[11].mxu1 }
 0x11b   : > { %v4617_v29 = vadd.f32 %v3708_v23, %v3644_v18  ;;  %v3711_v30 = vadd.f32 %v3710_v28, %v3709_v24  ;;  %2796 = vmatmul.mubr.bf16.gmra.mrb[116].mxu0 %v3365_v17 }
 0x11c   : > { %2893 = vmatmul.mubr.bf16.gmra.mrb[116].mxu1 %v3367_v21  ;;  %2803 = vmatprep.mubr.bf16.mxu0 %v3382_v22 }
 0x11d   : > { %v4619_v31 = vadd.f32 %v3711_v30, %v3647_v27  ;;  %2900 = vmatprep.mubr.bf16.mxu1 %v3384_v26 }
 0x11e   : > { %v3648_v34 = vpop.f32.mrb[12].mxu0 }
 0x11f   : > { %v3712_v37 = vpop.f32.mrb[12].mxu1  ;;  %v3649_v38 = vpop.f32.mrb[13].mxu0 }
 0x120   : > { %v3650_v40 = vadd.f32 %v3649_v38, %v3648_v34  ;;  %v3713_v41 = vpop.f32.mrb[13].mxu1  ;;  %v3651_v42 = vpop.f32.mrb[14].mxu0 }
 0x121   : > { %v3714_v45 = vadd.f32 %v3713_v41, %v3712_v37  ;;  %v3715_v46 = vpop.f32.mrb[14].mxu1  ;;  %v3652_v47 = vpop.f32.mrb[15].mxu0 }
 0x122   : > { %v3653_v50 = vadd.f32 %v3652_v47, %v3651_v42  ;;  %v3716_v52 = vpop.f32.mrb[15].mxu1 }
 0x123   : > { %v4625_v53 = vadd.f32 %v3714_v45, %v3650_v40  ;;  %v3717_v54 = vadd.f32 %v3716_v52, %v3715_v46  ;;  %2804 = vmatmul.mubr.bf16.gmra.mrb[120].mxu0 %v3381_v39 }
 0x124   : > { %2901 = vmatmul.mubr.bf16.gmra.mrb[120].mxu1 %v3383_v43  ;;  %2811 = vmatprep.mubr.bf16.mxu0 %v3398_v44 }
 0x125   : > { %v4627_v55 = vadd.f32 %v3717_v54, %v3653_v50  ;;  %2908 = vmatprep.mubr.bf16.mxu1 %v3400_v48 }
 0x126   : > { %v3654_v56 = vpop.f32.mrb[16].mxu0 }
 0x127   : > { %v3718_v57 = vpop.f32.mrb[16].mxu1  ;;  %v3655_v58 = vpop.f32.mrb[17].mxu0 }
 0x128   : > { %v3656_v60 = vadd.f32 %v3655_v58, %v3654_v56  ;;  %v3719_v61 = vpop.f32.mrb[17].mxu1  ;;  %v3657_v62 = vpop.f32.mrb[18].mxu0 }
 0x129   : > { %v3720_v0 = vadd.f32 %v3719_v61, %v3718_v57  ;;  %v3721_v1 = vpop.f32.mrb[18].mxu1  ;;  %v3658_v2 = vpop.f32.mrb[19].mxu0 }
 0x12a   : > { %v3659_v3 = vadd.f32 %v3658_v2, %v3657_v62  ;;  %v3722_v4 = vpop.f32.mrb[19].mxu1 }
 0x12b   : > { %v4629_v5 = vadd.f32 %v3720_v0, %v3656_v60  ;;  %v3723_v6 = vadd.f32 %v3722_v4, %v3721_v1  ;;  %2812 = vmatmul.mubr.bf16.gmra.mrb[124].mxu0 %v3397_v59 }
 0x12c   : > { %2909 = vmatmul.mubr.bf16.gmra.mrb[124].mxu1 %v3399_v63 }
 0x12d   : > { %v4631_v8 = vadd.f32 %v3723_v6, %v3659_v3 }
 0x12e   : > { %v3660_v10 = vpop.f32.mrb[20].mxu0 }
 0x12f   : > { %v3724_v11 = vpop.f32.mrb[20].mxu1  ;;  %v3661_v12 = vpop.f32.mrb[21].mxu0 }
 0x130   : > { %v3662_v13 = vadd.f32 %v3661_v12, %v3660_v10  ;;  %v3725_v14 = vpop.f32.mrb[21].mxu1  ;;  %v3663_v15 = vpop.f32.mrb[22].mxu0 }
 0x131   : > { %v3726_v16 = vadd.f32 %v3725_v14, %v3724_v11  ;;  %v3727_v17 = vpop.f32.mrb[22].mxu1  ;;  %v3664_v18 = vpop.f32.mrb[23].mxu0 }
 0x132   : > { %v3665_v19 = vadd.f32 %v3664_v18, %v3663_v15  ;;  %v3728_v20 = vpop.f32.mrb[23].mxu1 }
 0x133   : > { %v4633_v21 = vadd.f32 %v3726_v16, %v3662_v13  ;;  %v3729_v22 = vadd.f32 %v3728_v20, %v3727_v17 }
 0x135   : > { %v4635_v23 = vadd.f32 %v3729_v22, %v3665_v19 }
 0x136   : > { %v3666_v24 = vpop.f32.mrb[24].mxu0 }
 0x137   : > { %v3730_v25 = vpop.f32.mrb[24].mxu1  ;;  %v3667_v26 = vpop.f32.mrb[25].mxu0 }
 0x138   : > { %v3668_v27 = vadd.f32 %v3667_v26, %v3666_v24  ;;  %v3731_v28 = vpop.f32.mrb[25].mxu1  ;;  %v3669_v30 = vpop.f32.mrb[26].mxu0 }
 0x139   : > { %v3732_v32 = vadd.f32 %v3731_v28, %v3730_v25  ;;  %v3733_v33 = vpop.f32.mrb[26].mxu1  ;;  %v3670_v34 = vpop.f32.mrb[27].mxu0 }
 0x13a   : > { %v3671_v35 = vadd.f32 %v3670_v34, %v3669_v30  ;;  %v3734_v36 = vpop.f32.mrb[27].mxu1 }
 0x13b   : > { %v4637_v37 = vadd.f32 %v3732_v32, %v3668_v27  ;;  %v3735_v38 = vadd.f32 %v3734_v36, %v3733_v33 }
 0x13d   : > { %v4639_v39 = vadd.f32 %v3735_v38, %v3671_v35 }
 0x13e   : > { %v3672_v40 = vpop.f32.mrb[28].mxu0 }
 0x13f   : > { %v3736_v41 = vpop.f32.mrb[28].mxu1  ;;  %v3673_v42 = vpop.f32.mrb[29].mxu0 }
 0x140   : > { %v3674_v43 = vadd.f32 %v3673_v42, %v3672_v40  ;;  %v3737_v44 = vpop.f32.mrb[29].mxu1  ;;  %v3675_v45 = vpop.f32.mrb[30].mxu0 }
 0x141   : > { %v3738_v46 = vadd.f32 %v3737_v44, %v3736_v41  ;;  %v3739_v47 = vpop.f32.mrb[30].mxu1  ;;  %v3676_v48 = vpop.f32.mrb[31].mxu0 }
 0x142   : > { %v3677_v50 = vadd.f32 %v3676_v48, %v3675_v45  ;;  %v3740_v52 = vpop.f32.mrb[31].mxu1 }
 0x143   : > { %v4641_v54 = vadd.f32 %v3738_v46, %v3674_v43  ;;  %v3741_v56 = vadd.f32 %v3740_v52, %v3739_v47 }
 0x145   : > { %v4643_v57 = vadd.f32 %v3741_v56, %v3677_v50 }
 0x146   : > { %v3758_v58 = vpop.f32.mrb[32].mxu0 }
 0x147   : > { %v3822_v59 = vpop.f32.mrb[32].mxu1  ;;  %v3759_v60 = vpop.f32.mrb[33].mxu0 }
 0x148   : > { %v3760_v61 = vadd.f32 %v3759_v60, %v3758_v58  ;;  %v3823_v62 = vpop.f32.mrb[33].mxu1  ;;  %v3761_v63 = vpop.f32.mrb[34].mxu0 }
 0x149   : > { %v3824_v0 = vadd.f32 %v3823_v62, %v3822_v59  ;;  %v3825_v1 = vpop.f32.mrb[34].mxu1  ;;  %v3762_v2 = vpop.f32.mrb[35].mxu0 }
 0x14a   : > { %v2370_v3 = vadd.f32 %v3760_v61, %v4601_v49  ;;  %v3763_v4 = vadd.f32 %v3762_v2, %v3761_v63  ;;  %v3826_v6 = vpop.f32.mrb[35].mxu1 }
 0x14b   : > { %v3827_v10 = vadd.f32 %v3826_v6, %v3825_v1 }
 0x14c   : > { %v4646_v11 = vadd.f32 %v3824_v0, %v2370_v3  ;;  %v2373_v12 = vadd.f32 %v3763_v4, %v4603_v51 }
 0x14e   : > { %v4649_v13 = vadd.f32 %v3827_v10, %v2373_v12  ;;  %v3764_v14 = vpop.f32.mrb[36].mxu0 }
 0x14f   : > { %v3828_v15 = vpop.f32.mrb[36].mxu1  ;;  %v3765_v16 = vpop.f32.mrb[37].mxu0 }
 0x150   : > { %v3766_v17 = vadd.f32 %v3765_v16, %v3764_v14  ;;  %v3829_v18 = vpop.f32.mrb[37].mxu1  ;;  %v3767_v19 = vpop.f32.mrb[38].mxu0 }
 0x151   : > { %v3830_v20 = vadd.f32 %v3829_v18, %v3828_v15  ;;  %v3831_v22 = vpop.f32.mrb[38].mxu1  ;;  %v3768_v24 = vpop.f32.mrb[39].mxu0 }
 0x152   : > { %v2378_v49 = vadd.f32 %v3766_v17, %v4609_v7  ;;  %v3769_v25 = vadd.f32 %v3768_v24, %v3767_v19  ;;  %v3832_v26 = vpop.f32.mrb[39].mxu1 }
 0x153   : > { %v3833_v27 = vadd.f32 %v3832_v26, %v3831_v22 }
 0x154   : > { %v4652_v28 = vadd.f32 %v3830_v20, %v2378_v49  ;;  %v2381_v51 = vadd.f32 %v3769_v25, %v4611_v9 }
 0x156   : > { %v4655_v30 = vadd.f32 %v3833_v27, %v2381_v51  ;;  %v3770_v32 = vpop.f32.mrb[40].mxu0 }
 0x157   : > { %v3834_v33 = vpop.f32.mrb[40].mxu1  ;;  %v3771_v34 = vpop.f32.mrb[41].mxu0 }
 0x158   : > { %v3772_v35 = vadd.f32 %v3771_v34, %v3770_v32  ;;  %v3835_v36 = vpop.f32.mrb[41].mxu1  ;;  %v3773_v38 = vpop.f32.mrb[42].mxu0 }
 0x159   : > { %v3836_v40 = vadd.f32 %v3835_v36, %v3834_v33  ;;  %v3837_v41 = vpop.f32.mrb[42].mxu1  ;;  %v3774_v42 = vpop.f32.mrb[43].mxu0 }
 0x15a   : > { %v2386_v7 = vadd.f32 %v3772_v35, %v4617_v29  ;;  %v3775_v43 = vadd.f32 %v3774_v42, %v3773_v38  ;;  %v3838_v44 = vpop.f32.mrb[43].mxu1 }
 0x15b   : > { %v3839_v45 = vadd.f32 %v3838_v44, %v3837_v41 }
 0x15c   : > { %v4658_v46 = vadd.f32 %v3836_v40, %v2386_v7  ;;  %v2389_v9 = vadd.f32 %v3775_v43, %v4619_v31 }
 0x15e   : > { %v4661_v47 = vadd.f32 %v3839_v45, %v2389_v9  ;;  %v3776_v48 = vpop.f32.mrb[44].mxu0 }
 0x15f   : > { %v3840_v50 = vpop.f32.mrb[44].mxu1  ;;  %v3777_v52 = vpop.f32.mrb[45].mxu0 }
 0x160   : > { %v3778_v56 = vadd.f32 %v3777_v52, %v3776_v48  ;;  %v3841_v58 = vpop.f32.mrb[45].mxu1  ;;  %v3779_v59 = vpop.f32.mrb[46].mxu0 }
 0x161   : > { %v3842_v60 = vadd.f32 %v3841_v58, %v3840_v50  ;;  %v3843_v61 = vpop.f32.mrb[46].mxu1  ;;  %v3780_v62 = vpop.f32.mrb[47].mxu0 }
 0x162   : > { %v2394_v29 = vadd.f32 %v3778_v56, %v4625_v53  ;;  %v3781_v63 = vadd.f32 %v3780_v62, %v3779_v59  ;;  %v3844_v0 = vpop.f32.mrb[47].mxu1 }
 0x163   : > { %v3845_v1 = vadd.f32 %v3844_v0, %v3843_v61 }
 0x164   : > { %v4664_v2 = vadd.f32 %v3842_v60, %v2394_v29  ;;  %v2397_v31 = vadd.f32 %v3781_v63, %v4627_v55 }
 0x166   : > { %v4667_v3 = vadd.f32 %v3845_v1, %v2397_v31  ;;  %v3782_v4 = vpop.f32.mrb[48].mxu0 }
 0x167   : > { %v3846_v6 = vpop.f32.mrb[48].mxu1  ;;  %v3783_v10 = vpop.f32.mrb[49].mxu0 }
 0x168   : > { %v3784_v12 = vadd.f32 %v3783_v10, %v3782_v4  ;;  %v3847_v14 = vpop.f32.mrb[49].mxu1  ;;  %v3785_v15 = vpop.f32.mrb[50].mxu0 }
 0x169   : > { %v3848_v16 = vadd.f32 %v3847_v14, %v3846_v6  ;;  %v3849_v17 = vpop.f32.mrb[50].mxu1  ;;  %v3786_v18 = vpop.f32.mrb[51].mxu0 }
 0x16a   : > { %v2402_v53 = vadd.f32 %v3784_v12, %v4629_v5  ;;  %v3787_v19 = vadd.f32 %v3786_v18, %v3785_v15  ;;  %v3850_v20 = vpop.f32.mrb[51].mxu1 }
 0x16b   : > { %v3851_v22 = vadd.f32 %v3850_v20, %v3849_v17 }
 0x16c   : > { %v4670_v24 = vadd.f32 %v3848_v16, %v2402_v53  ;;  %v2405_v55 = vadd.f32 %v3787_v19, %v4631_v8 }
 0x16e   : > { %v4673_v49 = vadd.f32 %v3851_v22, %v2405_v55  ;;  %v3788_v25 = vpop.f32.mrb[52].mxu0 }
 0x16f   : > { %v3852_v26 = vpop.f32.mrb[52].mxu1  ;;  %v3789_v27 = vpop.f32.mrb[53].mxu0 }
 0x170   : > { %v3790_v51 = vadd.f32 %v3789_v27, %v3788_v25  ;;  %v3853_v32 = vpop.f32.mrb[53].mxu1  ;;  %v3791_v33 = vpop.f32.mrb[54].mxu0 }
 0x171   : > { %v3854_v34 = vadd.f32 %v3853_v32, %v3852_v26  ;;  %v3855_v35 = vpop.f32.mrb[54].mxu1  ;;  %v3792_v36 = vpop.f32.mrb[55].mxu0 }
 0x172   : > { %v2410_v5 = vadd.f32 %v3790_v51, %v4633_v21  ;;  %v3793_v38 = vadd.f32 %v3792_v36, %v3791_v33  ;;  %v3856_v40 = vpop.f32.mrb[55].mxu1 }
 0x173   : > { %v3857_v41 = vadd.f32 %v3856_v40, %v3855_v35 }
 0x174   : > { %v4676_v42 = vadd.f32 %v3854_v34, %v2410_v5  ;;  %v2413_v8 = vadd.f32 %v3793_v38, %v4635_v23 }
 0x176   : > { %v4679_v7 = vadd.f32 %v3857_v41, %v2413_v8  ;;  %v3794_v43 = vpop.f32.mrb[56].mxu0 }
 0x177   : > { %v3858_v44 = vpop.f32.mrb[56].mxu1  ;;  %v3795_v45 = vpop.f32.mrb[57].mxu0 }
 0x178   : > { %v3796_v9 = vadd.f32 %v3795_v45, %v3794_v43  ;;  %v3859_v48 = vpop.f32.mrb[57].mxu1  ;;  %v3797_v50 = vpop.f32.mrb[58].mxu0 }
 0x179   : > { %v3860_v52 = vadd.f32 %v3859_v48, %v3858_v44  ;;  %v3861_v56 = vpop.f32.mrb[58].mxu1  ;;  %v3798_v58 = vpop.f32.mrb[59].mxu0 }
 0x17a   : > { %v2418_v21 = vadd.f32 %v3796_v9, %v4637_v37  ;;  %v3799_v59 = vadd.f32 %v3798_v58, %v3797_v50  ;;  %v3862_v60 = vpop.f32.mrb[59].mxu1 }
 0x17b   : > { %v3863_v61 = vadd.f32 %v3862_v60, %v3861_v56 }
 0x17c   : > { %v4682_v62 = vadd.f32 %v3860_v52, %v2418_v21  ;;  %v2421_v23 = vadd.f32 %v3799_v59, %v4639_v39 }
 0x17e   : > { %v4685_v29 = vadd.f32 %v3863_v61, %v2421_v23  ;;  %v3800_v63 = vpop.f32.mrb[60].mxu0 }
 0x17f   : > { %v3864_v0 = vpop.f32.mrb[60].mxu1  ;;  %v3801_v1 = vpop.f32.mrb[61].mxu0 }
 0x180   : > { %v3802_v31 = vadd.f32 %v3801_v1, %v3800_v63  ;;  %v3865_v4 = vpop.f32.mrb[61].mxu1  ;;  %v3803_v6 = vpop.f32.mrb[62].mxu0 }
 0x181   : > { %v3866_v10 = vadd.f32 %v3865_v4, %v3864_v0  ;;  %v3867_v12 = vpop.f32.mrb[62].mxu1  ;;  %v3804_v14 = vpop.f32.mrb[63].mxu0 }
 0x182   : > { %v2426_v37 = vadd.f32 %v3802_v31, %v4641_v54  ;;  %v3805_v15 = vadd.f32 %v3804_v14, %v3803_v6  ;;  %v3868_v16 = vpop.f32.mrb[63].mxu1 }
 0x183   : > { %v3869_v17 = vadd.f32 %v3868_v16, %v3867_v12 }
 0x184   : > { %v4688_v18 = vadd.f32 %v3866_v10, %v2426_v37  ;;  %v2429_v39 = vadd.f32 %v3805_v15, %v4643_v57 }
 0x186   : > { %v4691_v53 = vadd.f32 %v3869_v17, %v2429_v39  ;;  %v3886_v19 = vpop.f32.mrb[64].mxu0 }
 0x187   : > { %v3950_v20 = vpop.f32.mrb[64].mxu1  ;;  %v3887_v22 = vpop.f32.mrb[65].mxu0 }
 0x188   : > { %v3888_v55 = vadd.f32 %v3887_v22, %v3886_v19  ;;  %v3951_v25 = vpop.f32.mrb[65].mxu1  ;;  %v3889_v26 = vpop.f32.mrb[66].mxu0 }
 0x189   : > { %v3952_v27 = vadd.f32 %v3951_v25, %v3950_v20  ;;  %v3953_v51 = vpop.f32.mrb[66].mxu1  ;;  %v3890_v32 = vpop.f32.mrb[67].mxu0 }
 0x18a   : > { %v2564_v54 = vadd.f32 %v3888_v55, %v4646_v11  ;;  %v3891_v33 = vadd.f32 %v3890_v32, %v3889_v26  ;;  %v3954_v34 = vpop.f32.mrb[67].mxu1 }
 0x18b   : > { %v3955_v35 = vadd.f32 %v3954_v34, %v3953_v51 }
 0x18c   : > { %v4694_v36 = vadd.f32 %v3952_v27, %v2564_v54  ;;  %v2567_v57 = vadd.f32 %v3891_v33, %v4649_v13 }
 0x18e   : > { %v4697_v5 = vadd.f32 %v3955_v35, %v2567_v57  ;;  %v3892_v38 = vpop.f32.mrb[68].mxu0 }
 0x18f   : > { %v3956_v40 = vpop.f32.mrb[68].mxu1  ;;  %v3893_v41 = vpop.f32.mrb[69].mxu0 }
 0x190   : > { %v3894_v8 = vadd.f32 %v3893_v41, %v3892_v38  ;;  %v3957_v43 = vpop.f32.mrb[69].mxu1  ;;  %v3895_v44 = vpop.f32.mrb[70].mxu0 }
 0x191   : > { %v3958_v45 = vadd.f32 %v3957_v43, %v3956_v40  ;;  %v3959_v9 = vpop.f32.mrb[70].mxu1  ;;  %v3896_v48 = vpop.f32.mrb[71].mxu0 }
 0x192   : > { %v2572_v11 = vadd.f32 %v3894_v8, %v4652_v28  ;;  %v3897_v50 = vadd.f32 %v3896_v48, %v3895_v44  ;;  %v3960_v52 = vpop.f32.mrb[71].mxu1 }
 0x193   : > { %v3961_v56 = vadd.f32 %v3960_v52, %v3959_v9 }
 0x194   : > { %v4700_v58 = vadd.f32 %v3958_v45, %v2572_v11  ;;  %v2575_v13 = vadd.f32 %v3897_v50, %v4655_v30 }
 0x196   : > { %v4703_v21 = vadd.f32 %v3961_v56, %v2575_v13  ;;  %v3898_v59 = vpop.f32.mrb[72].mxu0 }
 0x197   : > { %v3962_v60 = vpop.f32.mrb[72].mxu1  ;;  %v3899_v61 = vpop.f32.mrb[73].mxu0 }
 0x198   : > { %v3900_v23 = vadd.f32 %v3899_v61, %v3898_v59  ;;  %v3963_v63 = vpop.f32.mrb[73].mxu1  ;;  %v3901_v0 = vpop.f32.mrb[74].mxu0 }
 0x199   : > { %v3964_v1 = vadd.f32 %v3963_v63, %v3962_v60  ;;  %v3965_v31 = vpop.f32.mrb[74].mxu1  ;;  %v3902_v4 = vpop.f32.mrb[75].mxu0 }
 0x19a   : > { %v2580_v28 = vadd.f32 %v3900_v23, %v4658_v46  ;;  %v3903_v6 = vadd.f32 %v3902_v4, %v3901_v0  ;;  %v3966_v10 = vpop.f32.mrb[75].mxu1 }
 0x19b   : > { %v3967_v12 = vadd.f32 %v3966_v10, %v3965_v31 }
 0x19c   : > { %v4706_v14 = vadd.f32 %v3964_v1, %v2580_v28  ;;  %v2583_v30 = vadd.f32 %v3903_v6, %v4661_v47 }
 0x19e   : > { %v4709_v37 = vadd.f32 %v3967_v12, %v2583_v30  ;;  %v3904_v15 = vpop.f32.mrb[76].mxu0 }
 0x19f   : > { %v3968_v16 = vpop.f32.mrb[76].mxu1  ;;  %v3905_v17 = vpop.f32.mrb[77].mxu0 }
 0x1a0   : > { %v3906_v39 = vadd.f32 %v3905_v17, %v3904_v15  ;;  %v3969_v19 = vpop.f32.mrb[77].mxu1  ;;  %v3907_v20 = vpop.f32.mrb[78].mxu0 }
 0x1a1   : > { %v3970_v22 = vadd.f32 %v3969_v19, %v3968_v16  ;;  %v3971_v55 = vpop.f32.mrb[78].mxu1  ;;  %v3908_v25 = vpop.f32.mrb[79].mxu0 }
 0x1a2   : > { %v2588_v46 = vadd.f32 %v3906_v39, %v4664_v2  ;;  %v3909_v26 = vadd.f32 %v3908_v25, %v3907_v20  ;;  %v3972_v27 = vpop.f32.mrb[79].mxu1 }
 0x1a3   : > { %v3973_v51 = vadd.f32 %v3972_v27, %v3971_v55 }
 0x1a4   : > { %v4712_v32 = vadd.f32 %v3970_v22, %v2588_v46  ;;  %v2591_v47 = vadd.f32 %v3909_v26, %v4667_v3 }
 0x1a6   : > { %v4715_v54 = vadd.f32 %v3973_v51, %v2591_v47  ;;  %v3910_v33 = vpop.f32.mrb[80].mxu0 }
 0x1a7   : > { %v3974_v34 = vpop.f32.mrb[80].mxu1  ;;  %v3911_v35 = vpop.f32.mrb[81].mxu0 }
 0x1a8   : > { %v3912_v57 = vadd.f32 %v3911_v35, %v3910_v33  ;;  %v3975_v38 = vpop.f32.mrb[81].mxu1  ;;  %v3913_v40 = vpop.f32.mrb[82].mxu0 }
 0x1a9   : > { %v3976_v41 = vadd.f32 %v3975_v38, %v3974_v34  ;;  %v3977_v8 = vpop.f32.mrb[82].mxu1  ;;  %v3914_v43 = vpop.f32.mrb[83].mxu0 }
 0x1aa   : > { %v2596_v2 = vadd.f32 %v3912_v57, %v4670_v24  ;;  %v3915_v44 = vadd.f32 %v3914_v43, %v3913_v40  ;;  %v3978_v45 = vpop.f32.mrb[83].mxu1 }
 0x1ab   : > { %v3979_v9 = vadd.f32 %v3978_v45, %v3977_v8 }
 0x1ac   : > { %v4718_v48 = vadd.f32 %v3976_v41, %v2596_v2  ;;  %v2599_v3 = vadd.f32 %v3915_v44, %v4673_v49 }
 0x1ae   : > { %v4721_v11 = vadd.f32 %v3979_v9, %v2599_v3  ;;  %v3916_v50 = vpop.f32.mrb[84].mxu0 }
 0x1af   : > { %v3980_v52 = vpop.f32.mrb[84].mxu1  ;;  %v3917_v56 = vpop.f32.mrb[85].mxu0 }
 0x1b0   : > { %v3918_v13 = vadd.f32 %v3917_v56, %v3916_v50  ;;  %v3981_v59 = vpop.f32.mrb[85].mxu1  ;;  %v3919_v60 = vpop.f32.mrb[86].mxu0 }
 0x1b1   : > { %v3982_v61 = vadd.f32 %v3981_v59, %v3980_v52  ;;  %v3983_v23 = vpop.f32.mrb[86].mxu1  ;;  %v3920_v63 = vpop.f32.mrb[87].mxu0 }
 0x1b2   : > { %v2604_v24 = vadd.f32 %v3918_v13, %v4676_v42  ;;  %v3921_v0 = vadd.f32 %v3920_v63, %v3919_v60  ;;  %v3984_v1 = vpop.f32.mrb[87].mxu1 }
 0x1b3   : > { %v3985_v31 = vadd.f32 %v3984_v1, %v3983_v23 }
 0x1b4   : > { %v4724_v4 = vadd.f32 %v3982_v61, %v2604_v24  ;;  %v2607_v49 = vadd.f32 %v3921_v0, %v4679_v7 }
 0x1b6   : > { %v4727_v28 = vadd.f32 %v3985_v31, %v2607_v49  ;;  %v3922_v6 = vpop.f32.mrb[88].mxu0 }
 0x1b7   : > { %v3986_v10 = vpop.f32.mrb[88].mxu1  ;;  %v3923_v12 = vpop.f32.mrb[89].mxu0 }
 0x1b8   : > { %v3924_v30 = vadd.f32 %v3923_v12, %v3922_v6  ;;  %v3987_v15 = vpop.f32.mrb[89].mxu1  ;;  %v3925_v16 = vpop.f32.mrb[90].mxu0 }
 0x1b9   : > { %v3988_v17 = vadd.f32 %v3987_v15, %v3986_v10  ;;  %v3989_v39 = vpop.f32.mrb[90].mxu1  ;;  %v3926_v19 = vpop.f32.mrb[91].mxu0 }
 0x1ba   : > { %v2612_v42 = vadd.f32 %v3924_v30, %v4682_v62  ;;  %v3927_v20 = vadd.f32 %v3926_v19, %v3925_v16  ;;  %v3990_v22 = vpop.f32.mrb[91].mxu1 }
 0x1bb   : > { %v3991_v55 = vadd.f32 %v3990_v22, %v3989_v39 }
 0x1bc   : > { %v4730_v25 = vadd.f32 %v3988_v17, %v2612_v42  ;;  %v2615_v7 = vadd.f32 %v3927_v20, %v4685_v29 }
 0x1be   : > { %v4733_v46 = vadd.f32 %v3991_v55, %v2615_v7  ;;  %v3928_v26 = vpop.f32.mrb[92].mxu0 }
 0x1bf   : > { %v3992_v27 = vpop.f32.mrb[92].mxu1  ;;  %v3929_v51 = vpop.f32.mrb[93].mxu0 }
 0x1c0   : > { %v3930_v47 = vadd.f32 %v3929_v51, %v3928_v26  ;;  %v3993_v33 = vpop.f32.mrb[93].mxu1  ;;  %v3931_v34 = vpop.f32.mrb[94].mxu0 }
 0x1c1   : > { %v3994_v35 = vadd.f32 %v3993_v33, %v3992_v27  ;;  %v3995_v57 = vpop.f32.mrb[94].mxu1  ;;  %v3932_v38 = vpop.f32.mrb[95].mxu0 }
 0x1c2   : > { %v2620_v62 = vadd.f32 %v3930_v47, %v4688_v18  ;;  %v3933_v40 = vadd.f32 %v3932_v38, %v3931_v34  ;;  %v3996_v41 = vpop.f32.mrb[95].mxu1 }
 0x1c3   : > { %v3997_v8 = vadd.f32 %v3996_v41, %v3995_v57 }
 0x1c4   : > { %v4736_v43 = vadd.f32 %v3994_v35, %v2620_v62  ;;  %v2623_v29 = vadd.f32 %v3933_v40, %v4691_v53  ;;  %v4745_v53 = vld [vmem:[%s4803_s2] ss:$0 sm:$0xff] }
 0x1c6   : > { %v4739_v2 = vadd.f32 %v3997_v8, %v2623_v29  ;;  %v4014_v44 = vpop.f32.mrb[96].mxu0 }
 0x1c7   : > { %v4078_v45 = vpop.f32.mrb[96].mxu1  ;;  %v4015_v9 = vpop.f32.mrb[97].mxu0 }
 0x1c8   : > { %v4016_v3 = vadd.f32 %v4015_v9, %v4014_v44  ;;  %v4079_v50 = vpop.f32.mrb[97].mxu1  ;;  %v4017_v52 = vpop.f32.mrb[98].mxu0 }
 0x1c9   : > { %v4080_v56 = vadd.f32 %v4079_v50, %v4078_v45  ;;  %v4081_v13 = vpop.f32.mrb[98].mxu1  ;;  %v4018_v59 = vpop.f32.mrb[99].mxu0 }
 0x1ca   : > { %v2758_v18 = vadd.f32 %v4016_v3, %v4694_v36  ;;  %v4019_v60 = vadd.f32 %v4018_v59, %v4017_v52  ;;  %v4082_v61 = vpop.f32.mrb[99].mxu1 }
 0x1cb   : > { %v4083_v23 = vadd.f32 %v4082_v61, %v4081_v13 }
 0x1cc   : > { %v2855_v63 = vadd.f32 %v4080_v56, %v2758_v18  ;;  %v2761_v24 = vadd.f32 %v4019_v60, %v4697_v5 }
 0x1ce   : > { %v2975_v0 = vadd.f32 %v4745_v53, %v2855_v63  ;;  %v2858_v1 = vadd.f32 %v4083_v23, %v2761_v24  ;;  %v4020_v31 = vpop.f32.mrb[100].mxu0 }
 0x1cf   : > { %v4084_v49 = vpop.f32.mrb[100].mxu1  ;;  %v4021_v6 = vpop.f32.mrb[101].mxu0 }
 0x1d0   : > { %v3007_v10 = vmul.f32 0.2, %v2975_v0  ;;  %v2976_v36 = vadd.f32 %v4745_v53, %v2858_v1  ;;  %v4022_v12 = vadd.f32 %v4021_v6, %v4020_v31  ;;  %v4085_v30 = vpop.f32.mrb[101].mxu1  ;;  %v4023_v15 = vpop.f32.mrb[102].mxu0  ;;  %vm2991_vm0 = vcmp.ge.f32.partialorder %v2975_v0, 0.0 }
 0x1d1   : > { %v4086_v16 = vadd.f32 %v4085_v30, %v4084_v49  ;;  %v4087_v17 = vpop.f32.mrb[102].mxu1  ;;  %v4024_v39 = vpop.f32.mrb[103].mxu0 }
 0x1d2   : > { %vm2992_vm1 = vcmp.ge.f32.partialorder %v2976_v36, 0.0  ;;  %v3008_v19 = vmul.f32 0.2, %v2976_v36  ;;  %v2766_v5 = vadd.f32 %v4022_v12, %v4700_v58  ;;  %v4088_v42 = vpop.f32.mrb[103].mxu1  ;;  %v4025_v20 = vadd.f32 %v4024_v39, %v4023_v15 }
 0x1d3   : > { %v4089_v22 = vadd.f32 %v4088_v42, %v4087_v17  ;;  %v3023_v55 = vsel %vm2991_vm0, %v2975_v0, %v3007_v10 }
 0x1d4   : > { %v3024_v7 = vsel %vm2992_vm1, %v2976_v36, %v3008_v19  ;;  %v2863_v26 = vadd.f32 %v4086_v16, %v2766_v5  ;;  %v2769_v51 = vadd.f32 %v4025_v20, %v4703_v21 }
 0x1d5   : > { %v3570_v27 = vpack.c.bf16 %v3024_v7, %v3023_v55 }
 0x1d6   : > { %v2977_v47 = vadd.f32 %v4745_v53, %v2863_v26  ;;  %v4026_v33 = vpop.f32.mrb[104].mxu0  ;;  %v2866_v58 = vadd.f32 %v4089_v22, %v2769_v51 }
 0x1d7   : > { %3571 = vst [vmem:[%s4755_s28] sm:$0xff] %v3570_v27   ;;  %v4090_v34 = vpop.f32.mrb[104].mxu1  ;;  %v4027_v35 = vpop.f32.mrb[105].mxu0 }
 0x1d8   : > { %v4028_v57 = vadd.f32 %v4027_v35, %v4026_v33  ;;  %v4091_v38 = vpop.f32.mrb[105].mxu1  ;;  %v4029_v62 = vpop.f32.mrb[106].mxu0  ;;  %v3009_v40 = vmul.f32 0.2, %v2977_v47  ;;  %v2978_v41 = vadd.f32 %v4745_v53, %v2866_v58  ;;  %vm2993_vm2 = vcmp.ge.f32.partialorder %v2977_v47, 0.0 }
 0x1d9   : > { %v4092_v8 = vadd.f32 %v4091_v38, %v4090_v34  ;;  %v4093_v29 = vpop.f32.mrb[106].mxu1  ;;  %v4030_v44 = vpop.f32.mrb[107].mxu0 }
 0x1da   : > { %v2774_v45 = vadd.f32 %v4028_v57, %v4706_v14  ;;  %v4031_v21 = vadd.f32 %v4030_v44, %v4029_v62  ;;  %v4094_v9 = vpop.f32.mrb[107].mxu1  ;;  %vm2994_vm3 = vcmp.ge.f32.partialorder %v2978_v41, 0.0  ;;  %v3010_v3 = vmul.f32 0.2, %v2978_v41 }
 0x1db   : > { %v4095_v50 = vadd.f32 %v4094_v9, %v4093_v29  ;;  %v3025_v13 = vsel %vm2993_vm2, %v2977_v47, %v3009_v40 }
 0x1dc   : > { %v2871_v52 = vadd.f32 %v4092_v8, %v2774_v45  ;;  %v2777_v56 = vadd.f32 %v4031_v21, %v4709_v37  ;;  %v3026_v59 = vsel %vm2994_vm3, %v2978_v41, %v3010_v3 }
 0x1dd   : > { %v3575_v18 = vpack.c.bf16 %v3026_v59, %v3025_v13 }
 0x1de   : > { %v2979_v60 = vadd.f32 %v4745_v53, %v2871_v52  ;;  %v2874_v61 = vadd.f32 %v4095_v50, %v2777_v56  ;;  %v4032_v23 = vpop.f32.mrb[108].mxu0 }
 0x1df   : > { %v4096_v63 = vpop.f32.mrb[108].mxu1  ;;  %v4033_v24 = vpop.f32.mrb[109].mxu0  ;;  %3607 = vst [vmem:[%s4755_s28 + $0x8] sm:$0xff] %v3575_v18  }
 0x1e0   : > { %v3011_v14 = vmul.f32 0.2, %v2979_v60  ;;  %v2980_v0 = vadd.f32 %v4745_v53, %v2874_v61  ;;  %v4034_v1 = vadd.f32 %v4033_v24, %v4032_v23  ;;  %v4097_v31 = vpop.f32.mrb[109].mxu1  ;;  %v4035_v49 = vpop.f32.mrb[110].mxu0  ;;  %vm2995_vm4 = vcmp.ge.f32.partialorder %v2979_v60, 0.0 }
 0x1e1   : > { %v4098_v6 = vadd.f32 %v4097_v31, %v4096_v63  ;;  %v4099_v37 = vpop.f32.mrb[110].mxu1  ;;  %v4036_v10 = vpop.f32.mrb[111].mxu0 }
 0x1e2   : > { %vm2996_vm5 = vcmp.ge.f32.partialorder %v2980_v0, 0.0  ;;  %v3012_v36 = vmul.f32 0.2, %v2980_v0  ;;  %v2782_v12 = vadd.f32 %v4034_v1, %v4712_v32  ;;  %v4100_v30 = vpop.f32.mrb[111].mxu1  ;;  %v4037_v15 = vadd.f32 %v4036_v10, %v4035_v49 }
 0x1e3   : > { %v4101_v16 = vadd.f32 %v4100_v30, %v4099_v37  ;;  %v3027_v17 = vsel %vm2995_vm4, %v2979_v60, %v3011_v14 }
 0x1e4   : > { %v3028_v39 = vsel %vm2996_vm5, %v2980_v0, %v3012_v36  ;;  %v2879_v19 = vadd.f32 %v4098_v6, %v2782_v12  ;;  %v2785_v42 = vadd.f32 %v4037_v15, %v4715_v54 }
 0x1e5   : > { %v3580_v5 = vpack.c.bf16 %v3028_v39, %v3027_v17 }
 0x1e6   : > { %v2981_v20 = vadd.f32 %v4745_v53, %v2879_v19  ;;  %v4038_v22 = vpop.f32.mrb[112].mxu0  ;;  %v2882_v55 = vadd.f32 %v4101_v16, %v2785_v42 }
 0x1e7   : > { %3608 = vst [vmem:[%s4755_s28 + $0x10] sm:$0xff] %v3580_v5   ;;  %v4102_v7 = vpop.f32.mrb[112].mxu1  ;;  %v4039_v26 = vpop.f32.mrb[113].mxu0 }
 0x1e8   : > { %v4040_v27 = vadd.f32 %v4039_v26, %v4038_v22  ;;  %v4103_v51 = vpop.f32.mrb[113].mxu1  ;;  %v4041_v47 = vpop.f32.mrb[114].mxu0  ;;  %v3013_v32 = vmul.f32 0.2, %v2981_v20  ;;  %v2982_v33 = vadd.f32 %v4745_v53, %v2882_v55  ;;  %vm2997_vm6 = vcmp.ge.f32.partialorder %v2981_v20, 0.0 }
 0x1e9   : > { %v4104_v58 = vadd.f32 %v4103_v51, %v4102_v7  ;;  %v4105_v34 = vpop.f32.mrb[114].mxu1  ;;  %v4042_v35 = vpop.f32.mrb[115].mxu0 }
 0x1ea   : > { %v2790_v57 = vadd.f32 %v4040_v27, %v4718_v48  ;;  %v4043_v54 = vadd.f32 %v4042_v35, %v4041_v47  ;;  %v4106_v38 = vpop.f32.mrb[115].mxu1  ;;  %vm2998_vm7 = vcmp.ge.f32.partialorder %v2982_v33, 0.0  ;;  %v3014_v62 = vmul.f32 0.2, %v2982_v33 }
 0x1eb   : > { %v4107_v40 = vadd.f32 %v4106_v38, %v4105_v34  ;;  %v3029_v29 = vsel %vm2997_vm6, %v2981_v20, %v3013_v32 }
 0x1ec   : > { %v2887_v41 = vadd.f32 %v4104_v58, %v2790_v57  ;;  %v2793_v8 = vadd.f32 %v4043_v54, %v4721_v11  ;;  %v3030_v44 = vsel %vm2998_vm7, %v2982_v33, %v3014_v62 }
 0x1ed   : > { %v3585_v45 = vpack.c.bf16 %v3030_v44, %v3029_v29 }
 0x1ee   : > { %v2983_v21 = vadd.f32 %v4745_v53, %v2887_v41  ;;  %v2890_v9 = vadd.f32 %v4107_v40, %v2793_v8  ;;  %v4044_v3 = vpop.f32.mrb[116].mxu0 }
 0x1ef   : > { %v4108_v50 = vpop.f32.mrb[116].mxu1  ;;  %v4045_v52 = vpop.f32.mrb[117].mxu0  ;;  %3609 = vst [vmem:[%s4755_s28 + $0x18] sm:$0xff] %v3585_v45  }
 0x1f0   : > { %v3015_v48 = vmul.f32 0.2, %v2983_v21  ;;  %v2984_v56 = vadd.f32 %v4745_v53, %v2890_v9  ;;  %v4046_v13 = vadd.f32 %v4045_v52, %v4044_v3  ;;  %v4109_v59 = vpop.f32.mrb[117].mxu1  ;;  %v4047_v18 = vpop.f32.mrb[118].mxu0  ;;  %vm2999_vm8 = vcmp.ge.f32.partialorder %v2983_v21, 0.0 }
 0x1f1   : > { %v4110_v60 = vadd.f32 %v4109_v59, %v4108_v50  ;;  %v4111_v11 = vpop.f32.mrb[118].mxu1  ;;  %v4048_v61 = vpop.f32.mrb[119].mxu0 }
 0x1f2   : > { %vm3000_vm9 = vcmp.ge.f32.partialorder %v2984_v56, 0.0  ;;  %v3016_v23 = vmul.f32 0.2, %v2984_v56  ;;  %v2798_v63 = vadd.f32 %v4046_v13, %v4724_v4  ;;  %v4112_v24 = vpop.f32.mrb[119].mxu1  ;;  %v4049_v14 = vadd.f32 %v4048_v61, %v4047_v18 }
 0x1f3   : > { %v4113_v0 = vadd.f32 %v4112_v24, %v4111_v11  ;;  %v3031_v1 = vsel %vm2999_vm8, %v2983_v21, %v3015_v48 }
 0x1f4   : > { %v3032_v31 = vsel %vm3000_vm9, %v2984_v56, %v3016_v23  ;;  %v2895_v49 = vadd.f32 %v4110_v60, %v2798_v63  ;;  %v2801_v37 = vadd.f32 %v4049_v14, %v4727_v28 }
 0x1f5   : > { %v3590_v6 = vpack.c.bf16 %v3032_v31, %v3031_v1 }
 0x1f6   : > { %v2985_v10 = vadd.f32 %v4745_v53, %v2895_v49  ;;  %v4050_v36 = vpop.f32.mrb[120].mxu0  ;;  %v2898_v12 = vadd.f32 %v4113_v0, %v2801_v37 }
 0x1f7   : > { %3610 = vst [vmem:[%s4755_s28 + $0x20] sm:$0xff] %v3590_v6   ;;  %v4114_v30 = vpop.f32.mrb[120].mxu1  ;;  %v4051_v15 = vpop.f32.mrb[121].mxu0 }
 0x1f8   : > { %v4052_v16 = vadd.f32 %v4051_v15, %v4050_v36  ;;  %v4115_v17 = vpop.f32.mrb[121].mxu1  ;;  %v4053_v39 = vpop.f32.mrb[122].mxu0  ;;  %v3017_v4 = vmul.f32 0.2, %v2985_v10  ;;  %v2986_v19 = vadd.f32 %v4745_v53, %v2898_v12  ;;  %vm3001_vm10 = vcmp.ge.f32.partialorder %v2985_v10, 0.0 }
 0x1f9   : > { %v4116_v5 = vadd.f32 %v4115_v17, %v4114_v30  ;;  %v4117_v42 = vpop.f32.mrb[122].mxu1  ;;  %v4054_v20 = vpop.f32.mrb[123].mxu0 }
 0x1fa   : > { %v2806_v22 = vadd.f32 %v4052_v16, %v4730_v25  ;;  %v4055_v28 = vadd.f32 %v4054_v20, %v4053_v39  ;;  %v4118_v55 = vpop.f32.mrb[123].mxu1  ;;  %vm3002_vm11 = vcmp.ge.f32.partialorder %v2986_v19, 0.0  ;;  %v3018_v7 = vmul.f32 0.2, %v2986_v19 }
 0x1fb   : > { %v4119_v26 = vadd.f32 %v4118_v55, %v4117_v42  ;;  %v3033_v47 = vsel %vm3001_vm10, %v2985_v10, %v3017_v4 }
 0x1fc   : > { %v2903_v27 = vadd.f32 %v4116_v5, %v2806_v22  ;;  %v2809_v51 = vadd.f32 %v4055_v28, %v4733_v46  ;;  %v3034_v32 = vsel %vm3002_vm11, %v2986_v19, %v3018_v7 }
 0x1fd   : > { %v3595_v33 = vpack.c.bf16 %v3034_v32, %v3033_v47 }
 0x1fe   : > { %v2987_v58 = vadd.f32 %v4745_v53, %v2903_v27  ;;  %v2906_v34 = vadd.f32 %v4119_v26, %v2809_v51  ;;  %v4056_v35 = vpop.f32.mrb[124].mxu0 }
 0x1ff   : > { %v4120_v57 = vpop.f32.mrb[124].mxu1  ;;  %v4057_v54 = vpop.f32.mrb[125].mxu0  ;;  %3611 = vst [vmem:[%s4755_s28 + $0x28] sm:$0xff] %v3595_v33  }
 0x200   : > { %v3019_v25 = vmul.f32 0.2, %v2987_v58  ;;  %v2988_v38 = vadd.f32 %v4745_v53, %v2906_v34  ;;  %v4058_v62 = vadd.f32 %v4057_v54, %v4056_v35  ;;  %v4121_v40 = vpop.f32.mrb[125].mxu1  ;;  %v4059_v41 = vpop.f32.mrb[126].mxu0  ;;  %vm3003_vm12 = vcmp.ge.f32.partialorder %v2987_v58, 0.0 }
 0x201   : > { %v4122_v8 = vadd.f32 %v4121_v40, %v4120_v57  ;;  %v4123_v46 = vpop.f32.mrb[126].mxu1  ;;  %v4060_v29 = vpop.f32.mrb[127].mxu0 }
 0x202   : > { %vm3004_vm13 = vcmp.ge.f32.partialorder %v2988_v38, 0.0  ;;  %v3020_v44 = vmul.f32 0.2, %v2988_v38  ;;  %v2814_v45 = vadd.f32 %v4058_v62, %v4736_v43  ;;  %v4124_v21 = vpop.f32.mrb[127].mxu1  ;;  %v4061_v9 = vadd.f32 %v4060_v29, %v4059_v41 }
 0x203   : > { %v4125_v3 = vadd.f32 %v4124_v21, %v4123_v46  ;;  %v3035_v50 = vsel %vm3003_vm12, %v2987_v58, %v3019_v25 }
 0x204   : > { %v3036_v52 = vsel %vm3004_vm13, %v2988_v38, %v3020_v44  ;;  %v2911_v48 = vadd.f32 %v4122_v8, %v2814_v45  ;;  %v2817_v13 = vadd.f32 %v4061_v9, %v4739_v2 }
 0x205   : > { %v3600_v56 = vpack.c.bf16 %v3036_v52, %v3035_v50 }
 0x206   : > { %v2989_v59 = vadd.f32 %v4745_v53, %v2911_v48  ;;  %v2914_v18 = vadd.f32 %v4125_v3, %v2817_v13 }
 0x207   : > { %3612 = vst [vmem:[%s4755_s28 + $0x30] sm:$0xff] %v3600_v56  }
 0x208   : > { %v3021_v60 = vmul.f32 0.2, %v2989_v59  ;;  %v2990_v11 = vadd.f32 %v4745_v53, %v2914_v18  ;;  %vm3005_vm14 = vcmp.ge.f32.partialorder %v2989_v59, 0.0 }
 0x20a   : > { %vm3006_vm15 = vcmp.ge.f32.partialorder %v2990_v11, 0.0  ;;  %v3022_v43 = vmul.f32 0.2, %v2990_v11  ;;  %v3037_v61 = vsel %vm3005_vm14, %v2989_v59, %v3021_v60 }
 0x20c   : > { %v3038_v23 = vsel %vm3006_vm15, %v2990_v11, %v3022_v43 }
 0x20d   : > { %v3605_v63 = vpack.c.bf16 %v3038_v23, %v3037_v61 }
 0x20f   : > { %3613 = vst [vmem:[%s4755_s28 + $0x38] sm:$0xff] %v3605_v63  }
 0x210 PF: > { %s13_s14 = sadd.s32 1, %s4300_s14   ;;  %s4805_s12 = smov %s4296_s13 }
 0x211   : > { %p10_p5 = scmp.ge.s32.totalorder %s13_s14, 10   ;;  %s4806_s13 = smov %s4808_s15 }
 0x213   :  { %12 = sbr.rel (!%p10_p5) target bundleno = 2 (0x2), region = 76 }

// kernel: autoencoder_cov3d_mem_forward.17
= control target key start
LH: loop header
LB: loop body
LE: loop exit
PB: predicated region body
PF: predicated region fallthrough
CT: control target
= control target key end

     0   :  { %s5205_s12 = smov 0   ;;  %s5207_s13 = smov 0   ;;  %s5967_s0 = inlined_call_operand.vmem [shape: bf16[8,1024,1024], index: 0, kind: input, shape index: {}]   ;;  %s5968_s1 = inlined_call_operand.vmem [shape: bf16[8,1024,128], index: 1, kind: input, shape index: {}]   ;;  %s5969_s2 = inlined_call_operand.vmem [shape: f32[1,128], index: 2, kind: input, shape index: {}]   ;;  %s5970_s3 = inlined_call_operand.vmem [shape: bf16[8,1024,128], index: 3, kind: output, shape index: {}]  }
   0x1   :  { %s5209_s14 = smov 0   ;;  %s5211_s15 = smov 0  }
   0x2   :  { %s5213_s16 = smov 0  }
   0x3 LB: > { %s35_s17 = sadd.s32 1, %s5174_s14  ;;  %s39_s18 = sadd.s32 1, %s5178_s15  ;;  %s5182_s16 = sphi %s5213_s16, %s13_s16   ;;  %s5178_s15 = sphi %s5211_s15, %s6020_s15   ;;  %s5174_s14 = sphi %s5209_s14, %s6019_s14   ;;  %s5170_s13 = sphi %s5207_s13, %s6018_s13   ;;  %s5166_s12 = sphi %s5205_s12, %s6017_s12  }
   0x4   : > { %p37_p0 = scmp.ge.s32.totalorder %s35_s17, 2  ;;  %p4385_p1 = scmp.ge.s32.totalorder %s5182_s16, 1 }
   0x5   : > { %p212_p2 = scmp.lt.s32.totalorder %s5182_s16, 17 }
   0x6   : > { %s6022_s17 = smov (%p37_p0, %s35_s17), 0  ;;  %s6024_s18 = smov (!%p37_p0, %s39_s18), %s5178_s15 }
   0x7   : > { %p213_p3 = pnand %p4385_p1, %p212_p2  ;;  %p41_p4 = scmp.ge.s32.totalorder %s6024_s18, 8 }
   0x9   : > { %s6026_s18 = smov (%p41_p4, %s6024_s18), 0  ;;  %216 = sbr.rel (%p213_p3) target bundleno = 812 (0x32c), region = 32 }
  0x10   : > { %p269_p5 = scmp.lt.s32.totalorder %s5170_s13, 7  ;;  %v5184_v0 = vmov 0   ;;  %s4386_s23 = sshll.u32 %s5166_s12, 6 }
  0x11   : > { %2493 = vmatprep.subr.bf16.mxu0 %v5184_v0  ;;  %2782 = vmatprep.subr.bf16.mxu1 %v5184_v0  ;;  %p271_p6 = scmp.lt.s32.totalorder %s4386_s23, 127 }
  0x12   : > { %s6028_s13 = smov (!%p269_p5, %s5170_s13), 7 }
  0x13   : > { %s4782_s19 = sshll.u32 %s6028_s13, 9  ;;  %s6030_s23 = smov (!%p271_p6, %s4386_s23), 127 }
  0x14   : > { %s5245_s22 = scalar_lea.vmem %s5968_s1, %s4782_s19  ;;  %s4387_s24 = sshll.u32 %s6030_s23, 3 }
  0x15   : > { %v5079_v1 = vld [vmem:[%s5245_s22] sm:$0xff]   ;;  %v5081_v3 = vld [vmem:[%s5245_s22 + $0x8] sm:$0xff]   ;;  %v5083_v5 = vld [vmem:[%s5245_s22 + $0x10] sm:$0xff]   ;;  %s4388_s25 = sshll.u32 %s6028_s13, 10  ;;  %s4393_s4 = sshll.u32 %s6028_s13, 7 }
  0x16   : > { %v5080_v2 = vld [vmem:[%s5245_s22 + $0x80] sm:$0xff]   ;;  %2494 = vmatpush1.bf16.msra.mxu0 %v5079_v1  ;;  %v5082_v4 = vld [vmem:[%s5245_s22 + $0x88] sm:$0xff]   ;;  %v5084_v6 = vld [vmem:[%s5245_s22 + $0x90] sm:$0xff]   ;;  %s278_s26 = sadd.s32 %s4388_s25, %s4387_s24  ;;  %s308_s5 = sadd.s32 %s4393_s4, %s6030_s23 }
  0x17   : > { %2783 = vmatpush1.bf16.msra.mxu1 %v5080_v2  ;;  %2495 = vmatprep.subr.bf16.mxu0 %v5184_v0  ;;  %v5085_v7 = vld [vmem:[%s5245_s22 + $0x18] sm:$0xff]   ;;  %v5087_v9 = vld [vmem:[%s5245_s22 + $0x20] sm:$0xff]   ;;  %v5089_v11 = vld [vmem:[%s5245_s22 + $0x28] sm:$0xff]   ;;  %s4389_s27 = sshll.u32 %s278_s26, 2  ;;  %s4394_s8 = sshll.u32 %s308_s5, 2 }
  0x18   : > { %2784 = vmatprep.subr.bf16.mxu1 %v5184_v0  ;;  %v5086_v8 = vld [vmem:[%s5245_s22 + $0x98] sm:$0xff]   ;;  %v5088_v10 = vld [vmem:[%s5245_s22 + $0xa0] sm:$0xff]   ;;  %v5090_v12 = vld [vmem:[%s5245_s22 + $0xa8] sm:$0xff]   ;;  %s5285_s30 = scalar_lea.vmem %s5967_s0, %s4389_s27  ;;  %s5787_s11 = scalar_lea.vmem %s5970_s3, %s4394_s8 }
  0x19   : > { %v5091_v13 = vld [vmem:[%s5245_s22 + $0x30] sm:$0xff]   ;;  %v5093_v15 = vld [vmem:[%s5245_s22 + $0x38] sm:$0xff]   ;;  %v5095_v17 = vld [vmem:[%s5245_s22 + $0x40] sm:$0xff]  }
  0x1a   : > { %2496 = vmatpush1.bf16.msra.mxu0 %v5081_v3  ;;  %v5092_v14 = vld [vmem:[%s5245_s22 + $0xb0] sm:$0xff]   ;;  %v5094_v16 = vld [vmem:[%s5245_s22 + $0xb8] sm:$0xff]   ;;  %v5096_v18 = vld [vmem:[%s5245_s22 + $0xc0] sm:$0xff]  }
  0x1b   : > { %2785 = vmatpush1.bf16.msra.mxu1 %v5082_v4  ;;  %2497 = vmatprep.subr.bf16.mxu0 %v5184_v0  ;;  %v5292_v19 = vld [vmem:[%s5285_s30] sm:$0xff]  ;;  %v5298_v21 = vld [vmem:[%s5285_s30 + $0x8] sm:$0xff]  ;;  %v5099_v27 = vld [vmem:[%s5245_s22 + $0x50] sm:$0xff]  }
  0x1c   : > { %2786 = vmatprep.subr.bf16.mxu1 %v5184_v0  ;;  %v5295_v20 = vld [vmem:[%s5285_s30 + $0x20] sm:$0xff]  ;;  %v5303_v23 = vld [vmem:[%s5285_s30 + $0x28] sm:$0xff]  ;;  %v5100_v28 = vld [vmem:[%s5245_s22 + $0xd0] sm:$0xff]  }
  0x1d   : > { %v4396_v22 = vcombine.high %v5292_v19, %v5295_v20  ;;  %v5097_v24 = vld [vmem:[%s5245_s22 + $0x48] sm:$0xff]   ;;  %v4398_v25 = vcombine.high %v5298_v21, %v5303_v23  ;;  %v5101_v29 = vld [vmem:[%s5245_s22 + $0x58] sm:$0xff]   ;;  %v5103_v31 = vld [vmem:[%s5245_s22 + $0x60] sm:$0xff]   ;;  %v4395_v42 = vcombine.low %v5292_v19, %v5295_v20  ;;  %v4397_v44 = vcombine.low %v5298_v21, %v5303_v23 }
  0x1e   : > { %2498 = vmatpush1.bf16.msra.mxu0 %v5083_v5  ;;  %v5098_v26 = vld [vmem:[%s5245_s22 + $0xc8] sm:$0xff]   ;;  %v5102_v30 = vld [vmem:[%s5245_s22 + $0xd8] sm:$0xff]   ;;  %v5104_v32 = vld [vmem:[%s5245_s22 + $0xe0] sm:$0xff]  }
  0x1f   : > { %2787 = vmatpush1.bf16.msra.mxu1 %v5084_v6  ;;  %2499 = vmatprep.subr.bf16.mxu0 %v5184_v0  ;;  %v5105_v33 = vld [vmem:[%s5245_s22 + $0x68] sm:$0xff]   ;;  %v5107_v35 = vld [vmem:[%s5245_s22 + $0x70] sm:$0xff]   ;;  %v5109_v37 = vld [vmem:[%s5245_s22 + $0x78] sm:$0xff]  }
  0x20   : > { %2788 = vmatprep.subr.bf16.mxu1 %v5184_v0  ;;  %2525 = vmatprep.mubr.bf16.mxu0 %v4396_v22  ;;  %v5106_v34 = vld [vmem:[%s5245_s22 + $0xe8] sm:$0xff]   ;;  %v5108_v36 = vld [vmem:[%s5245_s22 + $0xf0] sm:$0xff]   ;;  %v5110_v38 = vld [vmem:[%s5245_s22 + $0xf8] sm:$0xff]  }
  0x21   : > { %2814 = vmatprep.mubr.bf16.mxu1 %v4398_v25  ;;  %v453_v39 = vld [vmem:[%s5285_s30 + $0x40] sm:$0xff]  ;;  %v454_v41 = vld [vmem:[%s5285_s30 + $0x48] sm:$0xff]  ;;  %v5115_v59 = vld [vmem:[%s5245_s22 + $0x110] sm:$0xff]  }
  0x22   : > { %2500 = vmatpush1.bf16.msra.mxu0 %v5085_v7  ;;  %v457_v40 = vld [vmem:[%s5285_s30 + $0x60] sm:$0xff]  ;;  %v458_v43 = vld [vmem:[%s5285_s30 + $0x68] sm:$0xff]  ;;  %v5116_v60 = vld [vmem:[%s5245_s22 + $0x190] sm:$0xff]  }
  0x23   : > { %2789 = vmatpush1.bf16.msra.mxu1 %v5086_v8  ;;  %2501 = vmatprep.subr.bf16.mxu0 %v5184_v0  ;;  %v5111_v45 = vld [vmem:[%s5245_s22 + $0x100] sm:$0xff]   ;;  %v4404_v47 = vcombine.high %v453_v39, %v457_v40  ;;  %v4406_v48 = vcombine.high %v454_v41, %v458_v43  ;;  %v5113_v51 = vld [vmem:[%s5245_s22 + $0x108] sm:$0xff]   ;;  %v4403_v55 = vcombine.low %v453_v39, %v457_v40  ;;  %v5117_v2 = vld [vmem:[%s5245_s22 + $0x118] sm:$0xff]  }
  0x24   : > { %2790 = vmatprep.subr.bf16.mxu1 %v5184_v0  ;;  %v5112_v46 = vld [vmem:[%s5245_s22 + $0x180] sm:$0xff]   ;;  %v5114_v52 = vld [vmem:[%s5245_s22 + $0x188] sm:$0xff]   ;;  %v4405_v56 = vcombine.low %v454_v41, %v458_v43  ;;  %v5118_v3 = vld [vmem:[%s5245_s22 + $0x198] sm:$0xff]  }
  0x25   : > { %v461_v49 = vld [vmem:[%s5285_s30 + $0x80] sm:$0xff]  ;;  %v462_v53 = vld [vmem:[%s5285_s30 + $0x88] sm:$0xff]  ;;  %v5123_v20 = vld [vmem:[%s5245_s22 + $0x130] sm:$0xff]  }
  0x26   : > { %2502 = vmatpush1.bf16.msra.mxu0 %v5087_v9  ;;  %v465_v50 = vld [vmem:[%s5285_s30 + $0xa0] sm:$0xff]  ;;  %v466_v54 = vld [vmem:[%s5285_s30 + $0xa8] sm:$0xff]  ;;  %v5124_v21 = vld [vmem:[%s5245_s22 + $0x1b0] sm:$0xff]  }
  0x27   : > { %2791 = vmatpush1.bf16.msra.mxu1 %v5088_v10  ;;  %2503 = vmatprep.subr.bf16.mxu0 %v5184_v0  ;;  %v4412_v57 = vcombine.high %v461_v49, %v465_v50  ;;  %v4414_v58 = vcombine.high %v462_v53, %v466_v54  ;;  %v469_v61 = vld [vmem:[%s5285_s30 + $0xc0] sm:$0xff]  ;;  %v470_v63 = vld [vmem:[%s5285_s30 + $0xc8] sm:$0xff]  ;;  %v4411_v4 = vcombine.low %v461_v49, %v465_v50 }
  0x28   : > { %2792 = vmatprep.subr.bf16.mxu1 %v5184_v0  ;;  %v473_v62 = vld [vmem:[%s5285_s30 + $0xe0] sm:$0xff]  ;;  %v474_v1 = vld [vmem:[%s5285_s30 + $0xe8] sm:$0xff]  ;;  %v4413_v6 = vcombine.low %v462_v53, %v466_v54  ;;  %v5133_v54 = vld [vmem:[%s5245_s22 + $0x158] sm:$0xff]  }
  0x29   : > { %v5119_v5 = vld [vmem:[%s5245_s22 + $0x120] sm:$0xff]   ;;  %v4420_v7 = vcombine.high %v469_v61, %v473_v62  ;;  %v4422_v9 = vcombine.high %v470_v63, %v474_v1  ;;  %v486_v25 = vld [vmem:[%s5285_s30 + $0x148] sm:$0xff] }
  0x2a   : > { %2504 = vmatpush1.bf16.msra.mxu0 %v5089_v11  ;;  %v5120_v8 = vld [vmem:[%s5245_s22 + $0x1a0] sm:$0xff]   ;;  %v5130_v39 = vld [vmem:[%s5245_s22 + $0x1c8] sm:$0xff]  }
  0x2b   : > { %2793 = vmatpush1.bf16.msra.mxu1 %v5090_v12  ;;  %2505 = vmatprep.subr.bf16.mxu0 %v5184_v0  ;;  %v477_v10 = vld [vmem:[%s5285_s30 + $0x100] sm:$0xff]  ;;  %v478_v12 = vld [vmem:[%s5285_s30 + $0x108] sm:$0xff] }
  0x2c   : > { %2794 = vmatprep.subr.bf16.mxu1 %v5184_v0  ;;  %v481_v11 = vld [vmem:[%s5285_s30 + $0x120] sm:$0xff]  ;;  %v506_v49 = vld [vmem:[%s5285_s30 + $0x1e8] sm:$0xff] }
  0x2d   : > { %v485_v22 = vld [vmem:[%s5285_s30 + $0x140] sm:$0xff] }
  0x2e   : > { %2506 = vmatpush1.bf16.msra.mxu0 %v5091_v13  ;;  %v482_v13 = vld [vmem:[%s5285_s30 + $0x128] sm:$0xff]  ;;  %v489_v23 = vld [vmem:[%s5285_s30 + $0x160] sm:$0xff] }
  0x2f   : > { %2795 = vmatpush1.bf16.msra.mxu1 %v5092_v14  ;;  %2507 = vmatprep.subr.bf16.mxu0 %v5184_v0  ;;  %v5121_v14 = vld [vmem:[%s5245_s22 + $0x128] sm:$0xff]   ;;  %v4430_v19 = vcombine.high %v478_v12, %v482_v13  ;;  %v4435_v40 = vcombine.low %v485_v22, %v489_v23 }
  0x30   : > { %2796 = vmatprep.subr.bf16.mxu1 %v5184_v0 }
  0x32   : > { %2508 = vmatpush1.bf16.msra.mxu0 %v5093_v15  ;;  %v5122_v15 = vld [vmem:[%s5245_s22 + $0x1a8] sm:$0xff]  }
  0x33   : > { %2797 = vmatpush1.bf16.msra.mxu1 %v5094_v16  ;;  %2509 = vmatprep.subr.bf16.mxu0 %v5184_v0  ;;  %v4419_v16 = vcombine.low %v469_v61, %v473_v62 }
  0x34   : > { %2798 = vmatprep.subr.bf16.mxu1 %v5184_v0 }
  0x36   : > { %2510 = vmatpush1.bf16.msra.mxu0 %v5095_v17  ;;  %v4421_v17 = vcombine.low %v470_v63, %v474_v1  ;;  %v517_v1 = vld [vmem:[%s5285_s30 + $0x240] sm:$0xff] }
  0x37   : > { %2799 = vmatpush1.bf16.msra.mxu1 %v5096_v18  ;;  %2511 = vmatprep.subr.bf16.mxu0 %v5184_v0  ;;  %v4428_v18 = vcombine.high %v477_v10, %v481_v11 }
  0x38   : > { %2800 = vmatprep.subr.bf16.mxu1 %v5184_v0 }
  0x3a   : > { %2512 = vmatpush1.bf16.msra.mxu0 %v5097_v24  ;;  %v5125_v24 = vld [vmem:[%s5245_s22 + $0x138] sm:$0xff]  }
  0x3b   : > { %2801 = vmatpush1.bf16.msra.mxu1 %v5098_v26  ;;  %2513 = vmatprep.subr.bf16.mxu0 %v5184_v0  ;;  %v490_v26 = vld [vmem:[%s5285_s30 + $0x168] sm:$0xff] }
  0x3c   : > { %2802 = vmatprep.subr.bf16.mxu1 %v5184_v0  ;;  %v4437_v41 = vcombine.low %v486_v25, %v490_v26 }
  0x3e   : > { %2514 = vmatpush1.bf16.msra.mxu0 %v5099_v27  ;;  %v5126_v27 = vld [vmem:[%s5245_s22 + $0x1b8] sm:$0xff]  }
  0x3f   : > { %2803 = vmatpush1.bf16.msra.mxu1 %v5100_v28  ;;  %2515 = vmatprep.subr.bf16.mxu0 %v5184_v0  ;;  %v4427_v28 = vcombine.low %v477_v10, %v481_v11  ;;  %v5136_v10 = vld [vmem:[%s5245_s22 + $0x1e0] sm:$0xff]  }
  0x40   : > { %2804 = vmatprep.subr.bf16.mxu1 %v5184_v0  ;;  %v525_v11 = vld [vmem:[%s5285_s30 + $0x280] sm:$0xff] }
  0x42   : > { %2516 = vmatpush1.bf16.msra.mxu0 %v5101_v29  ;;  %v4429_v29 = vcombine.low %v478_v12, %v482_v13  ;;  %v529_v12 = vld [vmem:[%s5285_s30 + $0x2a0] sm:$0xff]  ;;  %v526_v13 = vld [vmem:[%s5285_s30 + $0x288] sm:$0xff] }
  0x43   : > { %2805 = vmatpush1.bf16.msra.mxu1 %v5102_v30  ;;  %2517 = vmatprep.subr.bf16.mxu0 %v5184_v0  ;;  %v4436_v30 = vcombine.high %v485_v22, %v489_v23  ;;  %v538_v22 = vld [vmem:[%s5285_s30 + $0x2e8] sm:$0xff]  ;;  %v4475_v23 = vcombine.low %v525_v11, %v529_v12 }
  0x44   : > { %2806 = vmatprep.subr.bf16.mxu1 %v5184_v0 }
  0x46   : > { %2518 = vmatpush1.bf16.msra.mxu0 %v5103_v31  ;;  %v4438_v31 = vcombine.high %v486_v25, %v490_v26 }
  0x47   : > { %2807 = vmatpush1.bf16.msra.mxu1 %v5104_v32  ;;  %2519 = vmatprep.subr.bf16.mxu0 %v5184_v0  ;;  %v5127_v32 = vld [vmem:[%s5245_s22 + $0x140] sm:$0xff]  }
  0x48   : > { %2808 = vmatprep.subr.bf16.mxu1 %v5184_v0 }
  0x4a   : > { %2520 = vmatpush1.bf16.msra.mxu0 %v5105_v33  ;;  %v5128_v33 = vld [vmem:[%s5245_s22 + $0x1c0] sm:$0xff]  }
  0x4b   : > { %2809 = vmatpush1.bf16.msra.mxu1 %v5106_v34  ;;  %2521 = vmatprep.subr.bf16.mxu0 %v5184_v0  ;;  %v493_v34 = vld [vmem:[%s5285_s30 + $0x180] sm:$0xff] }
  0x4c   : > { %2810 = vmatprep.subr.bf16.mxu1 %v5184_v0 }
  0x4e   : > { %2522 = vmatpush1.bf16.msra.mxu0 %v5107_v35  ;;  %v497_v35 = vld [vmem:[%s5285_s30 + $0x1a0] sm:$0xff] }
  0x4f   : > { %2811 = vmatpush1.bf16.msra.mxu1 %v5108_v36  ;;  %2523 = vmatprep.subr.bf16.mxu0 %v5184_v0  ;;  %v5129_v36 = vld [vmem:[%s5245_s22 + $0x148] sm:$0xff]   ;;  %v4443_v50 = vcombine.low %v493_v34, %v497_v35 }
  0x50   : > { %2812 = vmatprep.subr.bf16.mxu1 %v5184_v0 }
  0x52   : > { %2524 = vmatpush1.bf16.msra.mxu0 %v5109_v37  ;;  %v494_v37 = vld [vmem:[%s5285_s30 + $0x188] sm:$0xff] }
  0x53   : > { %2813 = vmatpush1.bf16.msra.mxu1 %v5110_v38  ;;  %3071 = vmatprep.subr.bf16.mxu0 %v5184_v0  ;;  %v498_v38 = vld [vmem:[%s5285_s30 + $0x1a8] sm:$0xff] }
  0x54   : > { %3360 = vmatprep.subr.bf16.mxu1 %v5184_v0  ;;  %v4446_v43 = vcombine.high %v494_v37, %v498_v38 }
  0x55   : > { %2526 = vmatmul.mubr.bf16.vlgmr.msra.gmra.mrb[0].mxu0 %v4395_v42  ;;  %v4444_v42 = vcombine.high %v493_v34, %v497_v35  ;;  %v5138_v35 = vld [vmem:[%s5245_s22 + $0x1e8] sm:$0xff]  }
  0x56   : > { %2815 = vmatmul.mubr.bf16.vlgmr.msra.gmra.mrb[0].mxu1 %v4397_v44  ;;  %3072 = vmatpush1.bf16.msra.mxu0 %v5111_v45  ;;  %v5131_v44 = vld [vmem:[%s5245_s22 + $0x150] sm:$0xff]  }
  0x57   : > { %3361 = vmatpush1.bf16.msra.mxu1 %v5112_v46  ;;  %2533 = vmatprep.mubr.bf16.mxu0 %v4404_v47  ;;  %v5132_v45 = vld [vmem:[%s5245_s22 + $0x1d0] sm:$0xff]   ;;  %v501_v46 = vld [vmem:[%s5285_s30 + $0x1c0] sm:$0xff] }
  0x58   : > { %2822 = vmatprep.mubr.bf16.mxu1 %v4406_v48  ;;  %3073 = vmatprep.subr.bf16.mxu0 %v5184_v0  ;;  %v505_v47 = vld [vmem:[%s5285_s30 + $0x1e0] sm:$0xff]  ;;  %v502_v48 = vld [vmem:[%s5285_s30 + $0x1c8] sm:$0xff] }
  0x59   : > { %3362 = vmatprep.subr.bf16.mxu1 %v5184_v0  ;;  %v4454_v53 = vcombine.high %v502_v48, %v506_v49  ;;  %v4453_v61 = vcombine.low %v502_v48, %v506_v49  ;;  %v558_v48 = vld [vmem:[%s5285_s30 + $0x388] sm:$0xff] }
  0x5a   : > { %3074 = vmatpush1.bf16.msra.mxu0 %v5113_v51  ;;  %v4445_v51 = vcombine.low %v494_v37, %v498_v38  ;;  %v549_v37 = vld [vmem:[%s5285_s30 + $0x340] sm:$0xff]  ;;  %v562_v49 = vld [vmem:[%s5285_s30 + $0x3a8] sm:$0xff] }
  0x5b   : > { %3363 = vmatpush1.bf16.msra.mxu1 %v5114_v52  ;;  %3075 = vmatprep.subr.bf16.mxu0 %v5184_v0  ;;  %v4452_v52 = vcombine.high %v501_v46, %v505_v47  ;;  %v553_v38 = vld [vmem:[%s5285_s30 + $0x360] sm:$0xff] }
  0x5c   : > { %3364 = vmatprep.subr.bf16.mxu1 %v5184_v0 }
  0x5d   : > { %2534 = vmatmul.mubr.bf16.gmra.mrb[4].mxu0 %v4403_v55  ;;  %v5134_v55 = vld [vmem:[%s5245_s22 + $0x1d8] sm:$0xff]  }
  0x5e   : > { %2823 = vmatmul.mubr.bf16.gmra.mrb[4].mxu1 %v4405_v56  ;;  %2541 = vmatprep.mubr.bf16.mxu0 %v4412_v57  ;;  %v509_v56 = vld [vmem:[%s5285_s30 + $0x200] sm:$0xff] }
  0x5f   : > { %2830 = vmatprep.mubr.bf16.mxu1 %v4414_v58  ;;  %3076 = vmatpush1.bf16.msra.mxu0 %v5115_v59  ;;  %v513_v57 = vld [vmem:[%s5285_s30 + $0x220] sm:$0xff]  ;;  %v510_v58 = vld [vmem:[%s5285_s30 + $0x208] sm:$0xff] }
  0x60   : > { %3365 = vmatpush1.bf16.msra.mxu1 %v5116_v60  ;;  %3077 = vmatprep.subr.bf16.mxu0 %v5184_v0  ;;  %v514_v59 = vld [vmem:[%s5285_s30 + $0x228] sm:$0xff]  ;;  %v4451_v60 = vcombine.low %v501_v46, %v505_v47  ;;  %v4460_v62 = vcombine.high %v509_v56, %v513_v57  ;;  %v557_v46 = vld [vmem:[%s5285_s30 + $0x380] sm:$0xff] }
  0x61   : > { %3366 = vmatprep.subr.bf16.mxu1 %v5184_v0  ;;  %v4462_v63 = vcombine.high %v510_v58, %v514_v59  ;;  %v561_v47 = vld [vmem:[%s5285_s30 + $0x3a0] sm:$0xff] }
  0x63   : > { %3078 = vmatpush1.bf16.msra.mxu0 %v5117_v2  ;;  %v521_v2 = vld [vmem:[%s5285_s30 + $0x260] sm:$0xff] }
  0x64   : > { %3367 = vmatpush1.bf16.msra.mxu1 %v5118_v3  ;;  %3079 = vmatprep.subr.bf16.mxu0 %v5184_v0  ;;  %v518_v3 = vld [vmem:[%s5285_s30 + $0x248] sm:$0xff] }
  0x65   : > { %2542 = vmatmul.mubr.bf16.gmra.mrb[8].mxu0 %v4411_v4  ;;  %3368 = vmatprep.subr.bf16.mxu1 %v5184_v0  ;;  %v522_v4 = vld [vmem:[%s5285_s30 + $0x268] sm:$0xff] }
  0x66   : > { %2831 = vmatmul.mubr.bf16.gmra.mrb[8].mxu1 %v4413_v6  ;;  %2549 = vmatprep.mubr.bf16.mxu0 %v4420_v7  ;;  %v4461_v6 = vcombine.low %v510_v58, %v514_v59  ;;  %v4468_v7 = vcombine.high %v517_v1, %v521_v2  ;;  %v570_v58 = vld [vmem:[%s5285_s30 + $0x3e8] sm:$0xff]  ;;  %v4507_v59 = vcombine.low %v557_v46, %v561_v47 }
  0x67   : > { %2838 = vmatprep.mubr.bf16.mxu1 %v4422_v9  ;;  %3080 = vmatpush1.bf16.msra.mxu0 %v5119_v5  ;;  %v4459_v5 = vcombine.low %v509_v56, %v513_v57  ;;  %v5135_v9 = vld [vmem:[%s5245_s22 + $0x160] sm:$0xff]   ;;  %v566_v57 = vld [vmem:[%s5285_s30 + $0x3c8] sm:$0xff] }
  0x68   : > { %3369 = vmatpush1.bf16.msra.mxu1 %v5120_v8  ;;  %3081 = vmatprep.subr.bf16.mxu0 %v5184_v0  ;;  %v4470_v8 = vcombine.high %v518_v3, %v522_v4  ;;  %v569_v56 = vld [vmem:[%s5285_s30 + $0x3e0] sm:$0xff] }
  0x69   : > { %3370 = vmatprep.subr.bf16.mxu1 %v5184_v0 }
  0x6b   : > { %3082 = vmatpush1.bf16.msra.mxu0 %v5121_v14  ;;  %v530_v14 = vld [vmem:[%s5285_s30 + $0x2a8] sm:$0xff] }
  0x6c   : > { %3371 = vmatpush1.bf16.msra.mxu1 %v5122_v15  ;;  %3083 = vmatprep.subr.bf16.mxu0 %v5184_v0  ;;  %v4467_v15 = vcombine.low %v517_v1, %v521_v2  ;;  %v577_v1 = vld [vmem:[%s5285_s30 + $0x420] sm:$0xff]  ;;  %v574_v2 = vld [vmem:[%s5285_s30 + $0x408] sm:$0xff] }
  0x6d   : > { %2550 = vmatmul.mubr.bf16.gmra.mrb[12].mxu0 %v4419_v16  ;;  %3372 = vmatprep.subr.bf16.mxu1 %v5184_v0  ;;  %v4469_v16 = vcombine.low %v518_v3, %v522_v4  ;;  %v578_v3 = vld [vmem:[%s5285_s30 + $0x428] sm:$0xff] }
  0x6e   : > { %2839 = vmatmul.mubr.bf16.gmra.mrb[12].mxu1 %v4421_v17  ;;  %2557 = vmatprep.mubr.bf16.mxu0 %v4428_v18  ;;  %v4476_v17 = vcombine.high %v525_v11, %v529_v12  ;;  %v4478_v18 = vcombine.high %v526_v13, %v530_v14  ;;  %v582_v11 = vld [vmem:[%s5285_s30 + $0x448] sm:$0xff] }
  0x6f   : > { %2846 = vmatprep.mubr.bf16.mxu1 %v4430_v19  ;;  %3084 = vmatpush1.bf16.msra.mxu0 %v5123_v20  ;;  %v533_v19 = vld [vmem:[%s5285_s30 + $0x2c0] sm:$0xff]  ;;  %v586_v12 = vld [vmem:[%s5285_s30 + $0x468] sm:$0xff] }
  0x70   : > { %3373 = vmatpush1.bf16.msra.mxu1 %v5124_v21  ;;  %3085 = vmatprep.subr.bf16.mxu0 %v5184_v0  ;;  %v537_v20 = vld [vmem:[%s5285_s30 + $0x2e0] sm:$0xff]  ;;  %v534_v21 = vld [vmem:[%s5285_s30 + $0x2c8] sm:$0xff] }
  0x71   : > { %3374 = vmatprep.subr.bf16.mxu1 %v5184_v0  ;;  %v4484_v25 = vcombine.high %v533_v19, %v537_v20  ;;  %v4486_v26 = vcombine.high %v534_v21, %v538_v22 }
  0x73   : > { %3086 = vmatpush1.bf16.msra.mxu0 %v5125_v24  ;;  %v4477_v24 = vcombine.low %v526_v13, %v530_v14  ;;  %v4525_v14 = vcombine.low %v574_v2, %v578_v3 }
  0x74   : > { %3375 = vmatpush1.bf16.msra.mxu1 %v5126_v27  ;;  %3087 = vmatprep.subr.bf16.mxu0 %v5184_v0  ;;  %v5137_v27 = vld [vmem:[%s5245_s22 + $0x168] sm:$0xff]  }
  0x75   : > { %2558 = vmatmul.mubr.bf16.gmra.mrb[16].mxu0 %v4427_v28  ;;  %3376 = vmatprep.subr.bf16.mxu1 %v5184_v0  ;;  %v541_v28 = vld [vmem:[%s5285_s30 + $0x300] sm:$0xff] }
  0x76   : > { %2847 = vmatmul.mubr.bf16.gmra.mrb[16].mxu1 %v4429_v29  ;;  %2565 = vmatprep.mubr.bf16.mxu0 %v4436_v30  ;;  %v545_v29 = vld [vmem:[%s5285_s30 + $0x320] sm:$0xff]  ;;  %v542_v30 = vld [vmem:[%s5285_s30 + $0x308] sm:$0xff] }
  0x77   : > { %2854 = vmatprep.mubr.bf16.mxu1 %v4438_v31  ;;  %3088 = vmatpush1.bf16.msra.mxu0 %v5127_v32  ;;  %v546_v31 = vld [vmem:[%s5285_s30 + $0x328] sm:$0xff]  ;;  %v4483_v32 = vcombine.low %v533_v19, %v537_v20  ;;  %v4492_v34 = vcombine.high %v541_v28, %v545_v29 }
  0x78   : > { %3377 = vmatpush1.bf16.msra.mxu1 %v5128_v33  ;;  %3089 = vmatprep.subr.bf16.mxu0 %v5184_v0  ;;  %v4485_v33 = vcombine.low %v534_v21, %v538_v22  ;;  %v590_v19 = vld [vmem:[%s5285_s30 + $0x488] sm:$0xff]  ;;  %v4533_v22 = vcombine.low %v582_v11, %v586_v12 }
  0x79   : > { %3378 = vmatprep.subr.bf16.mxu1 %v5184_v0  ;;  %v594_v20 = vld [vmem:[%s5285_s30 + $0x4a8] sm:$0xff] }
  0x7b   : > { %3090 = vmatpush1.bf16.msra.mxu0 %v5129_v36  ;;  %v4494_v36 = vcombine.high %v542_v30, %v546_v31 }
  0x7c   : > { %3379 = vmatpush1.bf16.msra.mxu1 %v5130_v39  ;;  %3091 = vmatprep.subr.bf16.mxu0 %v5184_v0  ;;  %v550_v39 = vld [vmem:[%s5285_s30 + $0x348] sm:$0xff] }
  0x7d   : > { %2566 = vmatmul.mubr.bf16.gmra.mrb[20].mxu0 %v4435_v40  ;;  %3380 = vmatprep.subr.bf16.mxu1 %v5184_v0  ;;  %v554_v40 = vld [vmem:[%s5285_s30 + $0x368] sm:$0xff] }
  0x7e   : > { %2855 = vmatmul.mubr.bf16.gmra.mrb[20].mxu1 %v4437_v41  ;;  %2573 = vmatprep.mubr.bf16.mxu0 %v4444_v42  ;;  %v4491_v41 = vcombine.low %v541_v28, %v545_v29  ;;  %v4493_v42 = vcombine.low %v542_v30, %v546_v31  ;;  %v602_v28 = vld [vmem:[%s5285_s30 + $0x4e8] sm:$0xff]  ;;  %v4541_v30 = vcombine.low %v590_v19, %v594_v20 }
  0x7f   : > { %2862 = vmatprep.mubr.bf16.mxu1 %v4446_v43  ;;  %3092 = vmatpush1.bf16.msra.mxu0 %v5131_v44  ;;  %v4500_v43 = vcombine.high %v549_v37, %v553_v38  ;;  %v4502_v44 = vcombine.high %v550_v39, %v554_v40 }
  0x80   : > { %3381 = vmatpush1.bf16.msra.mxu1 %v5132_v45  ;;  %3093 = vmatprep.subr.bf16.mxu0 %v5184_v0  ;;  %v5139_v45 = vld [vmem:[%s5245_s22 + $0x170] sm:$0xff]  }
  0x81   : > { %3382 = vmatprep.subr.bf16.mxu1 %v5184_v0 }
  0x83   : > { %3094 = vmatpush1.bf16.msra.mxu0 %v5133_v54  ;;  %v4510_v54 = vcombine.high %v558_v48, %v562_v49 }
  0x84   : > { %3383 = vmatpush1.bf16.msra.mxu1 %v5134_v55  ;;  %3095 = vmatprep.subr.bf16.mxu0 %v5184_v0  ;;  %v565_v55 = vld [vmem:[%s5285_s30 + $0x3c0] sm:$0xff] }
  0x85   : > { %2574 = vmatmul.mubr.bf16.gmra.mrb[24].mxu0 %v4443_v50  ;;  %3384 = vmatprep.subr.bf16.mxu1 %v5184_v0  ;;  %v4499_v50 = vcombine.low %v549_v37, %v553_v38  ;;  %v4515_v4 = vcombine.low %v565_v55, %v569_v56 }
  0x86   : > { %2863 = vmatmul.mubr.bf16.gmra.mrb[24].mxu1 %v4445_v51  ;;  %2581 = vmatprep.mubr.bf16.mxu0 %v4452_v52  ;;  %v4501_v51 = vcombine.low %v550_v39, %v554_v40  ;;  %v4508_v52 = vcombine.high %v557_v46, %v561_v47 }
  0x87   : > { %2870 = vmatprep.mubr.bf16.mxu1 %v4454_v53  ;;  %3096 = vmatpush1.bf16.msra.mxu0 %v5135_v9  ;;  %v5140_v53 = vld [vmem:[%s5245_s22 + $0x1f0] sm:$0xff]   ;;  %v581_v9 = vld [vmem:[%s5285_s30 + $0x440] sm:$0xff] }
  0x88   : > { %3385 = vmatpush1.bf16.msra.mxu1 %v5136_v10  ;;  %3097 = vmatprep.subr.bf16.mxu0 %v5184_v0  ;;  %v585_v10 = vld [vmem:[%s5285_s30 + $0x460] sm:$0xff] }
  0x89   : > { %3386 = vmatprep.subr.bf16.mxu1 %v5184_v0  ;;  %v4531_v21 = vcombine.low %v581_v9, %v585_v10 }
  0x8b   : > { %3098 = vmatpush1.bf16.msra.mxu0 %v5137_v27  ;;  %v598_v27 = vld [vmem:[%s5285_s30 + $0x4c8] sm:$0xff] }
  0x8c   : > { %3099 = vmatprep.subr.bf16.mxu0 %v5184_v0  ;;  %3387 = vmatpush1.bf16.msra.mxu1 %v5138_v35  ;;  %v606_v35 = vld [vmem:[%s5285_s30 + $0x508] sm:$0xff]  ;;  %v4549_v38 = vcombine.low %v598_v27, %v602_v28 }
  0x8d   : > { %2582 = vmatmul.mubr.bf16.gmra.mrb[28].mxu0 %v4451_v60  ;;  %3388 = vmatprep.subr.bf16.mxu1 %v5184_v0  ;;  %v4509_v60 = vcombine.low %v558_v48, %v562_v49  ;;  %v621_v49 = vld [vmem:[%s5285_s30 + $0x580] sm:$0xff] }
  0x8e   : > { %2871 = vmatmul.mubr.bf16.gmra.mrb[28].mxu1 %v4453_v61  ;;  %2589 = vmatprep.mubr.bf16.mxu0 %v4460_v62  ;;  %v4516_v61 = vcombine.high %v565_v55, %v569_v56  ;;  %v4518_v62 = vcombine.high %v566_v57, %v570_v58 }
  0x8f   : > { %2878 = vmatprep.mubr.bf16.mxu1 %v4462_v63  ;;  %3100 = vmatpush1.bf16.msra.mxu0 %v5139_v45  ;;  %v573_v63 = vld [vmem:[%s5285_s30 + $0x400] sm:$0xff] }
  0x90   : > { %3101 = vmatprep.subr.bf16.mxu0 %v5184_v0  ;;  %3389 = vmatpush1.bf16.msra.mxu1 %v5140_v53  ;;  %v4523_v13 = vcombine.low %v573_v63, %v577_v1 }
  0x91   : > { %3390 = vmatprep.subr.bf16.mxu1 %v5184_v0  ;;  %v5141_v0 = vld [vmem:[%s5245_s22 + $0x178] sm:$0xff]  }
  0x93   : > { %3102 = vmatpush1.bf16.msra.mxu0 %v5141_v0 }
  0x95   : > { %2590 = vmatmul.mubr.bf16.gmra.mrb[32].mxu0 %v4459_v5  ;;  %v4517_v5 = vcombine.low %v566_v57, %v570_v58  ;;  %v629_v57 = vld [vmem:[%s5285_s30 + $0x5c0] sm:$0xff] }
  0x96   : > { %2879 = vmatmul.mubr.bf16.gmra.mrb[32].mxu1 %v4461_v6  ;;  %2597 = vmatprep.mubr.bf16.mxu0 %v4468_v7  ;;  %v4524_v6 = vcombine.high %v573_v63, %v577_v1  ;;  %v5142_v7 = vld [vmem:[%s5245_s22 + $0x1f8] sm:$0xff]   ;;  %v633_v58 = vld [vmem:[%s5285_s30 + $0x5e0] sm:$0xff] }
  0x97   : > { %2886 = vmatprep.mubr.bf16.mxu1 %v4470_v8  ;;  %v4526_v8 = vcombine.high %v574_v2, %v578_v3  ;;  %3391 = vmatpush1.bf16.msra.mxu1 %v5142_v7  ;;  %v4580_v0 = vcombine.high %v629_v57, %v633_v58  ;;  %v637_v1 = vld [vmem:[%s5285_s30 + $0x600] sm:$0xff]  ;;  %v638_v3 = vld [vmem:[%s5285_s30 + $0x608] sm:$0xff] }
  0x98   : > { %v641_v2 = vld [vmem:[%s5285_s30 + $0x620] sm:$0xff] }
  0x99   : > { %v4588_v7 = vcombine.high %v637_v1, %v641_v2 }
  0x9d   : > { %2598 = vmatmul.mubr.bf16.gmra.mrb[36].mxu0 %v4467_v15  ;;  %v4532_v15 = vcombine.high %v581_v9, %v585_v10  ;;  %v645_v9 = vld [vmem:[%s5285_s30 + $0x640] sm:$0xff] }
  0x9e   : > { %2887 = vmatmul.mubr.bf16.gmra.mrb[36].mxu1 %v4469_v16  ;;  %2605 = vmatprep.mubr.bf16.mxu0 %v4476_v17  ;;  %v4534_v16 = vcombine.high %v582_v11, %v586_v12  ;;  %v589_v17 = vld [vmem:[%s5285_s30 + $0x480] sm:$0xff]  ;;  %v646_v11 = vld [vmem:[%s5285_s30 + $0x648] sm:$0xff] }
  0x9f   : > { %2894 = vmatprep.mubr.bf16.mxu1 %v4478_v18  ;;  %v593_v18 = vld [vmem:[%s5285_s30 + $0x4a0] sm:$0xff]  ;;  %v650_v12 = vld [vmem:[%s5285_s30 + $0x668] sm:$0xff] }
  0xa0   : > { %v4539_v29 = vcombine.low %v589_v17, %v593_v18  ;;  %v649_v10 = vld [vmem:[%s5285_s30 + $0x660] sm:$0xff] }
  0xa5   : > { %2606 = vmatmul.mubr.bf16.gmra.mrb[40].mxu0 %v4475_v23  ;;  %v4540_v23 = vcombine.high %v589_v17, %v593_v18  ;;  %v653_v17 = vld [vmem:[%s5285_s30 + $0x680] sm:$0xff] }
  0xa6   : > { %2895 = vmatmul.mubr.bf16.gmra.mrb[40].mxu1 %v4477_v24  ;;  %2613 = vmatprep.mubr.bf16.mxu0 %v4484_v25  ;;  %v4542_v24 = vcombine.high %v590_v19, %v594_v20  ;;  %v597_v25 = vld [vmem:[%s5285_s30 + $0x4c0] sm:$0xff]  ;;  %v654_v19 = vld [vmem:[%s5285_s30 + $0x688] sm:$0xff] }
  0xa7   : > { %2902 = vmatprep.mubr.bf16.mxu1 %v4486_v26  ;;  %v601_v26 = vld [vmem:[%s5285_s30 + $0x4e0] sm:$0xff]  ;;  %v658_v20 = vld [vmem:[%s5285_s30 + $0x6a8] sm:$0xff] }
  0xa8   : > { %v4548_v31 = vcombine.high %v597_v25, %v601_v26  ;;  %v4547_v37 = vcombine.low %v597_v25, %v601_v26  ;;  %v657_v18 = vld [vmem:[%s5285_s30 + $0x6a0] sm:$0xff] }
  0xa9   : > { %v661_v25 = vld [vmem:[%s5285_s30 + $0x6c0] sm:$0xff] }
  0xaa   : > { %v665_v26 = vld [vmem:[%s5285_s30 + $0x6e0] sm:$0xff] }
  0xad   : > { %2614 = vmatmul.mubr.bf16.gmra.mrb[44].mxu0 %v4483_v32  ;;  %v4550_v32 = vcombine.high %v598_v27, %v602_v28  ;;  %v662_v27 = vld [vmem:[%s5285_s30 + $0x6c8] sm:$0xff] }
  0xae   : > { %2903 = vmatmul.mubr.bf16.gmra.mrb[44].mxu1 %v4485_v33  ;;  %2621 = vmatprep.mubr.bf16.mxu0 %v4492_v34  ;;  %v605_v33 = vld [vmem:[%s5285_s30 + $0x500] sm:$0xff]  ;;  %v666_v28 = vld [vmem:[%s5285_s30 + $0x6e8] sm:$0xff] }
  0xaf   : > { %2910 = vmatprep.mubr.bf16.mxu1 %v4494_v36  ;;  %v609_v34 = vld [vmem:[%s5285_s30 + $0x520] sm:$0xff]  ;;  %v610_v36 = vld [vmem:[%s5285_s30 + $0x528] sm:$0xff] }
  0xb0   : > { %v4556_v39 = vcombine.high %v605_v33, %v609_v34  ;;  %v4558_v40 = vcombine.high %v606_v35, %v610_v36  ;;  %v4555_v45 = vcombine.low %v605_v33, %v609_v34  ;;  %v4557_v46 = vcombine.low %v606_v35, %v610_v36  ;;  %v669_v33 = vld [vmem:[%s5285_s30 + $0x700] sm:$0xff]  ;;  %v670_v36 = vld [vmem:[%s5285_s30 + $0x708] sm:$0xff] }
  0xb1   : > { %v673_v34 = vld [vmem:[%s5285_s30 + $0x720] sm:$0xff] }
  0xb5   : > { %2622 = vmatmul.mubr.bf16.gmra.mrb[48].mxu0 %v4491_v41  ;;  %v613_v41 = vld [vmem:[%s5285_s30 + $0x540] sm:$0xff] }
  0xb6   : > { %2911 = vmatmul.mubr.bf16.gmra.mrb[48].mxu1 %v4493_v42  ;;  %2629 = vmatprep.mubr.bf16.mxu0 %v4500_v43  ;;  %v617_v42 = vld [vmem:[%s5285_s30 + $0x560] sm:$0xff]  ;;  %v614_v43 = vld [vmem:[%s5285_s30 + $0x548] sm:$0xff] }
  0xb7   : > { %2918 = vmatprep.mubr.bf16.mxu1 %v4502_v44  ;;  %v618_v44 = vld [vmem:[%s5285_s30 + $0x568] sm:$0xff]  ;;  %v4564_v47 = vcombine.high %v613_v41, %v617_v42  ;;  %v4563_v53 = vcombine.low %v613_v41, %v617_v42 }
  0xb8   : > { %v4566_v48 = vcombine.high %v614_v43, %v618_v44 }
  0xbd   : > { %2630 = vmatmul.mubr.bf16.gmra.mrb[52].mxu0 %v4499_v50  ;;  %v625_v50 = vld [vmem:[%s5285_s30 + $0x5a0] sm:$0xff] }
  0xbe   : > { %2919 = vmatmul.mubr.bf16.gmra.mrb[52].mxu1 %v4501_v51  ;;  %2637 = vmatprep.mubr.bf16.mxu0 %v4508_v52  ;;  %v622_v51 = vld [vmem:[%s5285_s30 + $0x588] sm:$0xff]  ;;  %v4572_v55 = vcombine.high %v621_v49, %v625_v50 }
  0xbf   : > { %2926 = vmatprep.mubr.bf16.mxu1 %v4510_v54  ;;  %v626_v52 = vld [vmem:[%s5285_s30 + $0x5a8] sm:$0xff]  ;;  %v4565_v54 = vcombine.low %v614_v43, %v618_v44  ;;  %v4613_v44 = vcombine.low %v662_v27, %v666_v28 }
  0xc0   : > { %v4574_v56 = vcombine.high %v622_v51, %v626_v52 }
  0xc5   : > { %2638 = vmatmul.mubr.bf16.gmra.mrb[56].mxu0 %v4507_v59  ;;  %v630_v59 = vld [vmem:[%s5285_s30 + $0x5c8] sm:$0xff] }
  0xc6   : > { %2927 = vmatmul.mubr.bf16.gmra.mrb[56].mxu1 %v4509_v60  ;;  %2645 = vmatprep.mubr.bf16.mxu0 %v4516_v61  ;;  %v634_v60 = vld [vmem:[%s5285_s30 + $0x5e8] sm:$0xff]  ;;  %v4571_v61 = vcombine.low %v621_v49, %v625_v50 }
  0xc7   : > { %2934 = vmatprep.mubr.bf16.mxu1 %v4518_v62  ;;  %v4573_v62 = vcombine.low %v622_v51, %v626_v52  ;;  %v4582_v63 = vcombine.high %v630_v59, %v634_v60  ;;  %v677_v51 = vld [vmem:[%s5285_s30 + $0x740] sm:$0xff] }
  0xc8   : > { %v681_v52 = vld [vmem:[%s5285_s30 + $0x760] sm:$0xff] }
  0xcd   : > { %2646 = vmatmul.mubr.bf16.gmra.mrb[60].mxu0 %v4515_v4  ;;  %v642_v4 = vld [vmem:[%s5285_s30 + $0x628] sm:$0xff] }
  0xce   : > { %2935 = vmatmul.mubr.bf16.gmra.mrb[60].mxu1 %v4517_v5  ;;  %2653 = vmatprep.mubr.bf16.mxu0 %v4524_v6  ;;  %v4579_v5 = vcombine.low %v629_v57, %v633_v58  ;;  %v4581_v6 = vcombine.low %v630_v59, %v634_v60  ;;  %v4619_v58 = vcombine.low %v669_v33, %v673_v34 }
  0xcf   : > { %2942 = vmatprep.mubr.bf16.mxu1 %v4526_v8  ;;  %v4590_v8 = vcombine.high %v638_v3, %v642_v4 }
  0xd5   : > { %2654 = vmatmul.mubr.bf16.gmra.mrb[64].mxu0 %v4523_v13  ;;  %v4587_v13 = vcombine.low %v637_v1, %v641_v2 }
  0xd6   : > { %2943 = vmatmul.mubr.bf16.gmra.mrb[64].mxu1 %v4525_v14  ;;  %2661 = vmatprep.mubr.bf16.mxu0 %v4532_v15  ;;  %v4589_v14 = vcombine.low %v638_v3, %v642_v4  ;;  %v4596_v15 = vcombine.high %v645_v9, %v649_v10 }
  0xd7   : > { %2950 = vmatprep.mubr.bf16.mxu1 %v4534_v16  ;;  %v4598_v16 = vcombine.high %v646_v11, %v650_v12 }
  0xdd   : > { %2662 = vmatmul.mubr.bf16.gmra.mrb[68].mxu0 %v4531_v21  ;;  %v4595_v21 = vcombine.low %v645_v9, %v649_v10  ;;  %v690_v9 = vld [vmem:[%s5285_s30 + $0x7a8] sm:$0xff] }
  0xde   : > { %2951 = vmatmul.mubr.bf16.gmra.mrb[68].mxu1 %v4533_v22  ;;  %2669 = vmatprep.mubr.bf16.mxu0 %v4540_v23  ;;  %v4597_v22 = vcombine.low %v646_v11, %v650_v12  ;;  %v4604_v23 = vcombine.high %v653_v17, %v657_v18  ;;  %v4627_v12 = vcombine.low %v677_v51, %v681_v52 }
  0xdf   : > { %2958 = vmatprep.mubr.bf16.mxu1 %v4542_v24  ;;  %v4606_v24 = vcombine.high %v654_v19, %v658_v20 }
  0xe5   : > { %2670 = vmatmul.mubr.bf16.gmra.mrb[72].mxu0 %v4539_v29  ;;  %v4603_v29 = vcombine.low %v653_v17, %v657_v18 }
  0xe6   : > { %2959 = vmatmul.mubr.bf16.gmra.mrb[72].mxu1 %v4541_v30  ;;  %2677 = vmatprep.mubr.bf16.mxu0 %v4548_v31  ;;  %v4605_v30 = vcombine.low %v654_v19, %v658_v20  ;;  %v4612_v31 = vcombine.high %v661_v25, %v665_v26 }
  0xe7   : > { %2966 = vmatprep.mubr.bf16.mxu1 %v4550_v32  ;;  %v4614_v32 = vcombine.high %v662_v27, %v666_v28  ;;  %v698_v27 = vld [vmem:[%s5285_s30 + $0x7e8] sm:$0xff] }
  0xed   : > { %2678 = vmatmul.mubr.bf16.gmra.mrb[76].mxu0 %v4547_v37  ;;  %v674_v37 = vld [vmem:[%s5285_s30 + $0x728] sm:$0xff] }
  0xee   : > { %2967 = vmatmul.mubr.bf16.gmra.mrb[76].mxu1 %v4549_v38  ;;  %2685 = vmatprep.mubr.bf16.mxu0 %v4556_v39 }
  0xef   : > { %2974 = vmatprep.mubr.bf16.mxu1 %v4558_v40  ;;  %v4611_v40 = vcombine.low %v661_v25, %v665_v26  ;;  %v694_v26 = vld [vmem:[%s5285_s30 + $0x7c8] sm:$0xff] }
  0xf5   : > { %2686 = vmatmul.mubr.bf16.gmra.mrb[80].mxu0 %v4555_v45  ;;  %v4620_v45 = vcombine.high %v669_v33, %v673_v34 }
  0xf6   : > { %2975 = vmatmul.mubr.bf16.gmra.mrb[80].mxu1 %v4557_v46  ;;  %2693 = vmatprep.mubr.bf16.mxu0 %v4564_v47 }
  0xf7   : > { %2982 = vmatprep.mubr.bf16.mxu1 %v4566_v48  ;;  %v4622_v48 = vcombine.high %v670_v36, %v674_v37 }
  0xfd   : > { %2694 = vmatmul.mubr.bf16.gmra.mrb[84].mxu0 %v4563_v53 }
  0xfe   : > { %2983 = vmatmul.mubr.bf16.gmra.mrb[84].mxu1 %v4565_v54  ;;  %2701 = vmatprep.mubr.bf16.mxu0 %v4572_v55  ;;  %v678_v54 = vld [vmem:[%s5285_s30 + $0x748] sm:$0xff] }
  0xff   : > { %2990 = vmatprep.mubr.bf16.mxu1 %v4574_v56  ;;  %v682_v55 = vld [vmem:[%s5285_s30 + $0x768] sm:$0xff] }
 0x100   : > { %v4630_v2 = vcombine.high %v678_v54, %v682_v55 }
 0x105   : > { %2702 = vmatmul.mubr.bf16.gmra.mrb[88].mxu0 %v4571_v61 }
 0x106   : > { %2991 = vmatmul.mubr.bf16.gmra.mrb[88].mxu1 %v4573_v62  ;;  %2709 = vmatprep.mubr.bf16.mxu0 %v4580_v0  ;;  %v4621_v62 = vcombine.low %v670_v36, %v674_v37  ;;  %v4628_v0 = vcombine.high %v677_v51, %v681_v52 }
 0x107   : > { %2998 = vmatprep.mubr.bf16.mxu1 %v4582_v63 }
 0x10d   : > { %2710 = vmatmul.mubr.bf16.gmra.mrb[92].mxu0 %v4579_v5  ;;  %v685_v5 = vld [vmem:[%s5285_s30 + $0x780] sm:$0xff] }
 0x10e   : > { %2999 = vmatmul.mubr.bf16.gmra.mrb[92].mxu1 %v4581_v6  ;;  %2717 = vmatprep.mubr.bf16.mxu0 %v4588_v7  ;;  %v689_v6 = vld [vmem:[%s5285_s30 + $0x7a0] sm:$0xff] }
 0x10f   : > { %3006 = vmatprep.mubr.bf16.mxu1 %v4590_v8  ;;  %v686_v8 = vld [vmem:[%s5285_s30 + $0x788] sm:$0xff]  ;;  %v4636_v17 = vcombine.high %v685_v5, %v689_v6 }
 0x110   : > { %v4638_v20 = vcombine.high %v686_v8, %v690_v9  ;;  %v4637_v34 = vcombine.low %v686_v8, %v690_v9 }
 0x115   : > { %2718 = vmatmul.mubr.bf16.gmra.mrb[96].mxu0 %v4587_v13 }
 0x116   : > { %3007 = vmatmul.mubr.bf16.gmra.mrb[96].mxu1 %v4589_v14  ;;  %2725 = vmatprep.mubr.bf16.mxu0 %v4596_v15 }
 0x117   : > { %3014 = vmatprep.mubr.bf16.mxu1 %v4598_v16  ;;  %v4629_v16 = vcombine.low %v678_v54, %v682_v55  ;;  %v4645_v54 = vcombine.low %v694_v26, %v698_v27 }
 0x11d   : > { %2726 = vmatmul.mubr.bf16.gmra.mrb[100].mxu0 %v4595_v21 }
 0x11e   : > { %3015 = vmatmul.mubr.bf16.gmra.mrb[100].mxu1 %v4597_v22  ;;  %2733 = vmatprep.mubr.bf16.mxu0 %v4604_v23  ;;  %v693_v23 = vld [vmem:[%s5285_s30 + $0x7c0] sm:$0xff] }
 0x11f   : > { %3022 = vmatprep.mubr.bf16.mxu1 %v4606_v24  ;;  %v697_v24 = vld [vmem:[%s5285_s30 + $0x7e0] sm:$0xff] }
 0x125   : > { %2734 = vmatmul.mubr.bf16.gmra.mrb[104].mxu0 %v4603_v29 }
 0x126   : > { %3023 = vmatmul.mubr.bf16.gmra.mrb[104].mxu1 %v4605_v30  ;;  %2741 = vmatprep.mubr.bf16.mxu0 %v4612_v31  ;;  %v4635_v30 = vcombine.low %v685_v5, %v689_v6 }
 0x127   : > { %3030 = vmatprep.mubr.bf16.mxu1 %v4614_v32 }
 0x128   : > { %v2527_v35 = vpop.f32.mrb[0].mxu0 }
 0x129   : > { %v2816_v38 = vpop.f32.mrb[0].mxu1  ;;  %v2529_v39 = vpop.f32.mrb[1].mxu0 }
 0x12a   : > { %v5515_v41 = vadd.f32 %v2816_v38, %v2527_v35  ;;  %v2818_v42 = vpop.f32.mrb[1].mxu1  ;;  %v2530_v43 = vpop.f32.mrb[2].mxu0  ;;  %v4644_v35 = vcombine.high %v693_v23, %v697_v24  ;;  %v4646_v38 = vcombine.high %v694_v26, %v698_v27 }
 0x12b   : > { %v2819_v46 = vpop.f32.mrb[2].mxu1  ;;  %v2532_v47 = vpop.f32.mrb[3].mxu0  ;;  %v447_v42 = vld [vmem:[%s5285_s30 + $0x10] sm:$0xff] }
 0x12c   : > { %v5517_v49 = vadd.f32 %v2819_v46, %v2530_v43  ;;  %v2821_v50 = vpop.f32.mrb[3].mxu1  ;;  %v451_v43 = vld [vmem:[%s5285_s30 + $0x30] sm:$0xff]  ;;  %v452_v46 = vld [vmem:[%s5285_s30 + $0x38] sm:$0xff] }
 0x12d   : > { %2742 = vmatmul.mubr.bf16.gmra.mrb[108].mxu0 %v4611_v40  ;;  %v4643_v50 = vcombine.low %v693_v23, %v697_v24  ;;  %v4400_v55 = vcombine.high %v447_v42, %v451_v43  ;;  %v4399_v6 = vcombine.low %v447_v42, %v451_v43  ;;  %v468_v23 = vld [vmem:[%s5285_s30 + $0xb8] sm:$0xff] }
 0x12e   : > { %3031 = vmatmul.mubr.bf16.gmra.mrb[108].mxu1 %v4613_v44  ;;  %2749 = vmatprep.mubr.bf16.mxu0 %v4620_v45  ;;  %v448_v45 = vld [vmem:[%s5285_s30 + $0x18] sm:$0xff] }
 0x12f   : > { %3038 = vmatprep.mubr.bf16.mxu1 %v4622_v48  ;;  %v472_v43 = vld [vmem:[%s5285_s30 + $0xd8] sm:$0xff] }
 0x130   : > { %v2535_v53 = vpop.f32.mrb[4].mxu0 }
 0x131   : > { %v2824_v56 = vpop.f32.mrb[4].mxu1  ;;  %v2537_v57 = vpop.f32.mrb[5].mxu0 }
 0x132   : > { %v5523_v59 = vadd.f32 %v2824_v56, %v2535_v53  ;;  %v2826_v60 = vpop.f32.mrb[5].mxu1  ;;  %v2538_v61 = vpop.f32.mrb[6].mxu0 }
 0x133   : > { %v2827_v63 = vpop.f32.mrb[6].mxu1  ;;  %v2540_v1 = vpop.f32.mrb[7].mxu0 }
 0x134   : > { %v5525_v3 = vadd.f32 %v2827_v63, %v2538_v61  ;;  %v2829_v4 = vpop.f32.mrb[7].mxu1  ;;  %v456_v1 = vld [vmem:[%s5285_s30 + $0x58] sm:$0xff] }
 0x135   : > { %2750 = vmatmul.mubr.bf16.gmra.mrb[112].mxu0 %v4619_v58  ;;  %v4402_v58 = vcombine.high %v448_v45, %v452_v46 }
 0x136   : > { %3039 = vmatmul.mubr.bf16.gmra.mrb[112].mxu1 %v4621_v62  ;;  %2757 = vmatprep.mubr.bf16.mxu0 %v4628_v0  ;;  %v455_v62 = vld [vmem:[%s5285_s30 + $0x50] sm:$0xff] }
 0x137   : > { %3046 = vmatprep.mubr.bf16.mxu1 %v4630_v2  ;;  %v459_v0 = vld [vmem:[%s5285_s30 + $0x70] sm:$0xff]  ;;  %v460_v2 = vld [vmem:[%s5285_s30 + $0x78] sm:$0xff] }
 0x138   : > { %v2543_v7 = vpop.f32.mrb[8].mxu0  ;;  %v4407_v26 = vcombine.low %v455_v62, %v459_v0 }
 0x139   : > { %v2832_v10 = vpop.f32.mrb[8].mxu1  ;;  %v2545_v11 = vpop.f32.mrb[9].mxu0 }
 0x13a   : > { %v5531_v13 = vadd.f32 %v2832_v10, %v2543_v7  ;;  %v2834_v14 = vpop.f32.mrb[9].mxu1  ;;  %v2546_v15 = vpop.f32.mrb[10].mxu0  ;;  %v4401_v10 = vcombine.low %v448_v45, %v452_v46  ;;  %v4408_v11 = vcombine.high %v455_v62, %v459_v0  ;;  %v479_v62 = vld [vmem:[%s5285_s30 + $0x110] sm:$0xff] }
 0x13b   : > { %v2835_v18 = vpop.f32.mrb[10].mxu1  ;;  %v2548_v19 = vpop.f32.mrb[11].mxu0  ;;  %v483_v0 = vld [vmem:[%s5285_s30 + $0x130] sm:$0xff] }
 0x13c   : > { %v5533_v21 = vadd.f32 %v2835_v18, %v2546_v15  ;;  %v2837_v22 = vpop.f32.mrb[11].mxu1  ;;  %v4410_v15 = vcombine.high %v456_v1, %v460_v2  ;;  %v463_v18 = vld [vmem:[%s5285_s30 + $0x90] sm:$0xff] }
 0x13d   : > { %2758 = vmatmul.mubr.bf16.gmra.mrb[116].mxu0 %v4627_v12  ;;  %v467_v19 = vld [vmem:[%s5285_s30 + $0xb0] sm:$0xff]  ;;  %v464_v22 = vld [vmem:[%s5285_s30 + $0x98] sm:$0xff] }
 0x13e   : > { %3047 = vmatmul.mubr.bf16.gmra.mrb[116].mxu1 %v4629_v16  ;;  %2765 = vmatprep.mubr.bf16.mxu0 %v4636_v17 }
 0x13f   : > { %3054 = vmatprep.mubr.bf16.mxu1 %v4638_v20 }
 0x140   : > { %v2551_v25 = vpop.f32.mrb[12].mxu0 }
 0x141   : > { %v2840_v28 = vpop.f32.mrb[12].mxu1  ;;  %v2553_v29 = vpop.f32.mrb[13].mxu0 }
 0x142   : > { %v5539_v31 = vadd.f32 %v2840_v28, %v2551_v25  ;;  %v2842_v32 = vpop.f32.mrb[13].mxu1  ;;  %v2554_v33 = vpop.f32.mrb[14].mxu0 }
 0x143   : > { %v2843_v36 = vpop.f32.mrb[14].mxu1  ;;  %v2556_v37 = vpop.f32.mrb[15].mxu0  ;;  %v4416_v32 = vcombine.high %v463_v18, %v467_v19 }
 0x144   : > { %v5541_v39 = vadd.f32 %v2843_v36, %v2554_v33  ;;  %v2845_v40 = vpop.f32.mrb[15].mxu1 }
 0x145   : > { %2766 = vmatmul.mubr.bf16.gmra.mrb[120].mxu0 %v4635_v30  ;;  %v4409_v30 = vcombine.low %v456_v1, %v460_v2  ;;  %v475_v40 = vld [vmem:[%s5285_s30 + $0xf0] sm:$0xff]  ;;  %v480_v1 = vld [vmem:[%s5285_s30 + $0x118] sm:$0xff] }
 0x146   : > { %3055 = vmatmul.mubr.bf16.gmra.mrb[120].mxu1 %v4637_v34  ;;  %2773 = vmatprep.mubr.bf16.mxu0 %v4644_v35  ;;  %v4418_v35 = vcombine.high %v464_v22, %v468_v23  ;;  %v484_v2 = vld [vmem:[%s5285_s30 + $0x138] sm:$0xff] }
 0x147   : > { %3062 = vmatprep.mubr.bf16.mxu1 %v4646_v38  ;;  %v471_v38 = vld [vmem:[%s5285_s30 + $0xd0] sm:$0xff] }
 0x148   : > { %v2559_v44 = vpop.f32.mrb[16].mxu0 }
 0x149   : > { %v2848_v47 = vpop.f32.mrb[16].mxu1  ;;  %v2561_v48 = vpop.f32.mrb[17].mxu0 }
 0x14a   : > { %v5547_v51 = vadd.f32 %v2848_v47, %v2559_v44  ;;  %v2850_v52 = vpop.f32.mrb[17].mxu1  ;;  %v2562_v53 = vpop.f32.mrb[18].mxu0  ;;  %v476_v44 = vld [vmem:[%s5285_s30 + $0xf8] sm:$0xff]  ;;  %v4415_v47 = vcombine.low %v463_v18, %v467_v19 }
 0x14b   : > { %v2851_v56 = vpop.f32.mrb[18].mxu1  ;;  %v2564_v57 = vpop.f32.mrb[19].mxu0 }
 0x14c   : > { %v5549_v60 = vadd.f32 %v2851_v56, %v2562_v53  ;;  %v2853_v61 = vpop.f32.mrb[19].mxu1  ;;  %v4417_v53 = vcombine.low %v464_v22, %v468_v23  ;;  %v4426_v57 = vcombine.high %v472_v43, %v476_v44  ;;  %v491_v22 = vld [vmem:[%s5285_s30 + $0x170] sm:$0xff] }
 0x14d   : > { %2774 = vmatmul.mubr.bf16.gmra.mrb[124].mxu0 %v4643_v50 }
 0x14e   : > { %3063 = vmatmul.mubr.bf16.gmra.mrb[124].mxu1 %v4645_v54  ;;  %3103 = vmatprep.mubr.bf16.mxu0 %v4400_v55  ;;  %v4424_v54 = vcombine.high %v471_v38, %v475_v40 }
 0x14f   : > { %3392 = vmatprep.mubr.bf16.mxu1 %v4402_v58 }
 0x150   : > { %v2567_v63 = vpop.f32.mrb[20].mxu0 }
 0x151   : > { %v2856_v4 = vpop.f32.mrb[20].mxu1  ;;  %v2569_v5 = vpop.f32.mrb[21].mxu0 }
 0x152   : > { %v5555_v7 = vadd.f32 %v2856_v4, %v2567_v63  ;;  %v2858_v8 = vpop.f32.mrb[21].mxu1  ;;  %v2570_v9 = vpop.f32.mrb[22].mxu0 }
 0x153   : > { %v2859_v12 = vpop.f32.mrb[22].mxu1  ;;  %v2572_v14 = vpop.f32.mrb[23].mxu0 }
 0x154   : > { %v5557_v16 = vadd.f32 %v2859_v12, %v2570_v9  ;;  %v2861_v17 = vpop.f32.mrb[23].mxu1  ;;  %v4432_v12 = vcombine.high %v479_v62, %v483_v0 }
 0x155   : > { %3104 = vmatmul.mubr.bf16.vlgmr.msra.gmra.mrb[128].mxu0 %v4399_v6  ;;  %v4423_v6 = vcombine.low %v471_v38, %v475_v40  ;;  %v4434_v17 = vcombine.high %v480_v1, %v484_v2 }
 0x156   : > { %3393 = vmatmul.mubr.bf16.vlgmr.msra.gmra.mrb[128].mxu1 %v4401_v10  ;;  %3111 = vmatprep.mubr.bf16.mxu0 %v4408_v11  ;;  %v4425_v11 = vcombine.low %v472_v43, %v476_v44  ;;  %v495_v44 = vld [vmem:[%s5285_s30 + $0x190] sm:$0xff] }
 0x157   : > { %3400 = vmatprep.mubr.bf16.mxu1 %v4410_v15 }
 0x158   : > { %v2575_v20 = vpop.f32.mrb[24].mxu0 }
 0x159   : > { %v2864_v24 = vpop.f32.mrb[24].mxu1  ;;  %v2577_v25 = vpop.f32.mrb[25].mxu0 }
 0x15a   : > { %v5563_v27 = vadd.f32 %v2864_v24, %v2575_v20  ;;  %v2866_v28 = vpop.f32.mrb[25].mxu1  ;;  %v2578_v29 = vpop.f32.mrb[26].mxu0  ;;  %v487_v20 = vld [vmem:[%s5285_s30 + $0x150] sm:$0xff]  ;;  %v488_v24 = vld [vmem:[%s5285_s30 + $0x158] sm:$0xff] }
 0x15b   : > { %v2867_v33 = vpop.f32.mrb[26].mxu1  ;;  %v2580_v34 = vpop.f32.mrb[27].mxu0  ;;  %v492_v25 = vld [vmem:[%s5285_s30 + $0x178] sm:$0xff] }
 0x15c   : > { %v5565_v36 = vadd.f32 %v2867_v33, %v2578_v29  ;;  %v2869_v37 = vpop.f32.mrb[27].mxu1  ;;  %v4431_v29 = vcombine.low %v479_v62, %v483_v0  ;;  %v4433_v34 = vcombine.low %v480_v1, %v484_v2  ;;  %v4442_v40 = vcombine.high %v488_v24, %v492_v25 }
 0x15d   : > { %3112 = vmatmul.mubr.bf16.gmra.mrb[132].mxu0 %v4407_v26 }
 0x15e   : > { %3401 = vmatmul.mubr.bf16.gmra.mrb[132].mxu1 %v4409_v30  ;;  %3119 = vmatprep.mubr.bf16.mxu0 %v4416_v32 }
 0x15f   : > { %3408 = vmatprep.mubr.bf16.mxu1 %v4418_v35  ;;  %v4440_v35 = vcombine.high %v487_v20, %v491_v22 }
 0x160   : > { %v2583_v42 = vpop.f32.mrb[28].mxu0 }
 0x161   : > { %v2872_v45 = vpop.f32.mrb[28].mxu1  ;;  %v2585_v46 = vpop.f32.mrb[29].mxu0 }
 0x162   : > { %v5571_v48 = vadd.f32 %v2872_v45, %v2583_v42  ;;  %v2874_v50 = vpop.f32.mrb[29].mxu1  ;;  %v2586_v52 = vpop.f32.mrb[30].mxu0  ;;  %v499_v45 = vld [vmem:[%s5285_s30 + $0x1b0] sm:$0xff] }
 0x163   : > { %v2875_v55 = vpop.f32.mrb[30].mxu1  ;;  %v2588_v56 = vpop.f32.mrb[31].mxu0  ;;  %v500_v50 = vld [vmem:[%s5285_s30 + $0x1b8] sm:$0xff]  ;;  %v4448_v62 = vcombine.high %v495_v44, %v499_v45 }
 0x164   : > { %v5573_v58 = vadd.f32 %v2875_v55, %v2586_v52  ;;  %v2877_v61 = vpop.f32.mrb[31].mxu1 }
 0x165   : > { %3120 = vmatmul.mubr.bf16.gmra.mrb[136].mxu0 %v4415_v47  ;;  %v496_v47 = vld [vmem:[%s5285_s30 + $0x198] sm:$0xff]  ;;  %v4441_v61 = vcombine.low %v488_v24, %v492_v25 }
 0x166   : > { %3409 = vmatmul.mubr.bf16.gmra.mrb[136].mxu1 %v4417_v53  ;;  %3127 = vmatprep.mubr.bf16.mxu0 %v4424_v54  ;;  %v4439_v54 = vcombine.low %v487_v20, %v491_v22  ;;  %v4450_v1 = vcombine.high %v496_v47, %v500_v50  ;;  %v4449_v22 = vcombine.low %v496_v47, %v500_v50 }
 0x167   : > { %3416 = vmatprep.mubr.bf16.mxu1 %v4426_v57 }
 0x168   : > { %v2591_v63 = vpop.f32.mrb[32].mxu0 }
 0x169   : > { %v2880_v4 = vpop.f32.mrb[32].mxu1  ;;  %v2593_v5 = vpop.f32.mrb[33].mxu0 }
 0x16a   : > { %v5579_v8 = vadd.f32 %v2880_v4, %v2591_v63  ;;  %v2882_v9 = vpop.f32.mrb[33].mxu1  ;;  %v2594_v10 = vpop.f32.mrb[34].mxu0  ;;  %v503_v5 = vld [vmem:[%s5285_s30 + $0x1d0] sm:$0xff] }
 0x16b   : > { %v2883_v14 = vpop.f32.mrb[34].mxu1  ;;  %v2596_v15 = vpop.f32.mrb[35].mxu0 }
 0x16c   : > { %v5581_v18 = vadd.f32 %v2883_v14, %v2594_v10  ;;  %v2885_v19 = vpop.f32.mrb[35].mxu1  ;;  %v504_v10 = vld [vmem:[%s5285_s30 + $0x1d8] sm:$0xff]  ;;  %v4447_v15 = vcombine.low %v495_v44, %v499_v45 }
 0x16d   : > { %3128 = vmatmul.mubr.bf16.gmra.mrb[140].mxu0 %v4423_v6  ;;  %v507_v6 = vld [vmem:[%s5285_s30 + $0x1f0] sm:$0xff] }
 0x16e   : > { %3417 = vmatmul.mubr.bf16.gmra.mrb[140].mxu1 %v4425_v11  ;;  %3135 = vmatprep.mubr.bf16.mxu0 %v4432_v12  ;;  %v508_v11 = vld [vmem:[%s5285_s30 + $0x1f8] sm:$0xff] }
 0x16f   : > { %3424 = vmatprep.mubr.bf16.mxu1 %v4434_v17  ;;  %v4457_v47 = vcombine.low %v504_v10, %v508_v11 }
 0x170   : > { %v2599_v23 = vpop.f32.mrb[36].mxu0 }
 0x171   : > { %v2888_v26 = vpop.f32.mrb[36].mxu1  ;;  %v2601_v28 = vpop.f32.mrb[37].mxu0 }
 0x172   : > { %v5587_v30 = vadd.f32 %v2888_v26, %v2599_v23  ;;  %v2890_v32 = vpop.f32.mrb[37].mxu1  ;;  %v2602_v33 = vpop.f32.mrb[38].mxu0  ;;  %v4456_v23 = vcombine.high %v503_v5, %v507_v6  ;;  %v4458_v26 = vcombine.high %v504_v10, %v508_v11 }
 0x173   : > { %v2891_v37 = vpop.f32.mrb[38].mxu1  ;;  %v2604_v38 = vpop.f32.mrb[39].mxu0  ;;  %v511_v32 = vld [vmem:[%s5285_s30 + $0x210] sm:$0xff] }
 0x174   : > { %v5589_v42 = vadd.f32 %v2891_v37, %v2602_v33  ;;  %v2893_v43 = vpop.f32.mrb[39].mxu1  ;;  %v515_v33 = vld [vmem:[%s5285_s30 + $0x230] sm:$0xff]  ;;  %v516_v37 = vld [vmem:[%s5285_s30 + $0x238] sm:$0xff] }
 0x175   : > { %3136 = vmatmul.mubr.bf16.gmra.mrb[144].mxu0 %v4431_v29  ;;  %v4455_v43 = vcombine.low %v503_v5, %v507_v6  ;;  %v4464_v50 = vcombine.high %v511_v32, %v515_v33  ;;  %v4463_v6 = vcombine.low %v511_v32, %v515_v33  ;;  %v532_v32 = vld [vmem:[%s5285_s30 + $0x2b8] sm:$0xff] }
 0x176   : > { %3425 = vmatmul.mubr.bf16.gmra.mrb[144].mxu1 %v4433_v34  ;;  %3143 = vmatprep.mubr.bf16.mxu0 %v4440_v35  ;;  %v512_v35 = vld [vmem:[%s5285_s30 + $0x218] sm:$0xff] }
 0x177   : > { %3432 = vmatprep.mubr.bf16.mxu1 %v4442_v40 }
 0x178   : > { %v2607_v46 = vpop.f32.mrb[40].mxu0 }
 0x179   : > { %v2896_v52 = vpop.f32.mrb[40].mxu1  ;;  %v2609_v53 = vpop.f32.mrb[41].mxu0 }
 0x17a   : > { %v5595_v55 = vadd.f32 %v2896_v52, %v2607_v46  ;;  %v2898_v56 = vpop.f32.mrb[41].mxu1  ;;  %v2610_v57 = vpop.f32.mrb[42].mxu0 }
 0x17b   : > { %v2899_v0 = vpop.f32.mrb[42].mxu1  ;;  %v2612_v63 = vpop.f32.mrb[43].mxu0 }
 0x17c   : > { %v5597_v2 = vadd.f32 %v2899_v0, %v2610_v57  ;;  %v2901_v4 = vpop.f32.mrb[43].mxu1  ;;  %v520_v63 = vld [vmem:[%s5285_s30 + $0x258] sm:$0xff] }
 0x17d   : > { %3144 = vmatmul.mubr.bf16.gmra.mrb[148].mxu0 %v4439_v54  ;;  %v4466_v54 = vcombine.high %v512_v35, %v516_v37 }
 0x17e   : > { %3433 = vmatmul.mubr.bf16.gmra.mrb[148].mxu1 %v4441_v61  ;;  %3151 = vmatprep.mubr.bf16.mxu0 %v4448_v62  ;;  %v519_v61 = vld [vmem:[%s5285_s30 + $0x250] sm:$0xff] }
 0x17f   : > { %3440 = vmatprep.mubr.bf16.mxu1 %v4450_v1  ;;  %v523_v62 = vld [vmem:[%s5285_s30 + $0x270] sm:$0xff]  ;;  %v524_v1 = vld [vmem:[%s5285_s30 + $0x278] sm:$0xff] }
 0x180   : > { %v2615_v9 = vpop.f32.mrb[44].mxu0 }
 0x181   : > { %v2904_v12 = vpop.f32.mrb[44].mxu1  ;;  %v2617_v14 = vpop.f32.mrb[45].mxu0 }
 0x182   : > { %v5603_v17 = vadd.f32 %v2904_v12, %v2615_v9  ;;  %v2906_v19 = vpop.f32.mrb[45].mxu1  ;;  %v2618_v20 = vpop.f32.mrb[46].mxu0  ;;  %v4465_v12 = vcombine.low %v512_v35, %v516_v37  ;;  %v4472_v14 = vcombine.high %v519_v61, %v523_v62  ;;  %v4471_v35 = vcombine.low %v519_v61, %v523_v62  ;;  %v536_v62 = vld [vmem:[%s5285_s30 + $0x2d8] sm:$0xff] }
 0x183   : > { %v2907_v24 = vpop.f32.mrb[46].mxu1  ;;  %v2620_v25 = vpop.f32.mrb[47].mxu0 }
 0x184   : > { %v5605_v28 = vadd.f32 %v2907_v24, %v2618_v20  ;;  %v2909_v29 = vpop.f32.mrb[47].mxu1  ;;  %v4474_v20 = vcombine.high %v520_v63, %v524_v1  ;;  %v527_v24 = vld [vmem:[%s5285_s30 + $0x290] sm:$0xff] }
 0x185   : > { %3152 = vmatmul.mubr.bf16.gmra.mrb[152].mxu0 %v4447_v15  ;;  %v531_v25 = vld [vmem:[%s5285_s30 + $0x2b0] sm:$0xff]  ;;  %v528_v29 = vld [vmem:[%s5285_s30 + $0x298] sm:$0xff] }
 0x186   : > { %3441 = vmatmul.mubr.bf16.gmra.mrb[152].mxu1 %v4449_v22  ;;  %3159 = vmatprep.mubr.bf16.mxu0 %v4456_v23 }
 0x187   : > { %3448 = vmatprep.mubr.bf16.mxu1 %v4458_v26 }
 0x188   : > { %v2623_v34 = vpop.f32.mrb[48].mxu0 }
 0x189   : > { %v2912_v38 = vpop.f32.mrb[48].mxu1  ;;  %v2625_v40 = vpop.f32.mrb[49].mxu0 }
 0x18a   : > { %v5611_v44 = vadd.f32 %v2912_v38, %v2623_v34  ;;  %v2914_v45 = vpop.f32.mrb[49].mxu1  ;;  %v2626_v46 = vpop.f32.mrb[50].mxu0 }
 0x18b   : > { %v2915_v52 = vpop.f32.mrb[50].mxu1  ;;  %v2628_v53 = vpop.f32.mrb[51].mxu0  ;;  %v4480_v45 = vcombine.high %v527_v24, %v531_v25 }
 0x18c   : > { %v5613_v56 = vadd.f32 %v2915_v52, %v2626_v46  ;;  %v2917_v57 = vpop.f32.mrb[51].mxu1 }
 0x18d   : > { %3160 = vmatmul.mubr.bf16.gmra.mrb[156].mxu0 %v4455_v43  ;;  %v4473_v43 = vcombine.low %v520_v63, %v524_v1  ;;  %v539_v57 = vld [vmem:[%s5285_s30 + $0x2f0] sm:$0xff]  ;;  %v4479_v63 = vcombine.low %v527_v24, %v531_v25 }
 0x18e   : > { %3449 = vmatmul.mubr.bf16.gmra.mrb[156].mxu1 %v4457_v47  ;;  %3167 = vmatprep.mubr.bf16.mxu0 %v4464_v50  ;;  %v4482_v50 = vcombine.high %v528_v29, %v532_v32  ;;  %v543_v24 = vld [vmem:[%s5285_s30 + $0x310] sm:$0xff] }
 0x18f   : > { %3456 = vmatprep.mubr.bf16.mxu1 %v4466_v54  ;;  %v535_v54 = vld [vmem:[%s5285_s30 + $0x2d0] sm:$0xff] }
 0x190   : > { %v2631_v0 = vpop.f32.mrb[52].mxu0  ;;  %v547_v25 = vld [vmem:[%s5285_s30 + $0x330] sm:$0xff] }
 0x191   : > { %v2920_v4 = vpop.f32.mrb[52].mxu1  ;;  %v2633_v5 = vpop.f32.mrb[53].mxu0 }
 0x192   : > { %v5619_v9 = vadd.f32 %v2920_v4, %v2631_v0  ;;  %v2922_v10 = vpop.f32.mrb[53].mxu1  ;;  %v2634_v11 = vpop.f32.mrb[54].mxu0  ;;  %v540_v0 = vld [vmem:[%s5285_s30 + $0x2f8] sm:$0xff] }
 0x193   : > { %v2923_v15 = vpop.f32.mrb[54].mxu1  ;;  %v2636_v19 = vpop.f32.mrb[55].mxu0 }
 0x194   : > { %v5621_v22 = vadd.f32 %v2923_v15, %v2634_v11  ;;  %v2925_v23 = vpop.f32.mrb[55].mxu1  ;;  %v4481_v11 = vcombine.low %v528_v29, %v532_v32  ;;  %v4490_v19 = vcombine.high %v536_v62, %v540_v0  ;;  %v4487_v29 = vcombine.low %v535_v54, %v539_v57 }
 0x195   : > { %3168 = vmatmul.mubr.bf16.gmra.mrb[160].mxu0 %v4463_v6 }
 0x196   : > { %3457 = vmatmul.mubr.bf16.gmra.mrb[160].mxu1 %v4465_v12  ;;  %3175 = vmatprep.mubr.bf16.mxu0 %v4472_v14  ;;  %v4488_v12 = vcombine.high %v535_v54, %v539_v57  ;;  %v551_v54 = vld [vmem:[%s5285_s30 + $0x350] sm:$0xff] }
 0x197   : > { %3464 = vmatprep.mubr.bf16.mxu1 %v4474_v20  ;;  %v555_v57 = vld [vmem:[%s5285_s30 + $0x370] sm:$0xff] }
 0x198   : > { %v2639_v26 = vpop.f32.mrb[56].mxu0 }
 0x199   : > { %v2928_v33 = vpop.f32.mrb[56].mxu1  ;;  %v2641_v34 = vpop.f32.mrb[57].mxu0 }
 0x19a   : > { %v5627_v37 = vadd.f32 %v2928_v33, %v2639_v26  ;;  %v2930_v38 = vpop.f32.mrb[57].mxu1  ;;  %v2642_v40 = vpop.f32.mrb[58].mxu0  ;;  %v544_v33 = vld [vmem:[%s5285_s30 + $0x318] sm:$0xff] }
 0x19b   : > { %v2931_v46 = vpop.f32.mrb[58].mxu1  ;;  %v2644_v47 = vpop.f32.mrb[59].mxu0  ;;  %v548_v34 = vld [vmem:[%s5285_s30 + $0x338] sm:$0xff] }
 0x19c   : > { %v5629_v52 = vadd.f32 %v2931_v46, %v2642_v40  ;;  %v2933_v53 = vpop.f32.mrb[59].mxu1  ;;  %v4496_v46 = vcombine.high %v543_v24, %v547_v25 }
 0x19d   : > { %3176 = vmatmul.mubr.bf16.gmra.mrb[164].mxu0 %v4471_v35  ;;  %v4498_v53 = vcombine.high %v544_v33, %v548_v34 }
 0x19e   : > { %3465 = vmatmul.mubr.bf16.gmra.mrb[164].mxu1 %v4473_v43  ;;  %3183 = vmatprep.mubr.bf16.mxu0 %v4480_v45  ;;  %v4489_v45 = vcombine.low %v536_v62, %v540_v0  ;;  %v4495_v62 = vcombine.low %v543_v24, %v547_v25  ;;  %v559_v24 = vld [vmem:[%s5285_s30 + $0x390] sm:$0xff] }
 0x19f   : > { %3472 = vmatprep.mubr.bf16.mxu1 %v4482_v50  ;;  %v563_v25 = vld [vmem:[%s5285_s30 + $0x3b0] sm:$0xff] }
 0x1a0   : > { %v2647_v61 = vpop.f32.mrb[60].mxu0 }
 0x1a1   : > { %v2936_v4 = vpop.f32.mrb[60].mxu1  ;;  %v2649_v5 = vpop.f32.mrb[61].mxu0 }
 0x1a2   : > { %v5635_v1 = vadd.f32 %v2936_v4, %v2647_v61  ;;  %v2938_v6 = vpop.f32.mrb[61].mxu1  ;;  %v2650_v10 = vpop.f32.mrb[62].mxu0 }
 0x1a3   : > { %v2939_v14 = vpop.f32.mrb[62].mxu1  ;;  %v2652_v15 = vpop.f32.mrb[63].mxu0  ;;  %v556_v6 = vld [vmem:[%s5285_s30 + $0x378] sm:$0xff] }
 0x1a4   : > { %v5637_v20 = vadd.f32 %v2939_v14, %v2650_v10  ;;  %v2941_v23 = vpop.f32.mrb[63].mxu1  ;;  %v4497_v15 = vcombine.low %v544_v33, %v548_v34  ;;  %v4503_v33 = vcombine.low %v551_v54, %v555_v57 }
 0x1a5   : > { %3184 = vmatmul.mubr.bf16.gmra.mrb[168].mxu0 %v4479_v63  ;;  %v552_v63 = vld [vmem:[%s5285_s30 + $0x358] sm:$0xff] }
 0x1a6   : > { %3473 = vmatmul.mubr.bf16.gmra.mrb[168].mxu1 %v4481_v11  ;;  %3191 = vmatprep.mubr.bf16.mxu0 %v4488_v12 }
 0x1a7   : > { %3480 = vmatprep.mubr.bf16.mxu1 %v4490_v19  ;;  %v4504_v19 = vcombine.high %v551_v54, %v555_v57  ;;  %v567_v54 = vld [vmem:[%s5285_s30 + $0x3d0] sm:$0xff] }
 0x1a8   : > { %v2655_v26 = vpop.f32.mrb[64].mxu0  ;;  %v571_v57 = vld [vmem:[%s5285_s30 + $0x3f0] sm:$0xff] }
 0x1a9   : > { %v2944_v35 = vpop.f32.mrb[64].mxu1  ;;  %v2657_v38 = vpop.f32.mrb[65].mxu0 }
 0x1aa   : > { %v5643_v32 = vadd.f32 %v2944_v35, %v2655_v26  ;;  %v2946_v40 = vpop.f32.mrb[65].mxu1  ;;  %v2658_v43 = vpop.f32.mrb[66].mxu0  ;;  %v4506_v35 = vcombine.high %v552_v63, %v556_v6 }
 0x1ab   : > { %v2947_v47 = vpop.f32.mrb[66].mxu1  ;;  %v2660_v50 = vpop.f32.mrb[67].mxu0 }
 0x1ac   : > { %v5645_v61 = vadd.f32 %v2947_v47, %v2658_v43  ;;  %v2949_v4 = vpop.f32.mrb[67].mxu1  ;;  %v560_v43 = vld [vmem:[%s5285_s30 + $0x398] sm:$0xff] }
 0x1ad   : > { %3192 = vmatmul.mubr.bf16.gmra.mrb[172].mxu0 %v4487_v29  ;;  %v4505_v4 = vcombine.low %v552_v63, %v556_v6  ;;  %v4511_v63 = vcombine.low %v559_v24, %v563_v25 }
 0x1ae   : > { %3481 = vmatmul.mubr.bf16.gmra.mrb[172].mxu1 %v4489_v45  ;;  %3199 = vmatprep.mubr.bf16.mxu0 %v4496_v46  ;;  %v564_v45 = vld [vmem:[%s5285_s30 + $0x3b8] sm:$0xff] }
 0x1af   : > { %3488 = vmatprep.mubr.bf16.mxu1 %v4498_v53 }
 0x1b0   : > { %v2663_v5 = vpop.f32.mrb[68].mxu0 }
 0x1b1   : > { %v2952_v10 = vpop.f32.mrb[68].mxu1  ;;  %v2665_v11 = vpop.f32.mrb[69].mxu0 }
 0x1b2   : > { %v5651_v0 = vadd.f32 %v2952_v10, %v2663_v5  ;;  %v2954_v12 = vpop.f32.mrb[69].mxu1  ;;  %v2666_v14 = vpop.f32.mrb[70].mxu0  ;;  %v4512_v5 = vcombine.high %v559_v24, %v563_v25  ;;  %v575_v24 = vld [vmem:[%s5285_s30 + $0x410] sm:$0xff] }
 0x1b3   : > { %v2955_v23 = vpop.f32.mrb[70].mxu1  ;;  %v2668_v26 = vpop.f32.mrb[71].mxu0  ;;  %v579_v25 = vld [vmem:[%s5285_s30 + $0x430] sm:$0xff] }
 0x1b4   : > { %v5653_v38 = vadd.f32 %v2955_v23, %v2666_v14  ;;  %v2957_v29 = vpop.f32.mrb[71].mxu1  ;;  %v572_v23 = vld [vmem:[%s5285_s30 + $0x3f8] sm:$0xff] }
 0x1b5   : > { %3200 = vmatmul.mubr.bf16.gmra.mrb[176].mxu0 %v4495_v62  ;;  %v4514_v62 = vcombine.high %v560_v43, %v564_v45 }
 0x1b6   : > { %3489 = vmatmul.mubr.bf16.gmra.mrb[176].mxu1 %v4497_v15  ;;  %3207 = vmatprep.mubr.bf16.mxu0 %v4504_v19  ;;  %v568_v19 = vld [vmem:[%s5285_s30 + $0x3d8] sm:$0xff] }
 0x1b7   : > { %3496 = vmatprep.mubr.bf16.mxu1 %v4506_v35 }
 0x1b8   : > { %v2671_v40 = vpop.f32.mrb[72].mxu0 }
 0x1b9   : > { %v2960_v46 = vpop.f32.mrb[72].mxu1  ;;  %v2673_v47 = vpop.f32.mrb[73].mxu0 }
 0x1ba   : > { %v5659_v34 = vadd.f32 %v2960_v46, %v2671_v40  ;;  %v2962_v50 = vpop.f32.mrb[73].mxu1  ;;  %v2674_v53 = vpop.f32.mrb[74].mxu0  ;;  %v4513_v46 = vcombine.low %v560_v43, %v564_v45  ;;  %v4520_v47 = vcombine.high %v567_v54, %v571_v57  ;;  %v4519_v43 = vcombine.low %v567_v54, %v571_v57  ;;  %v583_v54 = vld [vmem:[%s5285_s30 + $0x450] sm:$0xff] }
 0x1bb   : > { %v2963_v10 = vpop.f32.mrb[74].mxu1  ;;  %v2676_v11 = vpop.f32.mrb[75].mxu0  ;;  %v587_v57 = vld [vmem:[%s5285_s30 + $0x470] sm:$0xff] }
 0x1bc   : > { %v5661_v12 = vadd.f32 %v2963_v10, %v2674_v53  ;;  %v2965_v14 = vpop.f32.mrb[75].mxu1  ;;  %v4522_v53 = vcombine.high %v568_v19, %v572_v23  ;;  %v576_v11 = vld [vmem:[%s5285_s30 + $0x418] sm:$0xff] }
 0x1bd   : > { %3208 = vmatmul.mubr.bf16.gmra.mrb[180].mxu0 %v4503_v33 }
 0x1be   : > { %3497 = vmatmul.mubr.bf16.gmra.mrb[180].mxu1 %v4505_v4  ;;  %3215 = vmatprep.mubr.bf16.mxu0 %v4512_v5 }
 0x1bf   : > { %3504 = vmatprep.mubr.bf16.mxu1 %v4514_v62  ;;  %v580_v62 = vld [vmem:[%s5285_s30 + $0x438] sm:$0xff] }
 0x1c0   : > { %v2679_v15 = vpop.f32.mrb[76].mxu0 }
 0x1c1   : > { %v2968_v26 = vpop.f32.mrb[76].mxu1  ;;  %v2681_v35 = vpop.f32.mrb[77].mxu0 }
 0x1c2   : > { %v5667_v6 = vadd.f32 %v2968_v26, %v2679_v15  ;;  %v2970_v29 = vpop.f32.mrb[77].mxu1  ;;  %v2682_v40 = vpop.f32.mrb[78].mxu0 }
 0x1c3   : > { %v2971_v33 = vpop.f32.mrb[78].mxu1  ;;  %v2684_v50 = vpop.f32.mrb[79].mxu0  ;;  %v4528_v29 = vcombine.high %v575_v24, %v579_v25 }
 0x1c4   : > { %v5669_v4 = vadd.f32 %v2971_v33, %v2682_v40  ;;  %v2973_v5 = vpop.f32.mrb[79].mxu1 }
 0x1c5   : > { %3216 = vmatmul.mubr.bf16.gmra.mrb[184].mxu0 %v4511_v63  ;;  %v4521_v63 = vcombine.low %v568_v19, %v572_v23  ;;  %v584_v5 = vld [vmem:[%s5285_s30 + $0x458] sm:$0xff]  ;;  %v4527_v19 = vcombine.low %v575_v24, %v579_v25  ;;  %v591_v24 = vld [vmem:[%s5285_s30 + $0x490] sm:$0xff] }
 0x1c6   : > { %3505 = vmatmul.mubr.bf16.gmra.mrb[184].mxu1 %v4513_v46  ;;  %3223 = vmatprep.mubr.bf16.mxu0 %v4520_v47  ;;  %v4530_v47 = vcombine.high %v576_v11, %v580_v62  ;;  %v595_v25 = vld [vmem:[%s5285_s30 + $0x4b0] sm:$0xff] }
 0x1c7   : > { %3512 = vmatprep.mubr.bf16.mxu1 %v4522_v53 }
 0x1c8   : > { %v2687_v10 = vpop.f32.mrb[80].mxu0 }
 0x1c9   : > { %v2976_v14 = vpop.f32.mrb[80].mxu1  ;;  %v2689_v15 = vpop.f32.mrb[81].mxu0 }
 0x1ca   : > { %v5675_v45 = vadd.f32 %v2976_v14, %v2687_v10  ;;  %v2978_v26 = vpop.f32.mrb[81].mxu1  ;;  %v2690_v35 = vpop.f32.mrb[82].mxu0  ;;  %v588_v10 = vld [vmem:[%s5285_s30 + $0x478] sm:$0xff] }
 0x1cb   : > { %v2979_v40 = vpop.f32.mrb[82].mxu1  ;;  %v2692_v46 = vpop.f32.mrb[83].mxu0 }
 0x1cc   : > { %v5677_v33 = vadd.f32 %v2979_v40, %v2690_v35  ;;  %v2981_v50 = vpop.f32.mrb[83].mxu1  ;;  %v4538_v46 = vcombine.high %v584_v5, %v588_v10 }
 0x1cd   : > { %3224 = vmatmul.mubr.bf16.gmra.mrb[188].mxu0 %v4519_v43  ;;  %v4529_v43 = vcombine.low %v576_v11, %v580_v62  ;;  %v4535_v11 = vcombine.low %v583_v54, %v587_v57 }
 0x1ce   : > { %5971 = vst [vmem:[#allocation3_spill] sm:$0xff] %v5677_v33  ;;  %3513 = vmatmul.mubr.bf16.gmra.mrb[188].mxu1 %v4521_v63  ;;  %3231 = vmatprep.mubr.bf16.mxu0 %v4528_v29  ;;  %v4536_v63 = vcombine.high %v583_v54, %v587_v57  ;;  %v599_v54 = vld [vmem:[%s5285_s30 + $0x4d0] sm:$0xff] }
 0x1cf   : > { %3520 = vmatprep.mubr.bf16.mxu1 %v4530_v47  ;;  %v603_v57 = vld [vmem:[%s5285_s30 + $0x4f0] sm:$0xff] }
 0x1d0   : > { %v2695_v53 = vpop.f32.mrb[84].mxu0 }
 0x1d1   : > { %v2984_v14 = vpop.f32.mrb[84].mxu1  ;;  %v2697_v15 = vpop.f32.mrb[85].mxu0 }
 0x1d2   : > { %v5683_v23 = vadd.f32 %v2984_v14, %v2695_v53  ;;  %v2986_v26 = vpop.f32.mrb[85].mxu1  ;;  %v2698_v35 = vpop.f32.mrb[86].mxu0  ;;  %v592_v14 = vld [vmem:[%s5285_s30 + $0x498] sm:$0xff] }
 0x1d3   : > { %v2987_v29 = vpop.f32.mrb[86].mxu1  ;;  %v2700_v40 = vpop.f32.mrb[87].mxu0  ;;  %v596_v15 = vld [vmem:[%s5285_s30 + $0x4b8] sm:$0xff] }
 0x1d4   : > { %5972 = vst [vmem:[#allocation4_spill] sm:$0xff] %v5683_v23  ;;  %v5685_v47 = vadd.f32 %v2987_v29, %v2698_v35  ;;  %v2989_v50 = vpop.f32.mrb[87].mxu1 }
 0x1d5   : > { %3232 = vmatmul.mubr.bf16.gmra.mrb[192].mxu0 %v4527_v19  ;;  %v4537_v19 = vcombine.low %v584_v5, %v588_v10  ;;  %v4543_v5 = vcombine.low %v591_v24, %v595_v25 }
 0x1d6   : > { %5973 = vst [vmem:[#allocation5_spill] sm:$0xff] %v5685_v47  ;;  %3521 = vmatmul.mubr.bf16.gmra.mrb[192].mxu1 %v4529_v43  ;;  %3239 = vmatprep.mubr.bf16.mxu0 %v4536_v63  ;;  %v4544_v43 = vcombine.high %v591_v24, %v595_v25  ;;  %v607_v24 = vld [vmem:[%s5285_s30 + $0x510] sm:$0xff] }
 0x1d7   : > { %3528 = vmatprep.mubr.bf16.mxu1 %v4538_v46  ;;  %v4546_v46 = vcombine.high %v592_v14, %v596_v15  ;;  %v611_v25 = vld [vmem:[%s5285_s30 + $0x530] sm:$0xff] }
 0x1d8   : > { %v2703_v53 = vpop.f32.mrb[88].mxu0 }
 0x1d9   : > { %v2992_v26 = vpop.f32.mrb[88].mxu1  ;;  %v2705_v23 = vpop.f32.mrb[89].mxu0 }
 0x1da   : > { %v5691_v62 = vadd.f32 %v2992_v26, %v2703_v53  ;;  %v2994_v40 = vpop.f32.mrb[89].mxu1  ;;  %v2706_v35 = vpop.f32.mrb[90].mxu0  ;;  %v600_v53 = vld [vmem:[%s5285_s30 + $0x4d8] sm:$0xff] }
 0x1db   : > { %v2995_v63 = vpop.f32.mrb[90].mxu1  ;;  %v2708_v29 = vpop.f32.mrb[91].mxu0  ;;  %v604_v26 = vld [vmem:[%s5285_s30 + $0x4f8] sm:$0xff] }
 0x1dc   : > { %5974 = vst [vmem:[#allocation6_spill] sm:$0xff] %v5691_v62  ;;  %v5693_v50 = vadd.f32 %v2995_v63, %v2706_v35  ;;  %v2997_v47 = vpop.f32.mrb[91].mxu1  ;;  %v4554_v63 = vcombine.high %v600_v53, %v604_v26 }
 0x1dd   : > { %3240 = vmatmul.mubr.bf16.gmra.mrb[196].mxu0 %v4535_v11  ;;  %v4545_v47 = vcombine.low %v592_v14, %v596_v15  ;;  %v4552_v11 = vcombine.high %v599_v54, %v603_v57  ;;  %v4551_v14 = vcombine.low %v599_v54, %v603_v57  ;;  %v615_v54 = vld [vmem:[%s5285_s30 + $0x550] sm:$0xff] }
 0x1de   : > { %5975 = vst [vmem:[#allocation7_spill] sm:$0xff] %v5693_v50  ;;  %3529 = vmatmul.mubr.bf16.gmra.mrb[196].mxu1 %v4537_v19  ;;  %3247 = vmatprep.mubr.bf16.mxu0 %v4544_v43  ;;  %v619_v57 = vld [vmem:[%s5285_s30 + $0x570] sm:$0xff] }
 0x1df   : > { %3536 = vmatprep.mubr.bf16.mxu1 %v4546_v46 }
 0x1e0   : > { %v2711_v23 = vpop.f32.mrb[92].mxu0 }
 0x1e1   : > { %v3000_v40 = vpop.f32.mrb[92].mxu1  ;;  %v2713_v62 = vpop.f32.mrb[93].mxu0 }
 0x1e2   : > { %v5699_v10 = vadd.f32 %v3000_v40, %v2711_v23  ;;  %v3002_v29 = vpop.f32.mrb[93].mxu1  ;;  %v2714_v35 = vpop.f32.mrb[94].mxu0  ;;  %v608_v23 = vld [vmem:[%s5285_s30 + $0x518] sm:$0xff] }
 0x1e3   : > { %v3003_v19 = vpop.f32.mrb[94].mxu1  ;;  %v2716_v43 = vpop.f32.mrb[95].mxu0  ;;  %v612_v40 = vld [vmem:[%s5285_s30 + $0x538] sm:$0xff] }
 0x1e4   : > { %5976 = vst [vmem:[#allocation8_spill] sm:$0xff] %v5699_v10  ;;  %v5701_v46 = vadd.f32 %v3003_v19, %v2714_v35  ;;  %v3005_v50 = vpop.f32.mrb[95].mxu1  ;;  %v4562_v19 = vcombine.high %v608_v23, %v612_v40 }
 0x1e5   : > { %3248 = vmatmul.mubr.bf16.gmra.mrb[200].mxu0 %v4543_v5  ;;  %v4553_v50 = vcombine.low %v600_v53, %v604_v26  ;;  %v4560_v5 = vcombine.high %v607_v24, %v611_v25  ;;  %v4559_v53 = vcombine.low %v607_v24, %v611_v25  ;;  %v623_v24 = vld [vmem:[%s5285_s30 + $0x590] sm:$0xff] }
 0x1e6   : > { %5977 = vst [vmem:[#allocation9_spill] sm:$0xff] %v5701_v46  ;;  %3537 = vmatmul.mubr.bf16.gmra.mrb[200].mxu1 %v4545_v47  ;;  %3255 = vmatprep.mubr.bf16.mxu0 %v4552_v11  ;;  %v627_v25 = vld [vmem:[%s5285_s30 + $0x5b0] sm:$0xff] }
 0x1e7   : > { %3544 = vmatprep.mubr.bf16.mxu1 %v4554_v63 }
 0x1e8   : > { %v2719_v62 = vpop.f32.mrb[96].mxu0 }
 0x1e9   : > { %v3008_v29 = vpop.f32.mrb[96].mxu1  ;;  %v2721_v10 = vpop.f32.mrb[97].mxu0 }
 0x1ea   : > { %v5707_v15 = vadd.f32 %v3008_v29, %v2719_v62  ;;  %v3010_v43 = vpop.f32.mrb[97].mxu1  ;;  %v2722_v35 = vpop.f32.mrb[98].mxu0  ;;  %v616_v62 = vld [vmem:[%s5285_s30 + $0x558] sm:$0xff] }
 0x1eb   : > { %v3011_v47 = vpop.f32.mrb[98].mxu1  ;;  %v2724_v11 = vpop.f32.mrb[99].mxu0  ;;  %v620_v29 = vld [vmem:[%s5285_s30 + $0x578] sm:$0xff] }
 0x1ec   : > { %5978 = vst [vmem:[#allocation10_spill] sm:$0xff] %v5707_v15  ;;  %v5709_v63 = vadd.f32 %v3011_v47, %v2722_v35  ;;  %v3013_v46 = vpop.f32.mrb[99].mxu1  ;;  %v4570_v47 = vcombine.high %v616_v62, %v620_v29 }
 0x1ed   : > { %3256 = vmatmul.mubr.bf16.gmra.mrb[204].mxu0 %v4551_v14  ;;  %v4561_v46 = vcombine.low %v608_v23, %v612_v40  ;;  %v4568_v14 = vcombine.high %v615_v54, %v619_v57  ;;  %v4567_v23 = vcombine.low %v615_v54, %v619_v57  ;;  %v631_v54 = vld [vmem:[%s5285_s30 + $0x5d0] sm:$0xff] }
 0x1ee   : > { %5979 = vst [vmem:[#allocation11_spill] sm:$0xff] %v5709_v63  ;;  %3545 = vmatmul.mubr.bf16.gmra.mrb[204].mxu1 %v4553_v50  ;;  %3263 = vmatprep.mubr.bf16.mxu0 %v4560_v5  ;;  %v635_v57 = vld [vmem:[%s5285_s30 + $0x5f0] sm:$0xff] }
 0x1ef   : > { %3552 = vmatprep.mubr.bf16.mxu1 %v4562_v19 }
 0x1f0   : > { %v2727_v10 = vpop.f32.mrb[100].mxu0 }
 0x1f1   : > { %v3016_v43 = vpop.f32.mrb[100].mxu1  ;;  %v2729_v15 = vpop.f32.mrb[101].mxu0 }
 0x1f2   : > { %v5715_v26 = vadd.f32 %v3016_v43, %v2727_v10  ;;  %v3018_v11 = vpop.f32.mrb[101].mxu1  ;;  %v2730_v35 = vpop.f32.mrb[102].mxu0  ;;  %v624_v10 = vld [vmem:[%s5285_s30 + $0x598] sm:$0xff] }
 0x1f3   : > { %v3019_v50 = vpop.f32.mrb[102].mxu1  ;;  %v2732_v5 = vpop.f32.mrb[103].mxu0  ;;  %v628_v43 = vld [vmem:[%s5285_s30 + $0x5b8] sm:$0xff] }
 0x1f4   : > { %5980 = vst [vmem:[#allocation12_spill] sm:$0xff] %v5715_v26  ;;  %v5717_v19 = vadd.f32 %v3019_v50, %v2730_v35  ;;  %v3021_v63 = vpop.f32.mrb[103].mxu1  ;;  %v4578_v50 = vcombine.high %v624_v10, %v628_v43 }
 0x1f5   : > { %3264 = vmatmul.mubr.bf16.gmra.mrb[208].mxu0 %v4559_v53  ;;  %v4569_v63 = vcombine.low %v616_v62, %v620_v29  ;;  %v4576_v53 = vcombine.high %v623_v24, %v627_v25  ;;  %v4575_v62 = vcombine.low %v623_v24, %v627_v25  ;;  %v639_v24 = vld [vmem:[%s5285_s30 + $0x610] sm:$0xff] }
 0x1f6   : > { %5981 = vst [vmem:[#allocation13_spill] sm:$0xff] %v5717_v19  ;;  %3553 = vmatmul.mubr.bf16.gmra.mrb[208].mxu1 %v4561_v46  ;;  %3271 = vmatprep.mubr.bf16.mxu0 %v4568_v14  ;;  %v643_v25 = vld [vmem:[%s5285_s30 + $0x630] sm:$0xff] }
 0x1f7   : > { %3560 = vmatprep.mubr.bf16.mxu1 %v4570_v47 }
 0x1f8   : > { %v2735_v15 = vpop.f32.mrb[104].mxu0 }
 0x1f9   : > { %v3024_v11 = vpop.f32.mrb[104].mxu1  ;;  %v2737_v26 = vpop.f32.mrb[105].mxu0 }
 0x1fa   : > { %v5723_v40 = vadd.f32 %v3024_v11, %v2735_v15  ;;  %v3026_v5 = vpop.f32.mrb[105].mxu1  ;;  %v2738_v35 = vpop.f32.mrb[106].mxu0  ;;  %v632_v15 = vld [vmem:[%s5285_s30 + $0x5d8] sm:$0xff] }
 0x1fb   : > { %v3027_v46 = vpop.f32.mrb[106].mxu1  ;;  %v2740_v14 = vpop.f32.mrb[107].mxu0  ;;  %v636_v11 = vld [vmem:[%s5285_s30 + $0x5f8] sm:$0xff] }
 0x1fc   : > { %5982 = vst [vmem:[#allocation14_spill] sm:$0xff] %v5723_v40  ;;  %v5725_v47 = vadd.f32 %v3027_v46, %v2738_v35  ;;  %v3029_v19 = vpop.f32.mrb[107].mxu1  ;;  %v4586_v46 = vcombine.high %v632_v15, %v636_v11 }
 0x1fd   : > { %3272 = vmatmul.mubr.bf16.gmra.mrb[212].mxu0 %v4567_v23  ;;  %v4577_v19 = vcombine.low %v624_v10, %v628_v43  ;;  %v4584_v23 = vcombine.high %v631_v54, %v635_v57  ;;  %v4583_v10 = vcombine.low %v631_v54, %v635_v57  ;;  %v647_v54 = vld [vmem:[%s5285_s30 + $0x650] sm:$0xff] }
 0x1fe   : > { %5983 = vst [vmem:[#allocation15_spill] sm:$0xff] %v5725_v47  ;;  %3561 = vmatmul.mubr.bf16.gmra.mrb[212].mxu1 %v4569_v63  ;;  %3279 = vmatprep.mubr.bf16.mxu0 %v4576_v53  ;;  %v651_v57 = vld [vmem:[%s5285_s30 + $0x670] sm:$0xff] }
 0x1ff   : > { %3568 = vmatprep.mubr.bf16.mxu1 %v4578_v50 }
 0x200   : > { %v2743_v26 = vpop.f32.mrb[108].mxu0 }
 0x201   : > { %v3032_v5 = vpop.f32.mrb[108].mxu1  ;;  %v2745_v40 = vpop.f32.mrb[109].mxu0 }
 0x202   : > { %v5731_v29 = vadd.f32 %v3032_v5, %v2743_v26  ;;  %v3034_v14 = vpop.f32.mrb[109].mxu1  ;;  %v2746_v35 = vpop.f32.mrb[110].mxu0  ;;  %v640_v26 = vld [vmem:[%s5285_s30 + $0x618] sm:$0xff] }
 0x203   : > { %v3035_v63 = vpop.f32.mrb[110].mxu1  ;;  %v2748_v53 = vpop.f32.mrb[111].mxu0  ;;  %v644_v5 = vld [vmem:[%s5285_s30 + $0x638] sm:$0xff] }
 0x204   : > { %5984 = vst [vmem:[#allocation16_spill] sm:$0xff] %v5731_v29  ;;  %v5733_v50 = vadd.f32 %v3035_v63, %v2746_v35  ;;  %v3037_v47 = vpop.f32.mrb[111].mxu1  ;;  %v4594_v63 = vcombine.high %v640_v26, %v644_v5 }
 0x205   : > { %3280 = vmatmul.mubr.bf16.gmra.mrb[216].mxu0 %v4575_v62  ;;  %v4585_v47 = vcombine.low %v632_v15, %v636_v11  ;;  %v4592_v62 = vcombine.high %v639_v24, %v643_v25  ;;  %v4591_v15 = vcombine.low %v639_v24, %v643_v25  ;;  %v655_v24 = vld [vmem:[%s5285_s30 + $0x690] sm:$0xff] }
 0x206   : > { %5985 = vst [vmem:[#allocation17_spill] sm:$0xff] %v5733_v50  ;;  %3569 = vmatmul.mubr.bf16.gmra.mrb[216].mxu1 %v4577_v19  ;;  %3287 = vmatprep.mubr.bf16.mxu0 %v4584_v23  ;;  %v659_v25 = vld [vmem:[%s5285_s30 + $0x6b0] sm:$0xff] }
 0x207   : > { %3576 = vmatprep.mubr.bf16.mxu1 %v4586_v46 }
 0x208   : > { %v2751_v40 = vpop.f32.mrb[112].mxu0 }
 0x209   : > { %v3040_v14 = vpop.f32.mrb[112].mxu1  ;;  %v2753_v29 = vpop.f32.mrb[113].mxu0 }
 0x20a   : > { %v5739_v43 = vadd.f32 %v3040_v14, %v2751_v40  ;;  %v3042_v53 = vpop.f32.mrb[113].mxu1  ;;  %v2754_v35 = vpop.f32.mrb[114].mxu0  ;;  %v648_v40 = vld [vmem:[%s5285_s30 + $0x658] sm:$0xff] }
 0x20b   : > { %v3043_v19 = vpop.f32.mrb[114].mxu1  ;;  %v2756_v23 = vpop.f32.mrb[115].mxu0  ;;  %v652_v14 = vld [vmem:[%s5285_s30 + $0x678] sm:$0xff] }
 0x20c   : > { %5986 = vst [vmem:[#allocation18_spill] sm:$0xff] %v5739_v43  ;;  %v5741_v46 = vadd.f32 %v3043_v19, %v2754_v35  ;;  %v3045_v50 = vpop.f32.mrb[115].mxu1  ;;  %v4602_v19 = vcombine.high %v648_v40, %v652_v14 }
 0x20d   : > { %3288 = vmatmul.mubr.bf16.gmra.mrb[220].mxu0 %v4583_v10  ;;  %v4593_v50 = vcombine.low %v640_v26, %v644_v5  ;;  %v4600_v10 = vcombine.high %v647_v54, %v651_v57  ;;  %v4599_v26 = vcombine.low %v647_v54, %v651_v57  ;;  %v663_v54 = vld [vmem:[%s5285_s30 + $0x6d0] sm:$0xff] }
 0x20e   : > { %5987 = vst [vmem:[#allocation19_spill] sm:$0xff] %v5741_v46  ;;  %3577 = vmatmul.mubr.bf16.gmra.mrb[220].mxu1 %v4585_v47  ;;  %3295 = vmatprep.mubr.bf16.mxu0 %v4592_v62  ;;  %v667_v57 = vld [vmem:[%s5285_s30 + $0x6f0] sm:$0xff] }
 0x20f   : > { %3584 = vmatprep.mubr.bf16.mxu1 %v4594_v63 }
 0x210   : > { %v2759_v29 = vpop.f32.mrb[116].mxu0 }
 0x211   : > { %v3048_v53 = vpop.f32.mrb[116].mxu1  ;;  %v2761_v43 = vpop.f32.mrb[117].mxu0 }
 0x212   : > { %v5747_v11 = vadd.f32 %v3048_v53, %v2759_v29  ;;  %v3050_v23 = vpop.f32.mrb[117].mxu1  ;;  %v2762_v35 = vpop.f32.mrb[118].mxu0  ;;  %v656_v29 = vld [vmem:[%s5285_s30 + $0x698] sm:$0xff] }
 0x213   : > { %v3051_v47 = vpop.f32.mrb[118].mxu1  ;;  %v2764_v62 = vpop.f32.mrb[119].mxu0  ;;  %v660_v53 = vld [vmem:[%s5285_s30 + $0x6b8] sm:$0xff] }
 0x214   : > { %5988 = vst [vmem:[#allocation20_spill] sm:$0xff] %v5747_v11  ;;  %v5749_v63 = vadd.f32 %v3051_v47, %v2762_v35  ;;  %v3053_v46 = vpop.f32.mrb[119].mxu1  ;;  %v4610_v47 = vcombine.high %v656_v29, %v660_v53 }
 0x215   : > { %3296 = vmatmul.mubr.bf16.gmra.mrb[224].mxu0 %v4591_v15  ;;  %v4601_v46 = vcombine.low %v648_v40, %v652_v14  ;;  %v4608_v15 = vcombine.high %v655_v24, %v659_v25  ;;  %v4607_v40 = vcombine.low %v655_v24, %v659_v25  ;;  %v671_v24 = vld [vmem:[%s5285_s30 + $0x710] sm:$0xff] }
 0x216   : > { %5989 = vst [vmem:[#allocation21_spill] sm:$0xff] %v5749_v63  ;;  %3585 = vmatmul.mubr.bf16.gmra.mrb[224].mxu1 %v4593_v50  ;;  %3303 = vmatprep.mubr.bf16.mxu0 %v4600_v10  ;;  %v675_v25 = vld [vmem:[%s5285_s30 + $0x730] sm:$0xff] }
 0x217   : > { %3592 = vmatprep.mubr.bf16.mxu1 %v4602_v19 }
 0x218   : > { %v2767_v43 = vpop.f32.mrb[120].mxu0 }
 0x219   : > { %v3056_v23 = vpop.f32.mrb[120].mxu1  ;;  %v2769_v11 = vpop.f32.mrb[121].mxu0 }
 0x21a   : > { %v5755_v5 = vadd.f32 %v3056_v23, %v2767_v43  ;;  %v3058_v62 = vpop.f32.mrb[121].mxu1  ;;  %v2770_v35 = vpop.f32.mrb[122].mxu0  ;;  %v664_v43 = vld [vmem:[%s5285_s30 + $0x6d8] sm:$0xff] }
 0x21b   : > { %v3059_v50 = vpop.f32.mrb[122].mxu1  ;;  %v2772_v10 = vpop.f32.mrb[123].mxu0  ;;  %v668_v23 = vld [vmem:[%s5285_s30 + $0x6f8] sm:$0xff] }
 0x21c   : > { %5990 = vst [vmem:[#allocation22_spill] sm:$0xff] %v5755_v5  ;;  %v5757_v19 = vadd.f32 %v3059_v50, %v2770_v35  ;;  %v3061_v63 = vpop.f32.mrb[123].mxu1  ;;  %v4618_v10 = vcombine.high %v664_v43, %v668_v23 }
 0x21d   : > { %3304 = vmatmul.mubr.bf16.gmra.mrb[228].mxu0 %v4599_v26  ;;  %v4609_v63 = vcombine.low %v656_v29, %v660_v53  ;;  %v4616_v26 = vcombine.high %v663_v54, %v667_v57 }
 0x21e   : > { %5991 = vst [vmem:[#allocation23_spill] sm:$0xff] %v5757_v19  ;;  %3593 = vmatmul.mubr.bf16.gmra.mrb[228].mxu1 %v4601_v46  ;;  %3311 = vmatprep.mubr.bf16.mxu0 %v4608_v15 }
 0x21f   : > { %3600 = vmatprep.mubr.bf16.mxu1 %v4610_v47 }
 0x220   : > { %v2775_v11 = vpop.f32.mrb[124].mxu0 }
 0x221   : > { %v3064_v62 = vpop.f32.mrb[124].mxu1  ;;  %v2777_v5 = vpop.f32.mrb[125].mxu0 }
 0x222   : > { %v5763_v14 = vadd.f32 %v3064_v62, %v2775_v11  ;;  %v3066_v35 = vpop.f32.mrb[125].mxu1  ;;  %v2778_v50 = vpop.f32.mrb[126].mxu0  ;;  %v672_v11 = vld [vmem:[%s5285_s30 + $0x718] sm:$0xff] }
 0x223   : > { %v3067_v46 = vpop.f32.mrb[126].mxu1  ;;  %v2780_v15 = vpop.f32.mrb[127].mxu0  ;;  %v676_v62 = vld [vmem:[%s5285_s30 + $0x738] sm:$0xff] }
 0x224   : > { %5992 = vst [vmem:[#allocation24_spill] sm:$0xff] %v5763_v14  ;;  %v5765_v47 = vadd.f32 %v3067_v46, %v2778_v50  ;;  %v3069_v19 = vpop.f32.mrb[127].mxu1  ;;  %v4615_v15 = vcombine.low %v663_v54, %v667_v57 }
 0x225   : > { %3312 = vmatmul.mubr.bf16.gmra.mrb[232].mxu0 %v4607_v40  ;;  %v4617_v19 = vcombine.low %v664_v43, %v668_v23  ;;  %v4624_v40 = vcombine.high %v671_v24, %v675_v25  ;;  %v679_v23 = vld [vmem:[%s5285_s30 + $0x750] sm:$0xff] }
 0x226   : > { %5993 = vst [vmem:[#allocation25_spill] sm:$0xff] %v5765_v47  ;;  %3601 = vmatmul.mubr.bf16.gmra.mrb[232].mxu1 %v4609_v63  ;;  %3319 = vmatprep.mubr.bf16.mxu0 %v4616_v26  ;;  %v4626_v47 = vcombine.high %v672_v11, %v676_v62 }
 0x227   : > { %3608 = vmatprep.mubr.bf16.mxu1 %v4618_v10 }
 0x228   : > { %v3105_v5 = vpop.f32.mrb[128].mxu0 }
 0x229   : > { %v3106_v29 = vadd.f32 %v3105_v5, %v5515_v41  ;;  %v3394_v53 = vpop.f32.mrb[128].mxu1  ;;  %v3107_v35 = vpop.f32.mrb[129].mxu0  ;;  %v5778_v41 = vld [vmem:[%s5969_s2] ss:$0 sm:$0xff] }
 0x22a   : > { %v3396_v14 = vpop.f32.mrb[129].mxu1  ;;  %v3108_v50 = vpop.f32.mrb[130].mxu0 }
 0x22b   : > { %v3395_v63 = vadd.f32 %v3394_v53, %v3106_v29  ;;  %v3109_v26 = vadd.f32 %v3108_v50, %v5517_v49  ;;  %v3397_v46 = vpop.f32.mrb[130].mxu1  ;;  %v3110_v10 = vpop.f32.mrb[131].mxu0  ;;  %v683_v14 = vld [vmem:[%s5285_s30 + $0x770] sm:$0xff]  ;;  %v680_v29 = vld [vmem:[%s5285_s30 + $0x758] sm:$0xff] }
 0x22c   : > { %v3399_v54 = vpop.f32.mrb[131].mxu1  ;;  %v684_v53 = vld [vmem:[%s5285_s30 + $0x778] sm:$0xff] }
 0x22d   : > { %v3398_v57 = vadd.f32 %v3397_v46, %v3109_v26  ;;  %3320 = vmatmul.mubr.bf16.gmra.mrb[236].mxu0 %v4615_v15  ;;  %v3851_v43 = vadd.f32 %v5778_v41, %v3395_v63  ;;  %v4632_v46 = vcombine.high %v679_v23, %v683_v14 }
 0x22e   : > { %3609 = vmatmul.mubr.bf16.gmra.mrb[236].mxu1 %v4617_v19  ;;  %3327 = vmatprep.mubr.bf16.mxu0 %v4624_v40  ;;  %v4623_v40 = vcombine.low %v671_v24, %v675_v25 }
 0x22f   : > { %v3852_v49 = vadd.f32 %v5778_v41, %v3398_v57  ;;  %3616 = vmatprep.mubr.bf16.mxu1 %v4626_v47  ;;  %v4625_v47 = vcombine.low %v672_v11, %v676_v62  ;;  %v687_v11 = vld [vmem:[%s5285_s30 + $0x790] sm:$0xff] }
 0x230   : > { %v3113_v5 = vpop.f32.mrb[132].mxu0  ;;  %v691_v62 = vld [vmem:[%s5285_s30 + $0x7b0] sm:$0xff] }
 0x231   : > { %v4850_v35 = vpack.c.bf16 %v3852_v49, %v3851_v43  ;;  %v3114_v15 = vadd.f32 %v3113_v5, %v5523_v59  ;;  %v3402_v50 = vpop.f32.mrb[132].mxu1  ;;  %v3115_v19 = vpop.f32.mrb[133].mxu0  ;;  %v4634_v43 = vcombine.high %v680_v29, %v684_v53 }
 0x232   : > { %v3404_v63 = vpop.f32.mrb[133].mxu1  ;;  %v3116_v26 = vpop.f32.mrb[134].mxu0 }
 0x233   : > { %4851 = vst [vmem:[%s5787_s11] sm:$0xff] %v4850_v35   ;;  %v3403_v10 = vadd.f32 %v3402_v50, %v3114_v15  ;;  %v3117_v54 = vadd.f32 %v3116_v26, %v5525_v3  ;;  %v3405_v57 = vpop.f32.mrb[134].mxu1  ;;  %v3118_v33 = vpop.f32.mrb[135].mxu0  ;;  %v688_v35 = vld [vmem:[%s5285_s30 + $0x798] sm:$0xff]  ;;  %v4631_v63 = vcombine.low %v679_v23, %v683_v14 }
 0x234   : > { %v3407_v49 = vpop.f32.mrb[135].mxu1  ;;  %v692_v3 = vld [vmem:[%s5285_s30 + $0x7b8] sm:$0xff] }
 0x235   : > { %v3406_v59 = vadd.f32 %v3405_v57, %v3117_v54  ;;  %3328 = vmatmul.mubr.bf16.gmra.mrb[240].mxu0 %v4623_v40  ;;  %v3853_v24 = vadd.f32 %v5778_v41, %v3403_v10  ;;  %v4642_v49 = vcombine.high %v688_v35, %v692_v3 }
 0x236   : > { %3617 = vmatmul.mubr.bf16.gmra.mrb[240].mxu1 %v4625_v47  ;;  %3335 = vmatprep.mubr.bf16.mxu0 %v4632_v46  ;;  %v4633_v47 = vcombine.low %v680_v29, %v684_v53  ;;  %v4640_v46 = vcombine.high %v687_v11, %v691_v62  ;;  %v695_v29 = vld [vmem:[%s5285_s30 + $0x7d0] sm:$0xff] }
 0x237   : > { %v3854_v25 = vadd.f32 %v5778_v41, %v3406_v59  ;;  %3624 = vmatprep.mubr.bf16.mxu1 %v4634_v43  ;;  %v699_v53 = vld [vmem:[%s5285_s30 + $0x7f0] sm:$0xff] }
 0x238   : > { %v3121_v5 = vpop.f32.mrb[136].mxu0 }
 0x239   : > { %v4855_v15 = vpack.c.bf16 %v3854_v25, %v3853_v24  ;;  %v3122_v33 = vadd.f32 %v3121_v5, %v5531_v13  ;;  %v3410_v50 = vpop.f32.mrb[136].mxu1  ;;  %v3123_v19 = vpop.f32.mrb[137].mxu0  ;;  %v696_v25 = vld [vmem:[%s5285_s30 + $0x7d8] sm:$0xff] }
 0x23a   : > { %v3412_v40 = vpop.f32.mrb[137].mxu1  ;;  %v3124_v26 = vpop.f32.mrb[138].mxu0  ;;  %v4639_v19 = vcombine.low %v687_v11, %v691_v62 }
 0x23b   : > { %5007 = vst [vmem:[%s5787_s11 + $0x8] sm:$0xff] %v4855_v15   ;;  %v3411_v10 = vadd.f32 %v3410_v50, %v3122_v33  ;;  %v3125_v54 = vadd.f32 %v3124_v26, %v5533_v21  ;;  %v3413_v57 = vpop.f32.mrb[138].mxu1  ;;  %v3126_v43 = vpop.f32.mrb[139].mxu0  ;;  %v700_v21 = vld [vmem:[%s5285_s30 + $0x7f8] sm:$0xff]  ;;  %v4641_v26 = vcombine.low %v688_v35, %v692_v3 }
 0x23c   : > { %v3415_v59 = vpop.f32.mrb[139].mxu1  ;;  %v4650_v43 = vcombine.high %v696_v25, %v700_v21 }
 0x23d   : > { %v3414_v13 = vadd.f32 %v3413_v57, %v3125_v54  ;;  %3336 = vmatmul.mubr.bf16.gmra.mrb[244].mxu0 %v4631_v63  ;;  %v3855_v23 = vadd.f32 %v5778_v41, %v3411_v10 }
 0x23e   : > { %3625 = vmatmul.mubr.bf16.gmra.mrb[244].mxu1 %v4633_v47  ;;  %3343 = vmatprep.mubr.bf16.mxu0 %v4640_v46  ;;  %v4648_v47 = vcombine.high %v695_v29, %v699_v53 }
 0x23f   : > { %v3856_v14 = vadd.f32 %v5778_v41, %v3414_v13  ;;  %3632 = vmatprep.mubr.bf16.mxu1 %v4642_v49 }
 0x240   : > { %v3129_v24 = vpop.f32.mrb[140].mxu0 }
 0x241   : > { %v4860_v5 = vpack.c.bf16 %v3856_v14, %v3855_v23  ;;  %v3130_v15 = vadd.f32 %v3129_v24, %v5539_v31  ;;  %v3418_v33 = vpop.f32.mrb[140].mxu1  ;;  %v3131_v50 = vpop.f32.mrb[141].mxu0  ;;  %v4647_v23 = vcombine.low %v695_v29, %v699_v53 }
 0x242   : > { %v3420_v63 = vpop.f32.mrb[141].mxu1  ;;  %v3132_v40 = vpop.f32.mrb[142].mxu0 }
 0x243   : > { %5008 = vst [vmem:[%s5787_s11 + $0x10] sm:$0xff] %v4860_v5   ;;  %v3419_v46 = vadd.f32 %v3418_v33, %v3130_v15  ;;  %v3133_v10 = vadd.f32 %v3132_v40, %v5541_v39  ;;  %v3421_v54 = vpop.f32.mrb[142].mxu1  ;;  %v3134_v57 = vpop.f32.mrb[143].mxu0  ;;  %v4649_v5 = vcombine.low %v696_v25, %v700_v21 }
 0x244   : > { %v3423_v49 = vpop.f32.mrb[143].mxu1 }
 0x245   : > { %v3422_v59 = vadd.f32 %v3421_v54, %v3133_v10  ;;  %3344 = vmatmul.mubr.bf16.gmra.mrb[248].mxu0 %v4639_v19  ;;  %v3857_v31 = vadd.f32 %v5778_v41, %v3419_v46 }
 0x246   : > { %3633 = vmatmul.mubr.bf16.gmra.mrb[248].mxu1 %v4641_v26  ;;  %3351 = vmatprep.mubr.bf16.mxu0 %v4648_v47 }
 0x247   : > { %v3858_v11 = vadd.f32 %v5778_v41, %v3422_v59  ;;  %3640 = vmatprep.mubr.bf16.mxu1 %v4650_v43 }
 0x248   : > { %v3137_v62 = vpop.f32.mrb[144].mxu0 }
 0x249   : > { %v4865_v35 = vpack.c.bf16 %v3858_v11, %v3857_v31  ;;  %v3138_v3 = vadd.f32 %v3137_v62, %v5547_v51  ;;  %v3426_v13 = vpop.f32.mrb[144].mxu1  ;;  %v3139_v39 = vpop.f32.mrb[145].mxu0 }
 0x24a   : > { %v3428_v14 = vpop.f32.mrb[145].mxu1  ;;  %v3140_v24 = vpop.f32.mrb[146].mxu0 }
 0x24b   : > { %5009 = vst [vmem:[%s5787_s11 + $0x18] sm:$0xff] %v4865_v35   ;;  %v3427_v15 = vadd.f32 %v3426_v13, %v3138_v3  ;;  %v3141_v33 = vadd.f32 %v3140_v24, %v5549_v60  ;;  %v3429_v50 = vpop.f32.mrb[146].mxu1  ;;  %v3142_v19 = vpop.f32.mrb[147].mxu0 }
 0x24c   : > { %v3431_v63 = vpop.f32.mrb[147].mxu1 }
 0x24d   : > { %v3430_v40 = vadd.f32 %v3429_v50, %v3141_v33  ;;  %3352 = vmatmul.mubr.bf16.gmra.mrb[252].mxu0 %v4647_v23  ;;  %v3859_v26 = vadd.f32 %v5778_v41, %v3427_v15 }
 0x24e   : > { %3641 = vmatmul.mubr.bf16.gmra.mrb[252].mxu1 %v4649_v5 }
 0x24f   : > { %v3860_v51 = vadd.f32 %v5778_v41, %v3430_v40 }
 0x250   : > { %v3145_v47 = vpop.f32.mrb[148].mxu0 }
 0x251   : > { %v4870_v29 = vpack.c.bf16 %v3860_v51, %v3859_v26  ;;  %v3146_v53 = vadd.f32 %v3145_v47, %v5555_v7  ;;  %v3434_v25 = vpop.f32.mrb[148].mxu1  ;;  %v3147_v21 = vpop.f32.mrb[149].mxu0 }
 0x252   : > { %v3436_v46 = vpop.f32.mrb[149].mxu1  ;;  %v3148_v10 = vpop.f32.mrb[150].mxu0 }
 0x253   : > { %5010 = vst [vmem:[%s5787_s11 + $0x20] sm:$0xff] %v4870_v29   ;;  %v3435_v60 = vadd.f32 %v3434_v25, %v3146_v53  ;;  %v3149_v54 = vadd.f32 %v3148_v10, %v5557_v16  ;;  %v3437_v57 = vpop.f32.mrb[150].mxu1  ;;  %v3150_v43 = vpop.f32.mrb[151].mxu0 }
 0x254   : > { %v3439_v49 = vpop.f32.mrb[151].mxu1 }
 0x255   : > { %v3438_v59 = vadd.f32 %v3437_v57, %v3149_v54  ;;  %v3861_v31 = vadd.f32 %v5778_v41, %v3435_v60 }
 0x257   : > { %v3862_v11 = vadd.f32 %v5778_v41, %v3438_v59 }
 0x258   : > { %v3153_v62 = vpop.f32.mrb[152].mxu0 }
 0x259   : > { %v4875_v35 = vpack.c.bf16 %v3862_v11, %v3861_v31  ;;  %v3154_v7 = vadd.f32 %v3153_v62, %v5563_v27  ;;  %v3442_v3 = vpop.f32.mrb[152].mxu1  ;;  %v3155_v13 = vpop.f32.mrb[153].mxu0 }
 0x25a   : > { %v3444_v39 = vpop.f32.mrb[153].mxu1  ;;  %v3156_v23 = vpop.f32.mrb[154].mxu0 }
 0x25b   : > { %5011 = vst [vmem:[%s5787_s11 + $0x28] sm:$0xff] %v4875_v35   ;;  %v3443_v14 = vadd.f32 %v3442_v3, %v3154_v7  ;;  %v3157_v16 = vadd.f32 %v3156_v23, %v5565_v36  ;;  %v3445_v24 = vpop.f32.mrb[154].mxu1  ;;  %v3158_v5 = vpop.f32.mrb[155].mxu0 }
 0x25c   : > { %v3447_v15 = vpop.f32.mrb[155].mxu1 }
 0x25d   : > { %v3446_v33 = vadd.f32 %v3445_v24, %v3157_v16  ;;  %v3863_v50 = vadd.f32 %v5778_v41, %v3443_v14 }
 0x25f   : > { %v3864_v19 = vadd.f32 %v5778_v41, %v3446_v33 }
 0x260   : > { %v3161_v63 = vpop.f32.mrb[156].mxu0 }
 0x261   : > { %v4880_v40 = vpack.c.bf16 %v3864_v19, %v3863_v50  ;;  %v3162_v27 = vadd.f32 %v3161_v63, %v5571_v48  ;;  %v3450_v26 = vpop.f32.mrb[156].mxu1  ;;  %v3163_v51 = vpop.f32.mrb[157].mxu0 }
 0x262   : > { %v3452_v47 = vpop.f32.mrb[157].mxu1  ;;  %v3164_v29 = vpop.f32.mrb[158].mxu0 }
 0x263   : > { %5012 = vst [vmem:[%s5787_s11 + $0x30] sm:$0xff] %v4880_v40   ;;  %v3451_v53 = vadd.f32 %v3450_v26, %v3162_v27  ;;  %v3165_v36 = vadd.f32 %v3164_v29, %v5573_v58  ;;  %v3453_v25 = vpop.f32.mrb[158].mxu1  ;;  %v3166_v21 = vpop.f32.mrb[159].mxu0 }
 0x264   : > { %v3455_v46 = vpop.f32.mrb[159].mxu1 }
 0x265   : > { %v3454_v10 = vadd.f32 %v3453_v25, %v3165_v36  ;;  %v3865_v60 = vadd.f32 %v5778_v41, %v3451_v53 }
 0x267   : > { %v3866_v54 = vadd.f32 %v5778_v41, %v3454_v10 }
 0x268   : > { %v3169_v57 = vpop.f32.mrb[160].mxu0 }
 0x269   : > { %v4885_v43 = vpack.c.bf16 %v3866_v54, %v3865_v60  ;;  %v3170_v48 = vadd.f32 %v3169_v57, %v5579_v8  ;;  %v3458_v49 = vpop.f32.mrb[160].mxu1  ;;  %v3171_v59 = vpop.f32.mrb[161].mxu0 }
 0x26a   : > { %v3460_v31 = vpop.f32.mrb[161].mxu1  ;;  %v3172_v11 = vpop.f32.mrb[162].mxu0 }
 0x26b   : > { %5013 = vst [vmem:[%s5787_s11 + $0x38] sm:$0xff] %v4885_v43   ;;  %v3459_v62 = vadd.f32 %v3458_v49, %v3170_v48  ;;  %v3173_v58 = vadd.f32 %v3172_v11, %v5581_v18  ;;  %v3461_v35 = vpop.f32.mrb[162].mxu1  ;;  %v3174_v7 = vpop.f32.mrb[163].mxu0 }
 0x26c   : > { %v3463_v3 = vpop.f32.mrb[163].mxu1 }
 0x26d   : > { %v3462_v13 = vadd.f32 %v3461_v35, %v3173_v58  ;;  %v3867_v39 = vadd.f32 %v5778_v41, %v3459_v62 }
 0x26f   : > { %v3868_v23 = vadd.f32 %v5778_v41, %v3462_v13 }
 0x270   : > { %v3177_v14 = vpop.f32.mrb[164].mxu0 }
 0x271   : > { %v4890_v16 = vpack.c.bf16 %v3868_v23, %v3867_v39  ;;  %v3178_v8 = vadd.f32 %v3177_v14, %v5587_v30  ;;  %v3466_v24 = vpop.f32.mrb[164].mxu1  ;;  %v3179_v5 = vpop.f32.mrb[165].mxu0 }
 0x272   : > { %v3468_v15 = vpop.f32.mrb[165].mxu1  ;;  %v3180_v33 = vpop.f32.mrb[166].mxu0 }
 0x273   : > { %5014 = vst [vmem:[%s5787_s11 + $0x40] sm:$0xff] %v4890_v16   ;;  %v3467_v50 = vadd.f32 %v3466_v24, %v3178_v8  ;;  %v3181_v18 = vadd.f32 %v3180_v33, %v5589_v42  ;;  %v3469_v19 = vpop.f32.mrb[166].mxu1  ;;  %v3182_v63 = vpop.f32.mrb[167].mxu0 }
 0x274   : > { %v3471_v40 = vpop.f32.mrb[167].mxu1 }
 0x275   : > { %v3470_v27 = vadd.f32 %v3469_v19, %v3181_v18  ;;  %v3869_v26 = vadd.f32 %v5778_v41, %v3467_v50 }
 0x277   : > { %v3870_v51 = vadd.f32 %v5778_v41, %v3470_v27 }
 0x278   : > { %v3185_v47 = vpop.f32.mrb[168].mxu0 }
 0x279   : > { %v4895_v29 = vpack.c.bf16 %v3870_v51, %v3869_v26  ;;  %v3186_v30 = vadd.f32 %v3185_v47, %v5595_v55  ;;  %v3474_v53 = vpop.f32.mrb[168].mxu1  ;;  %v3187_v36 = vpop.f32.mrb[169].mxu0 }
 0x27a   : > { %v3476_v25 = vpop.f32.mrb[169].mxu1  ;;  %v3188_v21 = vpop.f32.mrb[170].mxu0 }
 0x27b   : > { %5015 = vst [vmem:[%s5787_s11 + $0x48] sm:$0xff] %v4895_v29   ;;  %v3475_v46 = vadd.f32 %v3474_v53, %v3186_v30  ;;  %v3189_v42 = vadd.f32 %v3188_v21, %v5597_v2  ;;  %v3477_v10 = vpop.f32.mrb[170].mxu1  ;;  %v3190_v60 = vpop.f32.mrb[171].mxu0 }
 0x27c   : > { %v3479_v54 = vpop.f32.mrb[171].mxu1 }
 0x27d   : > { %v3478_v57 = vadd.f32 %v3477_v10, %v3189_v42  ;;  %v3871_v43 = vadd.f32 %v5778_v41, %v3475_v46 }
 0x27f   : > { %v3872_v48 = vadd.f32 %v5778_v41, %v3478_v57 }
 0x280   : > { %v3193_v49 = vpop.f32.mrb[172].mxu0 }
 0x281   : > { %v4900_v59 = vpack.c.bf16 %v3872_v48, %v3871_v43  ;;  %v3194_v55 = vadd.f32 %v3193_v49, %v5603_v17  ;;  %v3482_v31 = vpop.f32.mrb[172].mxu1  ;;  %v3195_v11 = vpop.f32.mrb[173].mxu0 }
 0x282   : > { %v3484_v62 = vpop.f32.mrb[173].mxu1  ;;  %v3196_v58 = vpop.f32.mrb[174].mxu0 }
 0x283   : > { %5016 = vst [vmem:[%s5787_s11 + $0x50] sm:$0xff] %v4900_v59   ;;  %v3483_v35 = vadd.f32 %v3482_v31, %v3194_v55  ;;  %v3197_v2 = vadd.f32 %v3196_v58, %v5605_v28  ;;  %v3485_v7 = vpop.f32.mrb[174].mxu1  ;;  %v3198_v3 = vpop.f32.mrb[175].mxu0 }
 0x284   : > { %v3487_v13 = vpop.f32.mrb[175].mxu1 }
 0x285   : > { %v3486_v39 = vadd.f32 %v3485_v7, %v3197_v2  ;;  %v3873_v23 = vadd.f32 %v5778_v41, %v3483_v35 }
 0x287   : > { %v3874_v14 = vadd.f32 %v5778_v41, %v3486_v39 }
 0x288   : > { %v3201_v16 = vpop.f32.mrb[176].mxu0 }
 0x289   : > { %v4905_v8 = vpack.c.bf16 %v3874_v14, %v3873_v23  ;;  %v3202_v17 = vadd.f32 %v3201_v16, %v5611_v44  ;;  %v3490_v24 = vpop.f32.mrb[176].mxu1  ;;  %v3203_v5 = vpop.f32.mrb[177].mxu0 }
 0x28a   : > { %v3492_v15 = vpop.f32.mrb[177].mxu1  ;;  %v3204_v33 = vpop.f32.mrb[178].mxu0 }
 0x28b   : > { %5017 = vst [vmem:[%s5787_s11 + $0x58] sm:$0xff] %v4905_v8   ;;  %v3491_v50 = vadd.f32 %v3490_v24, %v3202_v17  ;;  %v3205_v28 = vadd.f32 %v3204_v33, %v5613_v56  ;;  %v3493_v18 = vpop.f32.mrb[178].mxu1  ;;  %v3206_v19 = vpop.f32.mrb[179].mxu0 }
 0x28c   : > { %v3495_v63 = vpop.f32.mrb[179].mxu1 }
 0x28d   : > { %v3494_v40 = vadd.f32 %v3493_v18, %v3205_v28  ;;  %v3875_v27 = vadd.f32 %v5778_v41, %v3491_v50 }
 0x28f   : > { %v3876_v26 = vadd.f32 %v5778_v41, %v3494_v40 }
 0x290   : > { %v3209_v51 = vpop.f32.mrb[180].mxu0 }
 0x291   : > { %v4910_v47 = vpack.c.bf16 %v3876_v26, %v3875_v27  ;;  %v3210_v44 = vadd.f32 %v3209_v51, %v5619_v9  ;;  %v3498_v29 = vpop.f32.mrb[180].mxu1  ;;  %v3211_v30 = vpop.f32.mrb[181].mxu0 }
 0x292   : > { %v3500_v53 = vpop.f32.mrb[181].mxu1  ;;  %v3212_v36 = vpop.f32.mrb[182].mxu0 }
 0x293   : > { %5018 = vst [vmem:[%s5787_s11 + $0x60] sm:$0xff] %v4910_v47   ;;  %v3499_v25 = vadd.f32 %v3498_v29, %v3210_v44  ;;  %v3213_v56 = vadd.f32 %v3212_v36, %v5621_v22  ;;  %v3501_v21 = vpop.f32.mrb[182].mxu1  ;;  %v3214_v46 = vpop.f32.mrb[183].mxu0 }
 0x294   : > { %v3503_v42 = vpop.f32.mrb[183].mxu1 }
 0x295   : > { %v3502_v10 = vadd.f32 %v3501_v21, %v3213_v56  ;;  %v3877_v60 = vadd.f32 %v5778_v41, %v3499_v25 }
 0x297   : > { %v3878_v54 = vadd.f32 %v5778_v41, %v3502_v10 }
 0x298   : > { %v3217_v57 = vpop.f32.mrb[184].mxu0 }
 0x299   : > { %v4915_v43 = vpack.c.bf16 %v3878_v54, %v3877_v60  ;;  %v3218_v9 = vadd.f32 %v3217_v57, %v5627_v37  ;;  %v3506_v48 = vpop.f32.mrb[184].mxu1  ;;  %v3219_v49 = vpop.f32.mrb[185].mxu0 }
 0x29a   : > { %v3508_v59 = vpop.f32.mrb[185].mxu1  ;;  %v3220_v55 = vpop.f32.mrb[186].mxu0 }
 0x29b   : > { %5019 = vst [vmem:[%s5787_s11 + $0x68] sm:$0xff] %v4915_v43   ;;  %v3507_v31 = vadd.f32 %v3506_v48, %v3218_v9  ;;  %v3221_v22 = vadd.f32 %v3220_v55, %v5629_v52  ;;  %v3509_v11 = vpop.f32.mrb[186].mxu1  ;;  %v3222_v62 = vpop.f32.mrb[187].mxu0 }
 0x29c   : > { %v3511_v58 = vpop.f32.mrb[187].mxu1 }
 0x29d   : > { %v3510_v35 = vadd.f32 %v3509_v11, %v3221_v22  ;;  %v3879_v2 = vadd.f32 %v5778_v41, %v3507_v31 }
 0x29f   : > { %v3880_v7 = vadd.f32 %v5778_v41, %v3510_v35 }
 0x2a0   : > { %v3225_v3 = vpop.f32.mrb[188].mxu0 }
 0x2a1   : > { %v4920_v13 = vpack.c.bf16 %v3880_v7, %v3879_v2  ;;  %v3226_v37 = vadd.f32 %v3225_v3, %v5635_v1  ;;  %v3514_v39 = vpop.f32.mrb[188].mxu1  ;;  %v3227_v23 = vpop.f32.mrb[189].mxu0 }
 0x2a2   : > { %v3516_v14 = vpop.f32.mrb[189].mxu1  ;;  %v3228_v16 = vpop.f32.mrb[190].mxu0 }
 0x2a3   : > { %5020 = vst [vmem:[%s5787_s11 + $0x70] sm:$0xff] %v4920_v13   ;;  %v3515_v8 = vadd.f32 %v3514_v39, %v3226_v37  ;;  %v3229_v52 = vadd.f32 %v3228_v16, %v5637_v20  ;;  %v3517_v17 = vpop.f32.mrb[190].mxu1  ;;  %v3230_v24 = vpop.f32.mrb[191].mxu0 }
 0x2a4   : > { %v3519_v5 = vpop.f32.mrb[191].mxu1 }
 0x2a5   : > { %v3518_v15 = vadd.f32 %v3517_v17, %v3229_v52  ;;  %v3881_v33 = vadd.f32 %v5778_v41, %v3515_v8 }
 0x2a7   : > { %v3882_v50 = vadd.f32 %v5778_v41, %v3518_v15 }
 0x2a8   : > { %v3233_v28 = vpop.f32.mrb[192].mxu0 }
 0x2a9   : > { %v4925_v18 = vpack.c.bf16 %v3882_v50, %v3881_v33  ;;  %v3234_v1 = vadd.f32 %v3233_v28, %v5643_v32  ;;  %v3522_v19 = vpop.f32.mrb[192].mxu1  ;;  %v3235_v63 = vpop.f32.mrb[193].mxu0 }
 0x2aa   : > { %v3524_v40 = vpop.f32.mrb[193].mxu1  ;;  %v3236_v27 = vpop.f32.mrb[194].mxu0 }
 0x2ab   : > { %5021 = vst [vmem:[%s5787_s11 + $0x78] sm:$0xff] %v4925_v18   ;;  %v3523_v26 = vadd.f32 %v3522_v19, %v3234_v1  ;;  %v3237_v20 = vadd.f32 %v3236_v27, %v5645_v61  ;;  %v3525_v51 = vpop.f32.mrb[194].mxu1  ;;  %v3238_v47 = vpop.f32.mrb[195].mxu0 }
 0x2ac   : > { %v3527_v44 = vpop.f32.mrb[195].mxu1 }
 0x2ad   : > { %v3526_v29 = vadd.f32 %v3525_v51, %v3237_v20  ;;  %v3883_v30 = vadd.f32 %v5778_v41, %v3523_v26 }
 0x2af   : > { %v3884_v53 = vadd.f32 %v5778_v41, %v3526_v29 }
 0x2b0   : > { %v3241_v36 = vpop.f32.mrb[196].mxu0 }
 0x2b1   : > { %v4930_v25 = vpack.c.bf16 %v3884_v53, %v3883_v30  ;;  %v3242_v32 = vadd.f32 %v3241_v36, %v5651_v0  ;;  %v3530_v56 = vpop.f32.mrb[196].mxu1  ;;  %v3243_v21 = vpop.f32.mrb[197].mxu0 }
 0x2b2   : > { %v3532_v46 = vpop.f32.mrb[197].mxu1  ;;  %v3244_v42 = vpop.f32.mrb[198].mxu0 }
 0x2b3   : > { %5022 = vst [vmem:[%s5787_s11 + $0x80] sm:$0xff] %v4930_v25   ;;  %v3531_v10 = vadd.f32 %v3530_v56, %v3242_v32  ;;  %v3245_v61 = vadd.f32 %v3244_v42, %v5653_v38  ;;  %v3533_v60 = vpop.f32.mrb[198].mxu1  ;;  %v3246_v54 = vpop.f32.mrb[199].mxu0 }
 0x2b4   : > { %v3535_v57 = vpop.f32.mrb[199].mxu1 }
 0x2b5   : > { %v3534_v43 = vadd.f32 %v3533_v60, %v3245_v61  ;;  %v3885_v9 = vadd.f32 %v5778_v41, %v3531_v10  ;;  %v5996_v10 = vld [vmem:[#allocation5_spill] sm:$0xff] }
 0x2b7   : > { %v3886_v48 = vadd.f32 %v5778_v41, %v3534_v43 }
 0x2b8   : > { %v3249_v49 = vpop.f32.mrb[200].mxu0 }
 0x2b9   : > { %v4935_v59 = vpack.c.bf16 %v3886_v48, %v3885_v9  ;;  %v3250_v0 = vadd.f32 %v3249_v49, %v5659_v34  ;;  %v3538_v55 = vpop.f32.mrb[200].mxu1  ;;  %v3251_v31 = vpop.f32.mrb[201].mxu0 }
 0x2ba   : > { %v3540_v22 = vpop.f32.mrb[201].mxu1  ;;  %v3252_v11 = vpop.f32.mrb[202].mxu0 }
 0x2bb   : > { %5023 = vst [vmem:[%s5787_s11 + $0x88] sm:$0xff] %v4935_v59   ;;  %v3539_v62 = vadd.f32 %v3538_v55, %v3250_v0  ;;  %v3253_v38 = vadd.f32 %v3252_v11, %v5661_v12  ;;  %v3541_v58 = vpop.f32.mrb[202].mxu1  ;;  %v3254_v35 = vpop.f32.mrb[203].mxu0  ;;  %v5997_v0 = vld [vmem:[#allocation6_spill] sm:$0xff] }
 0x2bc   : > { %v3543_v2 = vpop.f32.mrb[203].mxu1 }
 0x2bd   : > { %v3542_v7 = vadd.f32 %v3541_v58, %v3253_v38  ;;  %v3887_v3 = vadd.f32 %v5778_v41, %v3539_v62  ;;  %v5998_v58 = vld [vmem:[#allocation7_spill] sm:$0xff] }
 0x2bf   : > { %v3888_v13 = vadd.f32 %v5778_v41, %v3542_v7 }
 0x2c0   : > { %v3257_v37 = vpop.f32.mrb[204].mxu0 }
 0x2c1   : > { %v4940_v39 = vpack.c.bf16 %v3888_v13, %v3887_v3  ;;  %v3258_v34 = vadd.f32 %v3257_v37, %v5667_v6  ;;  %v3546_v23 = vpop.f32.mrb[204].mxu1  ;;  %v3259_v14 = vpop.f32.mrb[205].mxu0 }
 0x2c2   : > { %v3548_v16 = vpop.f32.mrb[205].mxu1  ;;  %v3260_v8 = vpop.f32.mrb[206].mxu0  ;;  %v5999_v14 = vld [vmem:[#allocation8_spill] sm:$0xff] }
 0x2c3   : > { %5024 = vst [vmem:[%s5787_s11 + $0x90] sm:$0xff] %v4940_v39   ;;  %v3547_v52 = vadd.f32 %v3546_v23, %v3258_v34  ;;  %v3261_v12 = vadd.f32 %v3260_v8, %v5669_v4  ;;  %v3549_v17 = vpop.f32.mrb[206].mxu1  ;;  %v3262_v24 = vpop.f32.mrb[207].mxu0  ;;  %v5994_v4 = vld [vmem:[#allocation3_spill] sm:$0xff] }
 0x2c4   : > { %v3551_v5 = vpop.f32.mrb[207].mxu1 }
 0x2c5   : > { %v3550_v15 = vadd.f32 %v3549_v17, %v3261_v12  ;;  %v3889_v33 = vadd.f32 %v5778_v41, %v3547_v52  ;;  %v6000_v5 = vld [vmem:[#allocation9_spill] sm:$0xff] }
 0x2c7   : > { %v3890_v50 = vadd.f32 %v5778_v41, %v3550_v15 }
 0x2c8   : > { %v3265_v28 = vpop.f32.mrb[208].mxu0 }
 0x2c9   : > { %v4945_v18 = vpack.c.bf16 %v3890_v50, %v3889_v33  ;;  %v3266_v6 = vadd.f32 %v3265_v28, %v5675_v45  ;;  %v3554_v1 = vpop.f32.mrb[208].mxu1  ;;  %v3267_v19 = vpop.f32.mrb[209].mxu0  ;;  %v5995_v45 = vld [vmem:[#allocation4_spill] sm:$0xff] }
 0x2ca   : > { %v3556_v63 = vpop.f32.mrb[209].mxu1  ;;  %v3268_v40 = vpop.f32.mrb[210].mxu0 }
 0x2cb   : > { %5025 = vst [vmem:[%s5787_s11 + $0x98] sm:$0xff] %v4945_v18   ;;  %v3555_v27 = vadd.f32 %v3554_v1, %v3266_v6  ;;  %v3269_v26 = vadd.f32 %v3268_v40, %v5994_v4  ;;  %v3557_v20 = vpop.f32.mrb[210].mxu1  ;;  %v3270_v51 = vpop.f32.mrb[211].mxu0  ;;  %v6001_v40 = vld [vmem:[#allocation10_spill] sm:$0xff] }
 0x2cc   : > { %v3559_v47 = vpop.f32.mrb[211].mxu1 }
 0x2cd   : > { %v3558_v44 = vadd.f32 %v3557_v20, %v3269_v26  ;;  %v3891_v29 = vadd.f32 %v5778_v41, %v3555_v27 }
 0x2cf   : > { %v3892_v30 = vadd.f32 %v5778_v41, %v3558_v44  ;;  %v6002_v44 = vld [vmem:[#allocation11_spill] sm:$0xff] }
 0x2d0   : > { %v3273_v53 = vpop.f32.mrb[212].mxu0 }
 0x2d1   : > { %v4950_v36 = vpack.c.bf16 %v3892_v30, %v3891_v29  ;;  %v3274_v25 = vadd.f32 %v3273_v53, %v5995_v45  ;;  %v3562_v32 = vpop.f32.mrb[212].mxu1  ;;  %v3275_v56 = vpop.f32.mrb[213].mxu0 }
 0x2d2   : > { %v3564_v21 = vpop.f32.mrb[213].mxu1  ;;  %v3276_v46 = vpop.f32.mrb[214].mxu0 }
 0x2d3   : > { %5026 = vst [vmem:[%s5787_s11 + $0xa0] sm:$0xff] %v4950_v36   ;;  %v3563_v42 = vadd.f32 %v3562_v32, %v3274_v25  ;;  %v3277_v61 = vadd.f32 %v3276_v46, %v5996_v10  ;;  %v3565_v60 = vpop.f32.mrb[214].mxu1  ;;  %v3278_v54 = vpop.f32.mrb[215].mxu0  ;;  %v6003_v46 = vld [vmem:[#allocation12_spill] sm:$0xff] }
 0x2d4   : > { %v3567_v57 = vpop.f32.mrb[215].mxu1 }
 0x2d5   : > { %v3566_v43 = vadd.f32 %v3565_v60, %v3277_v61  ;;  %v3893_v9 = vadd.f32 %v5778_v41, %v3563_v42 }
 0x2d7   : > { %v3894_v48 = vadd.f32 %v5778_v41, %v3566_v43  ;;  %v6004_v43 = vld [vmem:[#allocation13_spill] sm:$0xff] }
 0x2d8   : > { %v3281_v49 = vpop.f32.mrb[216].mxu0 }
 0x2d9   : > { %v4955_v59 = vpack.c.bf16 %v3894_v48, %v3893_v9  ;;  %v3282_v55 = vadd.f32 %v3281_v49, %v5997_v0  ;;  %v3570_v31 = vpop.f32.mrb[216].mxu1  ;;  %v3283_v22 = vpop.f32.mrb[217].mxu0 }
 0x2da   : > { %v3572_v11 = vpop.f32.mrb[217].mxu1  ;;  %v3284_v62 = vpop.f32.mrb[218].mxu0 }
 0x2db   : > { %5027 = vst [vmem:[%s5787_s11 + $0xa8] sm:$0xff] %v4955_v59   ;;  %v3571_v38 = vadd.f32 %v3570_v31, %v3282_v55  ;;  %v3285_v35 = vadd.f32 %v3284_v62, %v5998_v58  ;;  %v3573_v2 = vpop.f32.mrb[218].mxu1  ;;  %v3286_v7 = vpop.f32.mrb[219].mxu0  ;;  %v6005_v62 = vld [vmem:[#allocation14_spill] sm:$0xff] }
 0x2dc   : > { %v3575_v3 = vpop.f32.mrb[219].mxu1 }
 0x2dd   : > { %v3574_v13 = vadd.f32 %v3573_v2, %v3285_v35  ;;  %v3895_v37 = vadd.f32 %v5778_v41, %v3571_v38 }
 0x2df   : > { %v3896_v39 = vadd.f32 %v5778_v41, %v3574_v13  ;;  %v6006_v13 = vld [vmem:[#allocation15_spill] sm:$0xff] }
 0x2e0   : > { %v3289_v34 = vpop.f32.mrb[220].mxu0 }
 0x2e1   : > { %v4960_v23 = vpack.c.bf16 %v3896_v39, %v3895_v37  ;;  %v3290_v16 = vadd.f32 %v3289_v34, %v5999_v14  ;;  %v3578_v8 = vpop.f32.mrb[220].mxu1  ;;  %v3291_v52 = vpop.f32.mrb[221].mxu0 }
 0x2e2   : > { %v3580_v12 = vpop.f32.mrb[221].mxu1  ;;  %v3292_v17 = vpop.f32.mrb[222].mxu0 }
 0x2e3   : > { %5028 = vst [vmem:[%s5787_s11 + $0xb0] sm:$0xff] %v4960_v23   ;;  %v3579_v24 = vadd.f32 %v3578_v8, %v3290_v16  ;;  %v3293_v15 = vadd.f32 %v3292_v17, %v6000_v5  ;;  %v3581_v33 = vpop.f32.mrb[222].mxu1  ;;  %v3294_v50 = vpop.f32.mrb[223].mxu0  ;;  %v6007_v17 = vld [vmem:[#allocation16_spill] sm:$0xff] }
 0x2e4   : > { %v3583_v28 = vpop.f32.mrb[223].mxu1 }
 0x2e5   : > { %v3582_v18 = vadd.f32 %v3581_v33, %v3293_v15  ;;  %v3897_v6 = vadd.f32 %v5778_v41, %v3579_v24 }
 0x2e7   : > { %v3898_v1 = vadd.f32 %v5778_v41, %v3582_v18  ;;  %v6008_v18 = vld [vmem:[#allocation17_spill] sm:$0xff] }
 0x2e8   : > { %v3297_v19 = vpop.f32.mrb[224].mxu0 }
 0x2e9   : > { %v4965_v63 = vpack.c.bf16 %v3898_v1, %v3897_v6  ;;  %v3298_v27 = vadd.f32 %v3297_v19, %v6001_v40  ;;  %v3586_v4 = vpop.f32.mrb[224].mxu1  ;;  %v3299_v26 = vpop.f32.mrb[225].mxu0 }
 0x2ea   : > { %v3588_v20 = vpop.f32.mrb[225].mxu1  ;;  %v3300_v51 = vpop.f32.mrb[226].mxu0 }
 0x2eb   : > { %5029 = vst [vmem:[%s5787_s11 + $0xb8] sm:$0xff] %v4965_v63   ;;  %v3587_v47 = vadd.f32 %v3586_v4, %v3298_v27  ;;  %v3301_v29 = vadd.f32 %v3300_v51, %v6002_v44  ;;  %v3589_v30 = vpop.f32.mrb[226].mxu1  ;;  %v3302_v53 = vpop.f32.mrb[227].mxu0  ;;  %v6009_v51 = vld [vmem:[#allocation18_spill] sm:$0xff] }
 0x2ec   : > { %v3591_v36 = vpop.f32.mrb[227].mxu1 }
 0x2ed   : > { %v3590_v45 = vadd.f32 %v3589_v30, %v3301_v29  ;;  %v3899_v25 = vadd.f32 %v5778_v41, %v3587_v47 }
 0x2ef   : > { %v3900_v32 = vadd.f32 %v5778_v41, %v3590_v45  ;;  %v6010_v45 = vld [vmem:[#allocation19_spill] sm:$0xff] }
 0x2f0   : > { %v3305_v56 = vpop.f32.mrb[228].mxu0 }
 0x2f1   : > { %v4970_v21 = vpack.c.bf16 %v3900_v32, %v3899_v25  ;;  %v3306_v42 = vadd.f32 %v3305_v56, %v6003_v46  ;;  %v3594_v10 = vpop.f32.mrb[228].mxu1  ;;  %v3307_v61 = vpop.f32.mrb[229].mxu0 }
 0x2f2   : > { %v3596_v60 = vpop.f32.mrb[229].mxu1  ;;  %v3308_v54 = vpop.f32.mrb[230].mxu0 }
 0x2f3   : > { %5030 = vst [vmem:[%s5787_s11 + $0xc0] sm:$0xff] %v4970_v21   ;;  %v3595_v57 = vadd.f32 %v3594_v10, %v3306_v42  ;;  %v3309_v9 = vadd.f32 %v3308_v54, %v6004_v43  ;;  %v3597_v48 = vpop.f32.mrb[230].mxu1  ;;  %v3310_v49 = vpop.f32.mrb[231].mxu0  ;;  %v6011_v54 = vld [vmem:[#allocation20_spill] sm:$0xff] }
 0x2f4   : > { %v3599_v59 = vpop.f32.mrb[231].mxu1 }
 0x2f5   : > { %v3598_v0 = vadd.f32 %v3597_v48, %v3309_v9  ;;  %v3901_v55 = vadd.f32 %v5778_v41, %v3595_v57 }
 0x2f7   : > { %v3902_v31 = vadd.f32 %v5778_v41, %v3598_v0  ;;  %v6012_v0 = vld [vmem:[#allocation21_spill] sm:$0xff] }
 0x2f8   : > { %v3313_v22 = vpop.f32.mrb[232].mxu0 }
 0x2f9   : > { %v4975_v11 = vpack.c.bf16 %v3902_v31, %v3901_v55  ;;  %v3314_v38 = vadd.f32 %v3313_v22, %v6005_v62  ;;  %v3602_v58 = vpop.f32.mrb[232].mxu1  ;;  %v3315_v35 = vpop.f32.mrb[233].mxu0 }
 0x2fa   : > { %v3604_v2 = vpop.f32.mrb[233].mxu1  ;;  %v3316_v7 = vpop.f32.mrb[234].mxu0 }
 0x2fb   : > { %5031 = vst [vmem:[%s5787_s11 + $0xc8] sm:$0xff] %v4975_v11   ;;  %v3603_v3 = vadd.f32 %v3602_v58, %v3314_v38  ;;  %v3317_v37 = vadd.f32 %v3316_v7, %v6006_v13  ;;  %v3605_v39 = vpop.f32.mrb[234].mxu1  ;;  %v3318_v34 = vpop.f32.mrb[235].mxu0  ;;  %v6013_v7 = vld [vmem:[#allocation22_spill] sm:$0xff] }
 0x2fc   : > { %v3607_v23 = vpop.f32.mrb[235].mxu1 }
 0x2fd   : > { %v3606_v14 = vadd.f32 %v3605_v39, %v3317_v37  ;;  %v3903_v16 = vadd.f32 %v5778_v41, %v3603_v3 }
 0x2ff   : > { %v3904_v8 = vadd.f32 %v5778_v41, %v3606_v14  ;;  %v6014_v14 = vld [vmem:[#allocation23_spill] sm:$0xff] }
 0x300   : > { %v3321_v52 = vpop.f32.mrb[236].mxu0 }
 0x301   : > { %v4980_v12 = vpack.c.bf16 %v3904_v8, %v3903_v16  ;;  %v3322_v24 = vadd.f32 %v3321_v52, %v6007_v17  ;;  %v3610_v5 = vpop.f32.mrb[236].mxu1  ;;  %v3323_v15 = vpop.f32.mrb[237].mxu0 }
 0x302   : > { %v3612_v33 = vpop.f32.mrb[237].mxu1  ;;  %v3324_v50 = vpop.f32.mrb[238].mxu0 }
 0x303   : > { %5032 = vst [vmem:[%s5787_s11 + $0xd0] sm:$0xff] %v4980_v12   ;;  %v3611_v28 = vadd.f32 %v3610_v5, %v3322_v24  ;;  %v3325_v6 = vadd.f32 %v3324_v50, %v6008_v18  ;;  %v3613_v1 = vpop.f32.mrb[238].mxu1  ;;  %v3326_v19 = vpop.f32.mrb[239].mxu0  ;;  %v6015_v50 = vld [vmem:[#allocation24_spill] sm:$0xff] }
 0x304   : > { %v3615_v63 = vpop.f32.mrb[239].mxu1 }
 0x305   : > { %v3614_v40 = vadd.f32 %v3613_v1, %v3325_v6  ;;  %v3905_v27 = vadd.f32 %v5778_v41, %v3611_v28 }
 0x307   : > { %v3906_v4 = vadd.f32 %v5778_v41, %v3614_v40  ;;  %v6016_v40 = vld [vmem:[#allocation25_spill] sm:$0xff] }
 0x308   : > { %v3329_v26 = vpop.f32.mrb[240].mxu0 }
 0x309   : > { %v4985_v20 = vpack.c.bf16 %v3906_v4, %v3905_v27  ;;  %v3330_v47 = vadd.f32 %v3329_v26, %v6009_v51  ;;  %v3618_v44 = vpop.f32.mrb[240].mxu1  ;;  %v3331_v29 = vpop.f32.mrb[241].mxu0 }
 0x30a   : > { %v3620_v30 = vpop.f32.mrb[241].mxu1  ;;  %v3332_v53 = vpop.f32.mrb[242].mxu0 }
 0x30b   : > { %5033 = vst [vmem:[%s5787_s11 + $0xd8] sm:$0xff] %v4985_v20   ;;  %v3619_v36 = vadd.f32 %v3618_v44, %v3330_v47  ;;  %v3333_v25 = vadd.f32 %v3332_v53, %v6010_v45  ;;  %v3621_v32 = vpop.f32.mrb[242].mxu1  ;;  %v3334_v56 = vpop.f32.mrb[243].mxu0 }
 0x30c   : > { %v3623_v21 = vpop.f32.mrb[243].mxu1 }
 0x30d   : > { %v3622_v46 = vadd.f32 %v3621_v32, %v3333_v25  ;;  %v3907_v42 = vadd.f32 %v5778_v41, %v3619_v36 }
 0x30f   : > { %v3908_v10 = vadd.f32 %v5778_v41, %v3622_v46  ;;  %v5143_v41 = vld [vmem:[%s5969_s2] ss:$0 sm:$0xff] }
 0x310   : > { %v3337_v61 = vpop.f32.mrb[244].mxu0 }
 0x311   : > { %v4990_v60 = vpack.c.bf16 %v3908_v10, %v3907_v42  ;;  %v3338_v57 = vadd.f32 %v3337_v61, %v6011_v54  ;;  %v3626_v43 = vpop.f32.mrb[244].mxu1  ;;  %v3339_v9 = vpop.f32.mrb[245].mxu0 }
 0x312   : > { %v3628_v48 = vpop.f32.mrb[245].mxu1  ;;  %v3340_v49 = vpop.f32.mrb[246].mxu0 }
 0x313   : > { %5034 = vst [vmem:[%s5787_s11 + $0xe0] sm:$0xff] %v4990_v60   ;;  %v3627_v59 = vadd.f32 %v3626_v43, %v3338_v57  ;;  %v3341_v55 = vadd.f32 %v3340_v49, %v6012_v0  ;;  %v3629_v31 = vpop.f32.mrb[246].mxu1  ;;  %v3342_v22 = vpop.f32.mrb[247].mxu0 }
 0x314   : > { %v3631_v11 = vpop.f32.mrb[247].mxu1 }
 0x315   : > { %v3630_v62 = vadd.f32 %v3629_v31, %v3341_v55  ;;  %v3909_v38 = vadd.f32 %v5143_v41, %v3627_v59 }
 0x317   : > { %v3910_v58 = vadd.f32 %v5143_v41, %v3630_v62 }
 0x318   : > { %v3345_v35 = vpop.f32.mrb[248].mxu0 }
 0x319   : > { %v4995_v2 = vpack.c.bf16 %v3910_v58, %v3909_v38  ;;  %v3346_v3 = vadd.f32 %v3345_v35, %v6013_v7  ;;  %v3634_v13 = vpop.f32.mrb[248].mxu1  ;;  %v3347_v37 = vpop.f32.mrb[249].mxu0 }
 0x31a   : > { %v3636_v39 = vpop.f32.mrb[249].mxu1  ;;  %v3348_v34 = vpop.f32.mrb[250].mxu0 }
 0x31b   : > { %5035 = vst [vmem:[%s5787_s11 + $0xe8] sm:$0xff] %v4995_v2   ;;  %v3635_v23 = vadd.f32 %v3634_v13, %v3346_v3  ;;  %v3349_v16 = vadd.f32 %v3348_v34, %v6014_v14  ;;  %v3637_v8 = vpop.f32.mrb[250].mxu1  ;;  %v3350_v52 = vpop.f32.mrb[251].mxu0 }
 0x31c   : > { %v3639_v12 = vpop.f32.mrb[251].mxu1 }
 0x31d   : > { %v3638_v17 = vadd.f32 %v3637_v8, %v3349_v16  ;;  %v3911_v24 = vadd.f32 %v5143_v41, %v3635_v23 }
 0x31f   : > { %v3912_v5 = vadd.f32 %v5143_v41, %v3638_v17 }
 0x320   : > { %v3353_v15 = vpop.f32.mrb[252].mxu0 }
 0x321   : > { %v5000_v33 = vpack.c.bf16 %v3912_v5, %v3911_v24  ;;  %v3354_v28 = vadd.f32 %v3353_v15, %v6015_v50  ;;  %v3642_v18 = vpop.f32.mrb[252].mxu1  ;;  %v3355_v6 = vpop.f32.mrb[253].mxu0 }
 0x322   : > { %v3644_v1 = vpop.f32.mrb[253].mxu1  ;;  %v3356_v19 = vpop.f32.mrb[254].mxu0 }
 0x323   : > { %5036 = vst [vmem:[%s5787_s11 + $0xf0] sm:$0xff] %v5000_v33   ;;  %v3643_v63 = vadd.f32 %v3642_v18, %v3354_v28  ;;  %v3357_v27 = vadd.f32 %v3356_v19, %v6016_v40  ;;  %v3645_v4 = vpop.f32.mrb[254].mxu1  ;;  %v3358_v26 = vpop.f32.mrb[255].mxu0 }
 0x324   : > { %v3647_v20 = vpop.f32.mrb[255].mxu1 }
 0x325   : > { %v3646_v51 = vadd.f32 %v3645_v4, %v3357_v27  ;;  %v3913_v47 = vadd.f32 %v5143_v41, %v3643_v63 }
 0x327   : > { %v3914_v44 = vadd.f32 %v5143_v41, %v3646_v51 }
 0x329   : > { %v5005_v29 = vpack.c.bf16 %v3914_v44, %v3913_v47 }
 0x32b   : > { %5037 = vst [vmem:[%s5787_s11 + $0xf8] sm:$0xff] %v5005_v29  }
 0x32c PF: > { %s13_s16 = sadd.s32 1, %s5182_s16   ;;  %s6017_s12 = smov %s5174_s14 }
 0x32d   : > { %p10_p7 = scmp.ge.s32.totalorder %s13_s16, 18   ;;  %s6018_s13 = smov %s5178_s15 }
 0x32e   : > { %s6019_s14 = smov %s6022_s17  ;;  %s6020_s15 = smov %s6026_s18 }
 0x32f   :  { %12 = sbr.rel (!%p10_p7) target bundleno = 3 (0x3), region = 76 }

</bundles_post_ra>
